<compile_context>
chip_gen: v5e
topology: v5e:2x2
jax: 0.10.0
libtpu: 0.0.40
codegen_flags: <defaults>
</compile_context>

<pallas_src>
import jax
import jax.numpy as jnp
from jax.experimental import pallas as pl
from jax.experimental.pallas import tpu as pltpu

LANE = 128
SUBLANE = 8


def _round_up(x, m):
    return ((x + m - 1) // m) * m


def _vmem_capacity_bytes():
    try:
        return int(pltpu.get_tpu_info().vmem_capacity_bytes)
    except Exception:
        return 64 * 1024 * 1024  # v7x per-TensorCore VMEM (the smallest case)


def _choose_time_block(T, B, Hp, max_tc=64):
    """Derive Tc from a VMEM budget (<= ~50% of capacity) instead of a constant."""
    bytes_act = 2  # bf16 gx slabs / outputs
    budget = _vmem_capacity_bytes() // 2
    per_step = 2 * 2 * B * (4 * Hp + Hp) * bytes_act  # dirs * double-buffer * (gx+out)
    weights = 2 * Hp * 4 * Hp * bytes_act             # single-buffered W_hh (both dirs)
    scratch = 4 * B * Hp * 4                           # f32 h/c carries
    avail = max(budget - weights - scratch, per_step)
    return int(max(1, min(max_tc, T, avail // per_step)))


def _vmem_limit_bytes(tc, B, Hp):
    bytes_act = 2
    need = (2 * 2 * tc * B * (4 * Hp + Hp) * bytes_act
            + 2 * Hp * 4 * Hp * bytes_act
            + 4 * B * Hp * 4)
    cap = _vmem_capacity_bytes()
    return int(min(int(0.9 * cap), max(2 * need + (4 << 20), 32 << 20)))


# ----------------------------------------------------------------------------
# Pallas kernel: one grid step advances BOTH directions by Tc timesteps.
# ----------------------------------------------------------------------------
def _bilstm_block_kernel(gxf_ref, gxb_ref, whhf_ref, whhb_ref,
                         outf_ref, outb_ref,
                         hf_scr, cf_scr, hb_scr, cb_scr):
    """Per grid step n (nb = number of time blocks):

    gxf_ref : (Tc, B, 4Hp) bf16  precomputed x@W_ih^T + b (fwd), times [n*Tc, (n+1)*Tc)
    gxb_ref : (Tc, B, 4Hp) bf16  same for bwd, time-reversed block (nb-1-n)
    whh*_ref: (Hp, 4Hp)    bf16  transposed recurrent weights (grid-invariant)
    out*_ref: (Tc, B, Hp)  bf16  hidden-state outputs for the same windows
    *_scr   : (B, Hp)      f32   h / c carries, persist across grid steps
    """
    n = pl.program_id(0)

    @pl.when(n == 0)
    def _init():
        hf_scr[...] = jnp.zeros_like(hf_scr)
        cf_scr[...] = jnp.zeros_like(cf_scr)
        hb_scr[...] = jnp.zeros_like(hb_scr)
        cb_scr[...] = jnp.zeros_like(cb_scr)

    tc = gxf_ref.shape[0]
    Hp = hf_scr.shape[-1]

    def cell(gates, c):
        # PyTorch gate order i, f, g, o; Hp is a multiple of 128 so every
        # slice is lane-dense.  Gate math stays f32 (v5e has no bf16 VPU/EUP).
        i = jax.nn.sigmoid(gates[:, 0 * Hp:1 * Hp])
        f = jax.nn.sigmoid(gates[:, 1 * Hp:2 * Hp])
        g = jnp.tanh(gates[:, 2 * Hp:3 * Hp])
        o = jax.nn.sigmoid(gates[:, 3 * Hp:4 * Hp])
        c_new = f * c + i * g
        h_new = o * jnp.tanh(c_new)
        return h_new, c_new

    def step(s, carry):
        # ---- forward direction: row s of this block (global time n*Tc+s) ----
        g_f = gxf_ref[s].astype(jnp.float32) + jnp.dot(
            hf_scr[...].astype(jnp.bfloat16), whhf_ref[...],
            preferred_element_type=jnp.float32)
        h_f, c_f = cell(g_f, cf_scr[...])
        hf_scr[...] = h_f
        cf_scr[...] = c_f
        outf_ref[s] = h_f.astype(outf_ref.dtype)

        # ---- backward direction: row Tc-1-s of its (time-reversed) block ----
        sb = tc - 1 - s
        g_b = gxb_ref[sb].astype(jnp.float32) + jnp.dot(
            hb_scr[...].astype(jnp.bfloat16), whhb_ref[...],
            preferred_element_type=jnp.float32)
        h_b, c_b = cell(g_b, cb_scr[...])
        hb_scr[...] = h_b
        cb_scr[...] = c_b
        outb_ref[sb] = h_b.astype(outb_ref.dtype)
        return carry

    unroll = True if tc <= 8 else 4
    jax.lax.fori_loop(0, tc, step, 0, unroll=unroll)


def _bilstm_recurrence(gx_f, gx_b, whh_f_t, whh_b_t, tc, vmem_limit):
    """Fused fwd+bwd recurrence over precomputed bf16 gate inputs.

    gx_f, gx_b: (Tp, B, 4Hp) bf16; whh_*_t: (Hp, 4Hp) bf16.
    Returns (out_f, out_b) each (Tp, B, Hp) bf16, already in forward time order.
    """
    Tp, B, G = gx_f.shape
    Hp = whh_f_t.shape[0]
    nb = Tp // tc

    out_f, out_b = pl.pallas_call(
        _bilstm_block_kernel,
        out_shape=(jax.ShapeDtypeStruct((Tp, B, Hp), jnp.bfloat16),
                   jax.ShapeDtypeStruct((Tp, B, Hp), jnp.bfloat16)),
        grid_spec=pltpu.PrefetchScalarGridSpec(
            num_scalar_prefetch=0,
            grid=(nb,),
            in_specs=[
                # forward gate inputs: block n
                pl.BlockSpec((tc, B, G), lambda n: (n, 0, 0)),
                # backward gate inputs: time-reversed block (no jnp.flip)
                pl.BlockSpec((tc, B, G), lambda n: (nb - 1 - n, 0, 0)),
                # grid-invariant recurrent weights -> single-buffered
                pl.BlockSpec((Hp, G), lambda n: (0, 0),
                             pipeline_mode=pl.Buffered(1)),
                pl.BlockSpec((Hp, G), lambda n: (0, 0),
                             pipeline_mode=pl.Buffered(1)),
            ],
            out_specs=[
                pl.BlockSpec((tc, B, Hp), lambda n: (n, 0, 0)),
                pl.BlockSpec((tc, B, Hp), lambda n: (nb - 1 - n, 0, 0)),
            ],
            scratch_shapes=[pltpu.VMEM((B, Hp), jnp.float32)] * 4,  # hf, cf, hb, cb
        ),
        compiler_params=pltpu.CompilerParams(
            dimension_semantics=("arbitrary",),     # time recurrence -> sequential
            vmem_limit_bytes=vmem_limit,
        ),
    )(gx_f, gx_b, whh_f_t, whh_b_t)
    return out_f, out_b


# ----------------------------------------------------------------------------
# Parameter init (mimics nn.LSTM) + lane-dense repacking helpers.
# ----------------------------------------------------------------------------
def init_blstm_params(key, input_size, hidden_size, num_layers=2):
    """nn.LSTM-shaped params; uniform(-1/sqrt(H), 1/sqrt(H)) init."""
    H = hidden_size
    bound = 1.0 / float(jnp.sqrt(jnp.float32(H)))
    params = []
    for layer in range(num_layers):
        d_in = input_size if layer == 0 else 2 * hidden_size
        layer_params = {}
        for direction in ("fwd", "bwd"):
            key, k1, k2, k3, k4 = jax.random.split(key, 5)
            w_ih = jax.random.uniform(k1, (4 * H, d_in), jnp.float32, -bound, bound)
            w_hh = jax.random.uniform(k2, (4 * H, H), jnp.float32, -bound, bound)
            b_ih = jax.random.uniform(k3, (4 * H,), jnp.float32, -bound, bound)
            b_hh = jax.random.uniform(k4, (4 * H,), jnp.float32, -bound, bound)
            layer_params[direction] = {
                "w_ih_t": jnp.transpose(w_ih),      # (d_in, 4H)
                "w_hh_t": jnp.transpose(w_hh),      # (H, 4H)
                "bias": (b_ih + b_hh)[None, :],     # (1, 4H)
            }
        params.append(layer_params)
    return params


def _pad_gates(w, H, Hp):
    """(..., 4H) -> (..., 4Hp): each gate block placed at column offset k*Hp."""
    if Hp == H:
        return w
    pad = Hp - H
    parts = []
    for k in range(4):
        blk = w[..., k * H:(k + 1) * H]
        blk = jnp.pad(blk, [(0, 0)] * (w.ndim - 1) + [(0, pad)])
        parts.append(blk)
    return jnp.concatenate(parts, axis=-1)


def _pack_direction(p, H, Hp, split_input):
    """Repack one direction's params into lane-dense (Hp-padded) bf16 layout."""
    w_ih_t = _pad_gates(p["w_ih_t"], H, Hp)          # (d_in, 4Hp)
    w_hh_t = _pad_gates(p["w_hh_t"], H, Hp)          # (H, 4Hp)
    if Hp != H:
        w_hh_t = jnp.pad(w_hh_t, ((0, Hp - H), (0, 0)))
    packed = {
        "w_hh_t": w_hh_t.astype(jnp.bfloat16),       # (Hp, 4Hp)
        "bias": _pad_gates(p["bias"], H, Hp).astype(jnp.float32),  # (1, 4Hp)
    }
    if split_input:
        # d_in == 2H: rows 0:H multiply the previous layer's forward output,
        # rows H:2H its backward output -> avoids a (T,B,2H) concatenate.
        w_top, w_bot = w_ih_t[:H], w_ih_t[H:]
        if Hp != H:
            w_top = jnp.pad(w_top, ((0, Hp - H), (0, 0)))
            w_bot = jnp.pad(w_bot, ((0, Hp - H), (0, 0)))
        packed["w_ih_top"] = w_top.astype(jnp.bfloat16)   # (Hp, 4Hp)
        packed["w_ih_bot"] = w_bot.astype(jnp.bfloat16)   # (Hp, 4Hp)
    else:
        packed["w_ih"] = w_ih_t.astype(jnp.bfloat16)       # (d_in, 4Hp)
    return packed


# ----------------------------------------------------------------------------
# Public forward (batch-first, like PyTorch).
# ----------------------------------------------------------------------------
@jax.jit
def blstm_forward(x, params):
    """x: (B, T, input_size). Returns (B, T, 2*hidden_size) float32."""
    x_tm = jnp.transpose(x, (1, 0, 2)).astype(jnp.float32)  # (T, B, D) time-major
    T, B, _ = x_tm.shape
    H = params[0]["fwd"]["w_hh_t"].shape[0]
    Hp = _round_up(H, LANE)            # lane-dense gates / outputs
    Bp = _round_up(B, SUBLANE)         # sublane-aligned batch

    if Bp != B:
        x_tm = jnp.pad(x_tm, ((0, 0), (0, Bp - B), (0, 0)))

    tc = _choose_time_block(T, Bp, Hp)
    Tp = _round_up(T, tc)
    vmem_limit = _vmem_limit_bytes(tc, Bp, Hp)

    x_bf16 = x_tm.astype(jnp.bfloat16)
    out_f = out_b = None

    for li, layer_params in enumerate(params):
        pf = _pack_direction(layer_params["fwd"], H, Hp, split_input=(li > 0))
        pb = _pack_direction(layer_params["bwd"], H, Hp, split_input=(li > 0))

        # Hoisted input projection: one big GEMM per direction (f32 accumulate).
        if li == 0:
            gx_f = jnp.einsum("tbd,dg->tbg", x_bf16, pf["w_ih"],
                              preferred_element_type=jnp.float32) + pf["bias"]
            gx_b = jnp.einsum("tbd,dg->tbg", x_bf16, pb["w_ih"],
                              preferred_element_type=jnp.float32) + pb["bias"]
        else:
            gx_f = (jnp.einsum("tbh,hg->tbg", out_f, pf["w_ih_top"],
                               preferred_element_type=jnp.float32)
                    + jnp.einsum("tbh,hg->tbg", out_b, pf["w_ih_bot"],
                                 preferred_element_type=jnp.float32)
                    + pf["bias"])
            gx_b = (jnp.einsum("tbh,hg->tbg", out_f, pb["w_ih_top"],
                               preferred_element_type=jnp.float32)
                    + jnp.einsum("tbh,hg->tbg", out_b, pb["w_ih_bot"],
                                 preferred_element_type=jnp.float32)
                    + pb["bias"])

        gx_f = gx_f.astype(jnp.bfloat16)
        gx_b = gx_b.astype(jnp.bfloat16)
        if Tp != T:
            # Zero gate pre-activations at padded timesteps keep h/c exactly 0,
            # so the backward direction (which visits the tail first) is exact.
            gx_f = jnp.pad(gx_f, ((0, Tp - T), (0, 0), (0, 0)))
            gx_b = jnp.pad(gx_b, ((0, Tp - T), (0, 0), (0, 0)))

        out_f, out_b = _bilstm_recurrence(gx_f, gx_b, pf["w_hh_t"], pb["w_hh_t"],
                                          tc, vmem_limit)
        out_f = out_f[:T]
        out_b = out_b[:T]

    out = jnp.concatenate([out_f[..., :H], out_b[..., :H]], axis=-1)  # (T, Bp, 2H)
    out = jnp.transpose(out, (1, 0, 2)).astype(jnp.float32)           # (Bp, T, 2H)
    return out[:B]


# ----------------------------------------------------------------------------
# Pure-JAX reference (lax.scan) with matching numerics (bf16 matmul operands,
# f32 accumulation / gate math) for the correctness check.
# ----------------------------------------------------------------------------
def _lstm_direction_ref(x_tm, w_ih_t, w_hh_t, bias):
    H = w_hh_t.shape[0]
    B = x_tm.shape[1]
    w_ih_bf = w_ih_t.astype(jnp.bfloat16)
    w_hh_bf = w_hh_t.astype(jnp.bfloat16)
    gx = (jnp.einsum("tbd,dg->tbg", x_tm.astype(jnp.bfloat16), w_ih_bf,
                     preferred_element_type=jnp.float32) + bias
          ).astype(jnp.bfloat16)

    def step(carry, g_t):
        h, c = carry
        gates = g_t.astype(jnp.float32) + jnp.dot(
            h.astype(jnp.bfloat16), w_hh_bf, preferred_element_type=jnp.float32)
        i = jax.nn.sigmoid(gates[:, 0 * H:1 * H])
        f = jax.nn.sigmoid(gates[:, 1 * H:2 * H])
        g = jnp.tanh(gates[:, 2 * H:3 * H])
        o = jax.nn.sigmoid(gates[:, 3 * H:4 * H])
        c = f * c + i * g
        h = o * jnp.tanh(c)
        return (h, c), h

    init = (jnp.zeros((B, H), jnp.float32), jnp.zeros((B, H), jnp.float32))
    _, hs = jax.lax.scan(step, init, gx)
    return hs


def blstm_forward_ref(x, params):
    h = jnp.transpose(x, (1, 0, 2)).astype(jnp.float32)
    for layer_params in params:
        pf, pb = layer_params["fwd"], layer_params["bwd"]
        out_f = _lstm_direction_ref(h, pf["w_ih_t"], pf["w_hh_t"], pf["bias"])
        out_b = jnp.flip(
            _lstm_direction_ref(jnp.flip(h, axis=0),
                                pb["w_ih_t"], pb["w_hh_t"], pb["bias"]),
            axis=0)
        h = jnp.concatenate([out_f, out_b], axis=-1)
    return jnp.transpose(h, (1, 0, 2))


if __name__ == "__main__":
    B, T, INPUT_SIZE, HIDDEN = 2, 8, 16, 32

    key = jax.random.PRNGKey(0)
    key, kx = jax.random.split(key)
    x = jax.random.normal(kx, (B, T, INPUT_SIZE), jnp.float32)

    params = init_blstm_params(key, INPUT_SIZE, HIDDEN, num_layers=2)

    out = jax.block_until_ready(blstm_forward(x, params))
    assert out.shape == (B, T, 2 * HIDDEN), out.shape

    ref = jax.block_until_ready(blstm_forward_ref(x, params))
    max_err = float(jnp.max(jnp.abs(out - ref)))
    assert max_err < 2e-2, f"max abs err {max_err}"

    print("KERNEL_OK")
</pallas_src>

<mosaic_0001>
module attributes {stable_mosaic.version = 11 : i64} {
  func.func @_bilstm_block_kernel(%arg0: i32, %arg1: memref<8x8x512xbf16, #tpu.memory_space<vmem>>, %arg2: memref<8x8x512xbf16, #tpu.memory_space<vmem>>, %arg3: memref<128x512xbf16, #tpu.memory_space<vmem>>, %arg4: memref<128x512xbf16, #tpu.memory_space<vmem>>, %arg5: memref<8x8x128xbf16, #tpu.memory_space<vmem>>, %arg6: memref<8x8x128xbf16, #tpu.memory_space<vmem>>, %arg7: memref<8x128xf32, #tpu.memory_space<vmem>>, %arg8: memref<8x128xf32, #tpu.memory_space<vmem>>, %arg9: memref<8x128xf32, #tpu.memory_space<vmem>>, %arg10: memref<8x128xf32, #tpu.memory_space<vmem>>) attributes {dimension_semantics = [#tpu.dimension_semantics<arbitrary>], iteration_bounds = array<i64: 1>, scalar_prefetch = 0 : i64, scratch_operands = 4 : i64, tpu.core_type = #tpu.core_type<tc>, window_params = [{transform_indices = @transform_0, window_bounds = array<i64: 8, 8, 512>}, {transform_indices = @transform_1, window_bounds = array<i64: 8, 8, 512>}, {pipeline_mode = #tpu.pipeline_mode<synchronous>, transform_indices = @transform_2, window_bounds = array<i64: 128, 512>}, {pipeline_mode = #tpu.pipeline_mode<synchronous>, transform_indices = @transform_3, window_bounds = array<i64: 128, 512>}, {transform_indices = @transform_4, window_bounds = array<i64: 8, 8, 128>}, {transform_indices = @transform_5, window_bounds = array<i64: 8, 8, 128>}]} {
    %c0_i32 = arith.constant 0 : i32
    %0 = arith.cmpi eq, %arg0, %c0_i32 : i32
    %1 = arith.extui %0 : i1 to i32
    %c0_i32_0 = arith.constant 0 : i32
    %2 = arith.cmpi ne, %1, %c0_i32_0 : i32
    scf.if %2 {
      %cst_296 = arith.constant 0.000000e+00 : f32
      %683 = vector.broadcast %cst_296 : f32 to vector<8x128xf32>
      %c0_297 = arith.constant 0 : index
      %c0_298 = arith.constant 0 : index
      %684 = vector.load %arg7[%c0_297, %c0_298] : memref<8x128xf32, #tpu.memory_space<vmem>>, vector<8x128xf32>
      tpu.vector_store %arg7[%c0_297, %c0_298], %683 {strides = array<i32>} : memref<8x128xf32, #tpu.memory_space<vmem>>, vector<8x128xf32>,
      %cst_299 = arith.constant 0.000000e+00 : f32
      %685 = vector.broadcast %cst_299 : f32 to vector<8x128xf32>
      %c0_300 = arith.constant 0 : index
      %c0_301 = arith.constant 0 : index
      %686 = vector.load %arg8[%c0_300, %c0_301] : memref<8x128xf32, #tpu.memory_space<vmem>>, vector<8x128xf32>
      tpu.vector_store %arg8[%c0_300, %c0_301], %685 {strides = array<i32>} : memref<8x128xf32, #tpu.memory_space<vmem>>, vector<8x128xf32>,
      %cst_302 = arith.constant 0.000000e+00 : f32
      %687 = vector.broadcast %cst_302 : f32 to vector<8x128xf32>
      %c0_303 = arith.constant 0 : index
      %c0_304 = arith.constant 0 : index
      %688 = vector.load %arg9[%c0_303, %c0_304] : memref<8x128xf32, #tpu.memory_space<vmem>>, vector<8x128xf32>
      tpu.vector_store %arg9[%c0_303, %c0_304], %687 {strides = array<i32>} : memref<8x128xf32, #tpu.memory_space<vmem>>, vector<8x128xf32>,
      %cst_305 = arith.constant 0.000000e+00 : f32
      %689 = vector.broadcast %cst_305 : f32 to vector<8x128xf32>
      %c0_306 = arith.constant 0 : index
      %c0_307 = arith.constant 0 : index
      %690 = vector.load %arg10[%c0_306, %c0_307] : memref<8x128xf32, #tpu.memory_space<vmem>>, vector<8x128xf32>
      tpu.vector_store %arg10[%c0_306, %c0_307], %689 {strides = array<i32>} : memref<8x128xf32, #tpu.memory_space<vmem>>, vector<8x128xf32>,
    } else {
    }
    %c0_i32_1 = arith.constant 0 : i32
    %3 = arith.index_cast %c0_i32_1 : i32 to index
    %c0 = arith.constant 0 : index
    %c0_2 = arith.constant 0 : index
    %4 = vector.load %arg1[%3, %c0, %c0_2] : memref<8x8x512xbf16, #tpu.memory_space<vmem>>, vector<1x8x512xbf16>
    %5 = vector.shape_cast %4 : vector<1x8x512xbf16> to vector<8x512xbf16>
    %6 = arith.extf %5 : vector<8x512xbf16> to vector<8x512xf32>
    %c0_3 = arith.constant 0 : index
    %c0_4 = arith.constant 0 : index
    %7 = vector.load %arg7[%c0_3, %c0_4] : memref<8x128xf32, #tpu.memory_space<vmem>>, vector<8x128xf32>
    %8 = arith.truncf %7 : vector<8x128xf32> to vector<8x128xbf16>
    %c0_5 = arith.constant 0 : index
    %c0_6 = arith.constant 0 : index
    %9 = vector.load %arg3[%c0_5, %c0_6] : memref<128x512xbf16, #tpu.memory_space<vmem>>, vector<128x512xbf16>
    %cst = arith.constant dense<0.000000e+00> : vector<8x512xf32>
    %10 = tpu.matmul %8, %9, %cst {dimension_numbers = #tpu.dot_dimension_numbers<[1], [0], [0], [1], [0, 0, 1, 1], [], []>} : vector<8x128xbf16>, vector<128x512xbf16>, vector<8x512xf32> -> vector<8x512xf32>
    %11 = arith.addf %6, %10 : vector<8x512xf32>
    %c0_7 = arith.constant 0 : index
    %c0_8 = arith.constant 0 : index
    %12 = vector.load %arg8[%c0_7, %c0_8] : memref<8x128xf32, #tpu.memory_space<vmem>>, vector<8x128xf32>
    %13 = vector.extract_strided_slice %11 {offsets = [0, 0], sizes = [8, 128], strides = [1, 1]} : vector<8x512xf32> to vector<8x128xf32>
    %14 = arith.negf %13 : vector<8x128xf32>
    %15 = math.exp %14 : vector<8x128xf32>
    %cst_9 = arith.constant 1.000000e+00 : f32
    %16 = vector.broadcast %cst_9 : f32 to vector<8x128xf32>
    %17 = arith.addf %16, %15 : vector<8x128xf32>
    %18 = arith.divf %16, %17 : vector<8x128xf32>
    %19 = vector.extract_strided_slice %11 {offsets = [0, 128], sizes = [8, 128], strides = [1, 1]} : vector<8x512xf32> to vector<8x128xf32>
    %20 = arith.negf %19 : vector<8x128xf32>
    %21 = math.exp %20 : vector<8x128xf32>
    %cst_10 = arith.constant 1.000000e+00 : f32
    %22 = vector.broadcast %cst_10 : f32 to vector<8x128xf32>
    %23 = arith.addf %22, %21 : vector<8x128xf32>
    %24 = arith.divf %22, %23 : vector<8x128xf32>
    %25 = vector.extract_strided_slice %11 {offsets = [0, 256], sizes = [8, 128], strides = [1, 1]} : vector<8x512xf32> to vector<8x128xf32>
    %26 = math.tanh %25 : vector<8x128xf32>
    %27 = vector.extract_strided_slice %11 {offsets = [0, 384], sizes = [8, 128], strides = [1, 1]} : vector<8x512xf32> to vector<8x128xf32>
    %28 = arith.negf %27 : vector<8x128xf32>
    %29 = math.exp %28 : vector<8x128xf32>
    %cst_11 = arith.constant 1.000000e+00 : f32
    %30 = vector.broadcast %cst_11 : f32 to vector<8x128xf32>
    %31 = arith.addf %30, %29 : vector<8x128xf32>
    %32 = arith.divf %30, %31 : vector<8x128xf32>
    %33 = arith.mulf %24, %12 : vector<8x128xf32>
    %34 = arith.mulf %18, %26 : vector<8x128xf32>
    %35 = arith.addf %33, %34 : vector<8x128xf32>
    %36 = math.tanh %35 : vector<8x128xf32>
    %37 = arith.mulf %32, %36 : vector<8x128xf32>
    %c0_12 = arith.constant 0 : index
    %c0_13 = arith.constant 0 : index
    %38 = vector.load %arg7[%c0_12, %c0_13] : memref<8x128xf32, #tpu.memory_space<vmem>>, vector<8x128xf32>
    tpu.vector_store %arg7[%c0_12, %c0_13], %37 {strides = array<i32>} : memref<8x128xf32, #tpu.memory_space<vmem>>, vector<8x128xf32>,
    %c0_14 = arith.constant 0 : index
    %c0_15 = arith.constant 0 : index
    %39 = vector.load %arg8[%c0_14, %c0_15] : memref<8x128xf32, #tpu.memory_space<vmem>>, vector<8x128xf32>
    tpu.vector_store %arg8[%c0_14, %c0_15], %35 {strides = array<i32>} : memref<8x128xf32, #tpu.memory_space<vmem>>, vector<8x128xf32>,
    %40 = arith.truncf %37 : vector<8x128xf32> to vector<8x128xbf16>
    %41 = arith.index_cast %c0_i32_1 : i32 to index
    %c0_16 = arith.constant 0 : index
    %c0_17 = arith.constant 0 : index
    %42 = vector.load %arg5[%41, %c0_16, %c0_17] : memref<8x8x128xbf16, #tpu.memory_space<vmem>>, vector<1x8x128xbf16>
    %43 = vector.shape_cast %42 : vector<1x8x128xbf16> to vector<8x128xbf16>
    %44 = vector.shape_cast %40 : vector<8x128xbf16> to vector<1x8x128xbf16>
    tpu.vector_store %arg5[%41, %c0_16, %c0_17], %44 {strides = array<i32>} : memref<8x8x128xbf16, #tpu.memory_space<vmem>>, vector<1x8x128xbf16>,
    %c7_i32 = arith.constant 7 : i32
    %45 = arith.subi %c7_i32, %c0_i32_1 : i32
    %46 = arith.index_cast %45 : i32 to index
    %c0_18 = arith.constant 0 : index
    %c0_19 = arith.constant 0 : index
    %47 = vector.load %arg2[%46, %c0_18, %c0_19] : memref<8x8x512xbf16, #tpu.memory_space<vmem>>, vector<1x8x512xbf16>
    %48 = vector.shape_cast %47 : vector<1x8x512xbf16> to vector<8x512xbf16>
    %49 = arith.extf %48 : vector<8x512xbf16> to vector<8x512xf32>
    %c0_20 = arith.constant 0 : index
    %c0_21 = arith.constant 0 : index
    %50 = vector.load %arg9[%c0_20, %c0_21] : memref<8x128xf32, #tpu.memory_space<vmem>>, vector<8x128xf32>
    %51 = arith.truncf %50 : vector<8x128xf32> to vector<8x128xbf16>
    %c0_22 = arith.constant 0 : index
    %c0_23 = arith.constant 0 : index
    %52 = vector.load %arg4[%c0_22, %c0_23] : memref<128x512xbf16, #tpu.memory_space<vmem>>, vector<128x512xbf16>
    %cst_24 = arith.constant dense<0.000000e+00> : vector<8x512xf32>
    %53 = tpu.matmul %51, %52, %cst_24 {dimension_numbers = #tpu.dot_dimension_numbers<[1], [0], [0], [1], [0, 0, 1, 1], [], []>} : vector<8x128xbf16>, vector<128x512xbf16>, vector<8x512xf32> -> vector<8x512xf32>
    %54 = arith.addf %49, %53 : vector<8x512xf32>
    %c0_25 = arith.constant 0 : index
    %c0_26 = arith.constant 0 : index
    %55 = vector.load %arg10[%c0_25, %c0_26] : memref<8x128xf32, #tpu.memory_space<vmem>>, vector<8x128xf32>
    %56 = vector.extract_strided_slice %54 {offsets = [0, 0], sizes = [8, 128], strides = [1, 1]} : vector<8x512xf32> to vector<8x128xf32>
    %57 = arith.negf %56 : vector<8x128xf32>
    %58 = math.exp %57 : vector<8x128xf32>
    %cst_27 = arith.constant 1.000000e+00 : f32
    %59 = vector.broadcast %cst_27 : f32 to vector<8x128xf32>
    %60 = arith.addf %59, %58 : vector<8x128xf32>
    %61 = arith.divf %59, %60 : vector<8x128xf32>
    %62 = vector.extract_strided_slice %54 {offsets = [0, 128], sizes = [8, 128], strides = [1, 1]} : vector<8x512xf32> to vector<8x128xf32>
    %63 = arith.negf %62 : vector<8x128xf32>
    %64 = math.exp %63 : vector<8x128xf32>
    %cst_28 = arith.constant 1.000000e+00 : f32
    %65 = vector.broadcast %cst_28 : f32 to vector<8x128xf32>
    %66 = arith.addf %65, %64 : vector<8x128xf32>
    %67 = arith.divf %65, %66 : vector<8x128xf32>
    %68 = vector.extract_strided_slice %54 {offsets = [0, 256], sizes = [8, 128], strides = [1, 1]} : vector<8x512xf32> to vector<8x128xf32>
    %69 = math.tanh %68 : vector<8x128xf32>
    %70 = vector.extract_strided_slice %54 {offsets = [0, 384], sizes = [8, 128], strides = [1, 1]} : vector<8x512xf32> to vector<8x128xf32>
    %71 = arith.negf %70 : vector<8x128xf32>
    %72 = math.exp %71 : vector<8x128xf32>
    %cst_29 = arith.constant 1.000000e+00 : f32
    %73 = vector.broadcast %cst_29 : f32 to vector<8x128xf32>
    %74 = arith.addf %73, %72 : vector<8x128xf32>
    %75 = arith.divf %73, %74 : vector<8x128xf32>
    %76 = arith.mulf %67, %55 : vector<8x128xf32>
    %77 = arith.mulf %61, %69 : vector<8x128xf32>
    %78 = arith.addf %76, %77 : vector<8x128xf32>
    %79 = math.tanh %78 : vector<8x128xf32>
    %80 = arith.mulf %75, %79 : vector<8x128xf32>
    %c0_30 = arith.constant 0 : index
    %c0_31 = arith.constant 0 : index
    %81 = vector.load %arg9[%c0_30, %c0_31] : memref<8x128xf32, #tpu.memory_space<vmem>>, vector<8x128xf32>
    tpu.vector_store %arg9[%c0_30, %c0_31], %80 {strides = array<i32>} : memref<8x128xf32, #tpu.memory_space<vmem>>, vector<8x128xf32>,
    %c0_32 = arith.constant 0 : index
    %c0_33 = arith.constant 0 : index
    %82 = vector.load %arg10[%c0_32, %c0_33] : memref<8x128xf32, #tpu.memory_space<vmem>>, vector<8x128xf32>
    tpu.vector_store %arg10[%c0_32, %c0_33], %78 {strides = array<i32>} : memref<8x128xf32, #tpu.memory_space<vmem>>, vector<8x128xf32>,
    %83 = arith.truncf %80 : vector<8x128xf32> to vector<8x128xbf16>
    %84 = arith.index_cast %45 : i32 to index
    %c0_34 = arith.constant 0 : index
    %c0_35 = arith.constant 0 : index
    %85 = vector.load %arg6[%84, %c0_34, %c0_35] : memref<8x8x128xbf16, #tpu.memory_space<vmem>>, vector<1x8x128xbf16>
    %86 = vector.shape_cast %85 : vector<1x8x128xbf16> to vector<8x128xbf16>
    %87 = vector.shape_cast %83 : vector<8x128xbf16> to vector<1x8x128xbf16>
    tpu.vector_store %arg6[%84, %c0_34, %c0_35], %87 {strides = array<i32>} : memref<8x8x128xbf16, #tpu.memory_space<vmem>>, vector<1x8x128xbf16>,
    %c1_i32 = arith.constant 1 : i32
    %88 = arith.index_cast %c1_i32 : i32 to index
    %c0_36 = arith.constant 0 : index
    %c0_37 = arith.constant 0 : index
    %89 = vector.load %arg1[%88, %c0_36, %c0_37] : memref<8x8x512xbf16, #tpu.memory_space<vmem>>, vector<1x8x512xbf16>
    %90 = vector.shape_cast %89 : vector<1x8x512xbf16> to vector<8x512xbf16>
    %91 = arith.extf %90 : vector<8x512xbf16> to vector<8x512xf32>
    %c0_38 = arith.constant 0 : index
    %c0_39 = arith.constant 0 : index
    %92 = vector.load %arg7[%c0_38, %c0_39] : memref<8x128xf32, #tpu.memory_space<vmem>>, vector<8x128xf32>
    %93 = arith.truncf %92 : vector<8x128xf32> to vector<8x128xbf16>
    %c0_40 = arith.constant 0 : index
    %c0_41 = arith.constant 0 : index
    %94 = vector.load %arg3[%c0_40, %c0_41] : memref<128x512xbf16, #tpu.memory_space<vmem>>, vector<128x512xbf16>
    %cst_42 = arith.constant dense<0.000000e+00> : vector<8x512xf32>
    %95 = tpu.matmul %93, %94, %cst_42 {dimension_numbers = #tpu.dot_dimension_numbers<[1], [0], [0], [1], [0, 0, 1, 1], [], []>} : vector<8x128xbf16>, vector<128x512xbf16>, vector<8x512xf32> -> vector<8x512xf32>
    %96 = arith.addf %91, %95 : vector<8x512xf32>
    %c0_43 = arith.constant 0 : index
    %c0_44 = arith.constant 0 : index
    %97 = vector.load %arg8[%c0_43, %c0_44] : memref<8x128xf32, #tpu.memory_space<vmem>>, vector<8x128xf32>
    %98 = vector.extract_strided_slice %96 {offsets = [0, 0], sizes = [8, 128], strides = [1, 1]} : vector<8x512xf32> to vector<8x128xf32>
    %99 = arith.negf %98 : vector<8x128xf32>
    %100 = math.exp %99 : vector<8x128xf32>
    %cst_45 = arith.constant 1.000000e+00 : f32
    %101 = vector.broadcast %cst_45 : f32 to vector<8x128xf32>
    %102 = arith.addf %101, %100 : vector<8x128xf32>
    %103 = arith.divf %101, %102 : vector<8x128xf32>
    %104 = vector.extract_strided_slice %96 {offsets = [0, 128], sizes = [8, 128], strides = [1, 1]} : vector<8x512xf32> to vector<8x128xf32>
    %105 = arith.negf %104 : vector<8x128xf32>
    %106 = math.exp %105 : vector<8x128xf32>
    %cst_46 = arith.constant 1.000000e+00 : f32
    %107 = vector.broadcast %cst_46 : f32 to vector<8x128xf32>
    %108 = arith.addf %107, %106 : vector<8x128xf32>
    %109 = arith.divf %107, %108 : vector<8x128xf32>
    %110 = vector.extract_strided_slice %96 {offsets = [0, 256], sizes = [8, 128], strides = [1, 1]} : vector<8x512xf32> to vector<8x128xf32>
    %111 = math.tanh %110 : vector<8x128xf32>
    %112 = vector.extract_strided_slice %96 {offsets = [0, 384], sizes = [8, 128], strides = [1, 1]} : vector<8x512xf32> to vector<8x128xf32>
    %113 = arith.negf %112 : vector<8x128xf32>
    %114 = math.exp %113 : vector<8x128xf32>
    %cst_47 = arith.constant 1.000000e+00 : f32
    %115 = vector.broadcast %cst_47 : f32 to vector<8x128xf32>
    %116 = arith.addf %115, %114 : vector<8x128xf32>
    %117 = arith.divf %115, %116 : vector<8x128xf32>
    %118 = arith.mulf %109, %97 : vector<8x128xf32>
    %119 = arith.mulf %103, %111 : vector<8x128xf32>
    %120 = arith.addf %118, %119 : vector<8x128xf32>
    %121 = math.tanh %120 : vector<8x128xf32>
    %122 = arith.mulf %117, %121 : vector<8x128xf32>
    %c0_48 = arith.constant 0 : index
    %c0_49 = arith.constant 0 : index
    %123 = vector.load %arg7[%c0_48, %c0_49] : memref<8x128xf32, #tpu.memory_space<vmem>>, vector<8x128xf32>
    tpu.vector_store %arg7[%c0_48, %c0_49], %122 {strides = array<i32>} : memref<8x128xf32, #tpu.memory_space<vmem>>, vector<8x128xf32>,
    %c0_50 = arith.constant 0 : index
    %c0_51 = arith.constant 0 : index
    %124 = vector.load %arg8[%c0_50, %c0_51] : memref<8x128xf32, #tpu.memory_space<vmem>>, vector<8x128xf32>
    tpu.vector_store %arg8[%c0_50, %c0_51], %120 {strides = array<i32>} : memref<8x128xf32, #tpu.memory_space<vmem>>, vector<8x128xf32>,
    %125 = arith.truncf %122 : vector<8x128xf32> to vector<8x128xbf16>
    %126 = arith.index_cast %c1_i32 : i32 to index
    %c0_52 = arith.constant 0 : index
    %c0_53 = arith.constant 0 : index
    %127 = vector.load %arg5[%126, %c0_52, %c0_53] : memref<8x8x128xbf16, #tpu.memory_space<vmem>>, vector<1x8x128xbf16>
    %128 = vector.shape_cast %127 : vector<1x8x128xbf16> to vector<8x128xbf16>
    %129 = vector.shape_cast %125 : vector<8x128xbf16> to vector<1x8x128xbf16>
    tpu.vector_store %arg5[%126, %c0_52, %c0_53], %129 {strides = array<i32>} : memref<8x8x128xbf16, #tpu.memory_space<vmem>>, vector<1x8x128xbf16>,
    %c7_i32_54 = arith.constant 7 : i32
    %130 = arith.subi %c7_i32_54, %c1_i32 : i32
    %131 = arith.index_cast %130 : i32 to index
    %c0_55 = arith.constant 0 : index
    %c0_56 = arith.constant 0 : index
    %132 = vector.load %arg2[%131, %c0_55, %c0_56] : memref<8x8x512xbf16, #tpu.memory_space<vmem>>, vector<1x8x512xbf16>
    %133 = vector.shape_cast %132 : vector<1x8x512xbf16> to vector<8x512xbf16>
    %134 = arith.extf %133 : vector<8x512xbf16> to vector<8x512xf32>
    %c0_57 = arith.constant 0 : index
    %c0_58 = arith.constant 0 : index
    %135 = vector.load %arg9[%c0_57, %c0_58] : memref<8x128xf32, #tpu.memory_space<vmem>>, vector<8x128xf32>
    %136 = arith.truncf %135 : vector<8x128xf32> to vector<8x128xbf16>
    %c0_59 = arith.constant 0 : index
    %c0_60 = arith.constant 0 : index
    %137 = vector.load %arg4[%c0_59, %c0_60] : memref<128x512xbf16, #tpu.memory_space<vmem>>, vector<128x512xbf16>
    %cst_61 = arith.constant dense<0.000000e+00> : vector<8x512xf32>
    %138 = tpu.matmul %136, %137, %cst_61 {dimension_numbers = #tpu.dot_dimension_numbers<[1], [0], [0], [1], [0, 0, 1, 1], [], []>} : vector<8x128xbf16>, vector<128x512xbf16>, vector<8x512xf32> -> vector<8x512xf32>
    %139 = arith.addf %134, %138 : vector<8x512xf32>
    %c0_62 = arith.constant 0 : index
    %c0_63 = arith.constant 0 : index
    %140 = vector.load %arg10[%c0_62, %c0_63] : memref<8x128xf32, #tpu.memory_space<vmem>>, vector<8x128xf32>
    %141 = vector.extract_strided_slice %139 {offsets = [0, 0], sizes = [8, 128], strides = [1, 1]} : vector<8x512xf32> to vector<8x128xf32>
    %142 = arith.negf %141 : vector<8x128xf32>
    %143 = math.exp %142 : vector<8x128xf32>
    %cst_64 = arith.constant 1.000000e+00 : f32
    %144 = vector.broadcast %cst_64 : f32 to vector<8x128xf32>
    %145 = arith.addf %144, %143 : vector<8x128xf32>
    %146 = arith.divf %144, %145 : vector<8x128xf32>
    %147 = vector.extract_strided_slice %139 {offsets = [0, 128], sizes = [8, 128], strides = [1, 1]} : vector<8x512xf32> to vector<8x128xf32>
    %148 = arith.negf %147 : vector<8x128xf32>
    %149 = math.exp %148 : vector<8x128xf32>
    %cst_65 = arith.constant 1.000000e+00 : f32
    %150 = vector.broadcast %cst_65 : f32 to vector<8x128xf32>
    %151 = arith.addf %150, %149 : vector<8x128xf32>
    %152 = arith.divf %150, %151 : vector<8x128xf32>
    %153 = vector.extract_strided_slice %139 {offsets = [0, 256], sizes = [8, 128], strides = [1, 1]} : vector<8x512xf32> to vector<8x128xf32>
    %154 = math.tanh %153 : vector<8x128xf32>
    %155 = vector.extract_strided_slice %139 {offsets = [0, 384], sizes = [8, 128], strides = [1, 1]} : vector<8x512xf32> to vector<8x128xf32>
    %156 = arith.negf %155 : vector<8x128xf32>
    %157 = math.exp %156 : vector<8x128xf32>
    %cst_66 = arith.constant 1.000000e+00 : f32
    %158 = vector.broadcast %cst_66 : f32 to vector<8x128xf32>
    %159 = arith.addf %158, %157 : vector<8x128xf32>
    %160 = arith.divf %158, %159 : vector<8x128xf32>
    %161 = arith.mulf %152, %140 : vector<8x128xf32>
    %162 = arith.mulf %146, %154 : vector<8x128xf32>
    %163 = arith.addf %161, %162 : vector<8x128xf32>
    %164 = math.tanh %163 : vector<8x128xf32>
    %165 = arith.mulf %160, %164 : vector<8x128xf32>
    %c0_67 = arith.constant 0 : index
    %c0_68 = arith.constant 0 : index
    %166 = vector.load %arg9[%c0_67, %c0_68] : memref<8x128xf32, #tpu.memory_space<vmem>>, vector<8x128xf32>
    tpu.vector_store %arg9[%c0_67, %c0_68], %165 {strides = array<i32>} : memref<8x128xf32, #tpu.memory_space<vmem>>, vector<8x128xf32>,
    %c0_69 = arith.constant 0 : index
    %c0_70 = arith.constant 0 : index
    %167 = vector.load %arg10[%c0_69, %c0_70] : memref<8x128xf32, #tpu.memory_space<vmem>>, vector<8x128xf32>
    tpu.vector_store %arg10[%c0_69, %c0_70], %163 {strides = array<i32>} : memref<8x128xf32, #tpu.memory_space<vmem>>, vector<8x128xf32>,
    %168 = arith.truncf %165 : vector<8x128xf32> to vector<8x128xbf16>
    %169 = arith.index_cast %130 : i32 to index
    %c0_71 = arith.constant 0 : index
    %c0_72 = arith.constant 0 : index
    %170 = vector.load %arg6[%169, %c0_71, %c0_72] : memref<8x8x128xbf16, #tpu.memory_space<vmem>>, vector<1x8x128xbf16>
    %171 = vector.shape_cast %170 : vector<1x8x128xbf16> to vector<8x128xbf16>
    %172 = vector.shape_cast %168 : vector<8x128xbf16> to vector<1x8x128xbf16>
    tpu.vector_store %arg6[%169, %c0_71, %c0_72], %172 {strides = array<i32>} : memref<8x8x128xbf16, #tpu.memory_space<vmem>>, vector<1x8x128xbf16>,
    %c2_i32 = arith.constant 2 : i32
    %173 = arith.index_cast %c2_i32 : i32 to index
    %c0_73 = arith.constant 0 : index
    %c0_74 = arith.constant 0 : index
    %174 = vector.load %arg1[%173, %c0_73, %c0_74] : memref<8x8x512xbf16, #tpu.memory_space<vmem>>, vector<1x8x512xbf16>
    %175 = vector.shape_cast %174 : vector<1x8x512xbf16> to vector<8x512xbf16>
    %176 = arith.extf %175 : vector<8x512xbf16> to vector<8x512xf32>
    %c0_75 = arith.constant 0 : index
    %c0_76 = arith.constant 0 : index
    %177 = vector.load %arg7[%c0_75, %c0_76] : memref<8x128xf32, #tpu.memory_space<vmem>>, vector<8x128xf32>
    %178 = arith.truncf %177 : vector<8x128xf32> to vector<8x128xbf16>
    %c0_77 = arith.constant 0 : index
    %c0_78 = arith.constant 0 : index
    %179 = vector.load %arg3[%c0_77, %c0_78] : memref<128x512xbf16, #tpu.memory_space<vmem>>, vector<128x512xbf16>
    %cst_79 = arith.constant dense<0.000000e+00> : vector<8x512xf32>
    %180 = tpu.matmul %178, %179, %cst_79 {dimension_numbers = #tpu.dot_dimension_numbers<[1], [0], [0], [1], [0, 0, 1, 1], [], []>} : vector<8x128xbf16>, vector<128x512xbf16>, vector<8x512xf32> -> vector<8x512xf32>
    %181 = arith.addf %176, %180 : vector<8x512xf32>
    %c0_80 = arith.constant 0 : index
    %c0_81 = arith.constant 0 : index
    %182 = vector.load %arg8[%c0_80, %c0_81] : memref<8x128xf32, #tpu.memory_space<vmem>>, vector<8x128xf32>
    %183 = vector.extract_strided_slice %181 {offsets = [0, 0], sizes = [8, 128], strides = [1, 1]} : vector<8x512xf32> to vector<8x128xf32>
    %184 = arith.negf %183 : vector<8x128xf32>
    %185 = math.exp %184 : vector<8x128xf32>
    %cst_82 = arith.constant 1.000000e+00 : f32
    %186 = vector.broadcast %cst_82 : f32 to vector<8x128xf32>
    %187 = arith.addf %186, %185 : vector<8x128xf32>
    %188 = arith.divf %186, %187 : vector<8x128xf32>
    %189 = vector.extract_strided_slice %181 {offsets = [0, 128], sizes = [8, 128], strides = [1, 1]} : vector<8x512xf32> to vector<8x128xf32>
    %190 = arith.negf %189 : vector<8x128xf32>
    %191 = math.exp %190 : vector<8x128xf32>
    %cst_83 = arith.constant 1.000000e+00 : f32
    %192 = vector.broadcast %cst_83 : f32 to vector<8x128xf32>
    %193 = arith.addf %192, %191 : vector<8x128xf32>
    %194 = arith.divf %192, %193 : vector<8x128xf32>
    %195 = vector.extract_strided_slice %181 {offsets = [0, 256], sizes = [8, 128], strides = [1, 1]} : vector<8x512xf32> to vector<8x128xf32>
    %196 = math.tanh %195 : vector<8x128xf32>
    %197 = vector.extract_strided_slice %181 {offsets = [0, 384], sizes = [8, 128], strides = [1, 1]} : vector<8x512xf32> to vector<8x128xf32>
    %198 = arith.negf %197 : vector<8x128xf32>
    %199 = math.exp %198 : vector<8x128xf32>
    %cst_84 = arith.constant 1.000000e+00 : f32
    %200 = vector.broadcast %cst_84 : f32 to vector<8x128xf32>
    %201 = arith.addf %200, %199 : vector<8x128xf32>
    %202 = arith.divf %200, %201 : vector<8x128xf32>
    %203 = arith.mulf %194, %182 : vector<8x128xf32>
    %204 = arith.mulf %188, %196 : vector<8x128xf32>
    %205 = arith.addf %203, %204 : vector<8x128xf32>
    %206 = math.tanh %205 : vector<8x128xf32>
    %207 = arith.mulf %202, %206 : vector<8x128xf32>
    %c0_85 = arith.constant 0 : index
    %c0_86 = arith.constant 0 : index
    %208 = vector.load %arg7[%c0_85, %c0_86] : memref<8x128xf32, #tpu.memory_space<vmem>>, vector<8x128xf32>
    tpu.vector_store %arg7[%c0_85, %c0_86], %207 {strides = array<i32>} : memref<8x128xf32, #tpu.memory_space<vmem>>, vector<8x128xf32>,
    %c0_87 = arith.constant 0 : index
    %c0_88 = arith.constant 0 : index
    %209 = vector.load %arg8[%c0_87, %c0_88] : memref<8x128xf32, #tpu.memory_space<vmem>>, vector<8x128xf32>
    tpu.vector_store %arg8[%c0_87, %c0_88], %205 {strides = array<i32>} : memref<8x128xf32, #tpu.memory_space<vmem>>, vector<8x128xf32>,
    %210 = arith.truncf %207 : vector<8x128xf32> to vector<8x128xbf16>
    %211 = arith.index_cast %c2_i32 : i32 to index
    %c0_89 = arith.constant 0 : index
    %c0_90 = arith.constant 0 : index
    %212 = vector.load %arg5[%211, %c0_89, %c0_90] : memref<8x8x128xbf16, #tpu.memory_space<vmem>>, vector<1x8x128xbf16>
    %213 = vector.shape_cast %212 : vector<1x8x128xbf16> to vector<8x128xbf16>
    %214 = vector.shape_cast %210 : vector<8x128xbf16> to vector<1x8x128xbf16>
    tpu.vector_store %arg5[%211, %c0_89, %c0_90], %214 {strides = array<i32>} : memref<8x8x128xbf16, #tpu.memory_space<vmem>>, vector<1x8x128xbf16>,
    %c7_i32_91 = arith.constant 7 : i32
    %215 = arith.subi %c7_i32_91, %c2_i32 : i32
    %216 = arith.index_cast %215 : i32 to index
    %c0_92 = arith.constant 0 : index
    %c0_93 = arith.constant 0 : index
    %217 = vector.load %arg2[%216, %c0_92, %c0_93] : memref<8x8x512xbf16, #tpu.memory_space<vmem>>, vector<1x8x512xbf16>
    %218 = vector.shape_cast %217 : vector<1x8x512xbf16> to vector<8x512xbf16>
    %219 = arith.extf %218 : vector<8x512xbf16> to vector<8x512xf32>
    %c0_94 = arith.constant 0 : index
    %c0_95 = arith.constant 0 : index
    %220 = vector.load %arg9[%c0_94, %c0_95] : memref<8x128xf32, #tpu.memory_space<vmem>>, vector<8x128xf32>
    %221 = arith.truncf %220 : vector<8x128xf32> to vector<8x128xbf16>
    %c0_96 = arith.constant 0 : index
    %c0_97 = arith.constant 0 : index
    %222 = vector.load %arg4[%c0_96, %c0_97] : memref<128x512xbf16, #tpu.memory_space<vmem>>, vector<128x512xbf16>
    %cst_98 = arith.constant dense<0.000000e+00> : vector<8x512xf32>
    %223 = tpu.matmul %221, %222, %cst_98 {dimension_numbers = #tpu.dot_dimension_numbers<[1], [0], [0], [1], [0, 0, 1, 1], [], []>} : vector<8x128xbf16>, vector<128x512xbf16>, vector<8x512xf32> -> vector<8x512xf32>
    %224 = arith.addf %219, %223 : vector<8x512xf32>
    %c0_99 = arith.constant 0 : index
    %c0_100 = arith.constant 0 : index
    %225 = vector.load %arg10[%c0_99, %c0_100] : memref<8x128xf32, #tpu.memory_space<vmem>>, vector<8x128xf32>
    %226 = vector.extract_strided_slice %224 {offsets = [0, 0], sizes = [8, 128], strides = [1, 1]} : vector<8x512xf32> to vector<8x128xf32>
    %227 = arith.negf %226 : vector<8x128xf32>
    %228 = math.exp %227 : vector<8x128xf32>
    %cst_101 = arith.constant 1.000000e+00 : f32
    %229 = vector.broadcast %cst_101 : f32 to vector<8x128xf32>
    %230 = arith.addf %229, %228 : vector<8x128xf32>
    %231 = arith.divf %229, %230 : vector<8x128xf32>
    %232 = vector.extract_strided_slice %224 {offsets = [0, 128], sizes = [8, 128], strides = [1, 1]} : vector<8x512xf32> to vector<8x128xf32>
    %233 = arith.negf %232 : vector<8x128xf32>
    %234 = math.exp %233 : vector<8x128xf32>
    %cst_102 = arith.constant 1.000000e+00 : f32
    %235 = vector.broadcast %cst_102 : f32 to vector<8x128xf32>
    %236 = arith.addf %235, %234 : vector<8x128xf32>
    %237 = arith.divf %235, %236 : vector<8x128xf32>
    %238 = vector.extract_strided_slice %224 {offsets = [0, 256], sizes = [8, 128], strides = [1, 1]} : vector<8x512xf32> to vector<8x128xf32>
    %239 = math.tanh %238 : vector<8x128xf32>
    %240 = vector.extract_strided_slice %224 {offsets = [0, 384], sizes = [8, 128], strides = [1, 1]} : vector<8x512xf32> to vector<8x128xf32>
    %241 = arith.negf %240 : vector<8x128xf32>
    %242 = math.exp %241 : vector<8x128xf32>
    %cst_103 = arith.constant 1.000000e+00 : f32
    %243 = vector.broadcast %cst_103 : f32 to vector<8x128xf32>
    %244 = arith.addf %243, %242 : vector<8x128xf32>
    %245 = arith.divf %243, %244 : vector<8x128xf32>
    %246 = arith.mulf %237, %225 : vector<8x128xf32>
    %247 = arith.mulf %231, %239 : vector<8x128xf32>
    %248 = arith.addf %246, %247 : vector<8x128xf32>
    %249 = math.tanh %248 : vector<8x128xf32>
    %250 = arith.mulf %245, %249 : vector<8x128xf32>
    %c0_104 = arith.constant 0 : index
    %c0_105 = arith.constant 0 : index
    %251 = vector.load %arg9[%c0_104, %c0_105] : memref<8x128xf32, #tpu.memory_space<vmem>>, vector<8x128xf32>
    tpu.vector_store %arg9[%c0_104, %c0_105], %250 {strides = array<i32>} : memref<8x128xf32, #tpu.memory_space<vmem>>, vector<8x128xf32>,
    %c0_106 = arith.constant 0 : index
    %c0_107 = arith.constant 0 : index
    %252 = vector.load %arg10[%c0_106, %c0_107] : memref<8x128xf32, #tpu.memory_space<vmem>>, vector<8x128xf32>
    tpu.vector_store %arg10[%c0_106, %c0_107], %248 {strides = array<i32>} : memref<8x128xf32, #tpu.memory_space<vmem>>, vector<8x128xf32>,
    %253 = arith.truncf %250 : vector<8x128xf32> to vector<8x128xbf16>
    %254 = arith.index_cast %215 : i32 to index
    %c0_108 = arith.constant 0 : index
    %c0_109 = arith.constant 0 : index
    %255 = vector.load %arg6[%254, %c0_108, %c0_109] : memref<8x8x128xbf16, #tpu.memory_space<vmem>>, vector<1x8x128xbf16>
    %256 = vector.shape_cast %255 : vector<1x8x128xbf16> to vector<8x128xbf16>
    %257 = vector.shape_cast %253 : vector<8x128xbf16> to vector<1x8x128xbf16>
    tpu.vector_store %arg6[%254, %c0_108, %c0_109], %257 {strides = array<i32>} : memref<8x8x128xbf16, #tpu.memory_space<vmem>>, vector<1x8x128xbf16>,
    %c3_i32 = arith.constant 3 : i32
    %258 = arith.index_cast %c3_i32 : i32 to index
    %c0_110 = arith.constant 0 : index
    %c0_111 = arith.constant 0 : index
    %259 = vector.load %arg1[%258, %c0_110, %c0_111] : memref<8x8x512xbf16, #tpu.memory_space<vmem>>, vector<1x8x512xbf16>
    %260 = vector.shape_cast %259 : vector<1x8x512xbf16> to vector<8x512xbf16>
    %261 = arith.extf %260 : vector<8x512xbf16> to vector<8x512xf32>
    %c0_112 = arith.constant 0 : index
    %c0_113 = arith.constant 0 : index
    %262 = vector.load %arg7[%c0_112, %c0_113] : memref<8x128xf32, #tpu.memory_space<vmem>>, vector<8x128xf32>
    %263 = arith.truncf %262 : vector<8x128xf32> to vector<8x128xbf16>
    %c0_114 = arith.constant 0 : index
    %c0_115 = arith.constant 0 : index
    %264 = vector.load %arg3[%c0_114, %c0_115] : memref<128x512xbf16, #tpu.memory_space<vmem>>, vector<128x512xbf16>
    %cst_116 = arith.constant dense<0.000000e+00> : vector<8x512xf32>
    %265 = tpu.matmul %263, %264, %cst_116 {dimension_numbers = #tpu.dot_dimension_numbers<[1], [0], [0], [1], [0, 0, 1, 1], [], []>} : vector<8x128xbf16>, vector<128x512xbf16>, vector<8x512xf32> -> vector<8x512xf32>
    %266 = arith.addf %261, %265 : vector<8x512xf32>
    %c0_117 = arith.constant 0 : index
    %c0_118 = arith.constant 0 : index
    %267 = vector.load %arg8[%c0_117, %c0_118] : memref<8x128xf32, #tpu.memory_space<vmem>>, vector<8x128xf32>
    %268 = vector.extract_strided_slice %266 {offsets = [0, 0], sizes = [8, 128], strides = [1, 1]} : vector<8x512xf32> to vector<8x128xf32>
    %269 = arith.negf %268 : vector<8x128xf32>
    %270 = math.exp %269 : vector<8x128xf32>
    %cst_119 = arith.constant 1.000000e+00 : f32
    %271 = vector.broadcast %cst_119 : f32 to vector<8x128xf32>
    %272 = arith.addf %271, %270 : vector<8x128xf32>
    %273 = arith.divf %271, %272 : vector<8x128xf32>
    %274 = vector.extract_strided_slice %266 {offsets = [0, 128], sizes = [8, 128], strides = [1, 1]} : vector<8x512xf32> to vector<8x128xf32>
    %275 = arith.negf %274 : vector<8x128xf32>
    %276 = math.exp %275 : vector<8x128xf32>
    %cst_120 = arith.constant 1.000000e+00 : f32
    %277 = vector.broadcast %cst_120 : f32 to vector<8x128xf32>
    %278 = arith.addf %277, %276 : vector<8x128xf32>
    %279 = arith.divf %277, %278 : vector<8x128xf32>
    %280 = vector.extract_strided_slice %266 {offsets = [0, 256], sizes = [8, 128], strides = [1, 1]} : vector<8x512xf32> to vector<8x128xf32>
    %281 = math.tanh %280 : vector<8x128xf32>
    %282 = vector.extract_strided_slice %266 {offsets = [0, 384], sizes = [8, 128], strides = [1, 1]} : vector<8x512xf32> to vector<8x128xf32>
    %283 = arith.negf %282 : vector<8x128xf32>
    %284 = math.exp %283 : vector<8x128xf32>
    %cst_121 = arith.constant 1.000000e+00 : f32
    %285 = vector.broadcast %cst_121 : f32 to vector<8x128xf32>
    %286 = arith.addf %285, %284 : vector<8x128xf32>
    %287 = arith.divf %285, %286 : vector<8x128xf32>
    %288 = arith.mulf %279, %267 : vector<8x128xf32>
    %289 = arith.mulf %273, %281 : vector<8x128xf32>
    %290 = arith.addf %288, %289 : vector<8x128xf32>
    %291 = math.tanh %290 : vector<8x128xf32>
    %292 = arith.mulf %287, %291 : vector<8x128xf32>
    %c0_122 = arith.constant 0 : index
    %c0_123 = arith.constant 0 : index
    %293 = vector.load %arg7[%c0_122, %c0_123] : memref<8x128xf32, #tpu.memory_space<vmem>>, vector<8x128xf32>
    tpu.vector_store %arg7[%c0_122, %c0_123], %292 {strides = array<i32>} : memref<8x128xf32, #tpu.memory_space<vmem>>, vector<8x128xf32>,
    %c0_124 = arith.constant 0 : index
    %c0_125 = arith.constant 0 : index
    %294 = vector.load %arg8[%c0_124, %c0_125] : memref<8x128xf32, #tpu.memory_space<vmem>>, vector<8x128xf32>
    tpu.vector_store %arg8[%c0_124, %c0_125], %290 {strides = array<i32>} : memref<8x128xf32, #tpu.memory_space<vmem>>, vector<8x128xf32>,
    %295 = arith.truncf %292 : vector<8x128xf32> to vector<8x128xbf16>
    %296 = arith.index_cast %c3_i32 : i32 to index
    %c0_126 = arith.constant 0 : index
    %c0_127 = arith.constant 0 : index
    %297 = vector.load %arg5[%296, %c0_126, %c0_127] : memref<8x8x128xbf16, #tpu.memory_space<vmem>>, vector<1x8x128xbf16>
    %298 = vector.shape_cast %297 : vector<1x8x128xbf16> to vector<8x128xbf16>
    %299 = vector.shape_cast %295 : vector<8x128xbf16> to vector<1x8x128xbf16>
    tpu.vector_store %arg5[%296, %c0_126, %c0_127], %299 {strides = array<i32>} : memref<8x8x128xbf16, #tpu.memory_space<vmem>>, vector<1x8x128xbf16>,
    %c7_i32_128 = arith.constant 7 : i32
    %300 = arith.subi %c7_i32_128, %c3_i32 : i32
    %301 = arith.index_cast %300 : i32 to index
    %c0_129 = arith.constant 0 : index
    %c0_130 = arith.constant 0 : index
    %302 = vector.load %arg2[%301, %c0_129, %c0_130] : memref<8x8x512xbf16, #tpu.memory_space<vmem>>, vector<1x8x512xbf16>
    %303 = vector.shape_cast %302 : vector<1x8x512xbf16> to vector<8x512xbf16>
    %304 = arith.extf %303 : vector<8x512xbf16> to vector<8x512xf32>
    %c0_131 = arith.constant 0 : index
    %c0_132 = arith.constant 0 : index
    %305 = vector.load %arg9[%c0_131, %c0_132] : memref<8x128xf32, #tpu.memory_space<vmem>>, vector<8x128xf32>
    %306 = arith.truncf %305 : vector<8x128xf32> to vector<8x128xbf16>
    %c0_133 = arith.constant 0 : index
    %c0_134 = arith.constant 0 : index
    %307 = vector.load %arg4[%c0_133, %c0_134] : memref<128x512xbf16, #tpu.memory_space<vmem>>, vector<128x512xbf16>
    %cst_135 = arith.constant dense<0.000000e+00> : vector<8x512xf32>
    %308 = tpu.matmul %306, %307, %cst_135 {dimension_numbers = #tpu.dot_dimension_numbers<[1], [0], [0], [1], [0, 0, 1, 1], [], []>} : vector<8x128xbf16>, vector<128x512xbf16>, vector<8x512xf32> -> vector<8x512xf32>
    %309 = arith.addf %304, %308 : vector<8x512xf32>
    %c0_136 = arith.constant 0 : index
    %c0_137 = arith.constant 0 : index
    %310 = vector.load %arg10[%c0_136, %c0_137] : memref<8x128xf32, #tpu.memory_space<vmem>>, vector<8x128xf32>
    %311 = vector.extract_strided_slice %309 {offsets = [0, 0], sizes = [8, 128], strides = [1, 1]} : vector<8x512xf32> to vector<8x128xf32>
    %312 = arith.negf %311 : vector<8x128xf32>
    %313 = math.exp %312 : vector<8x128xf32>
    %cst_138 = arith.constant 1.000000e+00 : f32
    %314 = vector.broadcast %cst_138 : f32 to vector<8x128xf32>
    %315 = arith.addf %314, %313 : vector<8x128xf32>
    %316 = arith.divf %314, %315 : vector<8x128xf32>
    %317 = vector.extract_strided_slice %309 {offsets = [0, 128], sizes = [8, 128], strides = [1, 1]} : vector<8x512xf32> to vector<8x128xf32>
    %318 = arith.negf %317 : vector<8x128xf32>
    %319 = math.exp %318 : vector<8x128xf32>
    %cst_139 = arith.constant 1.000000e+00 : f32
    %320 = vector.broadcast %cst_139 : f32 to vector<8x128xf32>
    %321 = arith.addf %320, %319 : vector<8x128xf32>
    %322 = arith.divf %320, %321 : vector<8x128xf32>
    %323 = vector.extract_strided_slice %309 {offsets = [0, 256], sizes = [8, 128], strides = [1, 1]} : vector<8x512xf32> to vector<8x128xf32>
    %324 = math.tanh %323 : vector<8x128xf32>
    %325 = vector.extract_strided_slice %309 {offsets = [0, 384], sizes = [8, 128], strides = [1, 1]} : vector<8x512xf32> to vector<8x128xf32>
    %326 = arith.negf %325 : vector<8x128xf32>
    %327 = math.exp %326 : vector<8x128xf32>
    %cst_140 = arith.constant 1.000000e+00 : f32
    %328 = vector.broadcast %cst_140 : f32 to vector<8x128xf32>
    %329 = arith.addf %328, %327 : vector<8x128xf32>
    %330 = arith.divf %328, %329 : vector<8x128xf32>
    %331 = arith.mulf %322, %310 : vector<8x128xf32>
    %332 = arith.mulf %316, %324 : vector<8x128xf32>
    %333 = arith.addf %331, %332 : vector<8x128xf32>
    %334 = math.tanh %333 : vector<8x128xf32>
    %335 = arith.mulf %330, %334 : vector<8x128xf32>
    %c0_141 = arith.constant 0 : index
    %c0_142 = arith.constant 0 : index
    %336 = vector.load %arg9[%c0_141, %c0_142] : memref<8x128xf32, #tpu.memory_space<vmem>>, vector<8x128xf32>
    tpu.vector_store %arg9[%c0_141, %c0_142], %335 {strides = array<i32>} : memref<8x128xf32, #tpu.memory_space<vmem>>, vector<8x128xf32>,
    %c0_143 = arith.constant 0 : index
    %c0_144 = arith.constant 0 : index
    %337 = vector.load %arg10[%c0_143, %c0_144] : memref<8x128xf32, #tpu.memory_space<vmem>>, vector<8x128xf32>
    tpu.vector_store %arg10[%c0_143, %c0_144], %333 {strides = array<i32>} : memref<8x128xf32, #tpu.memory_space<vmem>>, vector<8x128xf32>,
    %338 = arith.truncf %335 : vector<8x128xf32> to vector<8x128xbf16>
    %339 = arith.index_cast %300 : i32 to index
    %c0_145 = arith.constant 0 : index
    %c0_146 = arith.constant 0 : index
    %340 = vector.load %arg6[%339, %c0_145, %c0_146] : memref<8x8x128xbf16, #tpu.memory_space<vmem>>, vector<1x8x128xbf16>
    %341 = vector.shape_cast %340 : vector<1x8x128xbf16> to vector<8x128xbf16>
    %342 = vector.shape_cast %338 : vector<8x128xbf16> to vector<1x8x128xbf16>
    tpu.vector_store %arg6[%339, %c0_145, %c0_146], %342 {strides = array<i32>} : memref<8x8x128xbf16, #tpu.memory_space<vmem>>, vector<1x8x128xbf16>,
    %c4_i32 = arith.constant 4 : i32
    %343 = arith.index_cast %c4_i32 : i32 to index
    %c0_147 = arith.constant 0 : index
    %c0_148 = arith.constant 0 : index
    %344 = vector.load %arg1[%343, %c0_147, %c0_148] : memref<8x8x512xbf16, #tpu.memory_space<vmem>>, vector<1x8x512xbf16>
    %345 = vector.shape_cast %344 : vector<1x8x512xbf16> to vector<8x512xbf16>
    %346 = arith.extf %345 : vector<8x512xbf16> to vector<8x512xf32>
    %c0_149 = arith.constant 0 : index
    %c0_150 = arith.constant 0 : index
    %347 = vector.load %arg7[%c0_149, %c0_150] : memref<8x128xf32, #tpu.memory_space<vmem>>, vector<8x128xf32>
    %348 = arith.truncf %347 : vector<8x128xf32> to vector<8x128xbf16>
    %c0_151 = arith.constant 0 : index
    %c0_152 = arith.constant 0 : index
    %349 = vector.load %arg3[%c0_151, %c0_152] : memref<128x512xbf16, #tpu.memory_space<vmem>>, vector<128x512xbf16>
    %cst_153 = arith.constant dense<0.000000e+00> : vector<8x512xf32>
    %350 = tpu.matmul %348, %349, %cst_153 {dimension_numbers = #tpu.dot_dimension_numbers<[1], [0], [0], [1], [0, 0, 1, 1], [], []>} : vector<8x128xbf16>, vector<128x512xbf16>, vector<8x512xf32> -> vector<8x512xf32>
    %351 = arith.addf %346, %350 : vector<8x512xf32>
    %c0_154 = arith.constant 0 : index
    %c0_155 = arith.constant 0 : index
    %352 = vector.load %arg8[%c0_154, %c0_155] : memref<8x128xf32, #tpu.memory_space<vmem>>, vector<8x128xf32>
    %353 = vector.extract_strided_slice %351 {offsets = [0, 0], sizes = [8, 128], strides = [1, 1]} : vector<8x512xf32> to vector<8x128xf32>
    %354 = arith.negf %353 : vector<8x128xf32>
    %355 = math.exp %354 : vector<8x128xf32>
    %cst_156 = arith.constant 1.000000e+00 : f32
    %356 = vector.broadcast %cst_156 : f32 to vector<8x128xf32>
    %357 = arith.addf %356, %355 : vector<8x128xf32>
    %358 = arith.divf %356, %357 : vector<8x128xf32>
    %359 = vector.extract_strided_slice %351 {offsets = [0, 128], sizes = [8, 128], strides = [1, 1]} : vector<8x512xf32> to vector<8x128xf32>
    %360 = arith.negf %359 : vector<8x128xf32>
    %361 = math.exp %360 : vector<8x128xf32>
    %cst_157 = arith.constant 1.000000e+00 : f32
    %362 = vector.broadcast %cst_157 : f32 to vector<8x128xf32>
    %363 = arith.addf %362, %361 : vector<8x128xf32>
    %364 = arith.divf %362, %363 : vector<8x128xf32>
    %365 = vector.extract_strided_slice %351 {offsets = [0, 256], sizes = [8, 128], strides = [1, 1]} : vector<8x512xf32> to vector<8x128xf32>
    %366 = math.tanh %365 : vector<8x128xf32>
    %367 = vector.extract_strided_slice %351 {offsets = [0, 384], sizes = [8, 128], strides = [1, 1]} : vector<8x512xf32> to vector<8x128xf32>
    %368 = arith.negf %367 : vector<8x128xf32>
    %369 = math.exp %368 : vector<8x128xf32>
    %cst_158 = arith.constant 1.000000e+00 : f32
    %370 = vector.broadcast %cst_158 : f32 to vector<8x128xf32>
    %371 = arith.addf %370, %369 : vector<8x128xf32>
    %372 = arith.divf %370, %371 : vector<8x128xf32>
    %373 = arith.mulf %364, %352 : vector<8x128xf32>
    %374 = arith.mulf %358, %366 : vector<8x128xf32>
    %375 = arith.addf %373, %374 : vector<8x128xf32>
    %376 = math.tanh %375 : vector<8x128xf32>
    %377 = arith.mulf %372, %376 : vector<8x128xf32>
    %c0_159 = arith.constant 0 : index
    %c0_160 = arith.constant 0 : index
    %378 = vector.load %arg7[%c0_159, %c0_160] : memref<8x128xf32, #tpu.memory_space<vmem>>, vector<8x128xf32>
    tpu.vector_store %arg7[%c0_159, %c0_160], %377 {strides = array<i32>} : memref<8x128xf32, #tpu.memory_space<vmem>>, vector<8x128xf32>,
    %c0_161 = arith.constant 0 : index
    %c0_162 = arith.constant 0 : index
    %379 = vector.load %arg8[%c0_161, %c0_162] : memref<8x128xf32, #tpu.memory_space<vmem>>, vector<8x128xf32>
    tpu.vector_store %arg8[%c0_161, %c0_162], %375 {strides = array<i32>} : memref<8x128xf32, #tpu.memory_space<vmem>>, vector<8x128xf32>,
    %380 = arith.truncf %377 : vector<8x128xf32> to vector<8x128xbf16>
    %381 = arith.index_cast %c4_i32 : i32 to index
    %c0_163 = arith.constant 0 : index
    %c0_164 = arith.constant 0 : index
    %382 = vector.load %arg5[%381, %c0_163, %c0_164] : memref<8x8x128xbf16, #tpu.memory_space<vmem>>, vector<1x8x128xbf16>
    %383 = vector.shape_cast %382 : vector<1x8x128xbf16> to vector<8x128xbf16>
    %384 = vector.shape_cast %380 : vector<8x128xbf16> to vector<1x8x128xbf16>
    tpu.vector_store %arg5[%381, %c0_163, %c0_164], %384 {strides = array<i32>} : memref<8x8x128xbf16, #tpu.memory_space<vmem>>, vector<1x8x128xbf16>,
    %c7_i32_165 = arith.constant 7 : i32
    %385 = arith.subi %c7_i32_165, %c4_i32 : i32
    %386 = arith.index_cast %385 : i32 to index
    %c0_166 = arith.constant 0 : index
    %c0_167 = arith.constant 0 : index
    %387 = vector.load %arg2[%386, %c0_166, %c0_167] : memref<8x8x512xbf16, #tpu.memory_space<vmem>>, vector<1x8x512xbf16>
    %388 = vector.shape_cast %387 : vector<1x8x512xbf16> to vector<8x512xbf16>
    %389 = arith.extf %388 : vector<8x512xbf16> to vector<8x512xf32>
    %c0_168 = arith.constant 0 : index
    %c0_169 = arith.constant 0 : index
    %390 = vector.load %arg9[%c0_168, %c0_169] : memref<8x128xf32, #tpu.memory_space<vmem>>, vector<8x128xf32>
    %391 = arith.truncf %390 : vector<8x128xf32> to vector<8x128xbf16>
    %c0_170 = arith.constant 0 : index
    %c0_171 = arith.constant 0 : index
    %392 = vector.load %arg4[%c0_170, %c0_171] : memref<128x512xbf16, #tpu.memory_space<vmem>>, vector<128x512xbf16>
    %cst_172 = arith.constant dense<0.000000e+00> : vector<8x512xf32>
    %393 = tpu.matmul %391, %392, %cst_172 {dimension_numbers = #tpu.dot_dimension_numbers<[1], [0], [0], [1], [0, 0, 1, 1], [], []>} : vector<8x128xbf16>, vector<128x512xbf16>, vector<8x512xf32> -> vector<8x512xf32>
    %394 = arith.addf %389, %393 : vector<8x512xf32>
    %c0_173 = arith.constant 0 : index
    %c0_174 = arith.constant 0 : index
    %395 = vector.load %arg10[%c0_173, %c0_174] : memref<8x128xf32, #tpu.memory_space<vmem>>, vector<8x128xf32>
    %396 = vector.extract_strided_slice %394 {offsets = [0, 0], sizes = [8, 128], strides = [1, 1]} : vector<8x512xf32> to vector<8x128xf32>
    %397 = arith.negf %396 : vector<8x128xf32>
    %398 = math.exp %397 : vector<8x128xf32>
    %cst_175 = arith.constant 1.000000e+00 : f32
    %399 = vector.broadcast %cst_175 : f32 to vector<8x128xf32>
    %400 = arith.addf %399, %398 : vector<8x128xf32>
    %401 = arith.divf %399, %400 : vector<8x128xf32>
    %402 = vector.extract_strided_slice %394 {offsets = [0, 128], sizes = [8, 128], strides = [1, 1]} : vector<8x512xf32> to vector<8x128xf32>
    %403 = arith.negf %402 : vector<8x128xf32>
    %404 = math.exp %403 : vector<8x128xf32>
    %cst_176 = arith.constant 1.000000e+00 : f32
    %405 = vector.broadcast %cst_176 : f32 to vector<8x128xf32>
    %406 = arith.addf %405, %404 : vector<8x128xf32>
    %407 = arith.divf %405, %406 : vector<8x128xf32>
    %408 = vector.extract_strided_slice %394 {offsets = [0, 256], sizes = [8, 128], strides = [1, 1]} : vector<8x512xf32> to vector<8x128xf32>
    %409 = math.tanh %408 : vector<8x128xf32>
    %410 = vector.extract_strided_slice %394 {offsets = [0, 384], sizes = [8, 128], strides = [1, 1]} : vector<8x512xf32> to vector<8x128xf32>
    %411 = arith.negf %410 : vector<8x128xf32>
    %412 = math.exp %411 : vector<8x128xf32>
    %cst_177 = arith.constant 1.000000e+00 : f32
    %413 = vector.broadcast %cst_177 : f32 to vector<8x128xf32>
    %414 = arith.addf %413, %412 : vector<8x128xf32>
    %415 = arith.divf %413, %414 : vector<8x128xf32>
    %416 = arith.mulf %407, %395 : vector<8x128xf32>
    %417 = arith.mulf %401, %409 : vector<8x128xf32>
    %418 = arith.addf %416, %417 : vector<8x128xf32>
    %419 = math.tanh %418 : vector<8x128xf32>
    %420 = arith.mulf %415, %419 : vector<8x128xf32>
    %c0_178 = arith.constant 0 : index
    %c0_179 = arith.constant 0 : index
    %421 = vector.load %arg9[%c0_178, %c0_179] : memref<8x128xf32, #tpu.memory_space<vmem>>, vector<8x128xf32>
    tpu.vector_store %arg9[%c0_178, %c0_179], %420 {strides = array<i32>} : memref<8x128xf32, #tpu.memory_space<vmem>>, vector<8x128xf32>,
    %c0_180 = arith.constant 0 : index
    %c0_181 = arith.constant 0 : index
    %422 = vector.load %arg10[%c0_180, %c0_181] : memref<8x128xf32, #tpu.memory_space<vmem>>, vector<8x128xf32>
    tpu.vector_store %arg10[%c0_180, %c0_181], %418 {strides = array<i32>} : memref<8x128xf32, #tpu.memory_space<vmem>>, vector<8x128xf32>,
    %423 = arith.truncf %420 : vector<8x128xf32> to vector<8x128xbf16>
    %424 = arith.index_cast %385 : i32 to index
    %c0_182 = arith.constant 0 : index
    %c0_183 = arith.constant 0 : index
    %425 = vector.load %arg6[%424, %c0_182, %c0_183] : memref<8x8x128xbf16, #tpu.memory_space<vmem>>, vector<1x8x128xbf16>
    %426 = vector.shape_cast %425 : vector<1x8x128xbf16> to vector<8x128xbf16>
    %427 = vector.shape_cast %423 : vector<8x128xbf16> to vector<1x8x128xbf16>
    tpu.vector_store %arg6[%424, %c0_182, %c0_183], %427 {strides = array<i32>} : memref<8x8x128xbf16, #tpu.memory_space<vmem>>, vector<1x8x128xbf16>,
    %c5_i32 = arith.constant 5 : i32
    %428 = arith.index_cast %c5_i32 : i32 to index
    %c0_184 = arith.constant 0 : index
    %c0_185 = arith.constant 0 : index
    %429 = vector.load %arg1[%428, %c0_184, %c0_185] : memref<8x8x512xbf16, #tpu.memory_space<vmem>>, vector<1x8x512xbf16>
    %430 = vector.shape_cast %429 : vector<1x8x512xbf16> to vector<8x512xbf16>
    %431 = arith.extf %430 : vector<8x512xbf16> to vector<8x512xf32>
    %c0_186 = arith.constant 0 : index
    %c0_187 = arith.constant 0 : index
    %432 = vector.load %arg7[%c0_186, %c0_187] : memref<8x128xf32, #tpu.memory_space<vmem>>, vector<8x128xf32>
    %433 = arith.truncf %432 : vector<8x128xf32> to vector<8x128xbf16>
    %c0_188 = arith.constant 0 : index
    %c0_189 = arith.constant 0 : index
    %434 = vector.load %arg3[%c0_188, %c0_189] : memref<128x512xbf16, #tpu.memory_space<vmem>>, vector<128x512xbf16>
    %cst_190 = arith.constant dense<0.000000e+00> : vector<8x512xf32>
    %435 = tpu.matmul %433, %434, %cst_190 {dimension_numbers = #tpu.dot_dimension_numbers<[1], [0], [0], [1], [0, 0, 1, 1], [], []>} : vector<8x128xbf16>, vector<128x512xbf16>, vector<8x512xf32> -> vector<8x512xf32>
    %436 = arith.addf %431, %435 : vector<8x512xf32>
    %c0_191 = arith.constant 0 : index
    %c0_192 = arith.constant 0 : index
    %437 = vector.load %arg8[%c0_191, %c0_192] : memref<8x128xf32, #tpu.memory_space<vmem>>, vector<8x128xf32>
    %438 = vector.extract_strided_slice %436 {offsets = [0, 0], sizes = [8, 128], strides = [1, 1]} : vector<8x512xf32> to vector<8x128xf32>
    %439 = arith.negf %438 : vector<8x128xf32>
    %440 = math.exp %439 : vector<8x128xf32>
    %cst_193 = arith.constant 1.000000e+00 : f32
    %441 = vector.broadcast %cst_193 : f32 to vector<8x128xf32>
    %442 = arith.addf %441, %440 : vector<8x128xf32>
    %443 = arith.divf %441, %442 : vector<8x128xf32>
    %444 = vector.extract_strided_slice %436 {offsets = [0, 128], sizes = [8, 128], strides = [1, 1]} : vector<8x512xf32> to vector<8x128xf32>
    %445 = arith.negf %444 : vector<8x128xf32>
    %446 = math.exp %445 : vector<8x128xf32>
    %cst_194 = arith.constant 1.000000e+00 : f32
    %447 = vector.broadcast %cst_194 : f32 to vector<8x128xf32>
    %448 = arith.addf %447, %446 : vector<8x128xf32>
    %449 = arith.divf %447, %448 : vector<8x128xf32>
    %450 = vector.extract_strided_slice %436 {offsets = [0, 256], sizes = [8, 128], strides = [1, 1]} : vector<8x512xf32> to vector<8x128xf32>
    %451 = math.tanh %450 : vector<8x128xf32>
    %452 = vector.extract_strided_slice %436 {offsets = [0, 384], sizes = [8, 128], strides = [1, 1]} : vector<8x512xf32> to vector<8x128xf32>
    %453 = arith.negf %452 : vector<8x128xf32>
    %454 = math.exp %453 : vector<8x128xf32>
    %cst_195 = arith.constant 1.000000e+00 : f32
    %455 = vector.broadcast %cst_195 : f32 to vector<8x128xf32>
    %456 = arith.addf %455, %454 : vector<8x128xf32>
    %457 = arith.divf %455, %456 : vector<8x128xf32>
    %458 = arith.mulf %449, %437 : vector<8x128xf32>
    %459 = arith.mulf %443, %451 : vector<8x128xf32>
    %460 = arith.addf %458, %459 : vector<8x128xf32>
    %461 = math.tanh %460 : vector<8x128xf32>
    %462 = arith.mulf %457, %461 : vector<8x128xf32>
    %c0_196 = arith.constant 0 : index
    %c0_197 = arith.constant 0 : index
    %463 = vector.load %arg7[%c0_196, %c0_197] : memref<8x128xf32, #tpu.memory_space<vmem>>, vector<8x128xf32>
    tpu.vector_store %arg7[%c0_196, %c0_197], %462 {strides = array<i32>} : memref<8x128xf32, #tpu.memory_space<vmem>>, vector<8x128xf32>,
    %c0_198 = arith.constant 0 : index
    %c0_199 = arith.constant 0 : index
    %464 = vector.load %arg8[%c0_198, %c0_199] : memref<8x128xf32, #tpu.memory_space<vmem>>, vector<8x128xf32>
    tpu.vector_store %arg8[%c0_198, %c0_199], %460 {strides = array<i32>} : memref<8x128xf32, #tpu.memory_space<vmem>>, vector<8x128xf32>,
    %465 = arith.truncf %462 : vector<8x128xf32> to vector<8x128xbf16>
    %466 = arith.index_cast %c5_i32 : i32 to index
    %c0_200 = arith.constant 0 : index
    %c0_201 = arith.constant 0 : index
    %467 = vector.load %arg5[%466, %c0_200, %c0_201] : memref<8x8x128xbf16, #tpu.memory_space<vmem>>, vector<1x8x128xbf16>
    %468 = vector.shape_cast %467 : vector<1x8x128xbf16> to vector<8x128xbf16>
    %469 = vector.shape_cast %465 : vector<8x128xbf16> to vector<1x8x128xbf16>
    tpu.vector_store %arg5[%466, %c0_200, %c0_201], %469 {strides = array<i32>} : memref<8x8x128xbf16, #tpu.memory_space<vmem>>, vector<1x8x128xbf16>,
    %c7_i32_202 = arith.constant 7 : i32
    %470 = arith.subi %c7_i32_202, %c5_i32 : i32
    %471 = arith.index_cast %470 : i32 to index
    %c0_203 = arith.constant 0 : index
    %c0_204 = arith.constant 0 : index
    %472 = vector.load %arg2[%471, %c0_203, %c0_204] : memref<8x8x512xbf16, #tpu.memory_space<vmem>>, vector<1x8x512xbf16>
    %473 = vector.shape_cast %472 : vector<1x8x512xbf16> to vector<8x512xbf16>
    %474 = arith.extf %473 : vector<8x512xbf16> to vector<8x512xf32>
    %c0_205 = arith.constant 0 : index
    %c0_206 = arith.constant 0 : index
    %475 = vector.load %arg9[%c0_205, %c0_206] : memref<8x128xf32, #tpu.memory_space<vmem>>, vector<8x128xf32>
    %476 = arith.truncf %475 : vector<8x128xf32> to vector<8x128xbf16>
    %c0_207 = arith.constant 0 : index
    %c0_208 = arith.constant 0 : index
    %477 = vector.load %arg4[%c0_207, %c0_208] : memref<128x512xbf16, #tpu.memory_space<vmem>>, vector<128x512xbf16>
    %cst_209 = arith.constant dense<0.000000e+00> : vector<8x512xf32>
    %478 = tpu.matmul %476, %477, %cst_209 {dimension_numbers = #tpu.dot_dimension_numbers<[1], [0], [0], [1], [0, 0, 1, 1], [], []>} : vector<8x128xbf16>, vector<128x512xbf16>, vector<8x512xf32> -> vector<8x512xf32>
    %479 = arith.addf %474, %478 : vector<8x512xf32>
    %c0_210 = arith.constant 0 : index
    %c0_211 = arith.constant 0 : index
    %480 = vector.load %arg10[%c0_210, %c0_211] : memref<8x128xf32, #tpu.memory_space<vmem>>, vector<8x128xf32>
    %481 = vector.extract_strided_slice %479 {offsets = [0, 0], sizes = [8, 128], strides = [1, 1]} : vector<8x512xf32> to vector<8x128xf32>
    %482 = arith.negf %481 : vector<8x128xf32>
    %483 = math.exp %482 : vector<8x128xf32>
    %cst_212 = arith.constant 1.000000e+00 : f32
    %484 = vector.broadcast %cst_212 : f32 to vector<8x128xf32>
    %485 = arith.addf %484, %483 : vector<8x128xf32>
    %486 = arith.divf %484, %485 : vector<8x128xf32>
    %487 = vector.extract_strided_slice %479 {offsets = [0, 128], sizes = [8, 128], strides = [1, 1]} : vector<8x512xf32> to vector<8x128xf32>
    %488 = arith.negf %487 : vector<8x128xf32>
    %489 = math.exp %488 : vector<8x128xf32>
    %cst_213 = arith.constant 1.000000e+00 : f32
    %490 = vector.broadcast %cst_213 : f32 to vector<8x128xf32>
    %491 = arith.addf %490, %489 : vector<8x128xf32>
    %492 = arith.divf %490, %491 : vector<8x128xf32>
    %493 = vector.extract_strided_slice %479 {offsets = [0, 256], sizes = [8, 128], strides = [1, 1]} : vector<8x512xf32> to vector<8x128xf32>
    %494 = math.tanh %493 : vector<8x128xf32>
    %495 = vector.extract_strided_slice %479 {offsets = [0, 384], sizes = [8, 128], strides = [1, 1]} : vector<8x512xf32> to vector<8x128xf32>
    %496 = arith.negf %495 : vector<8x128xf32>
    %497 = math.exp %496 : vector<8x128xf32>
    %cst_214 = arith.constant 1.000000e+00 : f32
    %498 = vector.broadcast %cst_214 : f32 to vector<8x128xf32>
    %499 = arith.addf %498, %497 : vector<8x128xf32>
    %500 = arith.divf %498, %499 : vector<8x128xf32>
    %501 = arith.mulf %492, %480 : vector<8x128xf32>
    %502 = arith.mulf %486, %494 : vector<8x128xf32>
    %503 = arith.addf %501, %502 : vector<8x128xf32>
    %504 = math.tanh %503 : vector<8x128xf32>
    %505 = arith.mulf %500, %504 : vector<8x128xf32>
    %c0_215 = arith.constant 0 : index
    %c0_216 = arith.constant 0 : index
    %506 = vector.load %arg9[%c0_215, %c0_216] : memref<8x128xf32, #tpu.memory_space<vmem>>, vector<8x128xf32>
    tpu.vector_store %arg9[%c0_215, %c0_216], %505 {strides = array<i32>} : memref<8x128xf32, #tpu.memory_space<vmem>>, vector<8x128xf32>,
    %c0_217 = arith.constant 0 : index
    %c0_218 = arith.constant 0 : index
    %507 = vector.load %arg10[%c0_217, %c0_218] : memref<8x128xf32, #tpu.memory_space<vmem>>, vector<8x128xf32>
    tpu.vector_store %arg10[%c0_217, %c0_218], %503 {strides = array<i32>} : memref<8x128xf32, #tpu.memory_space<vmem>>, vector<8x128xf32>,
    %508 = arith.truncf %505 : vector<8x128xf32> to vector<8x128xbf16>
    %509 = arith.index_cast %470 : i32 to index
    %c0_219 = arith.constant 0 : index
    %c0_220 = arith.constant 0 : index
    %510 = vector.load %arg6[%509, %c0_219, %c0_220] : memref<8x8x128xbf16, #tpu.memory_space<vmem>>, vector<1x8x128xbf16>
    %511 = vector.shape_cast %510 : vector<1x8x128xbf16> to vector<8x128xbf16>
    %512 = vector.shape_cast %508 : vector<8x128xbf16> to vector<1x8x128xbf16>
    tpu.vector_store %arg6[%509, %c0_219, %c0_220], %512 {strides = array<i32>} : memref<8x8x128xbf16, #tpu.memory_space<vmem>>, vector<1x8x128xbf16>,
    %c6_i32 = arith.constant 6 : i32
    %513 = arith.index_cast %c6_i32 : i32 to index
    %c0_221 = arith.constant 0 : index
    %c0_222 = arith.constant 0 : index
    %514 = vector.load %arg1[%513, %c0_221, %c0_222] : memref<8x8x512xbf16, #tpu.memory_space<vmem>>, vector<1x8x512xbf16>
    %515 = vector.shape_cast %514 : vector<1x8x512xbf16> to vector<8x512xbf16>
    %516 = arith.extf %515 : vector<8x512xbf16> to vector<8x512xf32>
    %c0_223 = arith.constant 0 : index
    %c0_224 = arith.constant 0 : index
    %517 = vector.load %arg7[%c0_223, %c0_224] : memref<8x128xf32, #tpu.memory_space<vmem>>, vector<8x128xf32>
    %518 = arith.truncf %517 : vector<8x128xf32> to vector<8x128xbf16>
    %c0_225 = arith.constant 0 : index
    %c0_226 = arith.constant 0 : index
    %519 = vector.load %arg3[%c0_225, %c0_226] : memref<128x512xbf16, #tpu.memory_space<vmem>>, vector<128x512xbf16>
    %cst_227 = arith.constant dense<0.000000e+00> : vector<8x512xf32>
    %520 = tpu.matmul %518, %519, %cst_227 {dimension_numbers = #tpu.dot_dimension_numbers<[1], [0], [0], [1], [0, 0, 1, 1], [], []>} : vector<8x128xbf16>, vector<128x512xbf16>, vector<8x512xf32> -> vector<8x512xf32>
    %521 = arith.addf %516, %520 : vector<8x512xf32>
    %c0_228 = arith.constant 0 : index
    %c0_229 = arith.constant 0 : index
    %522 = vector.load %arg8[%c0_228, %c0_229] : memref<8x128xf32, #tpu.memory_space<vmem>>, vector<8x128xf32>
    %523 = vector.extract_strided_slice %521 {offsets = [0, 0], sizes = [8, 128], strides = [1, 1]} : vector<8x512xf32> to vector<8x128xf32>
    %524 = arith.negf %523 : vector<8x128xf32>
    %525 = math.exp %524 : vector<8x128xf32>
    %cst_230 = arith.constant 1.000000e+00 : f32
    %526 = vector.broadcast %cst_230 : f32 to vector<8x128xf32>
    %527 = arith.addf %526, %525 : vector<8x128xf32>
    %528 = arith.divf %526, %527 : vector<8x128xf32>
    %529 = vector.extract_strided_slice %521 {offsets = [0, 128], sizes = [8, 128], strides = [1, 1]} : vector<8x512xf32> to vector<8x128xf32>
    %530 = arith.negf %529 : vector<8x128xf32>
    %531 = math.exp %530 : vector<8x128xf32>
    %cst_231 = arith.constant 1.000000e+00 : f32
    %532 = vector.broadcast %cst_231 : f32 to vector<8x128xf32>
    %533 = arith.addf %532, %531 : vector<8x128xf32>
    %534 = arith.divf %532, %533 : vector<8x128xf32>
    %535 = vector.extract_strided_slice %521 {offsets = [0, 256], sizes = [8, 128], strides = [1, 1]} : vector<8x512xf32> to vector<8x128xf32>
    %536 = math.tanh %535 : vector<8x128xf32>
    %537 = vector.extract_strided_slice %521 {offsets = [0, 384], sizes = [8, 128], strides = [1, 1]} : vector<8x512xf32> to vector<8x128xf32>
    %538 = arith.negf %537 : vector<8x128xf32>
    %539 = math.exp %538 : vector<8x128xf32>
    %cst_232 = arith.constant 1.000000e+00 : f32
    %540 = vector.broadcast %cst_232 : f32 to vector<8x128xf32>
    %541 = arith.addf %540, %539 : vector<8x128xf32>
    %542 = arith.divf %540, %541 : vector<8x128xf32>
    %543 = arith.mulf %534, %522 : vector<8x128xf32>
    %544 = arith.mulf %528, %536 : vector<8x128xf32>
    %545 = arith.addf %543, %544 : vector<8x128xf32>
    %546 = math.tanh %545 : vector<8x128xf32>
    %547 = arith.mulf %542, %546 : vector<8x128xf32>
    %c0_233 = arith.constant 0 : index
    %c0_234 = arith.constant 0 : index
    %548 = vector.load %arg7[%c0_233, %c0_234] : memref<8x128xf32, #tpu.memory_space<vmem>>, vector<8x128xf32>
    tpu.vector_store %arg7[%c0_233, %c0_234], %547 {strides = array<i32>} : memref<8x128xf32, #tpu.memory_space<vmem>>, vector<8x128xf32>,
    %c0_235 = arith.constant 0 : index
    %c0_236 = arith.constant 0 : index
    %549 = vector.load %arg8[%c0_235, %c0_236] : memref<8x128xf32, #tpu.memory_space<vmem>>, vector<8x128xf32>
    tpu.vector_store %arg8[%c0_235, %c0_236], %545 {strides = array<i32>} : memref<8x128xf32, #tpu.memory_space<vmem>>, vector<8x128xf32>,
    %550 = arith.truncf %547 : vector<8x128xf32> to vector<8x128xbf16>
    %551 = arith.index_cast %c6_i32 : i32 to index
    %c0_237 = arith.constant 0 : index
    %c0_238 = arith.constant 0 : index
    %552 = vector.load %arg5[%551, %c0_237, %c0_238] : memref<8x8x128xbf16, #tpu.memory_space<vmem>>, vector<1x8x128xbf16>
    %553 = vector.shape_cast %552 : vector<1x8x128xbf16> to vector<8x128xbf16>
    %554 = vector.shape_cast %550 : vector<8x128xbf16> to vector<1x8x128xbf16>
    tpu.vector_store %arg5[%551, %c0_237, %c0_238], %554 {strides = array<i32>} : memref<8x8x128xbf16, #tpu.memory_space<vmem>>, vector<1x8x128xbf16>,
    %c7_i32_239 = arith.constant 7 : i32
    %555 = arith.subi %c7_i32_239, %c6_i32 : i32
    %556 = arith.index_cast %555 : i32 to index
    %c0_240 = arith.constant 0 : index
    %c0_241 = arith.constant 0 : index
    %557 = vector.load %arg2[%556, %c0_240, %c0_241] : memref<8x8x512xbf16, #tpu.memory_space<vmem>>, vector<1x8x512xbf16>
    %558 = vector.shape_cast %557 : vector<1x8x512xbf16> to vector<8x512xbf16>
    %559 = arith.extf %558 : vector<8x512xbf16> to vector<8x512xf32>
    %c0_242 = arith.constant 0 : index
    %c0_243 = arith.constant 0 : index
    %560 = vector.load %arg9[%c0_242, %c0_243] : memref<8x128xf32, #tpu.memory_space<vmem>>, vector<8x128xf32>
    %561 = arith.truncf %560 : vector<8x128xf32> to vector<8x128xbf16>
    %c0_244 = arith.constant 0 : index
    %c0_245 = arith.constant 0 : index
    %562 = vector.load %arg4[%c0_244, %c0_245] : memref<128x512xbf16, #tpu.memory_space<vmem>>, vector<128x512xbf16>
    %cst_246 = arith.constant dense<0.000000e+00> : vector<8x512xf32>
    %563 = tpu.matmul %561, %562, %cst_246 {dimension_numbers = #tpu.dot_dimension_numbers<[1], [0], [0], [1], [0, 0, 1, 1], [], []>} : vector<8x128xbf16>, vector<128x512xbf16>, vector<8x512xf32> -> vector<8x512xf32>
    %564 = arith.addf %559, %563 : vector<8x512xf32>
    %c0_247 = arith.constant 0 : index
    %c0_248 = arith.constant 0 : index
    %565 = vector.load %arg10[%c0_247, %c0_248] : memref<8x128xf32, #tpu.memory_space<vmem>>, vector<8x128xf32>
    %566 = vector.extract_strided_slice %564 {offsets = [0, 0], sizes = [8, 128], strides = [1, 1]} : vector<8x512xf32> to vector<8x128xf32>
    %567 = arith.negf %566 : vector<8x128xf32>
    %568 = math.exp %567 : vector<8x128xf32>
    %cst_249 = arith.constant 1.000000e+00 : f32
    %569 = vector.broadcast %cst_249 : f32 to vector<8x128xf32>
    %570 = arith.addf %569, %568 : vector<8x128xf32>
    %571 = arith.divf %569, %570 : vector<8x128xf32>
    %572 = vector.extract_strided_slice %564 {offsets = [0, 128], sizes = [8, 128], strides = [1, 1]} : vector<8x512xf32> to vector<8x128xf32>
    %573 = arith.negf %572 : vector<8x128xf32>
    %574 = math.exp %573 : vector<8x128xf32>
    %cst_250 = arith.constant 1.000000e+00 : f32
    %575 = vector.broadcast %cst_250 : f32 to vector<8x128xf32>
    %576 = arith.addf %575, %574 : vector<8x128xf32>
    %577 = arith.divf %575, %576 : vector<8x128xf32>
    %578 = vector.extract_strided_slice %564 {offsets = [0, 256], sizes = [8, 128], strides = [1, 1]} : vector<8x512xf32> to vector<8x128xf32>
    %579 = math.tanh %578 : vector<8x128xf32>
    %580 = vector.extract_strided_slice %564 {offsets = [0, 384], sizes = [8, 128], strides = [1, 1]} : vector<8x512xf32> to vector<8x128xf32>
    %581 = arith.negf %580 : vector<8x128xf32>
    %582 = math.exp %581 : vector<8x128xf32>
    %cst_251 = arith.constant 1.000000e+00 : f32
    %583 = vector.broadcast %cst_251 : f32 to vector<8x128xf32>
    %584 = arith.addf %583, %582 : vector<8x128xf32>
    %585 = arith.divf %583, %584 : vector<8x128xf32>
    %586 = arith.mulf %577, %565 : vector<8x128xf32>
    %587 = arith.mulf %571, %579 : vector<8x128xf32>
    %588 = arith.addf %586, %587 : vector<8x128xf32>
    %589 = math.tanh %588 : vector<8x128xf32>
    %590 = arith.mulf %585, %589 : vector<8x128xf32>
    %c0_252 = arith.constant 0 : index
    %c0_253 = arith.constant 0 : index
    %591 = vector.load %arg9[%c0_252, %c0_253] : memref<8x128xf32, #tpu.memory_space<vmem>>, vector<8x128xf32>
    tpu.vector_store %arg9[%c0_252, %c0_253], %590 {strides = array<i32>} : memref<8x128xf32, #tpu.memory_space<vmem>>, vector<8x128xf32>,
    %c0_254 = arith.constant 0 : index
    %c0_255 = arith.constant 0 : index
    %592 = vector.load %arg10[%c0_254, %c0_255] : memref<8x128xf32, #tpu.memory_space<vmem>>, vector<8x128xf32>
    tpu.vector_store %arg10[%c0_254, %c0_255], %588 {strides = array<i32>} : memref<8x128xf32, #tpu.memory_space<vmem>>, vector<8x128xf32>,
    %593 = arith.truncf %590 : vector<8x128xf32> to vector<8x128xbf16>
    %594 = arith.index_cast %555 : i32 to index
    %c0_256 = arith.constant 0 : index
    %c0_257 = arith.constant 0 : index
    %595 = vector.load %arg6[%594, %c0_256, %c0_257] : memref<8x8x128xbf16, #tpu.memory_space<vmem>>, vector<1x8x128xbf16>
    %596 = vector.shape_cast %595 : vector<1x8x128xbf16> to vector<8x128xbf16>
    %597 = vector.shape_cast %593 : vector<8x128xbf16> to vector<1x8x128xbf16>
    tpu.vector_store %arg6[%594, %c0_256, %c0_257], %597 {strides = array<i32>} : memref<8x8x128xbf16, #tpu.memory_space<vmem>>, vector<1x8x128xbf16>,
    %c7_i32_258 = arith.constant 7 : i32
    %598 = arith.index_cast %c7_i32_258 : i32 to index
    %c0_259 = arith.constant 0 : index
    %c0_260 = arith.constant 0 : index
    %599 = vector.load %arg1[%598, %c0_259, %c0_260] : memref<8x8x512xbf16, #tpu.memory_space<vmem>>, vector<1x8x512xbf16>
    %600 = vector.shape_cast %599 : vector<1x8x512xbf16> to vector<8x512xbf16>
    %601 = arith.extf %600 : vector<8x512xbf16> to vector<8x512xf32>
    %c0_261 = arith.constant 0 : index
    %c0_262 = arith.constant 0 : index
    %602 = vector.load %arg7[%c0_261, %c0_262] : memref<8x128xf32, #tpu.memory_space<vmem>>, vector<8x128xf32>
    %603 = arith.truncf %602 : vector<8x128xf32> to vector<8x128xbf16>
    %c0_263 = arith.constant 0 : index
    %c0_264 = arith.constant 0 : index
    %604 = vector.load %arg3[%c0_263, %c0_264] : memref<128x512xbf16, #tpu.memory_space<vmem>>, vector<128x512xbf16>
    %cst_265 = arith.constant dense<0.000000e+00> : vector<8x512xf32>
    %605 = tpu.matmul %603, %604, %cst_265 {dimension_numbers = #tpu.dot_dimension_numbers<[1], [0], [0], [1], [0, 0, 1, 1], [], []>} : vector<8x128xbf16>, vector<128x512xbf16>, vector<8x512xf32> -> vector<8x512xf32>
    %606 = arith.addf %601, %605 : vector<8x512xf32>
    %c0_266 = arith.constant 0 : index
    %c0_267 = arith.constant 0 : index
    %607 = vector.load %arg8[%c0_266, %c0_267] : memref<8x128xf32, #tpu.memory_space<vmem>>, vector<8x128xf32>
    %608 = vector.extract_strided_slice %606 {offsets = [0, 0], sizes = [8, 128], strides = [1, 1]} : vector<8x512xf32> to vector<8x128xf32>
    %609 = arith.negf %608 : vector<8x128xf32>
    %610 = math.exp %609 : vector<8x128xf32>
    %cst_268 = arith.constant 1.000000e+00 : f32
    %611 = vector.broadcast %cst_268 : f32 to vector<8x128xf32>
    %612 = arith.addf %611, %610 : vector<8x128xf32>
    %613 = arith.divf %611, %612 : vector<8x128xf32>
    %614 = vector.extract_strided_slice %606 {offsets = [0, 128], sizes = [8, 128], strides = [1, 1]} : vector<8x512xf32> to vector<8x128xf32>
    %615 = arith.negf %614 : vector<8x128xf32>
    %616 = math.exp %615 : vector<8x128xf32>
    %cst_269 = arith.constant 1.000000e+00 : f32
    %617 = vector.broadcast %cst_269 : f32 to vector<8x128xf32>
    %618 = arith.addf %617, %616 : vector<8x128xf32>
    %619 = arith.divf %617, %618 : vector<8x128xf32>
    %620 = vector.extract_strided_slice %606 {offsets = [0, 256], sizes = [8, 128], strides = [1, 1]} : vector<8x512xf32> to vector<8x128xf32>
    %621 = math.tanh %620 : vector<8x128xf32>
    %622 = vector.extract_strided_slice %606 {offsets = [0, 384], sizes = [8, 128], strides = [1, 1]} : vector<8x512xf32> to vector<8x128xf32>
    %623 = arith.negf %622 : vector<8x128xf32>
    %624 = math.exp %623 : vector<8x128xf32>
    %cst_270 = arith.constant 1.000000e+00 : f32
    %625 = vector.broadcast %cst_270 : f32 to vector<8x128xf32>
    %626 = arith.addf %625, %624 : vector<8x128xf32>
    %627 = arith.divf %625, %626 : vector<8x128xf32>
    %628 = arith.mulf %619, %607 : vector<8x128xf32>
    %629 = arith.mulf %613, %621 : vector<8x128xf32>
    %630 = arith.addf %628, %629 : vector<8x128xf32>
    %631 = math.tanh %630 : vector<8x128xf32>
    %632 = arith.mulf %627, %631 : vector<8x128xf32>
    %c0_271 = arith.constant 0 : index
    %c0_272 = arith.constant 0 : index
    %633 = vector.load %arg7[%c0_271, %c0_272] : memref<8x128xf32, #tpu.memory_space<vmem>>, vector<8x128xf32>
    tpu.vector_store %arg7[%c0_271, %c0_272], %632 {strides = array<i32>} : memref<8x128xf32, #tpu.memory_space<vmem>>, vector<8x128xf32>,
    %c0_273 = arith.constant 0 : index
    %c0_274 = arith.constant 0 : index
    %634 = vector.load %arg8[%c0_273, %c0_274] : memref<8x128xf32, #tpu.memory_space<vmem>>, vector<8x128xf32>
    tpu.vector_store %arg8[%c0_273, %c0_274], %630 {strides = array<i32>} : memref<8x128xf32, #tpu.memory_space<vmem>>, vector<8x128xf32>,
    %635 = arith.truncf %632 : vector<8x128xf32> to vector<8x128xbf16>
    %636 = arith.index_cast %c7_i32_258 : i32 to index
    %c0_275 = arith.constant 0 : index
    %c0_276 = arith.constant 0 : index
    %637 = vector.load %arg5[%636, %c0_275, %c0_276] : memref<8x8x128xbf16, #tpu.memory_space<vmem>>, vector<1x8x128xbf16>
    %638 = vector.shape_cast %637 : vector<1x8x128xbf16> to vector<8x128xbf16>
    %639 = vector.shape_cast %635 : vector<8x128xbf16> to vector<1x8x128xbf16>
    tpu.vector_store %arg5[%636, %c0_275, %c0_276], %639 {strides = array<i32>} : memref<8x8x128xbf16, #tpu.memory_space<vmem>>, vector<1x8x128xbf16>,
    %c7_i32_277 = arith.constant 7 : i32
    %640 = arith.subi %c7_i32_277, %c7_i32_258 : i32
    %641 = arith.index_cast %640 : i32 to index
    %c0_278 = arith.constant 0 : index
    %c0_279 = arith.constant 0 : index
    %642 = vector.load %arg2[%641, %c0_278, %c0_279] : memref<8x8x512xbf16, #tpu.memory_space<vmem>>, vector<1x8x512xbf16>
    %643 = vector.shape_cast %642 : vector<1x8x512xbf16> to vector<8x512xbf16>
    %644 = arith.extf %643 : vector<8x512xbf16> to vector<8x512xf32>
    %c0_280 = arith.constant 0 : index
    %c0_281 = arith.constant 0 : index
    %645 = vector.load %arg9[%c0_280, %c0_281] : memref<8x128xf32, #tpu.memory_space<vmem>>, vector<8x128xf32>
    %646 = arith.truncf %645 : vector<8x128xf32> to vector<8x128xbf16>
    %c0_282 = arith.constant 0 : index
    %c0_283 = arith.constant 0 : index
    %647 = vector.load %arg4[%c0_282, %c0_283] : memref<128x512xbf16, #tpu.memory_space<vmem>>, vector<128x512xbf16>
    %cst_284 = arith.constant dense<0.000000e+00> : vector<8x512xf32>
    %648 = tpu.matmul %646, %647, %cst_284 {dimension_numbers = #tpu.dot_dimension_numbers<[1], [0], [0], [1], [0, 0, 1, 1], [], []>} : vector<8x128xbf16>, vector<128x512xbf16>, vector<8x512xf32> -> vector<8x512xf32>
    %649 = arith.addf %644, %648 : vector<8x512xf32>
    %c0_285 = arith.constant 0 : index
    %c0_286 = arith.constant 0 : index
    %650 = vector.load %arg10[%c0_285, %c0_286] : memref<8x128xf32, #tpu.memory_space<vmem>>, vector<8x128xf32>
    %651 = vector.extract_strided_slice %649 {offsets = [0, 0], sizes = [8, 128], strides = [1, 1]} : vector<8x512xf32> to vector<8x128xf32>
    %652 = arith.negf %651 : vector<8x128xf32>
    %653 = math.exp %652 : vector<8x128xf32>
    %cst_287 = arith.constant 1.000000e+00 : f32
    %654 = vector.broadcast %cst_287 : f32 to vector<8x128xf32>
    %655 = arith.addf %654, %653 : vector<8x128xf32>
    %656 = arith.divf %654, %655 : vector<8x128xf32>
    %657 = vector.extract_strided_slice %649 {offsets = [0, 128], sizes = [8, 128], strides = [1, 1]} : vector<8x512xf32> to vector<8x128xf32>
    %658 = arith.negf %657 : vector<8x128xf32>
    %659 = math.exp %658 : vector<8x128xf32>
    %cst_288 = arith.constant 1.000000e+00 : f32
    %660 = vector.broadcast %cst_288 : f32 to vector<8x128xf32>
    %661 = arith.addf %660, %659 : vector<8x128xf32>
    %662 = arith.divf %660, %661 : vector<8x128xf32>
    %663 = vector.extract_strided_slice %649 {offsets = [0, 256], sizes = [8, 128], strides = [1, 1]} : vector<8x512xf32> to vector<8x128xf32>
    %664 = math.tanh %663 : vector<8x128xf32>
    %665 = vector.extract_strided_slice %649 {offsets = [0, 384], sizes = [8, 128], strides = [1, 1]} : vector<8x512xf32> to vector<8x128xf32>
    %666 = arith.negf %665 : vector<8x128xf32>
    %667 = math.exp %666 : vector<8x128xf32>
    %cst_289 = arith.constant 1.000000e+00 : f32
    %668 = vector.broadcast %cst_289 : f32 to vector<8x128xf32>
    %669 = arith.addf %668, %667 : vector<8x128xf32>
    %670 = arith.divf %668, %669 : vector<8x128xf32>
    %671 = arith.mulf %662, %650 : vector<8x128xf32>
    %672 = arith.mulf %656, %664 : vector<8x128xf32>
    %673 = arith.addf %671, %672 : vector<8x128xf32>
    %674 = math.tanh %673 : vector<8x128xf32>
    %675 = arith.mulf %670, %674 : vector<8x128xf32>
    %c0_290 = arith.constant 0 : index
    %c0_291 = arith.constant 0 : index
    %676 = vector.load %arg9[%c0_290, %c0_291] : memref<8x128xf32, #tpu.memory_space<vmem>>, vector<8x128xf32>
    tpu.vector_store %arg9[%c0_290, %c0_291], %675 {strides = array<i32>} : memref<8x128xf32, #tpu.memory_space<vmem>>, vector<8x128xf32>,
    %c0_292 = arith.constant 0 : index
    %c0_293 = arith.constant 0 : index
    %677 = vector.load %arg10[%c0_292, %c0_293] : memref<8x128xf32, #tpu.memory_space<vmem>>, vector<8x128xf32>
    tpu.vector_store %arg10[%c0_292, %c0_293], %673 {strides = array<i32>} : memref<8x128xf32, #tpu.memory_space<vmem>>, vector<8x128xf32>,
    %678 = arith.truncf %675 : vector<8x128xf32> to vector<8x128xbf16>
    %679 = arith.index_cast %640 : i32 to index
    %c0_294 = arith.constant 0 : index
    %c0_295 = arith.constant 0 : index
    %680 = vector.load %arg6[%679, %c0_294, %c0_295] : memref<8x8x128xbf16, #tpu.memory_space<vmem>>, vector<1x8x128xbf16>
    %681 = vector.shape_cast %680 : vector<1x8x128xbf16> to vector<8x128xbf16>
    %682 = vector.shape_cast %678 : vector<8x128xbf16> to vector<1x8x128xbf16>
    tpu.vector_store %arg6[%679, %c0_294, %c0_295], %682 {strides = array<i32>} : memref<8x8x128xbf16, #tpu.memory_space<vmem>>, vector<1x8x128xbf16>,
    %c8_i32 = arith.constant 8 : i32
    return
  }
  func.func @transform_0(%arg0: i32) -> (i32, i32, i32) {
    %c0_i32 = arith.constant 0 : i32
    %c0_i32_0 = arith.constant 0 : i32
    %c0_i32_1 = arith.constant 0 : i32
    return %arg0, %c0_i32, %c0_i32_0 : i32, i32, i32
  }
  func.func @transform_1(%arg0: i32) -> (i32, i32, i32) {
    %c0_i32 = arith.constant 0 : i32
    %0 = arith.subi %c0_i32, %arg0 : i32
    %c0_i32_0 = arith.constant 0 : i32
    %c0_i32_1 = arith.constant 0 : i32
    %c0_i32_2 = arith.constant 0 : i32
    return %0, %c0_i32_0, %c0_i32_1 : i32, i32, i32
  }
  func.func @transform_2(%arg0: i32) -> (i32, i32) {
    %c0_i32 = arith.constant 0 : i32
    %c0_i32_0 = arith.constant 0 : i32
    %c0_i32_1 = arith.constant 0 : i32
    return %c0_i32, %c0_i32_0 : i32, i32
  }
  func.func @transform_3(%arg0: i32) -> (i32, i32) {
    %c0_i32 = arith.constant 0 : i32
    %c0_i32_0 = arith.constant 0 : i32
    %c0_i32_1 = arith.constant 0 : i32
    return %c0_i32, %c0_i32_0 : i32, i32
  }
  func.func @transform_4(%arg0: i32) -> (i32, i32, i32) {
    %c0_i32 = arith.constant 0 : i32
    %c0_i32_0 = arith.constant 0 : i32
    %c0_i32_1 = arith.constant 0 : i32
    return %arg0, %c0_i32, %c0_i32_0 : i32, i32, i32
  }
  func.func @transform_5(%arg0: i32) -> (i32, i32, i32) {
    %c0_i32 = arith.constant 0 : i32
    %0 = arith.subi %c0_i32, %arg0 : i32
    %c0_i32_0 = arith.constant 0 : i32
    %c0_i32_1 = arith.constant 0 : i32
    %c0_i32_2 = arith.constant 0 : i32
    return %0, %c0_i32_0, %c0_i32_1 : i32, i32, i32
  }
}

</mosaic_0001>

<bundles_post_ra>
// kernel: blstm_forward.2
= control target key start
LH: loop header
LB: loop body
LE: loop exit
PB: predicated region body
PF: predicated region fallthrough
CT: control target
= control target key end

     0   :  { %s12285_s2 = inlined_call_operand.vmem [shape: bf16[128,512], index: 2, kind: input, shape index: {}]   ;;  %s12286_s3 = inlined_call_operand.vmem [shape: bf16[128,512], index: 3, kind: input, shape index: {}]   ;;  %s12287_s0 = inlined_call_operand.vmem [shape: bf16[8,8,512], index: 0, kind: input, shape index: {}]   ;;  %s12288_s1 = inlined_call_operand.vmem [shape: bf16[8,8,512], index: 1, kind: input, shape index: {}]   ;;  %s12289_s4 = inlined_call_operand.vmem [shape: bf16[8,8,128], index: 4, kind: output, shape index: {0}]   ;;  %s12290_s5 = inlined_call_operand.vmem [shape: bf16[8,8,128], index: 5, kind: output, shape index: {1}]  }
   0x1   :  { %v5428_v0 = vld [vmem:[%s12285_s2 + $0xe0] sm:$0xf]  ;;  %v7482_v1 = vld [vmem:[%s12285_s2 + $0xec] sm:$0xf0]  ;;  %v7480_v2 = vld [vmem:[%s12285_s2 + $0xe4] sm:$0xf] }
   0x2   :  { %v5429_v3 = vor.u32 %v7482_v1, %v5428_v0  ;;  %v5430_v4 = vld [vmem:[%s12285_s2 + $0xf0] sm:$0xf0]  ;;  %v7481_v5 = vld [vmem:[%s12285_s2 + $0xec] sm:$0xf]  ;;  %v5438_v6 = vld [vmem:[%s12285_s2 + $0xf8] sm:$0xf0] }
   0x3   :  { %v5433_v7 = vor.u32 %v7480_v2, %v5430_v4  ;;  %v5441_v8 = vor.u32 %v7481_v5, %v5438_v6  ;;  %v5412_v9 = vld [vmem:[%s12285_s2 + $0xc0] sm:$0xf]  ;;  %v7478_v10 = vld [vmem:[%s12285_s2 + $0xcc] sm:$0xf0]  ;;  %v7476_v11 = vld [vmem:[%s12285_s2 + $0xc4] sm:$0xf] }
   0x4   :  { %266 = vmatpush.bf16.msra.mxu0 %v5429_v3  ;;  %v5413_v12 = vor.u32 %v7478_v10, %v5412_v9  ;;  %v5414_v13 = vld [vmem:[%s12285_s2 + $0xd0] sm:$0xf0]  ;;  %v7477_v14 = vld [vmem:[%s12285_s2 + $0xcc] sm:$0xf]  ;;  %v5422_v15 = vld [vmem:[%s12285_s2 + $0xd8] sm:$0xf0] }
   0x5   :  { %279 = vmatpush.bf16.msra.mxu1 %v5433_v7  ;;  %305 = vmatpush.bf16.msra.mxu3 %v5441_v8  ;;  %v5417_v16 = vor.u32 %v7476_v11, %v5414_v13  ;;  %v5425_v17 = vor.u32 %v7477_v14, %v5422_v15  ;;  %v5436_v18 = vld [vmem:[%s12285_s2 + $0xe8] sm:$0xf]  ;;  %v7483_v19 = vld [vmem:[%s12285_s2 + $0xf4] sm:$0xf0]  ;;  %v5396_v20 = vld [vmem:[%s12285_s2 + $0xa0] sm:$0xf] }
   0x6   :  { %v5437_v21 = vor.u32 %v7483_v19, %v5436_v18  ;;  %v7474_v22 = vld [vmem:[%s12285_s2 + $0xac] sm:$0xf0]  ;;  %v7472_v23 = vld [vmem:[%s12285_s2 + $0xa4] sm:$0xf]  ;;  %v5398_v24 = vld [vmem:[%s12285_s2 + $0xb0] sm:$0xf0] }
   0x7   :  { %v7473_v25 = vld [vmem:[%s12285_s2 + $0xac] sm:$0xf]  ;;  %v5406_v26 = vld [vmem:[%s12285_s2 + $0xb8] sm:$0xf0]  ;;  %v5420_v27 = vld [vmem:[%s12285_s2 + $0xc8] sm:$0xf]  ;;  %v5397_v28 = vor.u32 %v7474_v22, %v5396_v20  ;;  %v5401_v32 = vor.u32 %v7472_v23, %v5398_v24 }
   0x8   :  { %267 = vmatpush.bf16.msra.mxu0 %v5413_v12  ;;  %292 = vmatpush.bf16.msra.mxu2 %v5437_v21  ;;  %v7479_v29 = vld [vmem:[%s12285_s2 + $0xd4] sm:$0xf0]  ;;  %v5380_v30 = vld [vmem:[%s12285_s2 + $0x80] sm:$0xf]  ;;  %v7470_v31 = vld [vmem:[%s12285_s2 + $0x8c] sm:$0xf0]  ;;  %v5409_v33 = vor.u32 %v7473_v25, %v5406_v26 }
   0x9   :  { %280 = vmatpush.bf16.msra.mxu1 %v5417_v16  ;;  %306 = vmatpush.bf16.msra.mxu3 %v5425_v17  ;;  %v5421_v34 = vor.u32 %v7479_v29, %v5420_v27  ;;  %v7468_v35 = vld [vmem:[%s12285_s2 + $0x84] sm:$0xf]  ;;  %v5382_v36 = vld [vmem:[%s12285_s2 + $0x90] sm:$0xf0]  ;;  %v7469_v37 = vld [vmem:[%s12285_s2 + $0x8c] sm:$0xf]  ;;  %v5381_v41 = vor.u32 %v7470_v31, %v5380_v30 }
   0xa   :  { %v5390_v38 = vld [vmem:[%s12285_s2 + $0x98] sm:$0xf0]  ;;  %v5404_v39 = vld [vmem:[%s12285_s2 + $0xa8] sm:$0xf]  ;;  %v7475_v40 = vld [vmem:[%s12285_s2 + $0xb4] sm:$0xf0]  ;;  %v5385_v45 = vor.u32 %v7468_v35, %v5382_v36 }
   0xb   :  { %v5405_v42 = vor.u32 %v7475_v40, %v5404_v39  ;;  %v5364_v43 = vld [vmem:[%s12285_s2 + $0x60] sm:$0xf]  ;;  %v7466_v44 = vld [vmem:[%s12285_s2 + $0x6c] sm:$0xf0]  ;;  %v5393_v46 = vor.u32 %v7469_v37, %v5390_v38  ;;  %v7464_v47 = vld [vmem:[%s12285_s2 + $0x64] sm:$0xf] }
   0xc   :  { %268 = vmatpush.bf16.msra.mxu0 %v5397_v28  ;;  %293 = vmatpush.bf16.msra.mxu2 %v5421_v34  ;;  %v5388_v48 = vld [vmem:[%s12285_s2 + $0x88] sm:$0xf]  ;;  %v7471_v49 = vld [vmem:[%s12285_s2 + $0x94] sm:$0xf0]  ;;  %v5366_v50 = vld [vmem:[%s12285_s2 + $0x70] sm:$0xf0]  ;;  %v5365_v53 = vor.u32 %v7466_v44, %v5364_v43 }
   0xd   :  { %281 = vmatpush.bf16.msra.mxu1 %v5401_v32  ;;  %307 = vmatpush.bf16.msra.mxu3 %v5409_v33  ;;  %v7465_v51 = vld [vmem:[%s12285_s2 + $0x6c] sm:$0xf]  ;;  %v5374_v52 = vld [vmem:[%s12285_s2 + $0x78] sm:$0xf0]  ;;  %v5389_v54 = vor.u32 %v7471_v49, %v5388_v48  ;;  %v5348_v55 = vld [vmem:[%s12285_s2 + $0x40] sm:$0xf]  ;;  %v5369_v57 = vor.u32 %v7464_v47, %v5366_v50 }
   0xe   :  { %v7462_v56 = vld [vmem:[%s12285_s2 + $0x4c] sm:$0xf0]  ;;  %v5377_v58 = vor.u32 %v7465_v51, %v5374_v52  ;;  %v7460_v59 = vld [vmem:[%s12285_s2 + $0x44] sm:$0xf]  ;;  %v5372_v60 = vld [vmem:[%s12285_s2 + $0x68] sm:$0xf] }
   0xf   :  { %v7467_v61 = vld [vmem:[%s12285_s2 + $0x74] sm:$0xf0]  ;;  %v5350_v62 = vld [vmem:[%s12285_s2 + $0x50] sm:$0xf0]  ;;  %v7461_v63 = vld [vmem:[%s12285_s2 + $0x4c] sm:$0xf]  ;;  %v5349_v1 = vor.u32 %v7462_v56, %v5348_v55 }
  0x10   :  { %269 = vmatpush.bf16.msra.mxu0 %v5381_v41  ;;  %294 = vmatpush.bf16.msra.mxu2 %v5405_v42  ;;  %v5358_v0 = vld [vmem:[%s12285_s2 + $0x58] sm:$0xf0]  ;;  %v5373_v2 = vor.u32 %v7467_v61, %v5372_v60  ;;  %v5332_v3 = vld [vmem:[%s12285_s2 + $0x20] sm:$0xf]  ;;  %v7458_v4 = vld [vmem:[%s12285_s2 + $0x2c] sm:$0xf0]  ;;  %v5353_v5 = vor.u32 %v7460_v59, %v5350_v62 }
  0x11   :  { %282 = vmatpush.bf16.msra.mxu1 %v5385_v45  ;;  %308 = vmatpush.bf16.msra.mxu3 %v5393_v46  ;;  %v5361_v6 = vor.u32 %v7461_v63, %v5358_v0  ;;  %v7456_v7 = vld [vmem:[%s12285_s2 + $0x24] sm:$0xf]  ;;  %v5356_v8 = vld [vmem:[%s12285_s2 + $0x48] sm:$0xf]  ;;  %v7463_v9 = vld [vmem:[%s12285_s2 + $0x54] sm:$0xf0]  ;;  %v5333_v13 = vor.u32 %v7458_v4, %v5332_v3 }
  0x12   :  { %v5334_v10 = vld [vmem:[%s12285_s2 + $0x30] sm:$0xf0]  ;;  %v7457_v11 = vld [vmem:[%s12285_s2 + $0x2c] sm:$0xf]  ;;  %v5342_v12 = vld [vmem:[%s12285_s2 + $0x38] sm:$0xf0]  ;;  %v5357_v14 = vor.u32 %v7463_v9, %v5356_v8 }
  0x13   :  { %v5316_v15 = vld [vmem:[%s12285_s2] sm:$0xf]  ;;  %v7454_v16 = vld [vmem:[%s12285_s2 + $0xc] sm:$0xf0]  ;;  %v7452_v17 = vld [vmem:[%s12285_s2 + $0x4] sm:$0xf]  ;;  %v5337_v18 = vor.u32 %v7456_v7, %v5334_v10  ;;  %v5345_v19 = vor.u32 %v7457_v11, %v5342_v12 }
  0x14   :  { %270 = vmatpush.bf16.msra.mxu0 %v5365_v53  ;;  %295 = vmatpush.bf16.msra.mxu2 %v5389_v54  ;;  %v5318_v20 = vld [vmem:[%s12285_s2 + $0x10] sm:$0xf0]  ;;  %v5340_v21 = vld [vmem:[%s12285_s2 + $0x28] sm:$0xf]  ;;  %v7459_v22 = vld [vmem:[%s12285_s2 + $0x34] sm:$0xf0]  ;;  %v5317_v29 = vor.u32 %v7454_v16, %v5316_v15 }
  0x15   :  { %283 = vmatpush.bf16.msra.mxu1 %v5369_v57  ;;  %309 = vmatpush.bf16.msra.mxu3 %v5377_v58  ;;  %v7453_v23 = vld [vmem:[%s12285_s2 + $0xc] sm:$0xf]  ;;  %v5326_v24 = vld [vmem:[%s12285_s2 + $0x18] sm:$0xf0]  ;;  %v5561_v25 = vld [vmem:[%s12286_s3 + $0xe0] sm:$0xf]  ;;  %v5341_v32 = vor.u32 %v7459_v22, %v5340_v21  ;;  %v5321_v33 = vor.u32 %v7452_v17, %v5318_v20 }
  0x16   :  { %v7514_v26 = vld [vmem:[%s12286_s3 + $0xec] sm:$0xf0]  ;;  %v7512_v27 = vld [vmem:[%s12286_s3 + $0xe4] sm:$0xf]  ;;  %v5563_v28 = vld [vmem:[%s12286_s3 + $0xf0] sm:$0xf0]  ;;  %v5329_v34 = vor.u32 %v7453_v23, %v5326_v24 }
  0x17   :  { %v7513_v30 = vld [vmem:[%s12286_s3 + $0xec] sm:$0xf]  ;;  %v5571_v31 = vld [vmem:[%s12286_s3 + $0xf8] sm:$0xf0]  ;;  %v5324_v35 = vld [vmem:[%s12285_s2 + $0x8] sm:$0xf]  ;;  %v5562_v37 = vor.u32 %v7514_v26, %v5561_v25  ;;  %v5566_v38 = vor.u32 %v7512_v27, %v5563_v28 }
  0x18   :  { %271 = vmatpush.bf16.msra.mxu0 %v5349_v1  ;;  %296 = vmatpush.bf16.msra.mxu2 %v5373_v2  ;;  %v7455_v36 = vld [vmem:[%s12285_s2 + $0x14] sm:$0xf0]  ;;  %v5545_v39 = vld [vmem:[%s12286_s3 + $0xc0] sm:$0xf]  ;;  %v5569_v40 = vld [vmem:[%s12286_s3 + $0xe8] sm:$0xf]  ;;  %v5574_v42 = vor.u32 %v7513_v30, %v5571_v31 }
  0x19   :  { %284 = vmatpush.bf16.msra.mxu1 %v5353_v5  ;;  %310 = vmatpush.bf16.msra.mxu3 %v5361_v6  ;;  %v7515_v41 = vld [vmem:[%s12286_s3 + $0xf4] sm:$0xf0]  ;;  %v7510_v43 = vld [vmem:[%s12286_s3 + $0xcc] sm:$0xf0]  ;;  %v7508_v44 = vld [vmem:[%s12286_s3 + $0xc4] sm:$0xf]  ;;  %v5325_v48 = vor.u32 %v7455_v36, %v5324_v35 }
  0x1a   :  { %v5547_v45 = vld [vmem:[%s12286_s3 + $0xd0] sm:$0xf0]  ;;  %v7509_v46 = vld [vmem:[%s12286_s3 + $0xcc] sm:$0xf]  ;;  %v5555_v47 = vld [vmem:[%s12286_s3 + $0xd8] sm:$0xf0]  ;;  %v5570_v49 = vor.u32 %v7515_v41, %v5569_v40  ;;  %v5546_v50 = vor.u32 %v7510_v43, %v5545_v39 }
  0x1b   :  { %v5550_v51 = vor.u32 %v7508_v44, %v5547_v45  ;;  %v5529_v52 = vld [vmem:[%s12286_s3 + $0xa0] sm:$0xf]  ;;  %v5553_v53 = vld [vmem:[%s12286_s3 + $0xc8] sm:$0xf]  ;;  %v7511_v54 = vld [vmem:[%s12286_s3 + $0xd4] sm:$0xf0]  ;;  %v5558_v56 = vor.u32 %v7509_v46, %v5555_v47 }
  0x1c   :  { %272 = vmatpush.bf16.msra.mxu0 %v5333_v13  ;;  %297 = vmatpush.bf16.msra.mxu2 %v5357_v14  ;;  %v8221_v55 = vmov 0.0|0.0   ;;  %v7506_v57 = vld [vmem:[%s12286_s3 + $0xac] sm:$0xf0]  ;;  %v7504_v58 = vld [vmem:[%s12286_s3 + $0xa4] sm:$0xf]  ;;  %v5554_v62 = vor.u32 %v7511_v54, %v5553_v53 }
  0x1d   :  { %285 = vmatpush.bf16.msra.mxu1 %v5337_v18  ;;  %311 = vmatpush.bf16.msra.mxu3 %v5345_v19  ;;  %v5531_v59 = vld [vmem:[%s12286_s3 + $0xb0] sm:$0xf0]  ;;  %v7505_v60 = vld [vmem:[%s12286_s3 + $0xac] sm:$0xf]  ;;  %v5539_v61 = vld [vmem:[%s12286_s3 + $0xb8] sm:$0xf0]  ;;  %v5530_v63 = vor.u32 %v7506_v57, %v5529_v52 }
  0x1e   :  { %v5534_v0 = vor.u32 %v7504_v58, %v5531_v59  ;;  %v5513_v1 = vld [vmem:[%s12286_s3 + $0x80] sm:$0xf]  ;;  %v5537_v2 = vld [vmem:[%s12286_s3 + $0xa8] sm:$0xf]  ;;  %v7507_v3 = vld [vmem:[%s12286_s3 + $0xb4] sm:$0xf0]  ;;  %v5542_v4 = vor.u32 %v7505_v60, %v5539_v61 }
  0x1f   :  { %v7502_v5 = vld [vmem:[%s12286_s3 + $0x8c] sm:$0xf0]  ;;  %v7500_v6 = vld [vmem:[%s12286_s3 + $0x84] sm:$0xf]  ;;  %v5515_v7 = vld [vmem:[%s12286_s3 + $0x90] sm:$0xf0]  ;;  %v5538_v10 = vor.u32 %v7507_v3, %v5537_v2 }
  0x20   :  { %273 = vmatpush.bf16.msra.mxu0 %v5317_v29  ;;  %298 = vmatpush.bf16.msra.mxu2 %v5341_v32  ;;  %v7501_v8 = vld [vmem:[%s12286_s3 + $0x8c] sm:$0xf]  ;;  %v5523_v9 = vld [vmem:[%s12286_s3 + $0x98] sm:$0xf0]  ;;  %v5514_v11 = vor.u32 %v7502_v5, %v5513_v1  ;;  %v5518_v12 = vor.u32 %v7500_v6, %v5515_v7  ;;  %v5497_v13 = vld [vmem:[%s12286_s3 + $0x60] sm:$0xf] }
  0x21   :  { %286 = vmatpush.bf16.msra.mxu1 %v5321_v33  ;;  %312 = vmatpush.bf16.msra.mxu3 %v5329_v34  ;;  %v5521_v14 = vld [vmem:[%s12286_s3 + $0x88] sm:$0xf]  ;;  %v7503_v15 = vld [vmem:[%s12286_s3 + $0x94] sm:$0xf0]  ;;  %v5526_v16 = vor.u32 %v7501_v8, %v5523_v9  ;;  %v7498_v17 = vld [vmem:[%s12286_s3 + $0x6c] sm:$0xf0] }
  0x22   :  { %v7496_v18 = vld [vmem:[%s12286_s3 + $0x64] sm:$0xf]  ;;  %v5499_v19 = vld [vmem:[%s12286_s3 + $0x70] sm:$0xf0]  ;;  %v7497_v20 = vld [vmem:[%s12286_s3 + $0x6c] sm:$0xf]  ;;  %v5522_v22 = vor.u32 %v7503_v15, %v5521_v14  ;;  %v5498_v23 = vor.u32 %v7498_v17, %v5497_v13 }
  0x23   :  { %274 = vmatmul.bf16.vlgmr.msra.gmra.mxu0 %v8221_v55  ;;  %v5507_v21 = vld [vmem:[%s12286_s3 + $0x78] sm:$0xf0]  ;;  %v5502_v24 = vor.u32 %v7496_v18, %v5499_v19  ;;  %v5481_v25 = vld [vmem:[%s12286_s3 + $0x40] sm:$0xf]  ;;  %v5505_v26 = vld [vmem:[%s12286_s3 + $0x68] sm:$0xf] }
  0x24   :  { %591 = vmatpush.bf16.msrb.mxu0 %v5562_v37  ;;  %287 = vmatmul.bf16.vlgmr.msra.gmra.mxu1 %v8221_v55  ;;  %v7499_v27 = vld [vmem:[%s12286_s3 + $0x74] sm:$0xf0]  ;;  %v5510_v28 = vor.u32 %v7497_v20, %v5507_v21  ;;  %v7494_v29 = vld [vmem:[%s12286_s3 + $0x4c] sm:$0xf0]  ;;  %v7492_v30 = vld [vmem:[%s12286_s3 + $0x44] sm:$0xf] }
  0x25   :  { %604 = vmatpush.bf16.msrb.mxu1 %v5566_v38  ;;  %630 = vmatpush.bf16.msrb.mxu3 %v5574_v42  ;;  %v5483_v31 = vld [vmem:[%s12286_s3 + $0x50] sm:$0xf0]  ;;  %v7493_v32 = vld [vmem:[%s12286_s3 + $0x4c] sm:$0xf]  ;;  %v5491_v33 = vld [vmem:[%s12286_s3 + $0x58] sm:$0xf0]  ;;  %v5506_v34 = vor.u32 %v7499_v27, %v5505_v26  ;;  %v5482_v35 = vor.u32 %v7494_v29, %v5481_v25 }
  0x26   :  { %299 = vmatpush.bf16.msra.mxu2 %v5325_v48  ;;  %313 = vmatmul.bf16.vlgmr.msra.gmra.mxu3 %v8221_v55  ;;  %v5486_v36 = vor.u32 %v7492_v30, %v5483_v31  ;;  %v5465_v37 = vld [vmem:[%s12286_s3 + $0x20] sm:$0xf]  ;;  %v5489_v38 = vld [vmem:[%s12286_s3 + $0x48] sm:$0xf]  ;;  %v7495_v39 = vld [vmem:[%s12286_s3 + $0x54] sm:$0xf0]  ;;  %v5494_v40 = vor.u32 %v7493_v32, %v5491_v33 }
  0x27   :  { %v7490_v41 = vld [vmem:[%s12286_s3 + $0x2c] sm:$0xf0]  ;;  %v7488_v42 = vld [vmem:[%s12286_s3 + $0x24] sm:$0xf]  ;;  %v5467_v43 = vld [vmem:[%s12286_s3 + $0x30] sm:$0xf0]  ;;  %v5490_v46 = vor.u32 %v7495_v39, %v5489_v38 }
  0x28   :  { %592 = vmatpush.bf16.msrb.mxu0 %v5546_v50  ;;  %v7489_v44 = vld [vmem:[%s12286_s3 + $0x2c] sm:$0xf]  ;;  %v5475_v45 = vld [vmem:[%s12286_s3 + $0x38] sm:$0xf0]  ;;  %v5466_v47 = vor.u32 %v7490_v41, %v5465_v37  ;;  %v5470_v48 = vor.u32 %v7488_v42, %v5467_v43  ;;  %v5473_v50 = vld [vmem:[%s12286_s3 + $0x28] sm:$0xf] }
  0x29   :  { %605 = vmatpush.bf16.msrb.mxu1 %v5550_v51  ;;  %631 = vmatpush.bf16.msrb.mxu3 %v5558_v56  ;;  %v7491_v51 = vld [vmem:[%s12286_s3 + $0x34] sm:$0xf0]  ;;  %v5478_v52 = vor.u32 %v7489_v44, %v5475_v45  ;;  %v7486_v53 = vld [vmem:[%s12286_s3 + $0xc] sm:$0xf0]  ;;  %v7484_v54 = vld [vmem:[%s12286_s3 + $0x4] sm:$0xf] }
  0x2a   :  { %617 = vmatpush.bf16.msrb.mxu2 %v5570_v49  ;;  %v5449_v49 = vld [vmem:[%s12286_s3] sm:$0xf]  ;;  %v5451_v56 = vld [vmem:[%s12286_s3 + $0x10] sm:$0xf0]  ;;  %v7485_v57 = vld [vmem:[%s12286_s3 + $0xc] sm:$0xf]  ;;  %v5474_v59 = vor.u32 %v7491_v51, %v5473_v50 }
  0x2b   :  { %300 = vmatmul.bf16.vlgmr.msra.gmra.mxu2 %v8221_v55  ;;  %v5459_v58 = vld [vmem:[%s12286_s3 + $0x18] sm:$0xf0]  ;;  %v5450_v60 = vor.u32 %v7486_v53, %v5449_v49  ;;  %v5454_v61 = vor.u32 %v7484_v54, %v5451_v56  ;;  %v5695_v2 = vld [vmem:[%s12285_s2 + $0xe0] sm:$0xf]  ;;  %v7546_v3 = vld [vmem:[%s12285_s2 + $0xec] sm:$0xf0] }
  0x2c   :  { %593 = vmatpush.bf16.msrb.mxu0 %v5530_v63  ;;  %v5457_v63 = vld [vmem:[%s12286_s3 + $0x8] sm:$0xf]  ;;  %v5696_v5 = vor.u32 %v7546_v3, %v5695_v2  ;;  %v5697_v6 = vld [vmem:[%s12285_s2 + $0xf0] sm:$0xf0]  ;;  %v7547_v7 = vld [vmem:[%s12285_s2 + $0xf4] sm:$0xf0] }
  0x2d   :  { %606 = vmatpush.bf16.msrb.mxu1 %v5534_v0  ;;  %632 = vmatpush.bf16.msrb.mxu3 %v5542_v4  ;;  %v7487_v0 = vld [vmem:[%s12286_s3 + $0x14] sm:$0xf0]  ;;  %v7544_v4 = vld [vmem:[%s12285_s2 + $0xe4] sm:$0xf]  ;;  %v5679_v13 = vld [vmem:[%s12285_s2 + $0xc0] sm:$0xf] }
  0x2e   :  { %618 = vmatpush.bf16.msrb.mxu2 %v5554_v62  ;;  %v5462_v62 = vor.u32 %v7485_v57, %v5459_v58  ;;  %v5458_v1 = vor.u32 %v7487_v0, %v5457_v63  ;;  %v5700_v8 = vor.u32 %v7544_v4, %v5697_v6  ;;  %v7542_v14 = vld [vmem:[%s12285_s2 + $0xcc] sm:$0xf0]  ;;  %v7540_v15 = vld [vmem:[%s12285_s2 + $0xc4] sm:$0xf]  ;;  %v5681_v17 = vld [vmem:[%s12285_s2 + $0xd0] sm:$0xf0] }
  0x2f   :  { %v5687_v18 = vld [vmem:[%s12285_s2 + $0xc8] sm:$0xf]  ;;  %v7543_v19 = vld [vmem:[%s12285_s2 + $0xd4] sm:$0xf0]  ;;  %v5684_v20 = vor.u32 %v7540_v15, %v5681_v17  ;;  %v5663_v25 = vld [vmem:[%s12285_s2 + $0xa0] sm:$0xf] }
  0x30   :  { %594 = vmatpush.bf16.msrb.mxu0 %v5514_v11  ;;  %v5705_v11 = vld [vmem:[%s12285_s2 + $0xf8] sm:$0xf0]  ;;  %v5688_v21 = vor.u32 %v7543_v19, %v5687_v18  ;;  %v7538_v26 = vld [vmem:[%s12285_s2 + $0xac] sm:$0xf0]  ;;  %v7536_v27 = vld [vmem:[%s12285_s2 + $0xa4] sm:$0xf] }
  0x31   :  { %607 = vmatpush.bf16.msrb.mxu1 %v5518_v12  ;;  %633 = vmatpush.bf16.msrb.mxu3 %v5526_v16  ;;  %v5680_v16 = vor.u32 %v7542_v14, %v5679_v13  ;;  %v5665_v29 = vld [vmem:[%s12285_s2 + $0xb0] sm:$0xf0]  ;;  %v5671_v30 = vld [vmem:[%s12285_s2 + $0xa8] sm:$0xf]  ;;  %v7539_v31 = vld [vmem:[%s12285_s2 + $0xb4] sm:$0xf0] }
  0x32   :  { %619 = vmatpush.bf16.msrb.mxu2 %v5538_v10  ;;  %v7545_v10 = vld [vmem:[%s12285_s2 + $0xec] sm:$0xf]  ;;  %v5668_v32 = vor.u32 %v7536_v27, %v5665_v29  ;;  %v5672_v33 = vor.u32 %v7539_v31, %v5671_v30  ;;  %v5647_v38 = vld [vmem:[%s12285_s2 + $0x80] sm:$0xf]  ;;  %v7534_v39 = vld [vmem:[%s12285_s2 + $0x8c] sm:$0xf0] }
  0x33   :  { %v5708_v12 = vor.u32 %v7545_v10, %v5705_v11  ;;  %v5648_v41 = vor.u32 %v7534_v39, %v5647_v38  ;;  %v5649_v42 = vld [vmem:[%s12285_s2 + $0x90] sm:$0xf0]  ;;  %v5655_v43 = vld [vmem:[%s12285_s2 + $0x88] sm:$0xf]  ;;  %v7535_v44 = vld [vmem:[%s12285_s2 + $0x94] sm:$0xf0] }
  0x34   :  { %595 = vmatpush.bf16.msrb.mxu0 %v5498_v23  ;;  %v5689_v23 = vld [vmem:[%s12285_s2 + $0xd8] sm:$0xf0]  ;;  %v7530_v53 = vld [vmem:[%s12285_s2 + $0x6c] sm:$0xf0]  ;;  %v7528_v54 = vld [vmem:[%s12285_s2 + $0x64] sm:$0xf] }
  0x35   :  { %608 = vmatpush.bf16.msrb.mxu1 %v5502_v24  ;;  %634 = vmatpush.bf16.msrb.mxu3 %v5510_v28  ;;  %v5664_v28 = vor.u32 %v7538_v26, %v5663_v25  ;;  %v5633_v58 = vld [vmem:[%s12285_s2 + $0x70] sm:$0xf0]  ;;  %v5641_v2 = vld [vmem:[%s12285_s2 + $0x78] sm:$0xf0]  ;;  %v8770_v4 = vld [vmem:[%s12287_s0 + $0x8] sm:$0xff] }
  0x36   :  { %620 = vmatpush.bf16.msrb.mxu2 %v5522_v22  ;;  %v7541_v22 = vld [vmem:[%s12285_s2 + $0xcc] sm:$0xf]  ;;  %v5636_v63 = vor.u32 %v7528_v54, %v5633_v58  ;;  %v7524_v10 = vld [vmem:[%s12285_s2 + $0x44] sm:$0xf]  ;;  %v71_v11 = vunpack.c.h.bf16 %v8770_v4  ;;  %v5623_v13 = vld [vmem:[%s12285_s2 + $0x48] sm:$0xf] }
  0x37   :  { %v5692_v24 = vor.u32 %v7541_v22, %v5689_v23  ;;  %v7527_v14 = vld [vmem:[%s12285_s2 + $0x54] sm:$0xf0]  ;;  %v7525_v17 = vld [vmem:[%s12285_s2 + $0x4c] sm:$0xf]  ;;  %v5625_v18 = vld [vmem:[%s12285_s2 + $0x58] sm:$0xf0] }
  0x38   :  { %596 = vmatpush.bf16.msrb.mxu0 %v5482_v35  ;;  %v5673_v35 = vld [vmem:[%s12285_s2 + $0xb8] sm:$0xf0]  ;;  %v5628_v19 = vor.u32 %v7525_v17, %v5625_v18  ;;  %v7520_v22 = vld [vmem:[%s12285_s2 + $0x24] sm:$0xf]  ;;  %v5601_v26 = vld [vmem:[%s12285_s2 + $0x30] sm:$0xf0] }
  0x39   :  { %609 = vmatpush.bf16.msrb.mxu1 %v5486_v36  ;;  %635 = vmatpush.bf16.msrb.mxu3 %v5494_v40  ;;  %v66_v36 = vld [vmem:[%s12287_s0] sm:$0xff]  ;;  %v5607_v27 = vld [vmem:[%s12285_s2 + $0x28] sm:$0xf]  ;;  %v5604_v31 = vor.u32 %v7520_v22, %v5601_v26  ;;  %v7573_v26 = vld [vmem:[%s12286_s3 + $0xcc] sm:$0xf] }
  0x3a   :  { %621 = vmatpush.bf16.msrb.mxu2 %v5506_v34  ;;  %v7537_v34 = vld [vmem:[%s12285_s2 + $0xac] sm:$0xf]  ;;  %v7532_v40 = vld [vmem:[%s12285_s2 + $0x84] sm:$0xf]  ;;  %v68_v49 = vunpack.c.l.bf16 %v66_v36  ;;  %v69_v51 = vunpack.c.h.bf16 %v66_v36 }
  0x3b   :  { %v5676_v37 = vor.u32 %v7537_v34, %v5673_v35  ;;  %v5652_v45 = vor.u32 %v7532_v40, %v5649_v42  ;;  %v5609_v34 = vld [vmem:[%s12285_s2 + $0x38] sm:$0xf0]  ;;  %v7518_v42 = vld [vmem:[%s12285_s2 + $0xc] sm:$0xf0] }
  0x3c   :  { %597 = vmatpush.bf16.msrb.mxu0 %v5466_v47  ;;  %v7533_v47 = vld [vmem:[%s12285_s2 + $0x8c] sm:$0xf] }
  0x3d   :  { %610 = vmatpush.bf16.msrb.mxu1 %v5470_v48  ;;  %636 = vmatpush.bf16.msrb.mxu3 %v5478_v52  ;;  %v5657_v48 = vld [vmem:[%s12285_s2 + $0x98] sm:$0xf0]  ;;  %v5631_v52 = vld [vmem:[%s12285_s2 + $0x60] sm:$0xf] }
  0x3e   :  { %622 = vmatpush.bf16.msrb.mxu2 %v5490_v46  ;;  %v5656_v46 = vor.u32 %v7535_v44, %v5655_v43  ;;  %v5660_v50 = vor.u32 %v7533_v47, %v5657_v48  ;;  %v5632_v57 = vor.u32 %v7530_v53, %v5631_v52  ;;  %v70_v44 = vunpack.c.l.bf16 %v8770_v4  ;;  %v5585_v47 = vld [vmem:[%s12285_s2 + $0x10] sm:$0xf0]  ;;  %v5591_v48 = vld [vmem:[%s12285_s2 + $0x8] sm:$0xf] }
  0x3f   :  { %v5837_v4 = vld [vmem:[%s12286_s3 + $0xe8] sm:$0xf] }
  0x40   :  { %598 = vmatpush.bf16.msrb.mxu0 %v5450_v60  ;;  %v7531_v60 = vld [vmem:[%s12285_s2 + $0x74] sm:$0xf0] }
  0x41   :  { %611 = vmatpush.bf16.msrb.mxu1 %v5454_v61  ;;  %637 = vmatpush.bf16.msrb.mxu3 %v5462_v62 }
  0x42   :  { %623 = vmatpush.bf16.msrb.mxu2 %v5474_v59  ;;  %v5639_v59 = vld [vmem:[%s12285_s2 + $0x68] sm:$0xf] }
  0x43   :  { %599 = vmatmul.bf16.vlgmr.msrb.gmra.mxu0 %v8221_v55  ;;  %v5640_v0 = vor.u32 %v7531_v60, %v5639_v59 }
  0x44   :  { %612 = vmatmul.bf16.vlgmr.msrb.gmra.mxu1 %v8221_v55  ;;  %638 = vmatmul.bf16.vlgmr.msrb.gmra.mxu3 %v8221_v55 }
  0x45   :  { %917 = vmatpush.bf16.msra.mxu0 %v5696_v5  ;;  %930 = vmatpush.bf16.msra.mxu1 %v5700_v8 }
  0x46   :  { %624 = vmatpush.bf16.msrb.mxu2 %v5458_v1  ;;  %956 = vmatpush.bf16.msra.mxu3 %v5708_v12  ;;  %v7529_v1 = vld [vmem:[%s12285_s2 + $0x6c] sm:$0xf]  ;;  %v5617_v12 = vld [vmem:[%s12285_s2 + $0x50] sm:$0xf0] }
  0x47   :  { %v5644_v5 = vor.u32 %v7529_v1, %v5641_v2  ;;  %v5620_v15 = vor.u32 %v7524_v10, %v5617_v12  ;;  %v7576_v2 = vld [vmem:[%s12286_s3 + $0xe4] sm:$0xf] }
  0x49   :  { %625 = vmatmul.bf16.vlgmr.msrb.gmra.mxu2 %v8221_v55  ;;  %v5703_v55 = vld [vmem:[%s12285_s2 + $0xe8] sm:$0xf]  ;;  %918 = vmatpush.bf16.msra.mxu0 %v5680_v16  ;;  %v5624_v16 = vor.u32 %v7527_v14, %v5623_v13  ;;  %v5813_v14 = vld [vmem:[%s12286_s3 + $0xc0] sm:$0xf] }
  0x4a   :  { %v5704_v9 = vor.u32 %v7547_v7, %v5703_v55  ;;  %931 = vmatpush.bf16.msra.mxu1 %v5684_v20  ;;  %957 = vmatpush.bf16.msra.mxu3 %v5692_v24  ;;  %v5615_v55 = vld [vmem:[%s12285_s2 + $0x40] sm:$0xf]  ;;  %v7526_v7 = vld [vmem:[%s12285_s2 + $0x4c] sm:$0xf0] }
  0x4b   :  { %v5599_v20 = vld [vmem:[%s12285_s2 + $0x20] sm:$0xf] }
  0x4c   :  { %943 = vmatpush.bf16.msra.mxu2 %v5704_v9  ;;  %v5616_v9 = vor.u32 %v7526_v7, %v5615_v55  ;;  %v7579_v55 = vld [vmem:[%s12286_s3 + $0xf4] sm:$0xf0]  ;;  %v7577_v7 = vld [vmem:[%s12286_s3 + $0xec] sm:$0xf] }
  0x4d   :  { %919 = vmatpush.bf16.msra.mxu0 %v5664_v28  ;;  %v7523_v28 = vld [vmem:[%s12285_s2 + $0x34] sm:$0xf0]  ;;  %v5838_v12 = vor.u32 %v7579_v55, %v5837_v4  ;;  %v5791_v55 = vld [vmem:[%s12286_s3 + $0x98] sm:$0xf0] }
  0x4e   :  { %932 = vmatpush.bf16.msra.mxu1 %v5668_v32  ;;  %958 = vmatpush.bf16.msra.mxu3 %v5676_v37  ;;  %v5608_v32 = vor.u32 %v7523_v28, %v5607_v27 }
  0x50   :  { %944 = vmatpush.bf16.msra.mxu2 %v5688_v21  ;;  %v7522_v21 = vld [vmem:[%s12285_s2 + $0x2c] sm:$0xf0] }
  0x51   :  { %920 = vmatpush.bf16.msra.mxu0 %v5648_v41  ;;  %v5600_v25 = vor.u32 %v7522_v21, %v5599_v20  ;;  %v5583_v41 = vld [vmem:[%s12285_s2] sm:$0xf]  ;;  %v5815_v20 = vld [vmem:[%s12286_s3 + $0xd0] sm:$0xf0]  ;;  %v5821_v21 = vld [vmem:[%s12286_s3 + $0xc8] sm:$0xf] }
  0x52   :  { %933 = vmatpush.bf16.msra.mxu1 %v5652_v45  ;;  %959 = vmatpush.bf16.msra.mxu3 %v5660_v50  ;;  %v5584_v45 = vor.u32 %v7518_v42, %v5583_v41  ;;  %v7519_v50 = vld [vmem:[%s12285_s2 + $0x14] sm:$0xf0]  ;;  %v7558_v42 = vld [vmem:[%s12286_s3 + $0x4c] sm:$0xf0] }
  0x53   :  { %v5592_v60 = vor.u32 %v7519_v50, %v5591_v48  ;;  %v7571_v48 = vld [vmem:[%s12286_s3 + $0xb4] sm:$0xf0]  ;;  %v5807_v50 = vld [vmem:[%s12286_s3 + $0xb8] sm:$0xf0] }
  0x54   :  { %945 = vmatpush.bf16.msra.mxu2 %v5672_v33  ;;  %v7521_v33 = vld [vmem:[%s12285_s2 + $0x2c] sm:$0xf] }
  0x55   :  { %921 = vmatpush.bf16.msra.mxu0 %v5632_v57  ;;  %v5612_v36 = vor.u32 %v7521_v33, %v5609_v34  ;;  %v5593_v57 = vld [vmem:[%s12285_s2 + $0x18] sm:$0xf0] }
  0x56   :  { %934 = vmatpush.bf16.msra.mxu1 %v5636_v63  ;;  %960 = vmatpush.bf16.msra.mxu3 %v5644_v5  ;;  %v7578_v63 = vld [vmem:[%s12286_s3 + $0xec] sm:$0xf0]  ;;  %v5775_v34 = vld [vmem:[%s12286_s3 + $0x78] sm:$0xf0] }
  0x58   :  { %946 = vmatpush.bf16.msra.mxu2 %v5656_v46  ;;  %v7516_v46 = vld [vmem:[%s12285_s2 + $0x4] sm:$0xf] }
  0x59   :  { %922 = vmatpush.bf16.msra.mxu0 %v5616_v9  ;;  %v5588_v54 = vor.u32 %v7516_v46, %v5585_v47  ;;  %v5805_v46 = vld [vmem:[%s12286_s3 + $0xa8] sm:$0xf] }
  0x5a   :  { %935 = vmatpush.bf16.msra.mxu1 %v5620_v15  ;;  %961 = vmatpush.bf16.msra.mxu3 %v5628_v19  ;;  %v7574_v15 = vld [vmem:[%s12286_s3 + $0xcc] sm:$0xf0]  ;;  %v7572_v19 = vld [vmem:[%s12286_s3 + $0xc4] sm:$0xf] }
  0x5b   :  { %v5814_v18 = vor.u32 %v7574_v15, %v5813_v14  ;;  %v9022_v14 = vld [vmem:[%s12288_s1 + $0x78] sm:$0xff] }
  0x5c   :  { %947 = vmatpush.bf16.msra.mxu2 %v5640_v0 }
  0x5d   :  { %923 = vmatpush.bf16.msra.mxu0 %v5600_v25  ;;  %v7575_v25 = vld [vmem:[%s12286_s3 + $0xd4] sm:$0xf0] }
  0x5e   :  { %936 = vmatpush.bf16.msra.mxu1 %v5604_v31  ;;  %962 = vmatpush.bf16.msra.mxu3 %v5612_v36  ;;  %v5797_v31 = vld [vmem:[%s12286_s3 + $0xa0] sm:$0xf] }
  0x60   :  { %948 = vmatpush.bf16.msra.mxu2 %v5624_v16 }
  0x61   :  { %924 = vmatpush.bf16.msra.mxu0 %v5584_v45  ;;  %v5799_v45 = vld [vmem:[%s12286_s3 + $0xb0] sm:$0xf0] }
  0x62   :  { %937 = vmatpush.bf16.msra.mxu1 %v5588_v54  ;;  %v5806_v54 = vor.u32 %v7571_v48, %v5805_v46  ;;  %v5751_v46 = vld [vmem:[%s12286_s3 + $0x50] sm:$0xf0] }
  0x64   :  { %949 = vmatpush.bf16.msra.mxu2 %v5608_v32 }
  0x68   :  { %950 = vmatpush.bf16.msra.mxu2 %v5592_v60 }
  0x6c   :  { %1269 = vmatpush.bf16.msrb.mxu2 %v5838_v12 }
  0xa0   :  { %v275_v56 = vpop.f32.mrf.mxu0 }
  0xa1   :  { %v318_v61 = vadd.f32 %v275_v56, %v68_v49  ;;  %v288_v62 = vpop.f32.mrf.mxu1  ;;  %v7517_v56 = vld [vmem:[%s12285_s2 + $0xc] sm:$0xf] }
  0xa2   :  { %v319_v3 = vadd.f32 %v288_v62, %v69_v51  ;;  %v5829_v62 = vld [vmem:[%s12286_s3 + $0xe0] sm:$0xf] }
  0xa3   :  { %v5442_v6 = vmul.f32 -1.442695, %v318_v61  ;;  %v5596_v61 = vor.u32 %v7517_v56, %v5593_v57  ;;  %v5830_v1 = vor.u32 %v7578_v63, %v5829_v62  ;;  %v5781_v57 = vld [vmem:[%s12286_s3 + $0x80] sm:$0xf] }
  0xa4   :  { %v5443_v8 = vmul.f32 -1.442695, %v319_v3  ;;  %v5831_v3 = vld [vmem:[%s12286_s3 + $0xf0] sm:$0xf0] }
  0xa5   :  { %7965 = vpow2.f32 %v5442_v6  ;;  %963 = vmatpush.bf16.msra.mxu3 %v5596_v61  ;;  %v5834_v6 = vor.u32 %v7576_v2, %v5831_v3  ;;  %1243 = vmatpush.bf16.msrb.mxu0 %v5830_v1  ;;  %v5789_v1 = vld [vmem:[%s12286_s3 + $0x88] sm:$0xf]  ;;  %v7567_v2 = vld [vmem:[%s12286_s3 + $0x94] sm:$0xf0] }
  0xa6   :  { %7967 = vpow2.f32 %v5443_v8  ;;  %v5839_v8 = vld [vmem:[%s12286_s3 + $0xf8] sm:$0xf0]  ;;  %v5790_v15 = vor.u32 %v7567_v2, %v5789_v1  ;;  %v7553_v1 = vld [vmem:[%s12286_s3 + $0x2c] sm:$0xf] }
  0xa7   :  { %v5842_v13 = vor.u32 %v7577_v7, %v5839_v8  ;;  %1256 = vmatpush.bf16.msrb.mxu1 %v5834_v6  ;;  %v7565_v6 = vld [vmem:[%s12286_s3 + $0x8c] sm:$0xf]  ;;  %v5765_v7 = vld [vmem:[%s12286_s3 + $0x60] sm:$0xf]  ;;  %v5743_v2 = vld [vmem:[%s12286_s3 + $0x38] sm:$0xf0] }
  0xa8   :  { %v277_v24 = vpop.f32.mrf.mxu0 }
  0xa9   :  { %v314_v23 = vpop.f32.mrf.mxu3  ;;  %v290_v30 = vpop.f32.mrf.mxu1  ;;  %v8917_v24 = vld [vmem:[%s12288_s1 + $0x70] sm:$0xff]  ;;  %1282 = vmatpush.bf16.msrb.mxu3 %v5842_v13  ;;  %1244 = vmatpush.bf16.msrb.mxu0 %v5814_v18 }
  0xaa   :  { %v321_v29 = vadd.f32 %v314_v23, %v71_v11  ;;  %v5823_v30 = vld [vmem:[%s12286_s3 + $0xd8] sm:$0xf0]  ;;  %v394_v62 = vunpack.c.h.bf16 %v8917_v24  ;;  %v7560_v11 = vld [vmem:[%s12286_s3 + $0x64] sm:$0xf] }
  0xab   :  { %v7966_v37 = vpop.eup %7965  ;;  %v5826_v36 = vor.u32 %v7573_v26, %v5823_v30  ;;  %v5794_v26 = vor.u32 %v7565_v6, %v5791_v55 }
  0xac   :  { %v5444_v38 = vmul.f32 -1.442695, %v321_v29  ;;  %v7968_v39 = vpop.eup %7967  ;;  %v8821_v40 = vadd.f32 1.0, %v7966_v37  ;;  %v5818_v29 = vor.u32 %v7572_v19, %v5815_v20  ;;  %v7570_v37 = vld [vmem:[%s12286_s3 + $0xac] sm:$0xf0] }
  0xad   :  { %v8829_v43 = vadd.f32 1.0, %v7968_v39  ;;  %1283 = vmatpush.bf16.msrb.mxu3 %v5826_v36 }
  0xae   :  { %v301_v35 = vpop.f32.mrf.mxu2  ;;  %7969 = vpow2.f32 %v5444_v38  ;;  %v336_v49 = vand.u32 2147483647, %v8821_v40  ;;  %v338_v52 = vand.u32 2147483648, %v8821_v40  ;;  %vm332_vm0 = vweird.f32 %v8821_v40  ;;  %v7568_v38 = vld [vmem:[%s12286_s3 + $0xa4] sm:$0xf]  ;;  %1257 = vmatpush.bf16.msrb.mxu1 %v5818_v29 }
  0xaf   :  { %7971 = vrcp.f32 %v8821_v40  ;;  %v357_v51 = vand.u32 2147483648, %v8829_v43  ;;  %v320_v58 = vadd.f32 %v301_v35, %v70_v44  ;;  %v355_v59 = vand.u32 2147483647, %v8829_v43  ;;  %v7561_v29 = vld [vmem:[%s12286_s3 + $0x6c] sm:$0xf] }
  0xb0   :  { %7973 = vrcp.f32 %v8829_v43  ;;  %vm8885_vm1 = vcmp.eq.f32.partialorder %v336_v49, 8.507059e+37  ;;  %vm351_vm3 = vweird.f32 %v8829_v43  ;;  %v339_v28 = vor.u32 1.1754944e-38, %v338_v52  ;;  %v7569_v49 = vld [vmem:[%s12286_s3 + $0xac] sm:$0xf] }
  0xb1   :  { %v316_v53 = vpop.f32.mrf.mxu3  ;;  %7975 = vtanh.f32 %v320_v58  ;;  %v358_v33 = vor.u32 1.1754944e-38, %v357_v51  ;;  %v5822_v35 = vor.u32 %v7575_v25, %v5821_v21  ;;  %vm8954_vm7 = vcmp.eq.f32.partialorder %v355_v59, 8.507059e+37  ;;  %v7566_v58 = vld [vmem:[%s12286_s3 + $0x8c] sm:$0xf0]  ;;  %v7564_v59 = vld [vmem:[%s12286_s3 + $0x84] sm:$0xf] }
  0xb2   :  { %v5798_v44 = vor.u32 %v7570_v37, %v5797_v31  ;;  %v5802_v47 = vor.u32 %v7568_v38, %v5799_v45  ;;  %v393_v53 = vunpack.c.l.bf16 %v8917_v24  ;;  %v5810_v56 = vor.u32 %v7569_v49, %v5807_v50  ;;  %v5767_v21 = vld [vmem:[%s12286_s3 + $0x70] sm:$0xf0]  ;;  %v7557_v50 = vld [vmem:[%s12286_s3 + $0x4c] sm:$0xf] }
  0xb3   :  { %1270 = vmatpush.bf16.msrb.mxu2 %v5822_v35  ;;  %v5782_v63 = vor.u32 %v7566_v58, %v5781_v57  ;;  %v5749_v35 = vld [vmem:[%s12286_s3 + $0x40] sm:$0xf]  ;;  %v7554_v57 = vld [vmem:[%s12286_s3 + $0x2c] sm:$0xf0] }
  0xb4   :  { %v7970_v5 = vpop.eup %7969  ;;  %1245 = vmatpush.bf16.msrb.mxu0 %v5798_v44  ;;  %1258 = vmatpush.bf16.msrb.mxu1 %v5802_v47  ;;  %v7556_v44 = vld [vmem:[%s12286_s3 + $0x44] sm:$0xf]  ;;  %v7559_v47 = vld [vmem:[%s12286_s3 + $0x54] sm:$0xf0]  ;;  %v5750_v49 = vor.u32 %v7558_v42, %v5749_v35 }
  0xb5   :  { %v8881_v9 = vpop.eup %7971  ;;  %v8883_v10 = vadd.f32 1.0, %v7970_v5  ;;  %1284 = vmatpush.bf16.msrb.mxu3 %v5810_v56  ;;  %v5733_v56 = vld [vmem:[%s12286_s3 + $0x20] sm:$0xf] }
  0xb6   :  { %v303_v0 = vpop.f32.mrf.mxu2  ;;  %v8895_v16 = vpop.eup %7973  ;;  %v328_v17 = vmul.f32 %v8881_v9, %v8821_v40  ;;  %vm333_vm2 = vweird.f32 %v8881_v9  ;;  %v5778_v40 = vor.u32 %v7561_v29, %v5775_v34  ;;  %v5734_v6 = vor.u32 %v7554_v57, %v5733_v56 }
  0xb7   :  { %v347_v22 = vmul.f32 %v8895_v16, %v8829_v43  ;;  %7977 = vrcp.f32 %v8883_v10  ;;  %v375_v23 = vand.u32 2147483647, %v8883_v10  ;;  %vm352_vm4 = vweird.f32 %v8895_v16  ;;  %vm8936_vm5 = vmor %vm332_vm0, %vm333_vm2  ;;  %v7976_v51 = vpop.eup %7975  ;;  %v5783_v0 = vld [vmem:[%s12286_s3 + $0x90] sm:$0xf0]  ;;  %1271 = vmatpush.bf16.msrb.mxu2 %v5806_v54 }
  0xb8   :  { %v329_v27 = vsub.f32 1.0, %v328_v17  ;;  %v377_v39 = vand.u32 2147483648, %v8883_v10  ;;  %vm8950_vm6 = vmor %vm351_vm3, %vm352_vm4  ;;  %vm371_vm8 = vweird.f32 %v8883_v10  ;;  %v5786_v5 = vor.u32 %v7564_v59, %v5783_v0  ;;  %v7562_v17 = vld [vmem:[%s12286_s3 + $0x6c] sm:$0xf0]  ;;  %1246 = vmatpush.bf16.msrb.mxu0 %v5782_v63  ;;  %v5741_v63 = vld [vmem:[%s12286_s3 + $0x28] sm:$0xf] }
  0xb9   :  { %v348_v32 = vsub.f32 1.0, %v347_v22  ;;  %v5773_v22 = vld [vmem:[%s12286_s3 + $0x68] sm:$0xf]  ;;  %1285 = vmatpush.bf16.msrb.mxu3 %v5794_v26  ;;  %vm9092_vm11 = vcmp.eq.f32.partialorder %v375_v23, 8.507059e+37  ;;  %v5754_v54 = vor.u32 %v7556_v44, %v5751_v46  ;;  %v7555_v0 = vld [vmem:[%s12286_s3 + $0x34] sm:$0xf0]  ;;  %v395_v26 = vunpack.c.l.bf16 %v9022_v14 }
  0xba   :  { %v330_v41 = vmul.f32 %v8881_v9, %v329_v27  ;;  %v5766_v27 = vor.u32 %v7562_v17, %v5765_v7  ;;  %1259 = vmatpush.bf16.msrb.mxu1 %v5786_v5  ;;  %v378_v48 = vor.u32 1.1754944e-38, %v377_v39  ;;  %v5742_v17 = vor.u32 %v7555_v0, %v5741_v63 }
  0xbb   :  { %v349_v43 = vmul.f32 %v8895_v16, %v348_v32  ;;  %v396_v32 = vunpack.c.h.bf16 %v9022_v14  ;;  %1272 = vmatpush.bf16.msrb.mxu2 %v5790_v15 }
  0xbc   :  { %v331_v52 = vadd.f32 %v8881_v9, %v330_v41  ;;  %1247 = vmatpush.bf16.msrb.mxu0 %v5766_v27 }
  0xbd   :  { %v8985_v60 = vpop.eup %7977  ;;  %v350_v61 = vadd.f32 %v8895_v16, %v349_v43  ;;  %v5757_v43 = vld [vmem:[%s12286_s3 + $0x48] sm:$0xf]  ;;  %1286 = vmatpush.bf16.msrb.mxu3 %v5778_v40 }
  0xbe   :  { %v367_v3 = vmul.f32 %v8985_v60, %v8883_v10  ;;  %v335_v4 = vsel %vm8936_vm5, %v8881_v9, %v331_v52  ;;  %vm372_vm9 = vweird.f32 %v8985_v60  ;;  %v5758_v10 = vor.u32 %v7559_v47, %v5757_v43 }
  0xbf   :  { %v340_v8 = vsel %vm8885_vm1, %v339_v28, %v335_v4  ;;  %v354_v9 = vsel %vm8950_vm6, %v8895_v16, %v350_v61  ;;  %v7563_v28 = vld [vmem:[%s12286_s3 + $0x74] sm:$0xf0]  ;;  %vm9056_vm10 = vmor %vm371_vm8, %vm372_vm9 }
  0xc0   :  { %v600_v12 = vpop.f32.mrf.mxu0  ;;  %v368_v18 = vsub.f32 1.0, %v367_v3  ;;  %v359_v16 = vsel %vm8954_vm7, %v358_v33, %v354_v9  ;;  %v382_v19 = vmul.f32 %v7976_v51, %v340_v8  ;;  %v5770_v33 = vor.u32 %v7560_v11, %v5767_v21  ;;  %v5759_v51 = vld [vmem:[%s12286_s3 + $0x58] sm:$0xf0]  ;;  %1248 = vmatpush.bf16.msrb.mxu0 %v5750_v49  ;;  %v5717_v8 = vld [vmem:[%s12286_s3] sm:$0xf] }
  0xc1   :  { %v613_v13 = vpop.f32.mrf.mxu1  ;;  %v643_v20 = vadd.f32 %v600_v12, %v393_v53  ;;  %v381_v24 = vmul.f32 0.0, %v359_v16  ;;  %v5774_v41 = vor.u32 %v7563_v28, %v5773_v22  ;;  %v5762_v23 = vor.u32 %v7557_v50, %v5759_v51  ;;  %v7550_v9 = vld [vmem:[%s12286_s3 + $0xc] sm:$0xf0]  ;;  %v7548_v12 = vld [vmem:[%s12286_s3 + $0x4] sm:$0xf] }
  0xc2   :  { %v644_v25 = vadd.f32 %v613_v13, %v394_v62  ;;  %v369_v30 = vmul.f32 %v8985_v60, %v368_v18  ;;  %1260 = vmatpush.bf16.msrb.mxu1 %v5770_v33  ;;  %v5735_v62 = vld [vmem:[%s12286_s3 + $0x30] sm:$0xf0]  ;;  %v5746_v11 = vor.u32 %v7553_v1, %v5743_v2  ;;  %v5725_v16 = vld [vmem:[%s12286_s3 + $0x8] sm:$0xf]  ;;  %v7551_v21 = vld [vmem:[%s12286_s3 + $0x14] sm:$0xf0]  ;;  %v5718_v29 = vor.u32 %v7550_v9, %v5717_v8 }
  0xc3   :  { %v5575_v31 = vmul.f32 -1.442695, %v643_v20  ;;  %v9060_v37 = vadd.f32 %v382_v19, %v381_v24  ;;  %1273 = vmatpush.bf16.msrb.mxu2 %v5774_v41  ;;  %1287 = vmatpush.bf16.msrb.mxu3 %v5762_v23  ;;  %v5719_v18 = vld [vmem:[%s12286_s3 + $0x10] sm:$0xf0]  ;;  %v7549_v22 = vld [vmem:[%s12286_s3 + $0xc] sm:$0xf] }
  0xc4   :  { %v5576_v38 = vmul.f32 -1.442695, %v644_v25  ;;  %v370_v45 = vadd.f32 %v8985_v60, %v369_v30  ;;  %v5727_v24 = vld [vmem:[%s12286_s3 + $0x18] sm:$0xf0]  ;;  %1249 = vmatpush.bf16.msrb.mxu0 %v5734_v6  ;;  %v5722_v30 = vor.u32 %v7548_v12, %v5719_v18  ;;  %v5963_v8 = vld [vmem:[%s12285_s2 + $0xe0] sm:$0xf] }
  0xc5   :  { %7979 = vpow2.f32 %v5575_v31  ;;  %v5726_v31 = vor.u32 %v7551_v21, %v5725_v16  ;;  %v7610_v9 = vld [vmem:[%s12285_s2 + $0xec] sm:$0xf0]  ;;  %v7608_v12 = vld [vmem:[%s12285_s2 + $0xe4] sm:$0xf] }
  0xc6   :  { %7981 = vtanh.f32 %v9060_v37  ;;  %v374_v53 = vsel %vm9056_vm10, %v8985_v60, %v370_v45  ;;  %v7552_v60 = vld [vmem:[%s12286_s3 + $0x24] sm:$0xf]  ;;  %1261 = vmatpush.bf16.msrb.mxu1 %v5754_v54 }
  0xc7   :  { %7983 = vpow2.f32 %v5576_v38  ;;  %v639_v52 = vpop.f32.mrf.mxu3  ;;  %v379_v5 = vsel %vm9092_vm11, %v378_v48, %v374_v53  ;;  %v5738_v7 = vor.u32 %v7552_v60, %v5735_v62  ;;  %1274 = vmatpush.bf16.msrb.mxu2 %v5758_v10  ;;  %1288 = vmatpush.bf16.msrb.mxu3 %v5746_v11  ;;  %v7611_v11 = vld [vmem:[%s12285_s2 + $0xf4] sm:$0xf0] }
  0xc8   :  { %v646_v58 = vadd.f32 %v639_v52, %v396_v32  ;;  %v602_v59 = vpop.f32.mrf.mxu0  ;;  %v5730_v32 = vor.u32 %v7549_v22, %v5727_v24  ;;  %1250 = vmatpush.bf16.msrb.mxu0 %v5718_v29  ;;  %v5947_v22 = vld [vmem:[%s12285_s2 + $0xc0] sm:$0xf]  ;;  %v7606_v24 = vld [vmem:[%s12285_s2 + $0xcc] sm:$0xf0]  ;;  %v7607_v29 = vld [vmem:[%s12285_s2 + $0xd4] sm:$0xf0] }
  0xc9   :  { %v615_v61 = vpop.f32.mrf.mxu1 }
  0xca   :  { %v5577_v3 = vmul.f32 -1.442695, %v646_v58  ;;  %1262 = vmatpush.bf16.msrb.mxu1 %v5738_v7 }
  0xcb   :  { %v7980_v55 = vpop.eup %7979  ;;  %1275 = vmatpush.bf16.msrb.mxu2 %v5742_v17  ;;  %1289 = vmatpush.bf16.msrb.mxu3 %v5730_v32  ;;  %v5971_v17 = vld [vmem:[%s12285_s2 + $0xe8] sm:$0xf]  ;;  %v7605_v32 = vld [vmem:[%s12285_s2 + $0xcc] sm:$0xf] }
  0xcc   :  { %v626_v4 = vpop.f32.mrf.mxu2  ;;  %v7982_v13 = vpop.eup %7981  ;;  %v9131_v15 = vadd.f32 1.0, %v7980_v55  ;;  %7985 = vpow2.f32 %v5577_v3  ;;  %v5972_v16 = vor.u32 %v7611_v11, %v5971_v17 }
  0xcd   :  { %v7984_v19 = vpop.eup %7983  ;;  %v385_v20 = vmul.f32 %v7982_v13, %v379_v5  ;;  %v645_v34 = vadd.f32 %v626_v4, %v395_v26  ;;  %v5964_v13 = vor.u32 %v7610_v9, %v5963_v8  ;;  %v5948_v26 = vor.u32 %v7606_v24, %v5947_v22  ;;  %v7595_v8 = vld [vmem:[%s12285_s2 + $0x74] sm:$0xf0]  ;;  %v5885_v24 = vld [vmem:[%s12285_s2 + $0x50] sm:$0xf0] }
  0xce   :  { %7987 = vrcp.f32 %v9131_v15  ;;  %v670_v25 = vadd.f32 1.0, %v7984_v19  ;;  %1263 = vmatpush.bf16.msrb.mxu1 %v5722_v30  ;;  %v663_v44 = vand.u32 2147483648, %v9131_v15  ;;  %v661_v43 = vand.u32 2147483647, %v9131_v15  ;;  %v7609_v19 = vld [vmem:[%s12285_s2 + $0xec] sm:$0xf] }
  0xcf   :  { %v641_v27 = vpop.f32.mrf.mxu3  ;;  %v388_v28 = vpack.c.bf16 %v385_v20, %v385_v20  ;;  %1276 = vmatpush.bf16.msrb.mxu2 %v5726_v31  ;;  %vm657_vm13 = vweird.f32 %v9131_v15  ;;  %v5973_v20 = vld [vmem:[%s12285_s2 + $0xf8] sm:$0xf0] }
  0xd0   :  { %7989 = vrcp.f32 %v670_v25  ;;  %v682_v47 = vand.u32 2147483648, %v670_v25  ;;  %v680_v51 = vand.u32 2147483647, %v670_v25  ;;  %v664_v39 = vor.u32 1.1754944e-38, %v663_v44  ;;  %v5949_v27 = vld [vmem:[%s12285_s2 + $0xd0] sm:$0xf0] }
  0xd1   :  { %389 = vst [vmem:[%s12289_s4] sm:$0xf] %v388_v28  ;;  %925 = vmatmul.bf16.vlgmr.msra.gmra.mxu0 %v388_v28  ;;  %938 = vmatmul.bf16.vlgmr.msra.gmra.mxu1 %v388_v28  ;;  %vm676_vm0 = vweird.f32 %v670_v25  ;;  %vm662_vm1 = vcmp.eq.f32.partialorder %v661_v43, 8.507059e+37  ;;  %v5976_v21 = vor.u32 %v7609_v19, %v5973_v20  ;;  %v5941_v43 = vld [vmem:[%s12285_s2 + $0xb8] sm:$0xf0]  ;;  %v5883_v19 = vld [vmem:[%s12285_s2 + $0x40] sm:$0xf] }
  0xd2   :  { %v7986_v33 = vpop.eup %7985  ;;  %951 = vmatmul.bf16.vlgmr.msra.gmra.mxu2 %v388_v28  ;;  %964 = vmatmul.bf16.vlgmr.msra.gmra.mxu3 %v388_v28  ;;  %v683_v57 = vor.u32 1.1754944e-38, %v682_v47  ;;  %vm681_vm3 = vcmp.eq.f32.partialorder %v680_v51, 8.507059e+37  ;;  %v5955_v28 = vld [vmem:[%s12285_s2 + $0xc8] sm:$0xf]  ;;  %v5579_v47 = vld [vmem:[%s12287_s0 + $0x10] sm:$0xff] }
  0xd3   :  { %v690_v35 = vadd.f32 1.0, %v7986_v33  ;;  %1569 = vmatpush.bf16.msra.mxu0 %v5964_v13  ;;  %1595 = vmatpush.bf16.msra.mxu2 %v5972_v16  ;;  %v5956_v31 = vor.u32 %v7607_v29, %v5955_v28  ;;  %v5957_v33 = vld [vmem:[%s12285_s2 + $0xd8] sm:$0xf0]  ;;  %v7596_v51 = vld [vmem:[%s12285_s2 + $0x84] sm:$0xf] }
  0xd4   :  { %v628_v14 = vpop.f32.mrf.mxu2  ;;  %v7988_v36 = vpop.eup %7987  ;;  %1608 = vmatpush.bf16.msra.mxu3 %v5976_v21  ;;  %v7593_v13 = vld [vmem:[%s12285_s2 + $0x6c] sm:$0xf]  ;;  %v7590_v20 = vld [vmem:[%s12285_s2 + $0x4c] sm:$0xf0]  ;;  %v7588_v21 = vld [vmem:[%s12285_s2 + $0x44] sm:$0xf] }
  0xd5   :  { %v653_v38 = vmul.f32 %v7988_v36, %v9131_v15  ;;  %7991 = vrcp.f32 %v690_v35  ;;  %vm658_vm12 = vweird.f32 %v7988_v36  ;;  %v702_v1 = vand.u32 2147483648, %v690_v35  ;;  %v5965_v15 = vld [vmem:[%s12285_s2 + $0xf0] sm:$0xf0]  ;;  %v5931_v14 = vld [vmem:[%s12285_s2 + $0xa0] sm:$0xf] }
  0xd6   :  { %v7990_v41 = vpop.eup %7989  ;;  %7993 = vtanh.f32 %v645_v34  ;;  %vm659_vm15 = vmor %vm657_vm13, %vm658_vm12  ;;  %vm696_vm5 = vweird.f32 %v690_v35  ;;  %v700_v2 = vand.u32 2147483647, %v690_v35  ;;  %v5968_v18 = vor.u32 %v7608_v12, %v5965_v15  ;;  %v5909_v15 = vld [vmem:[%s12285_s2 + $0x78] sm:$0xf0]  ;;  %v7589_v28 = vld [vmem:[%s12285_s2 + $0x4c] sm:$0xf] }
  0xd7   :  { %v654_v40 = vsub.f32 1.0, %v653_v38  ;;  %v672_v42 = vmul.f32 %v7990_v41, %v670_v25  ;;  %vm677_vm14 = vweird.f32 %v7990_v41  ;;  %v703_v4 = vor.u32 1.1754944e-38, %v702_v1  ;;  %v7604_v25 = vld [vmem:[%s12285_s2 + $0xc4] sm:$0xf]  ;;  %1570 = vmatpush.bf16.msra.mxu0 %v5948_v26  ;;  %1596 = vmatpush.bf16.msra.mxu2 %v5956_v31  ;;  %v5899_v1 = vld [vmem:[%s12285_s2 + $0x60] sm:$0xf] }
  0xd8   :  { %vm678_vm2 = vmor %vm676_vm0, %vm677_vm14  ;;  %vm701_vm7 = vcmp.eq.f32.partialorder %v700_v2, 8.507059e+37  ;;  %1582 = vmatpush.bf16.msra.mxu1 %v5968_v18  ;;  %v5952_v30 = vor.u32 %v7604_v25, %v5949_v27  ;;  %v5960_v34 = vor.u32 %v7605_v32, %v5957_v33  ;;  %v7594_v2 = vld [vmem:[%s12285_s2 + $0x6c] sm:$0xf0]  ;;  %v5912_v18 = vor.u32 %v7593_v13, %v5909_v15  ;;  %v5891_v25 = vld [vmem:[%s12285_s2 + $0x48] sm:$0xf] }
  0xd9   :  { %v673_v45 = vsub.f32 1.0, %v672_v42  ;;  %v655_v46 = vmul.f32 %v7988_v36, %v654_v40  ;;  %v5939_v40 = vld [vmem:[%s12285_s2 + $0xa8] sm:$0xf]  ;;  %v7603_v42 = vld [vmem:[%s12285_s2 + $0xb4] sm:$0xf0]  ;;  %v5884_v22 = vor.u32 %v7590_v20, %v5883_v19  ;;  %v5888_v26 = vor.u32 %v7588_v21, %v5885_v24 }
  0xda   :  { %1609 = vmatpush.bf16.msra.mxu3 %v5960_v34  ;;  %v7591_v27 = vld [vmem:[%s12285_s2 + $0x54] sm:$0xf0]  ;;  %v5893_v29 = vld [vmem:[%s12285_s2 + $0x58] sm:$0xf0]  ;;  %v7640_v13 = vld [vmem:[%s12286_s3 + $0xe4] sm:$0xf] }
  0xdb   :  { %v7992_v48 = vpop.eup %7991  ;;  %v674_v49 = vmul.f32 %v7990_v41, %v673_v45  ;;  %v656_v50 = vadd.f32 %v7988_v36, %v655_v46  ;;  %v5940_v45 = vor.u32 %v7603_v42, %v5939_v40  ;;  %v7601_v46 = vld [vmem:[%s12285_s2 + $0xac] sm:$0xf]  ;;  %v5892_v32 = vor.u32 %v7591_v27, %v5891_v25  ;;  %v5869_v42 = vld [vmem:[%s12285_s2 + $0x30] sm:$0xf0]  ;;  %v7643_v19 = vld [vmem:[%s12286_s3 + $0xf4] sm:$0xf0] }
  0xdc   :  { %v7994_v52 = vpop.eup %7993  ;;  %v692_v53 = vmul.f32 %v7992_v48, %v690_v35  ;;  %vm697_vm4 = vweird.f32 %v7992_v48  ;;  %1583 = vmatpush.bf16.msra.mxu1 %v5952_v30  ;;  %v7602_v35 = vld [vmem:[%s12285_s2 + $0xac] sm:$0xf0]  ;;  %v5896_v33 = vor.u32 %v7589_v28, %v5893_v29  ;;  %v6099_v15 = vld [vmem:[%s12286_s3 + $0xf0] sm:$0xf0]  ;;  %v7641_v20 = vld [vmem:[%s12286_s3 + $0xec] sm:$0xf] }
  0xdd   :  { %v660_v54 = vsel %vm659_vm15, %v7988_v36, %v656_v50  ;;  %v675_v56 = vadd.f32 %v7990_v41, %v674_v49  ;;  %vm698_vm6 = vmor %vm696_vm5, %vm697_vm4  ;;  %v7600_v36 = vld [vmem:[%s12285_s2 + $0xa4] sm:$0xf]  ;;  %v5932_v38 = vor.u32 %v7602_v35, %v5931_v14  ;;  %1597 = vmatpush.bf16.msra.mxu2 %v5940_v45  ;;  %v5915_v49 = vld [vmem:[%s12285_s2 + $0x80] sm:$0xf] }
  0xde   :  { %v693_v58 = vsub.f32 1.0, %v692_v53  ;;  %v665_v59 = vsel %vm662_vm1, %v664_v39, %v660_v54  ;;  %v7598_v50 = vld [vmem:[%s12285_s2 + $0x8c] sm:$0xf0]  ;;  %v5917_v53 = vld [vmem:[%s12285_s2 + $0x90] sm:$0xf0] }
  0xdf   :  { %v679_v61 = vsel %vm678_vm2, %v7990_v41, %v675_v56  ;;  %v707_v10 = vmul.f32 %v7994_v52, %v665_v59  ;;  %v5933_v41 = vld [vmem:[%s12285_s2 + $0xb0] sm:$0xf0]  ;;  %1571 = vmatpush.bf16.msra.mxu0 %v5932_v38  ;;  %v5916_v52 = vor.u32 %v7598_v50, %v5915_v49  ;;  %v5923_v39 = vld [vmem:[%s12285_s2 + $0x88] sm:$0xf]  ;;  %v7599_v54 = vld [vmem:[%s12285_s2 + $0x94] sm:$0xf0]  ;;  %v719_v56 = vunpack.c.l.bf16 %v5579_v47 }
  0xe0   :  { %v694_v23 = vmul.f32 %v7992_v48, %v693_v58  ;;  %v684_v60 = vsel %vm681_vm3, %v683_v57, %v679_v61  ;;  %v5936_v44 = vor.u32 %v7600_v36, %v5933_v41  ;;  %v720_v57 = vunpack.c.h.bf16 %v5579_v47  ;;  %v7597_v61 = vld [vmem:[%s12285_s2 + $0x8c] sm:$0xf]  ;;  %v5867_v36 = vld [vmem:[%s12285_s2 + $0x20] sm:$0xf]  ;;  %v7586_v38 = vld [vmem:[%s12285_s2 + $0x2c] sm:$0xf0] }
  0xe1   :  { %v706_v62 = vmul.f32 0.0, %v684_v60  ;;  %v5920_v58 = vor.u32 %v7596_v51, %v5917_v53  ;;  %v5924_v59 = vor.u32 %v7599_v54, %v5923_v39  ;;  %v9265_v60 = vld [vmem:[%s12287_s0 + $0x18] sm:$0xff]  ;;  %v7584_v41 = vld [vmem:[%s12285_s2 + $0x24] sm:$0xf]  ;;  %v5868_v40 = vor.u32 %v7586_v38, %v5867_v36  ;;  %v5851_v54 = vld [vmem:[%s12285_s2] sm:$0xf] }
  0xe2   :  { %v695_v0 = vadd.f32 %v7992_v48, %v694_v23  ;;  %1584 = vmatpush.bf16.msra.mxu1 %v5936_v44  ;;  %v722_v16 = vunpack.c.h.bf16 %v9265_v60  ;;  %v5875_v44 = vld [vmem:[%s12285_s2 + $0x28] sm:$0xf]  ;;  %v7587_v45 = vld [vmem:[%s12285_s2 + $0x34] sm:$0xf0]  ;;  %v5877_v49 = vld [vmem:[%s12285_s2 + $0x38] sm:$0xf0]  ;;  %v721_v39 = vunpack.c.l.bf16 %v9265_v60 }
  0xe3   :  { %v9157_v63 = vadd.f32 %v707_v10, %v706_v62  ;;  %v5925_v10 = vld [vmem:[%s12285_s2 + $0x98] sm:$0xf0]  ;;  %1572 = vmatpush.bf16.msra.mxu0 %v5916_v52  ;;  %1598 = vmatpush.bf16.msra.mxu2 %v5924_v59  ;;  %v5876_v47 = vor.u32 %v7587_v45, %v5875_v44  ;;  %v7580_v59 = vld [vmem:[%s12285_s2 + $0x4] sm:$0xf]  ;;  %v6081_v25 = vld [vmem:[%s12286_s3 + $0xc0] sm:$0xf] }
  0xe4   :  { %v699_v3 = vsel %vm698_vm6, %v7992_v48, %v695_v0  ;;  %v5944_v48 = vor.u32 %v7601_v46, %v5941_v43  ;;  %v5928_v23 = vor.u32 %v7597_v61, %v5925_v10  ;;  %v5872_v43 = vor.u32 %v7584_v41, %v5869_v42  ;;  %v5853_v61 = vld [vmem:[%s12285_s2 + $0x10] sm:$0xf0]  ;;  %v5859_v10 = vld [vmem:[%s12285_s2 + $0x8] sm:$0xf]  ;;  %v6107_v24 = vld [vmem:[%s12286_s3 + $0xf8] sm:$0xf0] }
  0xe5   :  { %7995 = vtanh.f32 %v9157_v63  ;;  %v704_v6 = vsel %vm701_vm7, %v703_v4, %v699_v3  ;;  %v7592_v3 = vld [vmem:[%s12285_s2 + $0x64] sm:$0xf]  ;;  %v6110_v36 = vor.u32 %v7641_v20, %v6107_v24  ;;  %v6091_v42 = vld [vmem:[%s12286_s3 + $0xd8] sm:$0xf0]  ;;  %v9529_v24 = vld [vmem:[%s12288_s1 + $0x68] sm:$0xff] }
  0xe6   :  { %1610 = vmatpush.bf16.msra.mxu3 %v5944_v48  ;;  %1585 = vmatpush.bf16.msra.mxu1 %v5920_v58  ;;  %v7585_v48 = vld [vmem:[%s12285_s2 + $0x2c] sm:$0xf]  ;;  %v7636_v29 = vld [vmem:[%s12286_s3 + $0xc4] sm:$0xf] }
  0xe7   :  { %v5880_v51 = vor.u32 %v7585_v48, %v5877_v49  ;;  %v6065_v49 = vld [vmem:[%s12286_s3 + $0xa0] sm:$0xf] }
  0xea   :  { %1611 = vmatpush.bf16.msra.mxu3 %v5928_v23 }
  0xeb   :  { %v7996_v5 = vpop.eup %7995 }
  0xec   :  { %v710_v55 = vmul.f32 %v7996_v5, %v704_v6  ;;  %v5900_v6 = vor.u32 %v7594_v2, %v5899_v1  ;;  %v5856_v2 = vor.u32 %v7580_v59, %v5853_v61  ;;  %v6073_v61 = vld [vmem:[%s12286_s3 + $0xa8] sm:$0xf] }
  0xee   :  { %v713_v7 = vpack.c.bf16 %v710_v55, %v710_v55  ;;  %v5901_v55 = vld [vmem:[%s12285_s2 + $0x70] sm:$0xf0]  ;;  %1573 = vmatpush.bf16.msra.mxu0 %v5900_v6  ;;  %1612 = vmatpush.bf16.msra.mxu3 %v5912_v18 }
  0xef   :  { %v5904_v9 = vor.u32 %v7592_v3, %v5901_v55 }
  0xf0   :  { %5578 = vst [vmem:[%s12290_s5 + $0x1c] sm:$0xf] %v713_v7  ;;  %1251 = vmatmul.bf16.vlgmr.msrb.gmra.mxu0 %v713_v7  ;;  %1264 = vmatmul.bf16.vlgmr.msrb.gmra.mxu1 %v713_v7 }
  0xf1   :  { %1277 = vmatmul.bf16.vlgmr.msrb.gmra.mxu2 %v713_v7  ;;  %1290 = vmatmul.bf16.vlgmr.msrb.gmra.mxu3 %v713_v7  ;;  %v5907_v7 = vld [vmem:[%s12285_s2 + $0x68] sm:$0xf] }
  0xf2   :  { %v5908_v12 = vor.u32 %v7595_v8, %v5907_v7  ;;  %1586 = vmatpush.bf16.msra.mxu1 %v5904_v9  ;;  %1574 = vmatpush.bf16.msra.mxu0 %v5884_v22  ;;  %v6097_v7 = vld [vmem:[%s12286_s3 + $0xe0] sm:$0xf]  ;;  %v7642_v8 = vld [vmem:[%s12286_s3 + $0xec] sm:$0xf0] }
  0xf3   :  { %1613 = vmatpush.bf16.msra.mxu3 %v5896_v33  ;;  %v7624_v33 = vld [vmem:[%s12286_s3 + $0x64] sm:$0xf] }
  0xf4   :  { %1599 = vmatpush.bf16.msra.mxu2 %v5908_v12  ;;  %v6098_v12 = vor.u32 %v7642_v8, %v6097_v7  ;;  %v7628_v8 = vld [vmem:[%s12286_s3 + $0x84] sm:$0xf] }
  0xf6   :  { %1587 = vmatpush.bf16.msra.mxu1 %v5888_v26  ;;  %1575 = vmatpush.bf16.msra.mxu0 %v5868_v40  ;;  %v7638_v26 = vld [vmem:[%s12286_s3 + $0xcc] sm:$0xf0]  ;;  %v7637_v40 = vld [vmem:[%s12286_s3 + $0xcc] sm:$0xf] }
  0xf7   :  { %1614 = vmatpush.bf16.msra.mxu3 %v5880_v51  ;;  %v6082_v38 = vor.u32 %v7638_v26, %v6081_v25  ;;  %v6094_v51 = vor.u32 %v7637_v40, %v6091_v42  ;;  %v6059_v26 = vld [vmem:[%s12286_s3 + $0x98] sm:$0xf0]  ;;  %v7627_v40 = vld [vmem:[%s12286_s3 + $0x74] sm:$0xf0]  ;;  %v7625_v42 = vld [vmem:[%s12286_s3 + $0x6c] sm:$0xf] }
  0xf8   :  { %1600 = vmatpush.bf16.msra.mxu2 %v5892_v32 }
  0xfa   :  { %1588 = vmatpush.bf16.msra.mxu1 %v5872_v43 }
  0xfc   :  { %1601 = vmatpush.bf16.msra.mxu2 %v5876_v47  ;;  %v9449_v47 = vld [vmem:[%s12288_s1 + $0x60] sm:$0xff] }
  0xfe   :  { %1589 = vmatpush.bf16.msra.mxu1 %v5856_v2 }
 0x14e   :  { %v926_v62 = vpop.f32.mrf.mxu0  ;;  %v939_v0 = vpop.f32.mrf.mxu1 }
 0x14f   :  { %v969_v4 = vadd.f32 %v926_v62, %v719_v56  ;;  %v970_v5 = vadd.f32 %v939_v0, %v720_v57  ;;  %v7582_v56 = vld [vmem:[%s12285_s2 + $0xc] sm:$0xf0]  ;;  %v7583_v62 = vld [vmem:[%s12285_s2 + $0x14] sm:$0xf0] }
 0x150   :  { %v5852_v58 = vor.u32 %v7582_v56, %v5851_v54  ;;  %v5860_v3 = vor.u32 %v7583_v62, %v5859_v10  ;;  %v7635_v10 = vld [vmem:[%s12286_s3 + $0xb4] sm:$0xf0] }
 0x151   :  { %v5709_v17 = vmul.f32 -1.442695, %v969_v4  ;;  %v5710_v11 = vmul.f32 -1.442695, %v970_v5  ;;  %v7581_v4 = vld [vmem:[%s12285_s2 + $0xc] sm:$0xf]  ;;  %v6074_v2 = vor.u32 %v7635_v10, %v6073_v61 }
 0x152   :  { %1576 = vmatpush.bf16.msra.mxu0 %v5852_v58  ;;  %v5861_v5 = vld [vmem:[%s12285_s2 + $0x18] sm:$0xf0]  ;;  %1602 = vmatpush.bf16.msra.mxu2 %v5860_v3 }
 0x153   :  { %7997 = vpow2.f32 %v5709_v17  ;;  %v5864_v55 = vor.u32 %v7581_v4, %v5861_v5  ;;  %v6105_v17 = vld [vmem:[%s12286_s3 + $0xe8] sm:$0xf]  ;;  %v6075_v3 = vld [vmem:[%s12286_s3 + $0xb8] sm:$0xf0]  ;;  %v6049_v4 = vld [vmem:[%s12286_s3 + $0x80] sm:$0xf] }
 0x154   :  { %7999 = vpow2.f32 %v5710_v11  ;;  %v6106_v22 = vor.u32 %v7643_v19, %v6105_v17  ;;  %v7630_v5 = vld [vmem:[%s12286_s3 + $0x8c] sm:$0xf0]  ;;  %v7629_v19 = vld [vmem:[%s12286_s3 + $0x8c] sm:$0xf] }
 0x155   :  { %v952_v30 = vpop.f32.mrf.mxu2  ;;  %v965_v31 = vpop.f32.mrf.mxu3  ;;  %1615 = vmatpush.bf16.msra.mxu3 %v5864_v55  ;;  %v6050_v17 = vor.u32 %v7630_v5, %v6049_v4  ;;  %v6001_v5 = vld [vmem:[%s12286_s3 + $0x20] sm:$0xf] }
 0x156   :  { %v972_v34 = vadd.f32 %v965_v31, %v722_v16  ;;  %v928_v14 = vpop.f32.mrf.mxu0  ;;  %v941_v35 = vpop.f32.mrf.mxu1  ;;  %v971_v0 = vadd.f32 %v952_v30, %v721_v39  ;;  %v6102_v16 = vor.u32 %v7640_v13, %v6099_v15  ;;  %1895 = vmatpush.bf16.msrb.mxu0 %v6098_v12  ;;  %v6083_v30 = vld [vmem:[%s12286_s3 + $0xd0] sm:$0xf0]  ;;  %v6089_v31 = vld [vmem:[%s12286_s3 + $0xc8] sm:$0xf]  ;;  %1921 = vmatpush.bf16.msrb.mxu2 %v6106_v22  ;;  %v7619_v15 = vld [vmem:[%s12286_s3 + $0x34] sm:$0xf0] }
 0x157   :  { %v7639_v14 = vld [vmem:[%s12286_s3 + $0xd4] sm:$0xf0]  ;;  %v6086_v41 = vor.u32 %v7636_v29, %v6083_v30  ;;  %v6067_v39 = vld [vmem:[%s12286_s3 + $0xb0] sm:$0xf0]  ;;  %v6057_v12 = vld [vmem:[%s12286_s3 + $0x88] sm:$0xf] }
 0x158   :  { %v5711_v46 = vmul.f32 -1.442695, %v972_v34  ;;  %1908 = vmatpush.bf16.msrb.mxu1 %v6102_v16  ;;  %v6090_v48 = vor.u32 %v7639_v14, %v6089_v31  ;;  %v7631_v16 = vld [vmem:[%s12286_s3 + $0x94] sm:$0xf0] }
 0x159   :  { %v7998_v50 = vpop.eup %7997  ;;  %1934 = vmatpush.bf16.msrb.mxu3 %v6110_v36  ;;  %v6058_v25 = vor.u32 %v7631_v16, %v6057_v12 }
 0x15a   :  { %v8000_v52 = vpop.eup %7999  ;;  %v9340_v53 = vadd.f32 1.0, %v7998_v50  ;;  %8001 = vpow2.f32 %v5711_v46  ;;  %1896 = vmatpush.bf16.msrb.mxu0 %v6082_v38  ;;  %1922 = vmatpush.bf16.msrb.mxu2 %v6090_v48  ;;  %v6043_v46 = vld [vmem:[%s12286_s3 + $0x78] sm:$0xf0] }
 0x15b   :  { %v9349_v57 = vadd.f32 1.0, %v8000_v52  ;;  %v7634_v52 = vld [vmem:[%s12286_s3 + $0xac] sm:$0xf0] }
 0x15c   :  { %8003 = vrcp.f32 %v9340_v53  ;;  %v987_v1 = vand.u32 2147483647, %v9340_v53  ;;  %v989_v6 = vand.u32 2147483648, %v9340_v53  ;;  %vm983_vm9 = vweird.f32 %v9340_v53  ;;  %1909 = vmatpush.bf16.msrb.mxu1 %v6086_v41  ;;  %v6041_v41 = vld [vmem:[%s12286_s3 + $0x68] sm:$0xf] }
 0x15d   :  { %8005 = vrcp.f32 %v9349_v57  ;;  %v954_v23 = vpop.f32.mrf.mxu2  ;;  %v967_v60 = vpop.f32.mrf.mxu3  ;;  %v1008_v11 = vand.u32 2147483648, %v9349_v57  ;;  %v1006_v34 = vand.u32 2147483647, %v9349_v57  ;;  %v6066_v58 = vor.u32 %v7634_v52, %v6065_v49  ;;  %1935 = vmatpush.bf16.msrb.mxu3 %v6094_v51  ;;  %v7620_v52 = vld [vmem:[%s12286_s3 + $0x44] sm:$0xf] }
 0x15e   :  { %8007 = vtanh.f32 %v971_v0  ;;  %vm9426_vm10 = vcmp.eq.f32.partialorder %v987_v1, 8.507059e+37  ;;  %v990_v43 = vor.u32 1.1754944e-38, %v989_v6  ;;  %v7633_v23 = vld [vmem:[%s12286_s3 + $0xac] sm:$0xf]  ;;  %v1045_v0 = vunpack.c.l.bf16 %v9449_v47  ;;  %1923 = vmatpush.bf16.msrb.mxu2 %v6074_v2 }
 0x15f   :  { %v1009_v45 = vor.u32 1.1754944e-38, %v1008_v11  ;;  %v1046_v1 = vunpack.c.h.bf16 %v9449_v47  ;;  %vm1002_vm13 = vweird.f32 %v9349_v57  ;;  %v6078_v7 = vor.u32 %v7633_v23, %v6075_v3  ;;  %1897 = vmatpush.bf16.msrb.mxu0 %v6066_v58  ;;  %v7622_v47 = vld [vmem:[%s12286_s3 + $0x4c] sm:$0xf0]  ;;  %v7623_v58 = vld [vmem:[%s12286_s3 + $0x54] sm:$0xf0] }
 0x160   :  { %v8002_v9 = vpop.eup %8001  ;;  %vm9511_vm15 = vcmp.eq.f32.partialorder %v1006_v34, 8.507059e+37  ;;  %v6035_v34 = vld [vmem:[%s12286_s3 + $0x70] sm:$0xf0]  ;;  %v6042_v51 = vor.u32 %v7627_v40, %v6041_v41  ;;  %v6046_v23 = vor.u32 %v7625_v42, %v6043_v46  ;;  %v7613_v46 = vld [vmem:[%s12286_s3 + $0xc] sm:$0xf] }
 0x161   :  { %v9389_v18 = vadd.f32 1.0, %v8002_v9  ;;  %v6051_v9 = vld [vmem:[%s12286_s3 + $0x90] sm:$0xf0]  ;;  %1936 = vmatpush.bf16.msrb.mxu3 %v6078_v7 }
 0x162   :  { %v9397_v21 = vpop.eup %8003  ;;  %v6054_v11 = vor.u32 %v7628_v8, %v6051_v9  ;;  %1924 = vmatpush.bf16.msrb.mxu2 %v6058_v25 }
 0x163   :  { %v9408_v27 = vpop.eup %8005  ;;  %v979_v28 = vmul.f32 %v9397_v21, %v9340_v53  ;;  %vm984_vm8 = vweird.f32 %v9397_v21  ;;  %8009 = vrcp.f32 %v9389_v18  ;;  %v7632_v53 = vld [vmem:[%s12286_s3 + $0xa4] sm:$0xf]  ;;  %1898 = vmatpush.bf16.msrb.mxu0 %v6050_v17  ;;  %vm1022_vm1 = vweird.f32 %v9389_v18 }
 0x164   :  { %v998_v32 = vmul.f32 %v9408_v27, %v9349_v57  ;;  %vm9442_vm11 = vmor %vm983_vm9, %vm984_vm8  ;;  %v8008_v54 = vpop.eup %8007  ;;  %vm1003_vm12 = vweird.f32 %v9408_v27  ;;  %v6070_v59 = vor.u32 %v7632_v53, %v6067_v39  ;;  %v1048_v53 = vunpack.c.h.bf16 %v9529_v24  ;;  %v6003_v57 = vld [vmem:[%s12286_s3 + $0x30] sm:$0xf0] }
 0x165   :  { %v980_v35 = vsub.f32 1.0, %v979_v28  ;;  %vm9504_vm14 = vmor %vm1002_vm13, %vm1003_vm12  ;;  %v6033_v28 = vld [vmem:[%s12286_s3 + $0x60] sm:$0xf]  ;;  %v1028_v61 = vand.u32 2147483648, %v9389_v18 }
 0x166   :  { %v999_v44 = vsub.f32 1.0, %v998_v32  ;;  %1910 = vmatpush.bf16.msrb.mxu1 %v6070_v59  ;;  %v7626_v32 = vld [vmem:[%s12286_s3 + $0x6c] sm:$0xf0]  ;;  %v1026_v59 = vand.u32 2147483647, %v9389_v18  ;;  %1925 = vmatpush.bf16.msrb.mxu2 %v6042_v51 }
 0x167   :  { %v981_v50 = vmul.f32 %v9397_v21, %v980_v35  ;;  %v1029_v17 = vor.u32 1.1754944e-38, %v1028_v61 }
 0x168   :  { %v1000_v56 = vmul.f32 %v9408_v27, %v999_v44  ;;  %v6034_v44 = vor.u32 %v7626_v32, %v6033_v28  ;;  %vm1027_vm3 = vcmp.eq.f32.partialorder %v1026_v59, 8.507059e+37  ;;  %v5985_v28 = vld [vmem:[%s12286_s3] sm:$0xf]  ;;  %v5987_v32 = vld [vmem:[%s12286_s3 + $0x10] sm:$0xf0] }
 0x169   :  { %v9475_v60 = vpop.eup %8009  ;;  %v982_v62 = vadd.f32 %v9397_v21, %v981_v50 }
 0x16a   :  { %v1001_v6 = vadd.f32 %v9408_v27, %v1000_v56  ;;  %v1018_v55 = vmul.f32 %v9475_v60, %v9389_v18  ;;  %vm1023_vm0 = vweird.f32 %v9475_v60  ;;  %1911 = vmatpush.bf16.msrb.mxu1 %v6054_v11  ;;  %v6025_v56 = vld [vmem:[%s12286_s3 + $0x48] sm:$0xf]  ;;  %1899 = vmatpush.bf16.msrb.mxu0 %v6034_v44 }
 0x16b   :  { %v986_v13 = vsel %vm9442_vm11, %v9397_v21, %v982_v62  ;;  %vm9591_vm2 = vmor %vm1022_vm1, %vm1023_vm0  ;;  %v6026_v4 = vor.u32 %v7623_v58, %v6025_v56 }
 0x16c   :  { %v991_v20 = vsel %vm9426_vm10, %v990_v43, %v986_v13  ;;  %v1005_v21 = vsel %vm9504_vm14, %v9408_v27, %v1001_v6  ;;  %v1019_v22 = vsub.f32 1.0, %v1018_v55  ;;  %v6017_v43 = vld [vmem:[%s12286_s3 + $0x40] sm:$0xf]  ;;  %v7618_v6 = vld [vmem:[%s12286_s3 + $0x2c] sm:$0xf0] }
 0x16d   :  { %v1010_v27 = vsel %vm9511_vm15, %v1009_v45, %v1005_v21  ;;  %v1033_v29 = vmul.f32 %v8008_v54, %v991_v20  ;;  %v1252_v30 = vpop.f32.mrf.mxu0  ;;  %v1265_v31 = vpop.f32.mrf.mxu1  ;;  %v6038_v45 = vor.u32 %v7624_v33, %v6035_v34  ;;  %v6019_v54 = vld [vmem:[%s12286_s3 + $0x50] sm:$0xf0]  ;;  %v6018_v62 = vor.u32 %v7622_v47, %v6017_v43  ;;  %v7616_v55 = vld [vmem:[%s12286_s3 + $0x24] sm:$0xf]  ;;  %v6009_v13 = vld [vmem:[%s12286_s3 + $0x28] sm:$0xf]  ;;  %1926 = vmatpush.bf16.msrb.mxu2 %v6026_v4 }
 0x16e   :  { %v1032_v14 = vmul.f32 %v1010_v27, %v9060_v37  ;;  %v1020_v35 = vmul.f32 %v9475_v60, %v1019_v22  ;;  %v1295_v36 = vadd.f32 %v1252_v30, %v1045_v0  ;;  %v1296_v38 = vadd.f32 %v1265_v31, %v1046_v1  ;;  %v7621_v0 = vld [vmem:[%s12286_s3 + $0x4c] sm:$0xf]  ;;  %v6027_v1 = vld [vmem:[%s12286_s3 + $0x58] sm:$0xf0]  ;;  %v7614_v27 = vld [vmem:[%s12286_s3 + $0xc] sm:$0xf0] }
 0x16f   :  { %v6062_v37 = vor.u32 %v7629_v19, %v6059_v26  ;;  %1912 = vmatpush.bf16.msrb.mxu1 %v6038_v45  ;;  %v6022_v3 = vor.u32 %v7620_v52, %v6019_v54  ;;  %1900 = vmatpush.bf16.msrb.mxu0 %v6018_v62  ;;  %v6030_v16 = vor.u32 %v7621_v0, %v6027_v1  ;;  %v6011_v20 = vld [vmem:[%s12286_s3 + $0x38] sm:$0xf0]  ;;  %v5993_v33 = vld [vmem:[%s12286_s3 + $0x8] sm:$0xf]  ;;  %v7615_v34 = vld [vmem:[%s12286_s3 + $0x14] sm:$0xf0]  ;;  %v1047_v47 = vunpack.c.l.bf16 %v9529_v24 }
 0x170   :  { %v9569_v48 = vadd.f32 %v1033_v29, %v1032_v14  ;;  %v5843_v49 = vmul.f32 -1.442695, %v1295_v36  ;;  %v5844_v50 = vmul.f32 -1.442695, %v1296_v38  ;;  %v1021_v39 = vadd.f32 %v9475_v60, %v1020_v35  ;;  %v7612_v29 = vld [vmem:[%s12286_s3 + $0x4] sm:$0xf] }
 0x171   :  { %1937 = vmatpush.bf16.msrb.mxu3 %v6062_v37  ;;  %v6002_v19 = vor.u32 %v7618_v6, %v6001_v5  ;;  %v6006_v25 = vor.u32 %v7616_v55, %v6003_v57  ;;  %v6010_v26 = vor.u32 %v7619_v15, %v6009_v13  ;;  %v5986_v40 = vor.u32 %v7614_v27, %v5985_v28  ;;  %v5995_v43 = vld [vmem:[%s12286_s3 + $0x18] sm:$0xf0]  ;;  %v7674_v28 = vld [vmem:[%s12285_s2 + $0xec] sm:$0xf0]  ;;  %v7672_v27 = vld [vmem:[%s12285_s2 + $0xe4] sm:$0xf] }
 0x172   :  { %8011 = vtanh.f32 %v9569_v48  ;;  %v1025_v12 = vsel %vm9591_vm2, %v9475_v60, %v1021_v39  ;;  %v7617_v60 = vld [vmem:[%s12286_s3 + $0x2c] sm:$0xf]  ;;  %v5990_v44 = vor.u32 %v7612_v29, %v5987_v32  ;;  %v5994_v45 = vor.u32 %v7615_v34, %v5993_v33  ;;  %v7675_v32 = vld [vmem:[%s12285_s2 + $0xf4] sm:$0xf0] }
 0x173   :  { %8013 = vpow2.f32 %v5843_v49  ;;  %v1030_v22 = vsel %vm1027_vm3, %v1029_v17, %v1025_v12  ;;  %1913 = vmatpush.bf16.msrb.mxu1 %v6022_v3  ;;  %1901 = vmatpush.bf16.msrb.mxu0 %v6002_v19  ;;  %v6014_v41 = vor.u32 %v7617_v60, %v6011_v20 }
 0x174   :  { %8015 = vpow2.f32 %v5844_v50  ;;  %v9601_v18 = vpop.f32.mrf.mxu2  ;;  %v1291_v2 = vpop.f32.mrf.mxu3  ;;  %1927 = vmatpush.bf16.msrb.mxu2 %v6010_v26  ;;  %v5998_v50 = vor.u32 %v7613_v46, %v5995_v43 }
 0x175   :  { %v1298_v7 = vadd.f32 %v1291_v2, %v1048_v53  ;;  %v1254_v8 = vpop.f32.mrf.mxu0  ;;  %v1267_v9 = vpop.f32.mrf.mxu1  ;;  %1938 = vmatpush.bf16.msrb.mxu3 %v6046_v23  ;;  %v1297_v53 = vadd.f32 %v9601_v18, %v1047_v47  ;;  %v7669_v47 = vld [vmem:[%s12285_s2 + $0xcc] sm:$0xf] }
 0x177   :  { %v5845_v11 = vmul.f32 -1.442695, %v1298_v7  ;;  %1914 = vmatpush.bf16.msrb.mxu1 %v6006_v25  ;;  %1902 = vmatpush.bf16.msrb.mxu0 %v5986_v40  ;;  %v7668_v40 = vld [vmem:[%s12285_s2 + $0xc4] sm:$0xf] }
 0x178   :  { %v8012_v21 = vpop.eup %8011  ;;  %1928 = vmatpush.bf16.msrb.mxu2 %v5994_v45  ;;  %v7671_v45 = vld [vmem:[%s12285_s2 + $0xd4] sm:$0xf0] }
 0x179   :  { %v8014_v30 = vpop.eup %8013  ;;  %8017 = vpow2.f32 %v5845_v11  ;;  %v1036_v31 = vmul.f32 %v8012_v21, %v1030_v22  ;;  %1939 = vmatpush.bf16.msrb.mxu3 %v6030_v16 }
 0x17a   :  { %v8016_v14 = vpop.eup %8015  ;;  %v1303_v35 = vadd.f32 1.0, %v8014_v30  ;;  %v6233_v30 = vld [vmem:[%s12285_s2 + $0xf0] sm:$0xf0] }
 0x17b   :  { %v9648_v36 = vadd.f32 1.0, %v8016_v14  ;;  %v1039_v38 = vpack.c.bf16 %v1036_v31, %v1036_v31  ;;  %1915 = vmatpush.bf16.msrb.mxu1 %v5990_v44  ;;  %v6239_v31 = vld [vmem:[%s12285_s2 + $0xe8] sm:$0xf]  ;;  %v6236_v33 = vor.u32 %v7672_v27, %v6233_v30  ;;  %v7673_v14 = vld [vmem:[%s12285_s2 + $0xec] sm:$0xf] }
 0x17c   :  { %8019 = vrcp.f32 %v1303_v35  ;;  %v1280_v42 = vpop.f32.mrf.mxu2  ;;  %v1293_v37 = vpop.f32.mrf.mxu3  ;;  %v1315_v59 = vand.u32 2147483648, %v1303_v35  ;;  %v1313_v23 = vand.u32 2147483647, %v1303_v35  ;;  %vm1309_vm6 = vweird.f32 %v1303_v35  ;;  %v6223_v44 = vld [vmem:[%s12285_s2 + $0xc8] sm:$0xf] }
 0x17d   :  { %8021 = vrcp.f32 %v9648_v36  ;;  %5712 = vst [vmem:[%s12289_s4 + $0x4] sm:$0xf] %v1039_v38  ;;  %1577 = vmatmul.bf16.vlgmr.msra.gmra.mxu0 %v1039_v38  ;;  %1590 = vmatmul.bf16.vlgmr.msra.gmra.mxu1 %v1039_v38  ;;  %v1334_v61 = vand.u32 2147483648, %v9648_v36  ;;  %v1332_v1 = vand.u32 2147483647, %v9648_v36  ;;  %vm1328_vm7 = vweird.f32 %v9648_v36 }
 0x17e   :  { %1603 = vmatmul.bf16.vlgmr.msra.gmra.mxu2 %v1039_v38  ;;  %1616 = vmatmul.bf16.vlgmr.msra.gmra.mxu3 %v1039_v38  ;;  %v1316_v3 = vor.u32 1.1754944e-38, %v1315_v59  ;;  %vm1314_vm10 = vcmp.eq.f32.partialorder %v1313_v23, 8.507059e+37  ;;  %v6240_v34 = vor.u32 %v7675_v32, %v6239_v31  ;;  %v6215_v38 = vld [vmem:[%s12285_s2 + $0xc0] sm:$0xf]  ;;  %v6217_v37 = vld [vmem:[%s12285_s2 + $0xd0] sm:$0xf0]  ;;  %v6224_v43 = vor.u32 %v7671_v45, %v6223_v44 }
 0x17f   :  { %v8018_v49 = vpop.eup %8017  ;;  %1940 = vmatpush.bf16.msrb.mxu3 %v6014_v41  ;;  %v1335_v5 = vor.u32 1.1754944e-38, %v1334_v61  ;;  %vm1333_vm11 = vcmp.eq.f32.partialorder %v1332_v1, 8.507059e+37  ;;  %2234 = vmatpush.bf16.msra.mxu1 %v6236_v33  ;;  %v7670_v41 = vld [vmem:[%s12285_s2 + $0xcc] sm:$0xf0]  ;;  %v6220_v46 = vor.u32 %v7668_v40, %v6217_v37  ;;  %v6209_v23 = vld [vmem:[%s12285_s2 + $0xb8] sm:$0xf0] }
 0x180   :  { %v1342_v51 = vadd.f32 1.0, %v8018_v49  ;;  %2247 = vmatpush.bf16.msra.mxu2 %v6240_v34  ;;  %v6216_v42 = vor.u32 %v7670_v41, %v6215_v38  ;;  %v6225_v49 = vld [vmem:[%s12285_s2 + $0xd8] sm:$0xf0]  ;;  %v7662_v1 = vld [vmem:[%s12285_s2 + $0x8c] sm:$0xf0] }
 0x181   :  { %v6177_v30 = vld [vmem:[%s12285_s2 + $0x78] sm:$0xf0]  ;;  %v7652_v38 = vld [vmem:[%s12285_s2 + $0x44] sm:$0xf]  ;;  %v6153_v41 = vld [vmem:[%s12285_s2 + $0x50] sm:$0xf0] }
 0x182   :  { %v8020_v52 = vpop.eup %8019  ;;  %8023 = vrcp.f32 %v1342_v51  ;;  %v1354_v16 = vand.u32 2147483648, %v1342_v51  ;;  %vm1348_vm13 = vweird.f32 %v1342_v51  ;;  %v1352_v19 = vand.u32 2147483647, %v1342_v51  ;;  %v6159_v40 = vld [vmem:[%s12285_s2 + $0x48] sm:$0xf] }
 0x183   :  { %v8022_v39 = vpop.eup %8021  ;;  %v1305_v54 = vmul.f32 %v8020_v52, %v1303_v35  ;;  %1941 = vmatpush.bf16.msrb.mxu3 %v5998_v50  ;;  %8025 = vtanh.f32 %v1297_v53  ;;  %vm1310_vm4 = vweird.f32 %v8020_v52  ;;  %v6241_v35 = vld [vmem:[%s12285_s2 + $0xf8] sm:$0xf0]  ;;  %v6228_v50 = vor.u32 %v7669_v47, %v6225_v49  ;;  %2235 = vmatpush.bf16.msra.mxu1 %v6220_v46  ;;  %v7664_v53 = vld [vmem:[%s12285_s2 + $0xa4] sm:$0xf]  ;;  %v7655_v45 = vld [vmem:[%s12285_s2 + $0x54] sm:$0xf0] }
 0x184   :  { %v1324_v56 = vmul.f32 %v8022_v39, %v9648_v36  ;;  %vm1329_vm5 = vweird.f32 %v8022_v39  ;;  %vm1311_vm8 = vmor %vm1309_vm6, %vm1310_vm4  ;;  %v1355_v20 = vor.u32 1.1754944e-38, %v1354_v16  ;;  %vm1353_vm15 = vcmp.eq.f32.partialorder %v1352_v19, 8.507059e+37  ;;  %2248 = vmatpush.bf16.msra.mxu2 %v6224_v43  ;;  %v6167_v16 = vld [vmem:[%s12285_s2 + $0x60] sm:$0xf]  ;;  %v7658_v19 = vld [vmem:[%s12285_s2 + $0x6c] sm:$0xf0] }
 0x185   :  { %v1306_v58 = vsub.f32 1.0, %v1305_v54  ;;  %vm1330_vm9 = vmor %vm1328_vm7, %vm1329_vm5  ;;  %v6244_v36 = vor.u32 %v7673_v14, %v6241_v35  ;;  %v6201_v54 = vld [vmem:[%s12285_s2 + $0xb0] sm:$0xf0]  ;;  %v6151_v14 = vld [vmem:[%s12285_s2 + $0x40] sm:$0xf]  ;;  %v6156_v44 = vor.u32 %v7652_v38, %v6153_v41 }
 0x186   :  { %v1325_v24 = vsub.f32 1.0, %v1324_v56  ;;  %v6207_v56 = vld [vmem:[%s12285_s2 + $0xa8] sm:$0xf]  ;;  %v6204_v59 = vor.u32 %v7664_v53, %v6201_v54  ;;  %v7654_v35 = vld [vmem:[%s12285_s2 + $0x4c] sm:$0xf0] }
 0x187   :  { %v1307_v10 = vmul.f32 %v8020_v52, %v1306_v58  ;;  %2260 = vmatpush.bf16.msra.mxu3 %v6244_v36  ;;  %v7667_v58 = vld [vmem:[%s12285_s2 + $0xb4] sm:$0xf0]  ;;  %v6152_v36 = vor.u32 %v7654_v35, %v6151_v14  ;;  %v7653_v46 = vld [vmem:[%s12285_s2 + $0x4c] sm:$0xf]  ;;  %v6161_v43 = vld [vmem:[%s12285_s2 + $0x58] sm:$0xf0] }
 0x188   :  { %v8024_v62 = vpop.eup %8023  ;;  %v1326_v0 = vmul.f32 %v8022_v39, %v1325_v24  ;;  %v5847_v24 = vld [vmem:[%s12287_s0 + $0x20] sm:$0xff]  ;;  %v6208_v61 = vor.u32 %v7667_v58, %v6207_v56  ;;  %2236 = vmatpush.bf16.msra.mxu1 %v6204_v59  ;;  %v6143_v59 = vld [vmem:[%s12285_s2 + $0x28] sm:$0xf]  ;;  %v7707_v35 = vld [vmem:[%s12286_s3 + $0xf4] sm:$0xf0] }
 0x189   :  { %v1308_v18 = vadd.f32 %v8020_v52, %v1307_v10  ;;  %v1344_v2 = vmul.f32 %v8024_v62, %v1342_v51  ;;  %v8026_v7 = vpop.eup %8025  ;;  %vm1349_vm12 = vweird.f32 %v8024_v62  ;;  %v6199_v51 = vld [vmem:[%s12285_s2 + $0xa0] sm:$0xf]  ;;  %v7665_v10 = vld [vmem:[%s12285_s2 + $0xac] sm:$0xf]  ;;  %v7648_v54 = vld [vmem:[%s12285_s2 + $0x24] sm:$0xf] }
 0x18a   :  { %v1327_v4 = vadd.f32 %v8022_v39, %v1326_v0  ;;  %vm1350_vm14 = vmor %vm1348_vm13, %vm1349_vm12  ;;  %2249 = vmatpush.bf16.msra.mxu2 %v6208_v61  ;;  %v6183_v0 = vld [vmem:[%s12285_s2 + $0x80] sm:$0xf]  ;;  %v6375_v38 = vld [vmem:[%s12286_s3 + $0xf8] sm:$0xf0] }
 0x18b   :  { %v1312_v6 = vsel %vm1311_vm8, %v8020_v52, %v1308_v18  ;;  %v1345_v55 = vsub.f32 1.0, %v1344_v2  ;;  %v7666_v52 = vld [vmem:[%s12285_s2 + $0xac] sm:$0xf0]  ;;  %2261 = vmatpush.bf16.msra.mxu3 %v6228_v50  ;;  %v7660_v18 = vld [vmem:[%s12285_s2 + $0x84] sm:$0xf]  ;;  %v1371_v2 = vunpack.c.l.bf16 %v5847_v24 }
 0x18c   :  { %v1317_v8 = vsel %vm1314_vm10, %v1316_v3, %v1312_v6  ;;  %v1331_v9 = vsel %vm1330_vm9, %v8022_v39, %v1327_v4  ;;  %v6200_v39 = vor.u32 %v7666_v52, %v6199_v51  ;;  %v1372_v3 = vunpack.c.h.bf16 %v5847_v24  ;;  %v6191_v6 = vld [vmem:[%s12285_s2 + $0x88] sm:$0xf]  ;;  %v6135_v53 = vld [vmem:[%s12285_s2 + $0x20] sm:$0xf]  ;;  %v6137_v24 = vld [vmem:[%s12285_s2 + $0x30] sm:$0xf0] }
 0x18d   :  { %v1336_v12 = vsel %vm1333_vm11, %v1335_v5, %v1331_v9  ;;  %v1359_v57 = vmul.f32 %v8026_v7, %v1317_v8  ;;  %v1346_v13 = vmul.f32 %v8024_v62, %v1345_v55  ;;  %v6184_v4 = vor.u32 %v7662_v1, %v6183_v0  ;;  %v6185_v5 = vld [vmem:[%s12285_s2 + $0x90] sm:$0xf0]  ;;  %v7663_v55 = vld [vmem:[%s12285_s2 + $0x94] sm:$0xf0]  ;;  %v7661_v9 = vld [vmem:[%s12285_s2 + $0x8c] sm:$0xf] }
 0x18e   :  { %v1358_v15 = vmul.f32 %v1336_v12, %v9157_v63  ;;  %v6231_v63 = vld [vmem:[%s12285_s2 + $0xe0] sm:$0xf]  ;;  %v6188_v7 = vor.u32 %v7660_v18, %v6185_v5  ;;  %v6192_v8 = vor.u32 %v7663_v55, %v6191_v6  ;;  %v6193_v12 = vld [vmem:[%s12285_s2 + $0x98] sm:$0xf0]  ;;  %v6160_v51 = vor.u32 %v7655_v45, %v6159_v40  ;;  %v7649_v0 = vld [vmem:[%s12285_s2 + $0x2c] sm:$0xf] }
 0x18f   :  { %v1347_v11 = vadd.f32 %v8024_v62, %v1346_v13  ;;  %v6232_v29 = vor.u32 %v7674_v28, %v6231_v63  ;;  %v6196_v13 = vor.u32 %v7661_v9, %v6193_v12  ;;  %v7659_v63 = vld [vmem:[%s12285_s2 + $0x74] sm:$0xf0]  ;;  %v6164_v52 = vor.u32 %v7653_v46, %v6161_v43  ;;  %v6145_v1 = vld [vmem:[%s12285_s2 + $0x38] sm:$0xf0]  ;;  %v6119_v6 = vld [vmem:[%s12285_s2] sm:$0xf] }
 0x190   :  { %v9667_v17 = vadd.f32 %v1359_v57, %v1358_v15  ;;  %v9775_v57 = vld [vmem:[%s12287_s0 + $0x28] sm:$0xff]  ;;  %2237 = vmatpush.bf16.msra.mxu1 %v6188_v7  ;;  %2250 = vmatpush.bf16.msra.mxu2 %v6192_v8  ;;  %v7646_v55 = vld [vmem:[%s12285_s2 + $0xc] sm:$0xf0]  ;;  %v7644_v7 = vld [vmem:[%s12285_s2 + $0x4] sm:$0xf] }
 0x191   :  { %v1351_v60 = vsel %vm1350_vm14, %v8024_v62, %v1347_v11  ;;  %2221 = vmatpush.bf16.msra.mxu0 %v6232_v29  ;;  %v6212_v62 = vor.u32 %v7665_v10, %v6209_v23  ;;  %v7657_v29 = vld [vmem:[%s12285_s2 + $0x6c] sm:$0xf]  ;;  %v1374_v34 = vunpack.c.h.bf16 %v9775_v57  ;;  %v1373_v10 = vunpack.c.l.bf16 %v9775_v57  ;;  %v6121_v12 = vld [vmem:[%s12285_s2 + $0x10] sm:$0xf0] }
 0x192   :  { %8027 = vtanh.f32 %v9667_v17  ;;  %v1356_v22 = vsel %vm1353_vm15, %v1355_v20, %v1351_v60  ;;  %v7656_v60 = vld [vmem:[%s12285_s2 + $0x64] sm:$0xf]  ;;  %v6180_v33 = vor.u32 %v7657_v29, %v6177_v30  ;;  %v6140_v23 = vor.u32 %v7648_v54, %v6137_v24 }
 0x193   :  { %2262 = vmatpush.bf16.msra.mxu3 %v6212_v62  ;;  %v7651_v62 = vld [vmem:[%s12285_s2 + $0x34] sm:$0xf0] }
 0x195   :  { %2222 = vmatpush.bf16.msra.mxu0 %v6216_v42 }
 0x197   :  { %2263 = vmatpush.bf16.msra.mxu3 %v6196_v13 }
 0x198   :  { %v8028_v21 = vpop.eup %8027 }
 0x199   :  { %v1362_v25 = vmul.f32 %v8028_v21, %v1356_v22  ;;  %2223 = vmatpush.bf16.msra.mxu0 %v6200_v39  ;;  %v6168_v22 = vor.u32 %v7658_v19, %v6167_v16  ;;  %v7650_v39 = vld [vmem:[%s12285_s2 + $0x2c] sm:$0xf0]  ;;  %v6127_v16 = vld [vmem:[%s12285_s2 + $0x8] sm:$0xf]  ;;  %v7647_v19 = vld [vmem:[%s12285_s2 + $0x14] sm:$0xf0] }
 0x19a   :  { %v6136_v58 = vor.u32 %v7650_v39, %v6135_v53  ;;  %v6357_v53 = vld [vmem:[%s12286_s3 + $0xc8] sm:$0xf]  ;;  %v7703_v39 = vld [vmem:[%s12286_s3 + $0xd4] sm:$0xf0] }
 0x19b   :  { %v1365_v26 = vpack.c.bf16 %v1362_v25, %v1362_v25  ;;  %v6169_v25 = vld [vmem:[%s12285_s2 + $0x70] sm:$0xf0]  ;;  %2264 = vmatpush.bf16.msra.mxu3 %v6180_v33  ;;  %v6373_v33 = vld [vmem:[%s12286_s3 + $0xe8] sm:$0xf] }
 0x19c   :  { %v6172_v28 = vor.u32 %v7656_v60, %v6169_v25 }
 0x19d   :  { %5846 = vst [vmem:[%s12290_s5 + $0x18] sm:$0xf] %v1365_v26  ;;  %1903 = vmatmul.bf16.vlgmr.msrb.gmra.mxu0 %v1365_v26  ;;  %1916 = vmatmul.bf16.vlgmr.msrb.gmra.mxu1 %v1365_v26 }
 0x19e   :  { %1929 = vmatmul.bf16.vlgmr.msrb.gmra.mxu2 %v1365_v26  ;;  %1942 = vmatmul.bf16.vlgmr.msrb.gmra.mxu3 %v1365_v26  ;;  %v6175_v26 = vld [vmem:[%s12285_s2 + $0x68] sm:$0xf] }
 0x19f   :  { %2224 = vmatpush.bf16.msra.mxu0 %v6184_v4  ;;  %v6176_v27 = vor.u32 %v7659_v63, %v6175_v26  ;;  %2238 = vmatpush.bf16.msra.mxu1 %v6172_v28  ;;  %v6148_v4 = vor.u32 %v7649_v0, %v6145_v1  ;;  %v6365_v63 = vld [vmem:[%s12286_s3 + $0xe0] sm:$0xf]  ;;  %v7706_v28 = vld [vmem:[%s12286_s3 + $0xec] sm:$0xf0]  ;;  %v6359_v0 = vld [vmem:[%s12286_s3 + $0xd8] sm:$0xf0] }
 0x1a0   :  { %2265 = vmatpush.bf16.msra.mxu3 %v6164_v52  ;;  %v6333_v1 = vld [vmem:[%s12286_s3 + $0xa0] sm:$0xf] }
 0x1a1   :  { %2251 = vmatpush.bf16.msra.mxu2 %v6176_v27  ;;  %v7704_v27 = vld [vmem:[%s12286_s3 + $0xe4] sm:$0xf] }
 0x1a3   :  { %2225 = vmatpush.bf16.msra.mxu0 %v6168_v22  ;;  %2239 = vmatpush.bf16.msra.mxu1 %v6156_v44  ;;  %v6129_v22 = vld [vmem:[%s12285_s2 + $0x18] sm:$0xf0]  ;;  %v7700_v44 = vld [vmem:[%s12286_s3 + $0xc4] sm:$0xf] }
 0x1a4   :  { %2266 = vmatpush.bf16.msra.mxu3 %v6148_v4 }
 0x1a5   :  { %2252 = vmatpush.bf16.msra.mxu2 %v6160_v51 }
 0x1a7   :  { %2226 = vmatpush.bf16.msra.mxu0 %v6152_v36  ;;  %2240 = vmatpush.bf16.msra.mxu1 %v6140_v23  ;;  %v7705_v36 = vld [vmem:[%s12286_s3 + $0xec] sm:$0xf] }
 0x1a8   :  { %v6378_v51 = vor.u32 %v7705_v36, %v6375_v38  ;;  %v7695_v38 = vld [vmem:[%s12286_s3 + $0x94] sm:$0xf0] }
 0x1ab   :  { %2227 = vmatpush.bf16.msra.mxu0 %v6136_v58  ;;  %v7689_v58 = vld [vmem:[%s12286_s3 + $0x6c] sm:$0xf] }
 0x1fa   :  { %v1578_v15 = vpop.f32.mrf.mxu0  ;;  %v1591_v11 = vpop.f32.mrf.mxu1 }
 0x1fb   :  { %v1621_v20 = vadd.f32 %v1578_v15, %v1371_v2  ;;  %v1622_v21 = vadd.f32 %v1591_v11, %v1372_v3  ;;  %v6144_v3 = vor.u32 %v7651_v62, %v6143_v59  ;;  %v6120_v15 = vor.u32 %v7646_v55, %v6119_v6  ;;  %v9953_v59 = vld [vmem:[%s12288_s1 + $0x50] sm:$0xff]  ;;  %v7696_v55 = vld [vmem:[%s12286_s3 + $0xa4] sm:$0xf] }
 0x1fc   :  { %v6124_v11 = vor.u32 %v7644_v7, %v6121_v12  ;;  %v6358_v62 = vor.u32 %v7703_v39, %v6357_v53  ;;  %v6335_v7 = vld [vmem:[%s12286_s3 + $0xb0] sm:$0xf0]  ;;  %v6309_v53 = vld [vmem:[%s12286_s3 + $0x68] sm:$0xf] }
 0x1fd   :  { %v5977_v31 = vmul.f32 -1.442695, %v1621_v20  ;;  %v5978_v32 = vmul.f32 -1.442695, %v1622_v21  ;;  %2253 = vmatpush.bf16.msra.mxu2 %v6144_v3  ;;  %v6128_v20 = vor.u32 %v7647_v19, %v6127_v16  ;;  %v7645_v21 = vld [vmem:[%s12285_s2 + $0xc] sm:$0xf]  ;;  %2228 = vmatpush.bf16.msra.mxu0 %v6120_v15  ;;  %v6338_v15 = vor.u32 %v7696_v55, %v6335_v7 }
 0x1fe   :  { %2241 = vmatpush.bf16.msra.mxu1 %v6124_v11  ;;  %v6132_v26 = vor.u32 %v7645_v21, %v6129_v22  ;;  %v7699_v11 = vld [vmem:[%s12286_s3 + $0xb4] sm:$0xf0]  ;;  %v7697_v16 = vld [vmem:[%s12286_s3 + $0xac] sm:$0xf]  ;;  %v6343_v19 = vld [vmem:[%s12286_s3 + $0xb8] sm:$0xf0] }
 0x1ff   :  { %8029 = vpow2.f32 %v5977_v31  ;;  %v6366_v31 = vor.u32 %v7706_v28, %v6365_v63  ;;  %v6317_v22 = vld [vmem:[%s12286_s3 + $0x80] sm:$0xf] }
 0x200   :  { %8031 = vpow2.f32 %v5978_v32  ;;  %v6367_v32 = vld [vmem:[%s12286_s3 + $0xf0] sm:$0xf0]  ;;  %2267 = vmatpush.bf16.msra.mxu3 %v6132_v26  ;;  %v7692_v26 = vld [vmem:[%s12286_s3 + $0x84] sm:$0xf] }
 0x201   :  { %v1604_v42 = vpop.f32.mrf.mxu2  ;;  %v1617_v37 = vpop.f32.mrf.mxu3  ;;  %2254 = vmatpush.bf16.msra.mxu2 %v6128_v20  ;;  %v6370_v14 = vor.u32 %v7704_v27, %v6367_v32  ;;  %2547 = vmatpush.bf16.msrb.mxu0 %v6366_v31  ;;  %v6346_v27 = vor.u32 %v7697_v16, %v6343_v19  ;;  %v6319_v31 = vld [vmem:[%s12286_s3 + $0x90] sm:$0xf0]  ;;  %v6325_v32 = vld [vmem:[%s12286_s3 + $0x88] sm:$0xf]  ;;  %v6295_v16 = vld [vmem:[%s12286_s3 + $0x58] sm:$0xf0] }
 0x202   :  { %v1624_v47 = vadd.f32 %v1617_v37, %v1374_v34  ;;  %v1580_v49 = vpop.f32.mrf.mxu0  ;;  %v1593_v50 = vpop.f32.mrf.mxu1  ;;  %v1623_v57 = vadd.f32 %v1604_v42, %v1373_v10  ;;  %v6349_v42 = vld [vmem:[%s12286_s3 + $0xc0] sm:$0xf]  ;;  %v7702_v37 = vld [vmem:[%s12286_s3 + $0xcc] sm:$0xf0]  ;;  %v7701_v10 = vld [vmem:[%s12286_s3 + $0xcc] sm:$0xf]  ;;  %v6322_v36 = vor.u32 %v7692_v26, %v6319_v31 }
 0x203   :  { %2560 = vmatpush.bf16.msrb.mxu1 %v6370_v14  ;;  %v6374_v50 = vor.u32 %v7707_v35, %v6373_v33  ;;  %v6350_v52 = vor.u32 %v7702_v37, %v6349_v42  ;;  %v6362_v4 = vor.u32 %v7701_v10, %v6359_v0  ;;  %v10033_v35 = vld [vmem:[%s12288_s1 + $0x58] sm:$0xff]  ;;  %v7684_v0 = vld [vmem:[%s12286_s3 + $0x44] sm:$0xf]  ;;  %v6269_v19 = vld [vmem:[%s12286_s3 + $0x20] sm:$0xf] }
 0x204   :  { %v5979_v56 = vmul.f32 -1.442695, %v1624_v47  ;;  %v6351_v47 = vld [vmem:[%s12286_s3 + $0xd0] sm:$0xf0]  ;;  %2586 = vmatpush.bf16.msrb.mxu3 %v6378_v51  ;;  %v6327_v37 = vld [vmem:[%s12286_s3 + $0x98] sm:$0xf0] }
 0x205   :  { %v8030_v61 = vpop.eup %8029  ;;  %2573 = vmatpush.bf16.msrb.mxu2 %v6374_v50  ;;  %2548 = vmatpush.bf16.msrb.mxu0 %v6350_v52  ;;  %v6326_v50 = vor.u32 %v7695_v38, %v6325_v32  ;;  %v7688_v51 = vld [vmem:[%s12286_s3 + $0x64] sm:$0xf]  ;;  %v6303_v52 = vld [vmem:[%s12286_s3 + $0x70] sm:$0xf0]  ;;  %v6277_v31 = vld [vmem:[%s12286_s3 + $0x28] sm:$0xf] }
 0x206   :  { %v8032_v18 = vpop.eup %8031  ;;  %v9851_v2 = vadd.f32 1.0, %v8030_v61  ;;  %8033 = vpow2.f32 %v5979_v56  ;;  %v6354_v61 = vor.u32 %v7700_v44, %v6351_v47  ;;  %v6301_v44 = vld [vmem:[%s12286_s3 + $0x60] sm:$0xf]  ;;  %v6306_v10 = vor.u32 %v7688_v51, %v6303_v52  ;;  %v6271_v26 = vld [vmem:[%s12286_s3 + $0x30] sm:$0xf0] }
 0x207   :  { %v9853_v5 = vadd.f32 1.0, %v8032_v18  ;;  %v7698_v18 = vld [vmem:[%s12286_s3 + $0xac] sm:$0xf0]  ;;  %v7683_v32 = vld [vmem:[%s12286_s3 + $0x34] sm:$0xf0] }
 0x208   :  { %8035 = vrcp.f32 %v9851_v2  ;;  %v1639_v13 = vand.u32 2147483647, %v9851_v2  ;;  %v1641_v60 = vand.u32 2147483648, %v9851_v2  ;;  %vm1635_vm1 = vweird.f32 %v9851_v2  ;;  %2561 = vmatpush.bf16.msrb.mxu1 %v6354_v61  ;;  %2587 = vmatpush.bf16.msrb.mxu3 %v6362_v4  ;;  %v6287_v4 = vld [vmem:[%s12286_s3 + $0x50] sm:$0xf0] }
 0x209   :  { %8037 = vrcp.f32 %v9853_v5  ;;  %v1606_v8 = vpop.f32.mrf.mxu2  ;;  %v1619_v9 = vpop.f32.mrf.mxu3  ;;  %v1660_v29 = vand.u32 2147483648, %v9853_v5  ;;  %v1658_v43 = vand.u32 2147483647, %v9853_v5  ;;  %v6334_v6 = vor.u32 %v7698_v18, %v6333_v1  ;;  %2574 = vmatpush.bf16.msrb.mxu2 %v6358_v62  ;;  %v7686_v62 = vld [vmem:[%s12286_s3 + $0x4c] sm:$0xf0] }
 0x20a   :  { %8039 = vtanh.f32 %v1623_v57  ;;  %vm9930_vm2 = vcmp.eq.f32.partialorder %v1639_v13, 8.507059e+37  ;;  %v1642_v24 = vor.u32 1.1754944e-38, %v1641_v60  ;;  %v6341_v8 = vld [vmem:[%s12286_s3 + $0xa8] sm:$0xf]  ;;  %v1697_v57 = vunpack.c.l.bf16 %v9953_v59 }
 0x20b   :  { %v1661_v56 = vor.u32 1.1754944e-38, %v1660_v29  ;;  %v1698_v13 = vunpack.c.h.bf16 %v9953_v59  ;;  %vm1654_vm5 = vweird.f32 %v9853_v5  ;;  %v6342_v21 = vor.u32 %v7699_v11, %v6341_v8  ;;  %2549 = vmatpush.bf16.msrb.mxu0 %v6334_v6  ;;  %v7685_v11 = vld [vmem:[%s12286_s3 + $0x4c] sm:$0xf] }
 0x20c   :  { %v8034_v25 = vpop.eup %8033  ;;  %vm10015_vm7 = vcmp.eq.f32.partialorder %v1658_v43, 8.507059e+37  ;;  %2562 = vmatpush.bf16.msrb.mxu1 %v6338_v15  ;;  %2588 = vmatpush.bf16.msrb.mxu3 %v6346_v27  ;;  %v6290_v15 = vor.u32 %v7684_v0, %v6287_v4  ;;  %v6278_v52 = vor.u32 %v7683_v32, %v6277_v31 }
 0x20d   :  { %v9893_v30 = vadd.f32 1.0, %v8034_v25  ;;  %v7694_v25 = vld [vmem:[%s12286_s3 + $0x8c] sm:$0xf0]  ;;  %2575 = vmatpush.bf16.msrb.mxu2 %v6342_v21 }
 0x20e   :  { %v9901_v34 = vpop.eup %8035  ;;  %v6318_v29 = vor.u32 %v7694_v25, %v6317_v22  ;;  %v7682_v22 = vld [vmem:[%s12286_s3 + $0x2c] sm:$0xf0]  ;;  %v7680_v25 = vld [vmem:[%s12286_s3 + $0x24] sm:$0xf] }
 0x20f   :  { %v9912_v41 = vpop.eup %8037  ;;  %v1631_v40 = vmul.f32 %v9901_v34, %v9851_v2  ;;  %vm1636_vm0 = vweird.f32 %v9901_v34  ;;  %8041 = vrcp.f32 %v9893_v30  ;;  %vm1674_vm9 = vweird.f32 %v9893_v30 }
 0x210   :  { %v1650_v45 = vmul.f32 %v9912_v41, %v9853_v5  ;;  %vm9946_vm3 = vmor %vm1635_vm1, %vm1636_vm0  ;;  %v8040_v2 = vpop.eup %8039  ;;  %vm1655_vm4 = vweird.f32 %v9912_v41  ;;  %2550 = vmatpush.bf16.msrb.mxu0 %v6318_v29  ;;  %2563 = vmatpush.bf16.msrb.mxu1 %v6322_v36  ;;  %v1678_v6 = vand.u32 2147483647, %v9893_v30  ;;  %v1680_v55 = vand.u32 2147483648, %v9893_v30 }
 0x211   :  { %v1632_v49 = vsub.f32 1.0, %v1631_v40  ;;  %vm10008_vm6 = vmor %vm1654_vm5, %vm1655_vm4  ;;  %v7693_v40 = vld [vmem:[%s12286_s3 + $0x8c] sm:$0xf]  ;;  %2576 = vmatpush.bf16.msrb.mxu2 %v6326_v50  ;;  %v6298_v29 = vor.u32 %v7685_v11, %v6295_v16  ;;  %v6270_v38 = vor.u32 %v7682_v22, %v6269_v19 }
 0x212   :  { %v1651_v54 = vsub.f32 1.0, %v1650_v45  ;;  %v7690_v45 = vld [vmem:[%s12286_s3 + $0x6c] sm:$0xf0]  ;;  %v1681_v5 = vor.u32 1.1754944e-38, %v1680_v55  ;;  %vm1679_vm11 = vcmp.eq.f32.partialorder %v1678_v6, 8.507059e+37 }
 0x213   :  { %v1633_v23 = vmul.f32 %v9901_v34, %v1632_v49  ;;  %v6302_v61 = vor.u32 %v7690_v45, %v6301_v44  ;;  %v7678_v45 = vld [vmem:[%s12286_s3 + $0xc] sm:$0xf0] }
 0x214   :  { %v1652_v3 = vmul.f32 %v9912_v41, %v1651_v54  ;;  %2564 = vmatpush.bf16.msrb.mxu1 %v6306_v10 }
 0x215   :  { %v9979_v9 = vpop.eup %8041  ;;  %v1634_v12 = vadd.f32 %v9901_v34, %v1633_v23  ;;  %v6285_v23 = vld [vmem:[%s12286_s3 + $0x40] sm:$0xf]  ;;  %2551 = vmatpush.bf16.msrb.mxu0 %v6302_v61 }
 0x216   :  { %v1653_v60 = vadd.f32 %v9912_v41, %v1652_v3  ;;  %v1670_v20 = vmul.f32 %v9979_v9, %v9893_v30  ;;  %vm1675_vm8 = vweird.f32 %v9979_v9  ;;  %v6286_v30 = vor.u32 %v7686_v62, %v6285_v23 }
 0x217   :  { %v1638_v63 = vsel %vm9946_vm3, %v9901_v34, %v1634_v12  ;;  %vm10095_vm10 = vmor %vm1674_vm9, %vm1675_vm8  ;;  %v1699_v23 = vunpack.c.l.bf16 %v10033_v35 }
 0x218   :  { %v1643_v33 = vsel %vm9930_vm2, %v1642_v24, %v1638_v63  ;;  %v1657_v34 = vsel %vm10008_vm6, %v9912_v41, %v1653_v60  ;;  %v1671_v14 = vsub.f32 1.0, %v1670_v20  ;;  %v6311_v24 = vld [vmem:[%s12286_s3 + $0x78] sm:$0xf0]  ;;  %2565 = vmatpush.bf16.msrb.mxu1 %v6290_v15 }
 0x219   :  { %v1662_v41 = vsel %vm10015_vm7, %v1661_v56, %v1657_v34  ;;  %v1685_v42 = vmul.f32 %v8040_v2, %v1643_v33  ;;  %v7691_v56 = vld [vmem:[%s12286_s3 + $0x74] sm:$0xf0]  ;;  %v1700_v2 = vunpack.c.h.bf16 %v10033_v35  ;;  %v6314_v12 = vor.u32 %v7689_v58, %v6311_v24  ;;  %v7681_v33 = vld [vmem:[%s12286_s3 + $0x2c] sm:$0xf]  ;;  %2552 = vmatpush.bf16.msrb.mxu0 %v6286_v30  ;;  %v6263_v24 = vld [vmem:[%s12286_s3 + $0x18] sm:$0xf0] }
 0x21a   :  { %v1684_v46 = vmul.f32 %v1662_v41, %v9569_v48  ;;  %v1672_v43 = vmul.f32 %v9979_v9, %v1671_v14  ;;  %v1904_v47 = vpop.f32.mrf.mxu0  ;;  %v1917_v49 = vpop.f32.mrf.mxu1  ;;  %v6330_v48 = vor.u32 %v7693_v40, %v6327_v37  ;;  %v6310_v8 = vor.u32 %v7691_v56, %v6309_v53  ;;  %v6279_v41 = vld [vmem:[%s12286_s3 + $0x38] sm:$0xf0]  ;;  %v7679_v56 = vld [vmem:[%s12286_s3 + $0x14] sm:$0xf0]  ;;  %v7677_v58 = vld [vmem:[%s12286_s3 + $0xc] sm:$0xf] }
 0x21b   :  { %v1947_v39 = vadd.f32 %v1904_v47, %v1697_v57  ;;  %v1948_v54 = vadd.f32 %v1917_v49, %v1698_v13  ;;  %v6293_v57 = vld [vmem:[%s12286_s3 + $0x48] sm:$0xf]  ;;  %v7687_v13 = vld [vmem:[%s12286_s3 + $0x54] sm:$0xf0]  ;;  %v6274_v40 = vor.u32 %v7680_v25, %v6271_v26  ;;  %v6282_v53 = vor.u32 %v7681_v33, %v6279_v41 }
 0x21c   :  { %v10072_v59 = vadd.f32 %v1685_v42, %v1684_v46  ;;  %v1673_v3 = vadd.f32 %v9979_v9, %v1672_v43  ;;  %2589 = vmatpush.bf16.msrb.mxu3 %v6330_v48  ;;  %2577 = vmatpush.bf16.msrb.mxu2 %v6310_v8  ;;  %v6253_v42 = vld [vmem:[%s12286_s3] sm:$0xf]  ;;  %v7676_v46 = vld [vmem:[%s12286_s3 + $0x4] sm:$0xf]  ;;  %v6255_v43 = vld [vmem:[%s12286_s3 + $0x10] sm:$0xf0]  ;;  %v6266_v0 = vor.u32 %v7677_v58, %v6263_v24 }
 0x21d   :  { %v6111_v1 = vmul.f32 -1.442695, %v1947_v39  ;;  %v6112_v18 = vmul.f32 -1.442695, %v1948_v54  ;;  %v6261_v39 = vld [vmem:[%s12286_s3 + $0x8] sm:$0xf]  ;;  %2553 = vmatpush.bf16.msrb.mxu0 %v6270_v38  ;;  %2566 = vmatpush.bf16.msrb.mxu1 %v6274_v40  ;;  %v6254_v54 = vor.u32 %v7678_v45, %v6253_v42  ;;  %v6258_v48 = vor.u32 %v7676_v46, %v6255_v43 }
 0x21e   :  { %8043 = vtanh.f32 %v10072_v59  ;;  %v1677_v21 = vsel %vm10095_vm10, %v9979_v9, %v1673_v3  ;;  %v6294_v9 = vor.u32 %v7687_v13, %v6293_v57  ;;  %v6262_v62 = vor.u32 %v7679_v56, %v6261_v39  ;;  %v6501_v46 = vld [vmem:[%s12285_s2 + $0xf0] sm:$0xf0]  ;;  %v6507_v43 = vld [vmem:[%s12285_s2 + $0xe8] sm:$0xf]  ;;  %v6483_v39 = vld [vmem:[%s12285_s2 + $0xc0] sm:$0xf] }
 0x21f   :  { %8045 = vpow2.f32 %v6111_v1  ;;  %v1682_v36 = vsel %vm1679_vm11, %v1681_v5, %v1677_v21  ;;  %v6485_v58 = vld [vmem:[%s12285_s2 + $0xd0] sm:$0xf0]  ;;  %v6491_v24 = vld [vmem:[%s12285_s2 + $0xc8] sm:$0xf] }
 0x220   :  { %8047 = vpow2.f32 %v6112_v18  ;;  %2590 = vmatpush.bf16.msrb.mxu3 %v6314_v12  ;;  %2578 = vmatpush.bf16.msrb.mxu2 %v6294_v9 }
 0x221   :  { %v10114_v60 = vpop.f32.mrf.mxu2  ;;  %v1943_v20 = vpop.f32.mrf.mxu3  ;;  %2554 = vmatpush.bf16.msrb.mxu0 %v6254_v54  ;;  %2567 = vmatpush.bf16.msrb.mxu1 %v6258_v48  ;;  %v7734_v54 = vld [vmem:[%s12285_s2 + $0xcc] sm:$0xf0]  ;;  %v7732_v48 = vld [vmem:[%s12285_s2 + $0xc4] sm:$0xf] }
 0x222   :  { %v1950_v63 = vadd.f32 %v1943_v20, %v1700_v2  ;;  %v1906_v28 = vpop.f32.mrf.mxu0  ;;  %v1919_v27 = vpop.f32.mrf.mxu1  ;;  %v1949_v3 = vadd.f32 %v10114_v60, %v1699_v23  ;;  %v6484_v56 = vor.u32 %v7734_v54, %v6483_v39  ;;  %v7716_v39 = vld [vmem:[%s12285_s2 + $0x44] sm:$0xf]  ;;  %v6421_v54 = vld [vmem:[%s12285_s2 + $0x50] sm:$0xf0] }
 0x224   :  { %v8044_v34 = vpop.eup %8043  ;;  %v6113_v14 = vmul.f32 -1.442695, %v1950_v63  ;;  %2591 = vmatpush.bf16.msrb.mxu3 %v6298_v29  ;;  %2579 = vmatpush.bf16.msrb.mxu2 %v6278_v52  ;;  %v6509_v52 = vld [vmem:[%s12285_s2 + $0xf8] sm:$0xf0] }
 0x225   :  { %v8046_v37 = vpop.eup %8045  ;;  %v1688_v44 = vmul.f32 %v8044_v34, %v1682_v36 }
 0x226   :  { %v8048_v47 = vpop.eup %8047  ;;  %v10152_v49 = vadd.f32 1.0, %v8046_v37  ;;  %8049 = vpow2.f32 %v6113_v14  ;;  %v7738_v37 = vld [vmem:[%s12285_s2 + $0xec] sm:$0xf0] }
 0x227   :  { %v10154_v50 = vadd.f32 1.0, %v8048_v47  ;;  %v1691_v51 = vpack.c.bf16 %v1688_v44, %v1688_v44  ;;  %v7736_v44 = vld [vmem:[%s12285_s2 + $0xe4] sm:$0xf]  ;;  %v7739_v47 = vld [vmem:[%s12285_s2 + $0xf4] sm:$0xf0] }
 0x228   :  { %8051 = vrcp.f32 %v10152_v49  ;;  %2592 = vmatpush.bf16.msrb.mxu3 %v6282_v53  ;;  %2580 = vmatpush.bf16.msrb.mxu2 %v6262_v62  ;;  %v1967_v8 = vand.u32 2147483648, %v10152_v49  ;;  %v1965_v13 = vand.u32 2147483647, %v10152_v49  ;;  %vm1961_vm14 = vweird.f32 %v10152_v49  ;;  %v7733_v62 = vld [vmem:[%s12285_s2 + $0xcc] sm:$0xf] }
 0x229   :  { %8053 = vrcp.f32 %v10154_v50  ;;  %v1932_v61 = vpop.f32.mrf.mxu2  ;;  %v1945_v10 = vpop.f32.mrf.mxu3  ;;  %5980 = vst [vmem:[%s12289_s4 + $0x8] sm:$0xf] %v1691_v51  ;;  %2229 = vmatmul.bf16.vlgmr.msra.gmra.mxu0 %v1691_v51  ;;  %2242 = vmatmul.bf16.vlgmr.msra.gmra.mxu1 %v1691_v51  ;;  %v1986_v12 = vand.u32 2147483648, %v10154_v50  ;;  %v1984_v15 = vand.u32 2147483647, %v10154_v50  ;;  %vm1980_vm15 = vweird.f32 %v10154_v50 }
 0x22a   :  { %2255 = vmatmul.bf16.vlgmr.msra.gmra.mxu2 %v1691_v51  ;;  %2268 = vmatmul.bf16.vlgmr.msra.gmra.mxu3 %v1691_v51  ;;  %v1968_v19 = vor.u32 1.1754944e-38, %v1967_v8  ;;  %vm1966_vm2 = vcmp.eq.f32.partialorder %v1965_v13, 8.507059e+37  ;;  %v7737_v51 = vld [vmem:[%s12285_s2 + $0xec] sm:$0xf]  ;;  %v7735_v61 = vld [vmem:[%s12285_s2 + $0xd4] sm:$0xf0]  ;;  %v6488_v10 = vor.u32 %v7732_v48, %v6485_v58 }
 0x22b   :  { %v1987_v21 = vor.u32 1.1754944e-38, %v1986_v12  ;;  %vm1985_vm3 = vcmp.eq.f32.partialorder %v1984_v15, 8.507059e+37  ;;  %v6512_v53 = vor.u32 %v7737_v51, %v6509_v52  ;;  %v6492_v23 = vor.u32 %v7735_v61, %v6491_v24  ;;  %v6477_v13 = vld [vmem:[%s12285_s2 + $0xb8] sm:$0xf0]  ;;  %v6451_v15 = vld [vmem:[%s12285_s2 + $0x80] sm:$0xf] }
 0x22c   :  { %v8050_v1 = vpop.eup %8049  ;;  %2593 = vmatpush.bf16.msrb.mxu3 %v6266_v0  ;;  %v6493_v0 = vld [vmem:[%s12285_s2 + $0xd8] sm:$0xf0]  ;;  %v6419_v51 = vld [vmem:[%s12285_s2 + $0x40] sm:$0xf]  ;;  %v7718_v52 = vld [vmem:[%s12285_s2 + $0x4c] sm:$0xf0]  ;;  %v6424_v24 = vor.u32 %v7716_v39, %v6421_v54 }
 0x22d   :  { %v1994_v18 = vadd.f32 1.0, %v8050_v1  ;;  %v6496_v1 = vor.u32 %v7733_v62, %v6493_v0  ;;  %v6427_v48 = vld [vmem:[%s12285_s2 + $0x48] sm:$0xf]  ;;  %v7719_v61 = vld [vmem:[%s12285_s2 + $0x54] sm:$0xf0] }
 0x22e   :  { %v8052_v2 = vpop.eup %8051  ;;  %v6643_v39 = vld [vmem:[%s12286_s3 + $0xf8] sm:$0xf0] }
 0x22f   :  { %v8054_v4 = vpop.eup %8053  ;;  %v1957_v6 = vmul.f32 %v8052_v2, %v10152_v49  ;;  %8055 = vrcp.f32 %v1994_v18  ;;  %vm1962_vm12 = vweird.f32 %v8052_v2  ;;  %v2006_v33 = vand.u32 2147483648, %v1994_v18 }
 0x230   :  { %v1976_v35 = vmul.f32 %v8054_v4, %v10154_v50  ;;  %8057 = vtanh.f32 %v1949_v3  ;;  %vm1981_vm13 = vweird.f32 %v8054_v4  ;;  %vm1963_vm0 = vmor %vm1961_vm14, %vm1962_vm12  ;;  %vm2000_vm5 = vweird.f32 %v1994_v18  ;;  %2912 = vmatpush.bf16.msra.mxu3 %v6512_v53  ;;  %v7728_v3 = vld [vmem:[%s12285_s2 + $0xa4] sm:$0xf] }
 0x231   :  { %v1958_v55 = vsub.f32 1.0, %v1957_v6  ;;  %vm1982_vm1 = vmor %vm1980_vm15, %vm1981_vm13  ;;  %v2004_v34 = vand.u32 2147483647, %v1994_v18  ;;  %v2007_v36 = vor.u32 1.1754944e-38, %v2006_v33  ;;  %v6504_v49 = vor.u32 %v7736_v44, %v6501_v46  ;;  %v6469_v6 = vld [vmem:[%s12285_s2 + $0xb0] sm:$0xf0] }
 0x232   :  { %v1977_v7 = vsub.f32 1.0, %v1976_v35  ;;  %v6508_v50 = vor.u32 %v7739_v47, %v6507_v43  ;;  %v6475_v35 = vld [vmem:[%s12285_s2 + $0xa8] sm:$0xf]  ;;  %v6472_v8 = vor.u32 %v7728_v3, %v6469_v6  ;;  %v6435_v33 = vld [vmem:[%s12285_s2 + $0x60] sm:$0xf]  ;;  %v6420_v53 = vor.u32 %v7718_v52, %v6419_v51 }
 0x233   :  { %v1959_v57 = vmul.f32 %v8052_v2, %v1958_v55  ;;  %vm2005_vm7 = vcmp.eq.f32.partialorder %v2004_v34, 8.507059e+37  ;;  %2886 = vmatpush.bf16.msra.mxu1 %v6504_v49  ;;  %v7731_v55 = vld [vmem:[%s12285_s2 + $0xb4] sm:$0xf0]  ;;  %v7722_v34 = vld [vmem:[%s12285_s2 + $0x6c] sm:$0xf0] }
 0x234   :  { %v1978_v30 = vmul.f32 %v8054_v4, %v1977_v7  ;;  %2899 = vmatpush.bf16.msra.mxu2 %v6508_v50  ;;  %2913 = vmatpush.bf16.msra.mxu3 %v6496_v1  ;;  %v6115_v7 = vld [vmem:[%s12287_s0 + $0x30] sm:$0xff]  ;;  %v6476_v12 = vor.u32 %v7731_v55, %v6475_v35  ;;  %v6445_v46 = vld [vmem:[%s12285_s2 + $0x78] sm:$0xf0]  ;;  %v6403_v3 = vld [vmem:[%s12285_s2 + $0x20] sm:$0xf] }
 0x235   :  { %v8056_v11 = vpop.eup %8055  ;;  %v1960_v16 = vadd.f32 %v8052_v2, %v1959_v57  ;;  %v7729_v57 = vld [vmem:[%s12285_s2 + $0xac] sm:$0xf]  ;;  %v7712_v6 = vld [vmem:[%s12285_s2 + $0x24] sm:$0xf]  ;;  %v7771_v52 = vld [vmem:[%s12286_s3 + $0xf4] sm:$0xf0] }
 0x236   :  { %v1979_v60 = vadd.f32 %v8054_v4, %v1978_v30  ;;  %v1996_v20 = vmul.f32 %v8056_v11, %v1994_v18  ;;  %v8058_v25 = vpop.eup %8057  ;;  %vm2001_vm4 = vweird.f32 %v8056_v11  ;;  %v6467_v18 = vld [vmem:[%s12285_s2 + $0xa0] sm:$0xf]  ;;  %v6480_v30 = vor.u32 %v7729_v57, %v6477_v13 }
 0x237   :  { %v1964_v22 = vsel %vm1963_vm0, %v8052_v2, %v1960_v16  ;;  %vm2002_vm6 = vmor %vm2000_vm5, %vm2001_vm4  ;;  %2887 = vmatpush.bf16.msra.mxu1 %v6488_v10  ;;  %v7730_v2 = vld [vmem:[%s12285_s2 + $0xac] sm:$0xf0]  ;;  %v7724_v16 = vld [vmem:[%s12285_s2 + $0x84] sm:$0xf] }
 0x238   :  { %v1969_v26 = vsel %vm1966_vm2, %v1968_v19, %v1964_v22  ;;  %v1983_v5 = vsel %vm1982_vm1, %v8054_v4, %v1979_v60  ;;  %v1997_v63 = vsub.f32 1.0, %v1996_v20  ;;  %2900 = vmatpush.bf16.msra.mxu2 %v6492_v23  ;;  %v6468_v4 = vor.u32 %v7730_v2, %v6467_v18  ;;  %2914 = vmatpush.bf16.msra.mxu3 %v6480_v30  ;;  %v6459_v22 = vld [vmem:[%s12285_s2 + $0x88] sm:$0xf]  ;;  %v7717_v10 = vld [vmem:[%s12285_s2 + $0x4c] sm:$0xf] }
 0x239   :  { %v1988_v28 = vsel %vm1985_vm3, %v1987_v21, %v1983_v5  ;;  %v2011_v27 = vmul.f32 %v8058_v25, %v1969_v26  ;;  %v2023_v19 = vunpack.c.l.bf16 %v6115_v7  ;;  %v2024_v60 = vunpack.c.h.bf16 %v6115_v7  ;;  %v6453_v21 = vld [vmem:[%s12285_s2 + $0x90] sm:$0xf0]  ;;  %v7727_v25 = vld [vmem:[%s12285_s2 + $0x94] sm:$0xf0]  ;;  %v6429_v23 = vld [vmem:[%s12285_s2 + $0x58] sm:$0xf0] }
 0x23a   :  { %v2010_v9 = vmul.f32 %v1988_v28, %v9667_v17  ;;  %v1998_v29 = vmul.f32 %v8056_v11, %v1997_v63  ;;  %v6499_v17 = vld [vmem:[%s12285_s2 + $0xe0] sm:$0xf]  ;;  %v6456_v26 = vor.u32 %v7724_v16, %v6453_v21  ;;  %v6460_v5 = vor.u32 %v7727_v25, %v6459_v22  ;;  %v7725_v63 = vld [vmem:[%s12285_s2 + $0x8c] sm:$0xf]  ;;  %v6461_v28 = vld [vmem:[%s12285_s2 + $0x98] sm:$0xf0] }
 0x23b   :  { %v6500_v45 = vor.u32 %v7738_v37, %v6499_v17  ;;  %2888 = vmatpush.bf16.msra.mxu1 %v6472_v8  ;;  %v7723_v17 = vld [vmem:[%s12285_s2 + $0x74] sm:$0xf0]  ;;  %v6428_v18 = vor.u32 %v7719_v61, %v6427_v48  ;;  %v6432_v2 = vor.u32 %v7717_v10, %v6429_v23  ;;  %v6405_v7 = vld [vmem:[%s12285_s2 + $0x30] sm:$0xf0]  ;;  %v6411_v8 = vld [vmem:[%s12285_s2 + $0x28] sm:$0xf] }
 0x23c   :  { %v10184_v31 = vadd.f32 %v2011_v27, %v2010_v9  ;;  %v1999_v32 = vadd.f32 %v8056_v11, %v1998_v29  ;;  %2901 = vmatpush.bf16.msra.mxu2 %v6476_v12  ;;  %v10292_v27 = vld [vmem:[%s12287_s0 + $0x38] sm:$0xff]  ;;  %v6464_v9 = vor.u32 %v7725_v63, %v6461_v28  ;;  %v6408_v13 = vor.u32 %v7712_v6, %v6405_v7  ;;  %v6387_v22 = vld [vmem:[%s12285_s2] sm:$0xf]  ;;  %v7710_v25 = vld [vmem:[%s12285_s2 + $0xc] sm:$0xf0] }
 0x23d   :  { %2873 = vmatpush.bf16.msra.mxu0 %v6500_v45  ;;  %v7721_v45 = vld [vmem:[%s12285_s2 + $0x6c] sm:$0xf]  ;;  %v2026_v50 = vunpack.c.h.bf16 %v10292_v27  ;;  %v2025_v57 = vunpack.c.l.bf16 %v10292_v27  ;;  %v7715_v30 = vld [vmem:[%s12285_s2 + $0x34] sm:$0xf0]  ;;  %v6389_v28 = vld [vmem:[%s12285_s2 + $0x10] sm:$0xf0] }
 0x23e   :  { %8059 = vtanh.f32 %v10184_v31  ;;  %v2003_v14 = vsel %vm2002_vm6, %v8056_v11, %v1999_v32  ;;  %v7726_v11 = vld [vmem:[%s12285_s2 + $0x8c] sm:$0xf0]  ;;  %2915 = vmatpush.bf16.msra.mxu3 %v6464_v9  ;;  %v6448_v49 = vor.u32 %v7721_v45, %v6445_v46 }
 0x23f   :  { %v2008_v40 = vsel %vm2005_vm7, %v2007_v36, %v2003_v14  ;;  %v6452_v20 = vor.u32 %v7726_v11, %v6451_v15  ;;  %2889 = vmatpush.bf16.msra.mxu1 %v6456_v26  ;;  %v7720_v14 = vld [vmem:[%s12285_s2 + $0x64] sm:$0xf]  ;;  %v7713_v15 = vld [vmem:[%s12285_s2 + $0x2c] sm:$0xf]  ;;  %v6413_v11 = vld [vmem:[%s12285_s2 + $0x38] sm:$0xf0] }
 0x240   :  { %2902 = vmatpush.bf16.msra.mxu2 %v6460_v5  ;;  %v7708_v26 = vld [vmem:[%s12285_s2 + $0x4] sm:$0xf] }
 0x241   :  { %2874 = vmatpush.bf16.msra.mxu0 %v6484_v56 }
 0x242   :  { %2916 = vmatpush.bf16.msra.mxu3 %v6448_v49  ;;  %v6641_v49 = vld [vmem:[%s12286_s3 + $0xe8] sm:$0xf] }
 0x244   :  { %v8060_v38 = vpop.eup %8059 }
 0x245   :  { %v2014_v41 = vmul.f32 %v8060_v38, %v2008_v40  ;;  %2875 = vmatpush.bf16.msra.mxu0 %v6468_v4  ;;  %v6436_v40 = vor.u32 %v7722_v34, %v6435_v33  ;;  %v7714_v4 = vld [vmem:[%s12285_s2 + $0x2c] sm:$0xf0]  ;;  %v6395_v33 = vld [vmem:[%s12285_s2 + $0x8] sm:$0xf]  ;;  %v7711_v34 = vld [vmem:[%s12285_s2 + $0x14] sm:$0xf0] }
 0x246   :  { %2917 = vmatpush.bf16.msra.mxu3 %v6432_v2  ;;  %v6404_v55 = vor.u32 %v7714_v4, %v6403_v3  ;;  %v6625_v3 = vld [vmem:[%s12286_s3 + $0xc8] sm:$0xf]  ;;  %v7767_v4 = vld [vmem:[%s12286_s3 + $0xd4] sm:$0xf0] }
 0x247   :  { %v2017_v42 = vpack.c.bf16 %v2014_v41, %v2014_v41  ;;  %v6437_v41 = vld [vmem:[%s12285_s2 + $0x70] sm:$0xf0] }
 0x248   :  { %v6440_v37 = vor.u32 %v7720_v14, %v6437_v41 }
 0x249   :  { %6114 = vst [vmem:[%s12290_s5 + $0x14] sm:$0xf] %v2017_v42  ;;  %2555 = vmatmul.bf16.vlgmr.msrb.gmra.mxu0 %v2017_v42  ;;  %2568 = vmatmul.bf16.vlgmr.msrb.gmra.mxu1 %v2017_v42 }
 0x24a   :  { %2581 = vmatmul.bf16.vlgmr.msrb.gmra.mxu2 %v2017_v42  ;;  %2594 = vmatmul.bf16.vlgmr.msrb.gmra.mxu3 %v2017_v42  ;;  %v6443_v42 = vld [vmem:[%s12285_s2 + $0x68] sm:$0xf] }
 0x24b   :  { %2876 = vmatpush.bf16.msra.mxu0 %v6452_v20  ;;  %v6444_v44 = vor.u32 %v7723_v17, %v6443_v42  ;;  %2890 = vmatpush.bf16.msra.mxu1 %v6440_v37  ;;  %v6416_v20 = vor.u32 %v7713_v15, %v6413_v11  ;;  %v6633_v17 = vld [vmem:[%s12286_s3 + $0xe0] sm:$0xf]  ;;  %v7770_v37 = vld [vmem:[%s12286_s3 + $0xec] sm:$0xf0]  ;;  %v6627_v15 = vld [vmem:[%s12286_s3 + $0xd8] sm:$0xf0] }
 0x24c   :  { %v6601_v11 = vld [vmem:[%s12286_s3 + $0xa0] sm:$0xf] }
 0x24d   :  { %2903 = vmatpush.bf16.msra.mxu2 %v6444_v44  ;;  %2918 = vmatpush.bf16.msra.mxu3 %v6416_v20  ;;  %v7768_v44 = vld [vmem:[%s12286_s3 + $0xe4] sm:$0xf] }
 0x24f   :  { %2877 = vmatpush.bf16.msra.mxu0 %v6436_v40  ;;  %2891 = vmatpush.bf16.msra.mxu1 %v6424_v24  ;;  %v6397_v40 = vld [vmem:[%s12285_s2 + $0x18] sm:$0xf0]  ;;  %v7764_v24 = vld [vmem:[%s12286_s3 + $0xc4] sm:$0xf] }
 0x251   :  { %2904 = vmatpush.bf16.msra.mxu2 %v6428_v18 }
 0x253   :  { %2878 = vmatpush.bf16.msra.mxu0 %v6420_v53  ;;  %2892 = vmatpush.bf16.msra.mxu1 %v6408_v13  ;;  %v7769_v53 = vld [vmem:[%s12286_s3 + $0xec] sm:$0xf] }
 0x254   :  { %v6646_v18 = vor.u32 %v7769_v53, %v6643_v39  ;;  %v7759_v39 = vld [vmem:[%s12286_s3 + $0x94] sm:$0xf0] }
 0x257   :  { %2879 = vmatpush.bf16.msra.mxu0 %v6404_v55  ;;  %v7753_v55 = vld [vmem:[%s12286_s3 + $0x6c] sm:$0xf] }
 0x2a6   :  { %v2230_v29 = vpop.f32.mrf.mxu0  ;;  %v2243_v32 = vpop.f32.mrf.mxu1 }
 0x2a7   :  { %v2273_v36 = vadd.f32 %v2230_v29, %v2023_v19  ;;  %v2274_v38 = vadd.f32 %v2243_v32, %v2024_v60  ;;  %v6412_v60 = vor.u32 %v7715_v30, %v6411_v8  ;;  %v6388_v29 = vor.u32 %v7710_v25, %v6387_v22  ;;  %v10470_v8 = vld [vmem:[%s12288_s1 + $0x40] sm:$0xff] }
 0x2a8   :  { %v6392_v32 = vor.u32 %v7708_v26, %v6389_v28  ;;  %v6626_v30 = vor.u32 %v7767_v4, %v6625_v3  ;;  %v7760_v25 = vld [vmem:[%s12286_s3 + $0xa4] sm:$0xf]  ;;  %v6603_v26 = vld [vmem:[%s12286_s3 + $0xb0] sm:$0xf0]  ;;  %v6577_v3 = vld [vmem:[%s12286_s3 + $0x68] sm:$0xf] }
 0x2a9   :  { %v6245_v43 = vmul.f32 -1.442695, %v2273_v36  ;;  %v6246_v47 = vmul.f32 -1.442695, %v2274_v38  ;;  %2905 = vmatpush.bf16.msra.mxu2 %v6412_v60  ;;  %v6396_v36 = vor.u32 %v7711_v34, %v6395_v33  ;;  %v7709_v38 = vld [vmem:[%s12285_s2 + $0xc] sm:$0xf]  ;;  %2880 = vmatpush.bf16.msra.mxu0 %v6388_v29  ;;  %v6606_v29 = vor.u32 %v7760_v25, %v6603_v26 }
 0x2aa   :  { %2893 = vmatpush.bf16.msra.mxu1 %v6392_v32  ;;  %v6400_v42 = vor.u32 %v7709_v38, %v6397_v40  ;;  %v7763_v32 = vld [vmem:[%s12286_s3 + $0xb4] sm:$0xf0]  ;;  %v7761_v33 = vld [vmem:[%s12286_s3 + $0xac] sm:$0xf]  ;;  %v6611_v34 = vld [vmem:[%s12286_s3 + $0xb8] sm:$0xf0] }
 0x2ab   :  { %8061 = vpow2.f32 %v6245_v43  ;;  %v6634_v43 = vor.u32 %v7770_v37, %v6633_v17  ;;  %v6585_v40 = vld [vmem:[%s12286_s3 + $0x80] sm:$0xf] }
 0x2ac   :  { %8063 = vpow2.f32 %v6246_v47  ;;  %v6635_v47 = vld [vmem:[%s12286_s3 + $0xf0] sm:$0xf0]  ;;  %2919 = vmatpush.bf16.msra.mxu3 %v6400_v42  ;;  %v7756_v42 = vld [vmem:[%s12286_s3 + $0x84] sm:$0xf] }
 0x2ad   :  { %v2256_v56 = vpop.f32.mrf.mxu2  ;;  %v2269_v58 = vpop.f32.mrf.mxu3  ;;  %2906 = vmatpush.bf16.msra.mxu2 %v6396_v36  ;;  %v6638_v51 = vor.u32 %v7768_v44, %v6635_v47  ;;  %3199 = vmatpush.bf16.msrb.mxu0 %v6634_v43  ;;  %v6614_v44 = vor.u32 %v7761_v33, %v6611_v34  ;;  %v6587_v43 = vld [vmem:[%s12286_s3 + $0x90] sm:$0xf0]  ;;  %v6593_v47 = vld [vmem:[%s12286_s3 + $0x88] sm:$0xf]  ;;  %v6563_v33 = vld [vmem:[%s12286_s3 + $0x58] sm:$0xf0] }
 0x2ae   :  { %v2276_v62 = vadd.f32 %v2269_v58, %v2026_v50  ;;  %v2232_v0 = vpop.f32.mrf.mxu0  ;;  %v2245_v1 = vpop.f32.mrf.mxu1  ;;  %v2275_v27 = vadd.f32 %v2256_v56, %v2025_v57  ;;  %v6617_v56 = vld [vmem:[%s12286_s3 + $0xc0] sm:$0xf]  ;;  %v7766_v58 = vld [vmem:[%s12286_s3 + $0xcc] sm:$0xf0]  ;;  %v7765_v57 = vld [vmem:[%s12286_s3 + $0xcc] sm:$0xf]  ;;  %v6590_v53 = vor.u32 %v7756_v42, %v6587_v43 }
 0x2af   :  { %3212 = vmatpush.bf16.msrb.mxu1 %v6638_v51  ;;  %v6642_v1 = vor.u32 %v7771_v52, %v6641_v49  ;;  %v6618_v2 = vor.u32 %v7766_v58, %v6617_v56  ;;  %v6630_v20 = vor.u32 %v7765_v57, %v6627_v15  ;;  %v10550_v52 = vld [vmem:[%s12288_s1 + $0x48] sm:$0xff]  ;;  %v6595_v58 = vld [vmem:[%s12286_s3 + $0x98] sm:$0xf0]  ;;  %v7748_v15 = vld [vmem:[%s12286_s3 + $0x44] sm:$0xf] }
 0x2b0   :  { %v6247_v35 = vmul.f32 -1.442695, %v2276_v62  ;;  %v6619_v62 = vld [vmem:[%s12286_s3 + $0xd0] sm:$0xf0]  ;;  %3238 = vmatpush.bf16.msrb.mxu3 %v6646_v18  ;;  %v7752_v18 = vld [vmem:[%s12286_s3 + $0x64] sm:$0xf] }
 0x2b1   :  { %v8062_v12 = vpop.eup %8061  ;;  %3225 = vmatpush.bf16.msrb.mxu2 %v6642_v1  ;;  %3200 = vmatpush.bf16.msrb.mxu0 %v6618_v2  ;;  %v6594_v1 = vor.u32 %v7759_v39, %v6593_v47  ;;  %v6571_v2 = vld [vmem:[%s12286_s3 + $0x70] sm:$0xf0]  ;;  %v6537_v34 = vld [vmem:[%s12286_s3 + $0x20] sm:$0xf]  ;;  %v6545_v43 = vld [vmem:[%s12286_s3 + $0x28] sm:$0xf] }
 0x2b2   :  { %v8064_v16 = vpop.eup %8063  ;;  %v10368_v19 = vadd.f32 1.0, %v8062_v12  ;;  %8065 = vpow2.f32 %v6247_v35  ;;  %v6622_v12 = vor.u32 %v7764_v24, %v6619_v62  ;;  %v6569_v24 = vld [vmem:[%s12286_s3 + $0x60] sm:$0xf]  ;;  %v6574_v57 = vor.u32 %v7752_v18, %v6571_v2  ;;  %v6539_v42 = vld [vmem:[%s12286_s3 + $0x30] sm:$0xf0] }
 0x2b3   :  { %v10370_v21 = vadd.f32 1.0, %v8064_v16  ;;  %v7762_v16 = vld [vmem:[%s12286_s3 + $0xac] sm:$0xf0]  ;;  %v7747_v47 = vld [vmem:[%s12286_s3 + $0x34] sm:$0xf0] }
 0x2b4   :  { %8067 = vrcp.f32 %v10368_v19  ;;  %v2291_v9 = vand.u32 2147483647, %v10368_v19  ;;  %v2293_v14 = vand.u32 2147483648, %v10368_v19  ;;  %vm2287_vm9 = vweird.f32 %v10368_v19  ;;  %3213 = vmatpush.bf16.msrb.mxu1 %v6622_v12  ;;  %3239 = vmatpush.bf16.msrb.mxu3 %v6630_v20  ;;  %v6555_v20 = vld [vmem:[%s12286_s3 + $0x50] sm:$0xf0] }
 0x2b5   :  { %8069 = vrcp.f32 %v10370_v21  ;;  %v2258_v5 = vpop.f32.mrf.mxu2  ;;  %v2271_v63 = vpop.f32.mrf.mxu3  ;;  %v2312_v45 = vand.u32 2147483648, %v10370_v21  ;;  %v2310_v23 = vand.u32 2147483647, %v10370_v21  ;;  %v6602_v22 = vor.u32 %v7762_v16, %v6601_v11  ;;  %3226 = vmatpush.bf16.msrb.mxu2 %v6626_v30  ;;  %v7750_v30 = vld [vmem:[%s12286_s3 + $0x4c] sm:$0xf0] }
 0x2b6   :  { %8071 = vtanh.f32 %v2275_v27  ;;  %vm10447_vm10 = vcmp.eq.f32.partialorder %v2291_v9, 8.507059e+37  ;;  %v2294_v7 = vor.u32 1.1754944e-38, %v2293_v14  ;;  %v6609_v5 = vld [vmem:[%s12286_s3 + $0xa8] sm:$0xf]  ;;  %v2349_v27 = vunpack.c.l.bf16 %v10470_v8 }
 0x2b7   :  { %v2313_v35 = vor.u32 1.1754944e-38, %v2312_v45  ;;  %v2350_v9 = vunpack.c.h.bf16 %v10470_v8  ;;  %vm2306_vm13 = vweird.f32 %v10370_v21  ;;  %v6610_v38 = vor.u32 %v7763_v32, %v6609_v5  ;;  %3201 = vmatpush.bf16.msrb.mxu0 %v6602_v22  ;;  %v7749_v32 = vld [vmem:[%s12286_s3 + $0x4c] sm:$0xf] }
 0x2b8   :  { %v8066_v41 = vpop.eup %8065  ;;  %vm10532_vm15 = vcmp.eq.f32.partialorder %v2310_v23, 8.507059e+37  ;;  %3214 = vmatpush.bf16.msrb.mxu1 %v6606_v29  ;;  %3240 = vmatpush.bf16.msrb.mxu3 %v6614_v44  ;;  %v6558_v29 = vor.u32 %v7748_v15, %v6555_v20  ;;  %v6546_v2 = vor.u32 %v7747_v47, %v6545_v43 }
 0x2b9   :  { %v10410_v46 = vadd.f32 1.0, %v8066_v41  ;;  %v7758_v41 = vld [vmem:[%s12286_s3 + $0x8c] sm:$0xf0]  ;;  %3227 = vmatpush.bf16.msrb.mxu2 %v6610_v38 }
 0x2ba   :  { %v10418_v50 = vpop.eup %8067  ;;  %v6586_v45 = vor.u32 %v7758_v41, %v6585_v40  ;;  %v7746_v40 = vld [vmem:[%s12286_s3 + $0x2c] sm:$0xf0]  ;;  %v7744_v41 = vld [vmem:[%s12286_s3 + $0x24] sm:$0xf] }
 0x2bb   :  { %v10429_v54 = vpop.eup %8069  ;;  %v2283_v48 = vmul.f32 %v10418_v50, %v10368_v19  ;;  %vm2288_vm8 = vweird.f32 %v10418_v50  ;;  %8073 = vrcp.f32 %v10410_v46  ;;  %vm2326_vm1 = vweird.f32 %v10410_v46 }
 0x2bc   :  { %v2302_v61 = vmul.f32 %v10429_v54, %v10370_v21  ;;  %vm10463_vm11 = vmor %vm2287_vm9, %vm2288_vm8  ;;  %v8072_v19 = vpop.eup %8071  ;;  %vm2307_vm12 = vweird.f32 %v10429_v54  ;;  %3202 = vmatpush.bf16.msrb.mxu0 %v6586_v45  ;;  %3215 = vmatpush.bf16.msrb.mxu1 %v6590_v53  ;;  %v2330_v22 = vand.u32 2147483647, %v10410_v46  ;;  %v2332_v25 = vand.u32 2147483648, %v10410_v46 }
 0x2bd   :  { %v2284_v0 = vsub.f32 1.0, %v2283_v48  ;;  %vm10525_vm14 = vmor %vm2306_vm13, %vm2307_vm12  ;;  %v7757_v48 = vld [vmem:[%s12286_s3 + $0x8c] sm:$0xf]  ;;  %3228 = vmatpush.bf16.msrb.mxu2 %v6594_v1  ;;  %v6566_v45 = vor.u32 %v7749_v32, %v6563_v33  ;;  %v6538_v39 = vor.u32 %v7746_v40, %v6537_v34 }
 0x2be   :  { %v2303_v6 = vsub.f32 1.0, %v2302_v61  ;;  %v7754_v61 = vld [vmem:[%s12286_s3 + $0x6c] sm:$0xf0]  ;;  %v2333_v21 = vor.u32 1.1754944e-38, %v2332_v25  ;;  %vm2331_vm3 = vcmp.eq.f32.partialorder %v2330_v22, 8.507059e+37 }
 0x2bf   :  { %v2285_v13 = vmul.f32 %v10418_v50, %v2284_v0  ;;  %v6570_v12 = vor.u32 %v7754_v61, %v6569_v24  ;;  %v7742_v61 = vld [vmem:[%s12286_s3 + $0xc] sm:$0xf0] }
 0x2c0   :  { %v2304_v60 = vmul.f32 %v10429_v54, %v2303_v6  ;;  %3216 = vmatpush.bf16.msrb.mxu1 %v6574_v57 }
 0x2c1   :  { %v10496_v63 = vpop.eup %8073  ;;  %v2286_v28 = vadd.f32 %v10418_v50, %v2285_v13  ;;  %v6553_v13 = vld [vmem:[%s12286_s3 + $0x40] sm:$0xf]  ;;  %3203 = vmatpush.bf16.msrb.mxu0 %v6570_v12 }
 0x2c2   :  { %v2305_v14 = vadd.f32 %v10429_v54, %v2304_v60  ;;  %v2322_v36 = vmul.f32 %v10496_v63, %v10410_v46  ;;  %vm2327_vm0 = vweird.f32 %v10496_v63  ;;  %v6554_v46 = vor.u32 %v7750_v30, %v6553_v13 }
 0x2c3   :  { %v2290_v17 = vsel %vm10463_vm11, %v10418_v50, %v2286_v28  ;;  %vm10612_vm2 = vmor %vm2326_vm1, %vm2327_vm0  ;;  %v2351_v13 = vunpack.c.l.bf16 %v10550_v52 }
 0x2c4   :  { %v2295_v49 = vsel %vm10447_vm10, %v2294_v7, %v2290_v17  ;;  %v2309_v50 = vsel %vm10525_vm14, %v10429_v54, %v2305_v14  ;;  %v2323_v51 = vsub.f32 1.0, %v2322_v36  ;;  %v6579_v7 = vld [vmem:[%s12286_s3 + $0x78] sm:$0xf0]  ;;  %3217 = vmatpush.bf16.msrb.mxu1 %v6558_v29 }
 0x2c5   :  { %v2314_v54 = vsel %vm10532_vm15, %v2313_v35, %v2309_v50  ;;  %v2337_v56 = vmul.f32 %v8072_v19, %v2295_v49  ;;  %v7755_v35 = vld [vmem:[%s12286_s3 + $0x74] sm:$0xf0]  ;;  %v2352_v19 = vunpack.c.h.bf16 %v10550_v52  ;;  %v6582_v28 = vor.u32 %v7753_v55, %v6579_v7  ;;  %v7745_v49 = vld [vmem:[%s12286_s3 + $0x2c] sm:$0xf]  ;;  %3204 = vmatpush.bf16.msrb.mxu0 %v6554_v46  ;;  %v6531_v7 = vld [vmem:[%s12286_s3 + $0x18] sm:$0xf0] }
 0x2c6   :  { %v2336_v10 = vmul.f32 %v2314_v54, %v10072_v59  ;;  %v2324_v23 = vmul.f32 %v10496_v63, %v2323_v51  ;;  %v2556_v62 = vpop.f32.mrf.mxu0  ;;  %v2569_v0 = vpop.f32.mrf.mxu1  ;;  %v6598_v59 = vor.u32 %v7757_v48, %v6595_v58  ;;  %v6578_v5 = vor.u32 %v7755_v35, %v6577_v3  ;;  %v6547_v54 = vld [vmem:[%s12286_s3 + $0x38] sm:$0xf0]  ;;  %v7743_v35 = vld [vmem:[%s12286_s3 + $0x14] sm:$0xf0]  ;;  %v7741_v55 = vld [vmem:[%s12286_s3 + $0xc] sm:$0xf] }
 0x2c7   :  { %v2599_v4 = vadd.f32 %v2556_v62, %v2349_v27  ;;  %v2600_v6 = vadd.f32 %v2569_v0, %v2350_v9  ;;  %v6561_v27 = vld [vmem:[%s12286_s3 + $0x48] sm:$0xf]  ;;  %v7751_v9 = vld [vmem:[%s12286_s3 + $0x54] sm:$0xf0]  ;;  %v6542_v48 = vor.u32 %v7744_v41, %v6539_v42  ;;  %v6550_v3 = vor.u32 %v7745_v49, %v6547_v54 }
 0x2c8   :  { %v10589_v8 = vadd.f32 %v2337_v56, %v2336_v10  ;;  %v2325_v60 = vadd.f32 %v10496_v63, %v2324_v23  ;;  %3241 = vmatpush.bf16.msrb.mxu3 %v6598_v59  ;;  %3229 = vmatpush.bf16.msrb.mxu2 %v6578_v5  ;;  %v6521_v56 = vld [vmem:[%s12286_s3] sm:$0xf]  ;;  %v7740_v10 = vld [vmem:[%s12286_s3 + $0x4] sm:$0xf]  ;;  %v6523_v23 = vld [vmem:[%s12286_s3 + $0x10] sm:$0xf0]  ;;  %v6534_v15 = vor.u32 %v7741_v55, %v6531_v7 }
 0x2c9   :  { %v6379_v11 = vmul.f32 -1.442695, %v2599_v4  ;;  %v6380_v16 = vmul.f32 -1.442695, %v2600_v6  ;;  %v6529_v4 = vld [vmem:[%s12286_s3 + $0x8] sm:$0xf]  ;;  %3205 = vmatpush.bf16.msrb.mxu0 %v6538_v39  ;;  %3218 = vmatpush.bf16.msrb.mxu1 %v6542_v48  ;;  %v6522_v6 = vor.u32 %v7742_v61, %v6521_v56  ;;  %v6526_v59 = vor.u32 %v7740_v10, %v6523_v23 }
 0x2ca   :  { %8075 = vtanh.f32 %v10589_v8  ;;  %v2329_v38 = vsel %vm10612_vm2, %v10496_v63, %v2325_v60  ;;  %v6562_v63 = vor.u32 %v7751_v9, %v6561_v27  ;;  %v6530_v30 = vor.u32 %v7743_v35, %v6529_v4  ;;  %v6769_v10 = vld [vmem:[%s12285_s2 + $0xf0] sm:$0xf0]  ;;  %v6775_v23 = vld [vmem:[%s12285_s2 + $0xe8] sm:$0xf]  ;;  %v6751_v4 = vld [vmem:[%s12285_s2 + $0xc0] sm:$0xf] }
 0x2cb   :  { %8077 = vpow2.f32 %v6379_v11  ;;  %v2334_v53 = vsel %vm2331_vm3, %v2333_v21, %v2329_v38  ;;  %v6753_v55 = vld [vmem:[%s12285_s2 + $0xd0] sm:$0xf0]  ;;  %v6759_v7 = vld [vmem:[%s12285_s2 + $0xc8] sm:$0xf] }
 0x2cc   :  { %8079 = vpow2.f32 %v6380_v16  ;;  %3242 = vmatpush.bf16.msrb.mxu3 %v6582_v28  ;;  %3230 = vmatpush.bf16.msrb.mxu2 %v6562_v63 }
 0x2cd   :  { %v10631_v14 = vpop.f32.mrf.mxu2  ;;  %v2595_v36 = vpop.f32.mrf.mxu3  ;;  %3206 = vmatpush.bf16.msrb.mxu0 %v6522_v6  ;;  %3219 = vmatpush.bf16.msrb.mxu1 %v6526_v59  ;;  %v7798_v6 = vld [vmem:[%s12285_s2 + $0xcc] sm:$0xf0]  ;;  %v7796_v59 = vld [vmem:[%s12285_s2 + $0xc4] sm:$0xf] }
 0x2ce   :  { %v2602_v17 = vadd.f32 %v2595_v36, %v2352_v19  ;;  %v2558_v37 = vpop.f32.mrf.mxu0  ;;  %v2571_v44 = vpop.f32.mrf.mxu1  ;;  %v2601_v60 = vadd.f32 %v10631_v14, %v2351_v13  ;;  %v6752_v35 = vor.u32 %v7798_v6, %v6751_v4  ;;  %v7780_v4 = vld [vmem:[%s12285_s2 + $0x44] sm:$0xf]  ;;  %v6689_v6 = vld [vmem:[%s12285_s2 + $0x50] sm:$0xf0] }
 0x2d0   :  { %v8076_v50 = vpop.eup %8075  ;;  %v6381_v51 = vmul.f32 -1.442695, %v2602_v17  ;;  %3243 = vmatpush.bf16.msrb.mxu3 %v6566_v45  ;;  %3231 = vmatpush.bf16.msrb.mxu2 %v6546_v2  ;;  %v6777_v2 = vld [vmem:[%s12285_s2 + $0xf8] sm:$0xf0] }
 0x2d1   :  { %v8078_v58 = vpop.eup %8077  ;;  %v2340_v24 = vmul.f32 %v8076_v50, %v2334_v53 }
 0x2d2   :  { %v8080_v62 = vpop.eup %8079  ;;  %v10669_v0 = vadd.f32 1.0, %v8078_v58  ;;  %8081 = vpow2.f32 %v6381_v51  ;;  %v7802_v58 = vld [vmem:[%s12285_s2 + $0xec] sm:$0xf0] }
 0x2d3   :  { %v10671_v1 = vadd.f32 1.0, %v8080_v62  ;;  %v2343_v18 = vpack.c.bf16 %v2340_v24, %v2340_v24  ;;  %v7800_v24 = vld [vmem:[%s12285_s2 + $0xe4] sm:$0xf]  ;;  %v7803_v62 = vld [vmem:[%s12285_s2 + $0xf4] sm:$0xf0] }
 0x2d4   :  { %8083 = vrcp.f32 %v10669_v0  ;;  %3244 = vmatpush.bf16.msrb.mxu3 %v6550_v3  ;;  %3232 = vmatpush.bf16.msrb.mxu2 %v6530_v30  ;;  %v2619_v5 = vand.u32 2147483648, %v10669_v0  ;;  %v2617_v9 = vand.u32 2147483647, %v10669_v0  ;;  %vm2613_vm6 = vweird.f32 %v10669_v0  ;;  %v7797_v30 = vld [vmem:[%s12285_s2 + $0xcc] sm:$0xf] }
 0x2d5   :  { %8085 = vrcp.f32 %v10671_v1  ;;  %v2584_v12 = vpop.f32.mrf.mxu2  ;;  %v2597_v57 = vpop.f32.mrf.mxu3  ;;  %6248 = vst [vmem:[%s12289_s4 + $0xc] sm:$0xf] %v2343_v18  ;;  %2881 = vmatmul.bf16.vlgmr.msra.gmra.mxu0 %v2343_v18  ;;  %2894 = vmatmul.bf16.vlgmr.msra.gmra.mxu1 %v2343_v18  ;;  %v2638_v28 = vand.u32 2147483648, %v10671_v1  ;;  %v2636_v29 = vand.u32 2147483647, %v10671_v1  ;;  %vm2632_vm7 = vweird.f32 %v10671_v1 }
 0x2d6   :  { %2907 = vmatmul.bf16.vlgmr.msra.gmra.mxu2 %v2343_v18  ;;  %2920 = vmatmul.bf16.vlgmr.msra.gmra.mxu3 %v2343_v18  ;;  %v2620_v34 = vor.u32 1.1754944e-38, %v2619_v5  ;;  %vm2618_vm10 = vcmp.eq.f32.partialorder %v2617_v9, 8.507059e+37  ;;  %v7801_v18 = vld [vmem:[%s12285_s2 + $0xec] sm:$0xf]  ;;  %v7799_v12 = vld [vmem:[%s12285_s2 + $0xd4] sm:$0xf0]  ;;  %v6756_v57 = vor.u32 %v7796_v59, %v6753_v55 }
 0x2d7   :  { %v2639_v38 = vor.u32 1.1754944e-38, %v2638_v28  ;;  %vm2637_vm11 = vcmp.eq.f32.partialorder %v2636_v29, 8.507059e+37  ;;  %v6780_v3 = vor.u32 %v7801_v18, %v6777_v2  ;;  %v6760_v13 = vor.u32 %v7799_v12, %v6759_v7  ;;  %v6745_v9 = vld [vmem:[%s12285_s2 + $0xb8] sm:$0xf0]  ;;  %v6719_v29 = vld [vmem:[%s12285_s2 + $0x80] sm:$0xf] }
 0x2d8   :  { %v8082_v11 = vpop.eup %8081  ;;  %3245 = vmatpush.bf16.msrb.mxu3 %v6534_v15  ;;  %v6761_v15 = vld [vmem:[%s12285_s2 + $0xd8] sm:$0xf0]  ;;  %v6687_v18 = vld [vmem:[%s12285_s2 + $0x40] sm:$0xf]  ;;  %v7782_v2 = vld [vmem:[%s12285_s2 + $0x4c] sm:$0xf0]  ;;  %v6692_v7 = vor.u32 %v7780_v4, %v6689_v6 }
 0x2d9   :  { %v2646_v16 = vadd.f32 1.0, %v8082_v11  ;;  %v6764_v11 = vor.u32 %v7797_v30, %v6761_v15  ;;  %v6695_v59 = vld [vmem:[%s12285_s2 + $0x48] sm:$0xf]  ;;  %v7783_v12 = vld [vmem:[%s12285_s2 + $0x54] sm:$0xf0] }
 0x2da   :  { %v8084_v19 = vpop.eup %8083  ;;  %v6911_v4 = vld [vmem:[%s12286_s3 + $0xf8] sm:$0xf0] }
 0x2db   :  { %v8086_v20 = vpop.eup %8085  ;;  %v2609_v22 = vmul.f32 %v8084_v19, %v10669_v0  ;;  %8087 = vrcp.f32 %v2646_v16  ;;  %vm2614_vm4 = vweird.f32 %v8084_v19  ;;  %v2658_v49 = vand.u32 2147483648, %v2646_v16 }
 0x2dc   :  { %v2628_v52 = vmul.f32 %v8086_v20, %v10671_v1  ;;  %8089 = vtanh.f32 %v2601_v60  ;;  %vm2633_vm5 = vweird.f32 %v8086_v20  ;;  %vm2615_vm8 = vmor %vm2613_vm6, %vm2614_vm4  ;;  %vm2652_vm13 = vweird.f32 %v2646_v16  ;;  %3564 = vmatpush.bf16.msra.mxu3 %v6780_v3  ;;  %v7792_v60 = vld [vmem:[%s12285_s2 + $0xa4] sm:$0xf] }
 0x2dd   :  { %v2610_v25 = vsub.f32 1.0, %v2609_v22  ;;  %vm2634_vm9 = vmor %vm2632_vm7, %vm2633_vm5  ;;  %v2656_v50 = vand.u32 2147483647, %v2646_v16  ;;  %v2659_v53 = vor.u32 1.1754944e-38, %v2658_v49  ;;  %v6772_v0 = vor.u32 %v7800_v24, %v6769_v10  ;;  %v6737_v22 = vld [vmem:[%s12285_s2 + $0xb0] sm:$0xf0] }
 0x2de   :  { %v2629_v26 = vsub.f32 1.0, %v2628_v52  ;;  %v6776_v1 = vor.u32 %v7803_v62, %v6775_v23  ;;  %v6743_v52 = vld [vmem:[%s12285_s2 + $0xa8] sm:$0xf]  ;;  %v6740_v5 = vor.u32 %v7792_v60, %v6737_v22  ;;  %v6703_v49 = vld [vmem:[%s12285_s2 + $0x60] sm:$0xf]  ;;  %v6688_v3 = vor.u32 %v7782_v2, %v6687_v18 }
 0x2df   :  { %v2611_v27 = vmul.f32 %v8084_v19, %v2610_v25  ;;  %vm2657_vm15 = vcmp.eq.f32.partialorder %v2656_v50, 8.507059e+37  ;;  %3538 = vmatpush.bf16.msra.mxu1 %v6772_v0  ;;  %v7795_v25 = vld [vmem:[%s12285_s2 + $0xb4] sm:$0xf0]  ;;  %v7786_v50 = vld [vmem:[%s12285_s2 + $0x6c] sm:$0xf0] }
 0x2e0   :  { %v2630_v46 = vmul.f32 %v8086_v20, %v2629_v26  ;;  %3551 = vmatpush.bf16.msra.mxu2 %v6776_v1  ;;  %3565 = vmatpush.bf16.msra.mxu3 %v6764_v11  ;;  %v6383_v26 = vld [vmem:[%s12287_s0 + $0x40] sm:$0xff]  ;;  %v6744_v28 = vor.u32 %v7795_v25, %v6743_v52  ;;  %v6713_v10 = vld [vmem:[%s12285_s2 + $0x78] sm:$0xf0]  ;;  %v7835_v2 = vld [vmem:[%s12286_s3 + $0xf4] sm:$0xf0] }
 0x2e1   :  { %v8088_v32 = vpop.eup %8087  ;;  %v2612_v33 = vadd.f32 %v8084_v19, %v2611_v27  ;;  %v7793_v27 = vld [vmem:[%s12285_s2 + $0xac] sm:$0xf]  ;;  %v6671_v60 = vld [vmem:[%s12285_s2 + $0x20] sm:$0xf]  ;;  %v7776_v22 = vld [vmem:[%s12285_s2 + $0x24] sm:$0xf] }
 0x2e2   :  { %v2631_v14 = vadd.f32 %v8086_v20, %v2630_v46  ;;  %v2648_v36 = vmul.f32 %v8088_v32, %v2646_v16  ;;  %v8090_v41 = vpop.eup %8089  ;;  %vm2653_vm12 = vweird.f32 %v8088_v32  ;;  %v6735_v16 = vld [vmem:[%s12285_s2 + $0xa0] sm:$0xf]  ;;  %v6748_v46 = vor.u32 %v7793_v27, %v6745_v9 }
 0x2e3   :  { %v2616_v40 = vsel %vm2615_vm8, %v8084_v19, %v2612_v33  ;;  %vm2654_vm14 = vmor %vm2652_vm13, %vm2653_vm12  ;;  %3539 = vmatpush.bf16.msra.mxu1 %v6756_v57  ;;  %v7794_v19 = vld [vmem:[%s12285_s2 + $0xac] sm:$0xf0]  ;;  %v7788_v33 = vld [vmem:[%s12285_s2 + $0x84] sm:$0xf] }
 0x2e4   :  { %v2621_v42 = vsel %vm2618_vm10, %v2620_v34, %v2616_v40  ;;  %v2635_v21 = vsel %vm2634_vm9, %v8086_v20, %v2631_v14  ;;  %v2649_v17 = vsub.f32 1.0, %v2648_v36  ;;  %3552 = vmatpush.bf16.msra.mxu2 %v6760_v13  ;;  %v6736_v20 = vor.u32 %v7794_v19, %v6735_v16  ;;  %3566 = vmatpush.bf16.msra.mxu3 %v6748_v46  ;;  %v6727_v40 = vld [vmem:[%s12285_s2 + $0x88] sm:$0xf]  ;;  %v7781_v57 = vld [vmem:[%s12285_s2 + $0x4c] sm:$0xf] }
 0x2e5   :  { %v2640_v37 = vsel %vm2637_vm11, %v2639_v38, %v2635_v21  ;;  %v2663_v44 = vmul.f32 %v8090_v41, %v2621_v42  ;;  %v2675_v34 = vunpack.c.l.bf16 %v6383_v26  ;;  %v2676_v14 = vunpack.c.h.bf16 %v6383_v26  ;;  %v6721_v38 = vld [vmem:[%s12285_s2 + $0x90] sm:$0xf0]  ;;  %v7791_v41 = vld [vmem:[%s12285_s2 + $0x94] sm:$0xf0]  ;;  %v6697_v13 = vld [vmem:[%s12285_s2 + $0x58] sm:$0xf0] }
 0x2e6   :  { %v2662_v63 = vmul.f32 %v2640_v37, %v10184_v31  ;;  %v2650_v45 = vmul.f32 %v8088_v32, %v2649_v17  ;;  %v6767_v31 = vld [vmem:[%s12285_s2 + $0xe0] sm:$0xf]  ;;  %v6724_v42 = vor.u32 %v7788_v33, %v6721_v38  ;;  %v6728_v21 = vor.u32 %v7791_v41, %v6727_v40  ;;  %v7789_v17 = vld [vmem:[%s12285_s2 + $0x8c] sm:$0xf]  ;;  %v6729_v37 = vld [vmem:[%s12285_s2 + $0x98] sm:$0xf0] }
 0x2e7   :  { %v6768_v61 = vor.u32 %v7802_v58, %v6767_v31  ;;  %3540 = vmatpush.bf16.msra.mxu1 %v6740_v5  ;;  %v7787_v31 = vld [vmem:[%s12285_s2 + $0x74] sm:$0xf0]  ;;  %v6696_v16 = vor.u32 %v7783_v12, %v6695_v59  ;;  %v6700_v19 = vor.u32 %v7781_v57, %v6697_v13  ;;  %v6673_v26 = vld [vmem:[%s12285_s2 + $0x30] sm:$0xf0]  ;;  %v6679_v5 = vld [vmem:[%s12285_s2 + $0x28] sm:$0xf] }
 0x2e8   :  { %v10701_v43 = vadd.f32 %v2663_v44, %v2662_v63  ;;  %v2651_v47 = vadd.f32 %v8088_v32, %v2650_v45  ;;  %3553 = vmatpush.bf16.msra.mxu2 %v6744_v28  ;;  %v10809_v44 = vld [vmem:[%s12287_s0 + $0x48] sm:$0xff]  ;;  %v6732_v63 = vor.u32 %v7789_v17, %v6729_v37  ;;  %v6676_v9 = vor.u32 %v7776_v22, %v6673_v26  ;;  %v7779_v46 = vld [vmem:[%s12285_s2 + $0x34] sm:$0xf0]  ;;  %v6655_v40 = vld [vmem:[%s12285_s2] sm:$0xf] }
 0x2e9   :  { %3525 = vmatpush.bf16.msra.mxu0 %v6768_v61  ;;  %v7785_v61 = vld [vmem:[%s12285_s2 + $0x6c] sm:$0xf]  ;;  %v2678_v1 = vunpack.c.h.bf16 %v10809_v44  ;;  %v2677_v27 = vunpack.c.l.bf16 %v10809_v44  ;;  %v7774_v41 = vld [vmem:[%s12285_s2 + $0xc] sm:$0xf0]  ;;  %v6657_v37 = vld [vmem:[%s12285_s2 + $0x10] sm:$0xf0] }
 0x2ea   :  { %8091 = vtanh.f32 %v10701_v43  ;;  %v2655_v51 = vsel %vm2654_vm14, %v8088_v32, %v2651_v47  ;;  %v7790_v32 = vld [vmem:[%s12285_s2 + $0x8c] sm:$0xf0]  ;;  %3567 = vmatpush.bf16.msra.mxu3 %v6732_v63  ;;  %v6716_v0 = vor.u32 %v7785_v61, %v6713_v10 }
 0x2eb   :  { %v2660_v48 = vsel %vm2657_vm15, %v2659_v53, %v2655_v51  ;;  %v6720_v36 = vor.u32 %v7790_v32, %v6719_v29  ;;  %3541 = vmatpush.bf16.msra.mxu1 %v6724_v42  ;;  %v7784_v51 = vld [vmem:[%s12285_s2 + $0x64] sm:$0xf]  ;;  %v7777_v29 = vld [vmem:[%s12285_s2 + $0x2c] sm:$0xf]  ;;  %v6681_v32 = vld [vmem:[%s12285_s2 + $0x38] sm:$0xf0] }
 0x2ec   :  { %3554 = vmatpush.bf16.msra.mxu2 %v6728_v21  ;;  %v7772_v42 = vld [vmem:[%s12285_s2 + $0x4] sm:$0xf] }
 0x2ed   :  { %3526 = vmatpush.bf16.msra.mxu0 %v6752_v35 }
 0x2ee   :  { %3568 = vmatpush.bf16.msra.mxu3 %v6716_v0  ;;  %v6909_v0 = vld [vmem:[%s12286_s3 + $0xe8] sm:$0xf] }
 0x2f0   :  { %v8092_v39 = vpop.eup %8091 }
 0x2f1   :  { %v2666_v54 = vmul.f32 %v8092_v39, %v2660_v48  ;;  %3527 = vmatpush.bf16.msra.mxu0 %v6736_v20  ;;  %v6704_v48 = vor.u32 %v7786_v50, %v6703_v49  ;;  %v7778_v20 = vld [vmem:[%s12285_s2 + $0x2c] sm:$0xf0]  ;;  %v6663_v49 = vld [vmem:[%s12285_s2 + $0x8] sm:$0xf]  ;;  %v7775_v50 = vld [vmem:[%s12285_s2 + $0x14] sm:$0xf0] }
 0x2f2   :  { %3569 = vmatpush.bf16.msra.mxu3 %v6700_v19  ;;  %v6672_v25 = vor.u32 %v7778_v20, %v6671_v60  ;;  %v6893_v60 = vld [vmem:[%s12286_s3 + $0xc8] sm:$0xf]  ;;  %v7831_v20 = vld [vmem:[%s12286_s3 + $0xd4] sm:$0xf0] }
 0x2f3   :  { %v2669_v56 = vpack.c.bf16 %v2666_v54, %v2666_v54  ;;  %v6705_v54 = vld [vmem:[%s12285_s2 + $0x70] sm:$0xf0] }
 0x2f4   :  { %v6708_v58 = vor.u32 %v7784_v51, %v6705_v54 }
 0x2f5   :  { %6382 = vst [vmem:[%s12290_s5 + $0x10] sm:$0xf] %v2669_v56  ;;  %3207 = vmatmul.bf16.vlgmr.msrb.gmra.mxu0 %v2669_v56  ;;  %3220 = vmatmul.bf16.vlgmr.msrb.gmra.mxu1 %v2669_v56 }
 0x2f6   :  { %3233 = vmatmul.bf16.vlgmr.msrb.gmra.mxu2 %v2669_v56  ;;  %3246 = vmatmul.bf16.vlgmr.msrb.gmra.mxu3 %v2669_v56  ;;  %v6711_v56 = vld [vmem:[%s12285_s2 + $0x68] sm:$0xf] }
 0x2f7   :  { %3528 = vmatpush.bf16.msra.mxu0 %v6720_v36  ;;  %v6712_v24 = vor.u32 %v7787_v31, %v6711_v56  ;;  %3542 = vmatpush.bf16.msra.mxu1 %v6708_v58  ;;  %v6684_v36 = vor.u32 %v7777_v29, %v6681_v32  ;;  %v6901_v31 = vld [vmem:[%s12286_s3 + $0xe0] sm:$0xf]  ;;  %v7834_v58 = vld [vmem:[%s12286_s3 + $0xec] sm:$0xf0]  ;;  %v6895_v29 = vld [vmem:[%s12286_s3 + $0xd8] sm:$0xf0] }
 0x2f8   :  { %v6869_v32 = vld [vmem:[%s12286_s3 + $0xa0] sm:$0xf] }
 0x2f9   :  { %3555 = vmatpush.bf16.msra.mxu2 %v6712_v24  ;;  %3570 = vmatpush.bf16.msra.mxu3 %v6684_v36  ;;  %v7832_v24 = vld [vmem:[%s12286_s3 + $0xe4] sm:$0xf] }
 0x2fb   :  { %3529 = vmatpush.bf16.msra.mxu0 %v6704_v48  ;;  %3543 = vmatpush.bf16.msra.mxu1 %v6692_v7  ;;  %v6665_v48 = vld [vmem:[%s12285_s2 + $0x18] sm:$0xf0]  ;;  %v7828_v7 = vld [vmem:[%s12286_s3 + $0xc4] sm:$0xf] }
 0x2fd   :  { %3556 = vmatpush.bf16.msra.mxu2 %v6696_v16 }
 0x2ff   :  { %3530 = vmatpush.bf16.msra.mxu0 %v6688_v3  ;;  %3544 = vmatpush.bf16.msra.mxu1 %v6676_v9  ;;  %v7833_v3 = vld [vmem:[%s12286_s3 + $0xec] sm:$0xf] }
 0x300   :  { %v6914_v16 = vor.u32 %v7833_v3, %v6911_v4  ;;  %v7823_v4 = vld [vmem:[%s12286_s3 + $0x94] sm:$0xf0] }
 0x303   :  { %3531 = vmatpush.bf16.msra.mxu0 %v6672_v25  ;;  %v7817_v25 = vld [vmem:[%s12286_s3 + $0x6c] sm:$0xf] }
 0x352   :  { %v2882_v45 = vpop.f32.mrf.mxu0  ;;  %v2895_v47 = vpop.f32.mrf.mxu1 }
 0x353   :  { %v2925_v53 = vadd.f32 %v2882_v45, %v2675_v34  ;;  %v2926_v39 = vadd.f32 %v2895_v47, %v2676_v14  ;;  %v6680_v14 = vor.u32 %v7779_v46, %v6679_v5  ;;  %v6656_v45 = vor.u32 %v7774_v41, %v6655_v40  ;;  %v10987_v5 = vld [vmem:[%s12288_s1 + $0x30] sm:$0xff]  ;;  %v7824_v41 = vld [vmem:[%s12286_s3 + $0xa4] sm:$0xf] }
 0x354   :  { %v6660_v47 = vor.u32 %v7772_v42, %v6657_v37  ;;  %v6894_v46 = vor.u32 %v7831_v20, %v6893_v60  ;;  %v6871_v42 = vld [vmem:[%s12286_s3 + $0xb0] sm:$0xf0]  ;;  %v6845_v60 = vld [vmem:[%s12286_s3 + $0x68] sm:$0xf] }
 0x355   :  { %v6513_v23 = vmul.f32 -1.442695, %v2925_v53  ;;  %v6514_v62 = vmul.f32 -1.442695, %v2926_v39  ;;  %3557 = vmatpush.bf16.msra.mxu2 %v6680_v14  ;;  %v6664_v53 = vor.u32 %v7775_v50, %v6663_v49  ;;  %v7773_v39 = vld [vmem:[%s12285_s2 + $0xc] sm:$0xf]  ;;  %3532 = vmatpush.bf16.msra.mxu0 %v6656_v45  ;;  %v6874_v45 = vor.u32 %v7824_v41, %v6871_v42 }
 0x356   :  { %3545 = vmatpush.bf16.msra.mxu1 %v6660_v47  ;;  %v6668_v56 = vor.u32 %v7773_v39, %v6665_v48  ;;  %v7827_v47 = vld [vmem:[%s12286_s3 + $0xb4] sm:$0xf0]  ;;  %v7825_v49 = vld [vmem:[%s12286_s3 + $0xac] sm:$0xf]  ;;  %v6879_v50 = vld [vmem:[%s12286_s3 + $0xb8] sm:$0xf0] }
 0x357   :  { %8093 = vpow2.f32 %v6513_v23  ;;  %v6902_v23 = vor.u32 %v7834_v58, %v6901_v31  ;;  %v6853_v48 = vld [vmem:[%s12286_s3 + $0x80] sm:$0xf] }
 0x358   :  { %8095 = vpow2.f32 %v6514_v62  ;;  %v6903_v62 = vld [vmem:[%s12286_s3 + $0xf0] sm:$0xf0]  ;;  %3571 = vmatpush.bf16.msra.mxu3 %v6668_v56  ;;  %v7820_v56 = vld [vmem:[%s12286_s3 + $0x84] sm:$0xf] }
 0x359   :  { %v2908_v35 = vpop.f32.mrf.mxu2  ;;  %v2921_v55 = vpop.f32.mrf.mxu3  ;;  %3558 = vmatpush.bf16.msra.mxu2 %v6664_v53  ;;  %v6906_v18 = vor.u32 %v7832_v24, %v6903_v62  ;;  %3851 = vmatpush.bf16.msrb.mxu0 %v6902_v23  ;;  %v6882_v24 = vor.u32 %v7825_v49, %v6879_v50  ;;  %v6855_v23 = vld [vmem:[%s12286_s3 + $0x90] sm:$0xf0]  ;;  %v6861_v62 = vld [vmem:[%s12286_s3 + $0x88] sm:$0xf]  ;;  %v6831_v49 = vld [vmem:[%s12286_s3 + $0x58] sm:$0xf0] }
 0x35a   :  { %v2928_v30 = vadd.f32 %v2921_v55, %v2678_v1  ;;  %v2884_v15 = vpop.f32.mrf.mxu0  ;;  %v2897_v11 = vpop.f32.mrf.mxu1  ;;  %v2927_v44 = vadd.f32 %v2908_v35, %v2677_v27  ;;  %v6885_v35 = vld [vmem:[%s12286_s3 + $0xc0] sm:$0xf]  ;;  %v7830_v55 = vld [vmem:[%s12286_s3 + $0xcc] sm:$0xf0]  ;;  %v7829_v27 = vld [vmem:[%s12286_s3 + $0xcc] sm:$0xf]  ;;  %v6858_v3 = vor.u32 %v7820_v56, %v6855_v23 }
 0x35b   :  { %3864 = vmatpush.bf16.msrb.mxu1 %v6906_v18  ;;  %v6910_v11 = vor.u32 %v7835_v2, %v6909_v0  ;;  %v6886_v19 = vor.u32 %v7830_v55, %v6885_v35  ;;  %v6898_v36 = vor.u32 %v7829_v27, %v6895_v29  ;;  %v11067_v2 = vld [vmem:[%s12288_s1 + $0x38] sm:$0xff]  ;;  %v7812_v29 = vld [vmem:[%s12286_s3 + $0x44] sm:$0xf]  ;;  %v6805_v50 = vld [vmem:[%s12286_s3 + $0x20] sm:$0xf] }
 0x35c   :  { %v6515_v52 = vmul.f32 -1.442695, %v2928_v30  ;;  %v6887_v30 = vld [vmem:[%s12286_s3 + $0xd0] sm:$0xf0]  ;;  %3890 = vmatpush.bf16.msrb.mxu3 %v6914_v16  ;;  %v6863_v55 = vld [vmem:[%s12286_s3 + $0x98] sm:$0xf0] }
 0x35d   :  { %v8094_v28 = vpop.eup %8093  ;;  %3877 = vmatpush.bf16.msrb.mxu2 %v6910_v11  ;;  %3852 = vmatpush.bf16.msrb.mxu0 %v6886_v19  ;;  %v6862_v11 = vor.u32 %v7823_v4, %v6861_v62  ;;  %v7816_v16 = vld [vmem:[%s12286_s3 + $0x64] sm:$0xf]  ;;  %v6839_v19 = vld [vmem:[%s12286_s3 + $0x70] sm:$0xf0]  ;;  %v6813_v23 = vld [vmem:[%s12286_s3 + $0x28] sm:$0xf] }
 0x35e   :  { %v8096_v33 = vpop.eup %8095  ;;  %v10885_v34 = vadd.f32 1.0, %v8094_v28  ;;  %8097 = vpow2.f32 %v6515_v52  ;;  %v6890_v28 = vor.u32 %v7828_v7, %v6887_v30  ;;  %v6837_v7 = vld [vmem:[%s12286_s3 + $0x60] sm:$0xf]  ;;  %v6842_v27 = vor.u32 %v7816_v16, %v6839_v19  ;;  %v6807_v56 = vld [vmem:[%s12286_s3 + $0x30] sm:$0xf0] }
 0x35f   :  { %v10887_v38 = vadd.f32 1.0, %v8096_v33  ;;  %v7826_v33 = vld [vmem:[%s12286_s3 + $0xac] sm:$0xf0]  ;;  %v7811_v62 = vld [vmem:[%s12286_s3 + $0x34] sm:$0xf0] }
 0x360   :  { %8099 = vrcp.f32 %v10885_v34  ;;  %v2943_v63 = vand.u32 2147483647, %v10885_v34  ;;  %v2945_v51 = vand.u32 2147483648, %v10885_v34  ;;  %vm2939_vm1 = vweird.f32 %v10885_v34  ;;  %3865 = vmatpush.bf16.msrb.mxu1 %v6890_v28  ;;  %3891 = vmatpush.bf16.msrb.mxu3 %v6898_v36  ;;  %v6823_v36 = vld [vmem:[%s12286_s3 + $0x50] sm:$0xf0] }
 0x361   :  { %8101 = vrcp.f32 %v10887_v38  ;;  %v2910_v21 = vpop.f32.mrf.mxu2  ;;  %v2923_v17 = vpop.f32.mrf.mxu3  ;;  %v2964_v61 = vand.u32 2147483648, %v10887_v38  ;;  %v2962_v13 = vand.u32 2147483647, %v10887_v38  ;;  %v6870_v40 = vor.u32 %v7826_v33, %v6869_v32  ;;  %3878 = vmatpush.bf16.msrb.mxu2 %v6894_v46  ;;  %v7814_v46 = vld [vmem:[%s12286_s3 + $0x4c] sm:$0xf0] }
 0x362   :  { %8103 = vtanh.f32 %v2927_v44  ;;  %vm10964_vm2 = vcmp.eq.f32.partialorder %v2943_v63, 8.507059e+37  ;;  %v2946_v26 = vor.u32 1.1754944e-38, %v2945_v51  ;;  %v6877_v21 = vld [vmem:[%s12286_s3 + $0xa8] sm:$0xf]  ;;  %v3001_v44 = vunpack.c.l.bf16 %v10987_v5 }
 0x363   :  { %v2965_v52 = vor.u32 1.1754944e-38, %v2964_v61  ;;  %v3002_v63 = vunpack.c.h.bf16 %v10987_v5  ;;  %vm2958_vm5 = vweird.f32 %v10887_v38  ;;  %v6878_v39 = vor.u32 %v7827_v47, %v6877_v21  ;;  %3853 = vmatpush.bf16.msrb.mxu0 %v6870_v40  ;;  %v7813_v47 = vld [vmem:[%s12286_s3 + $0x4c] sm:$0xf] }
 0x364   :  { %v8098_v54 = vpop.eup %8097  ;;  %vm11049_vm7 = vcmp.eq.f32.partialorder %v2962_v13, 8.507059e+37  ;;  %3866 = vmatpush.bf16.msrb.mxu1 %v6874_v45  ;;  %3892 = vmatpush.bf16.msrb.mxu3 %v6882_v24  ;;  %v6826_v45 = vor.u32 %v7812_v29, %v6823_v36  ;;  %v6814_v19 = vor.u32 %v7811_v62, %v6813_v23 }
 0x365   :  { %v10927_v10 = vadd.f32 1.0, %v8098_v54  ;;  %v7822_v54 = vld [vmem:[%s12286_s3 + $0x8c] sm:$0xf0]  ;;  %3879 = vmatpush.bf16.msrb.mxu2 %v6878_v39 }
 0x366   :  { %v10935_v1 = vpop.eup %8099  ;;  %v6854_v61 = vor.u32 %v7822_v54, %v6853_v48  ;;  %v7810_v48 = vld [vmem:[%s12286_s3 + $0x2c] sm:$0xf0]  ;;  %v7808_v54 = vld [vmem:[%s12286_s3 + $0x24] sm:$0xf] }
 0x367   :  { %v10946_v6 = vpop.eup %8101  ;;  %v2935_v59 = vmul.f32 %v10935_v1, %v10885_v34  ;;  %vm2940_vm0 = vweird.f32 %v10935_v1  ;;  %8105 = vrcp.f32 %v10927_v10  ;;  %vm2978_vm9 = vweird.f32 %v10927_v10 }
 0x368   :  { %v2954_v12 = vmul.f32 %v10946_v6, %v10887_v38  ;;  %vm10980_vm3 = vmor %vm2939_vm1, %vm2940_vm0  ;;  %v8104_v34 = vpop.eup %8103  ;;  %vm2959_vm4 = vweird.f32 %v10946_v6  ;;  %3854 = vmatpush.bf16.msrb.mxu0 %v6854_v61  ;;  %3867 = vmatpush.bf16.msrb.mxu1 %v6858_v3  ;;  %v2982_v40 = vand.u32 2147483647, %v10927_v10  ;;  %v2984_v41 = vand.u32 2147483648, %v10927_v10 }
 0x369   :  { %v2936_v15 = vsub.f32 1.0, %v2935_v59  ;;  %vm11042_vm6 = vmor %vm2958_vm5, %vm2959_vm4  ;;  %v7821_v59 = vld [vmem:[%s12286_s3 + $0x8c] sm:$0xf]  ;;  %3880 = vmatpush.bf16.msrb.mxu2 %v6862_v11  ;;  %v6834_v61 = vor.u32 %v7813_v47, %v6831_v49  ;;  %v6806_v4 = vor.u32 %v7810_v48, %v6805_v50 }
 0x36a   :  { %v2955_v22 = vsub.f32 1.0, %v2954_v12  ;;  %v7818_v12 = vld [vmem:[%s12286_s3 + $0x6c] sm:$0xf0]  ;;  %v2985_v38 = vor.u32 1.1754944e-38, %v2984_v41  ;;  %vm2983_vm11 = vcmp.eq.f32.partialorder %v2982_v40, 8.507059e+37 }
 0x36b   :  { %v2937_v9 = vmul.f32 %v10935_v1, %v2936_v15  ;;  %v6838_v28 = vor.u32 %v7818_v12, %v6837_v7  ;;  %v7806_v12 = vld [vmem:[%s12286_s3 + $0xc] sm:$0xf0] }
 0x36c   :  { %v2956_v14 = vmul.f32 %v10946_v6, %v2955_v22  ;;  %3868 = vmatpush.bf16.msrb.mxu1 %v6842_v27 }
 0x36d   :  { %v11013_v17 = vpop.eup %8105  ;;  %v2938_v37 = vadd.f32 %v10935_v1, %v2937_v9  ;;  %v6821_v9 = vld [vmem:[%s12286_s3 + $0x40] sm:$0xf]  ;;  %3855 = vmatpush.bf16.msrb.mxu0 %v6838_v28 }
 0x36e   :  { %v2957_v51 = vadd.f32 %v10946_v6, %v2956_v14  ;;  %v2974_v53 = vmul.f32 %v11013_v17, %v10927_v10  ;;  %vm2979_vm8 = vweird.f32 %v11013_v17  ;;  %v6822_v10 = vor.u32 %v7814_v46, %v6821_v9 }
 0x36f   :  { %v2942_v31 = vsel %vm10980_vm3, %v10935_v1, %v2938_v37  ;;  %vm11129_vm10 = vmor %vm2978_vm9, %vm2979_vm8  ;;  %v3003_v9 = vunpack.c.l.bf16 %v11067_v2 }
 0x370   :  { %v2947_v0 = vsel %vm10964_vm2, %v2946_v26, %v2942_v31  ;;  %v2961_v1 = vsel %vm11042_vm6, %v10946_v6, %v2957_v51  ;;  %v2975_v18 = vsub.f32 1.0, %v2974_v53  ;;  %v6847_v26 = vld [vmem:[%s12286_s3 + $0x78] sm:$0xf0]  ;;  %3869 = vmatpush.bf16.msrb.mxu1 %v6826_v45 }
 0x371   :  { %v2966_v6 = vsel %vm11049_vm7, %v2965_v52, %v2961_v1  ;;  %v2989_v35 = vmul.f32 %v8104_v34, %v2947_v0  ;;  %v7819_v52 = vld [vmem:[%s12286_s3 + $0x74] sm:$0xf0]  ;;  %v3004_v34 = vunpack.c.h.bf16 %v11067_v2  ;;  %v6850_v37 = vor.u32 %v7817_v25, %v6847_v26  ;;  %v7809_v0 = vld [vmem:[%s12286_s3 + $0x2c] sm:$0xf]  ;;  %3856 = vmatpush.bf16.msrb.mxu0 %v6822_v10  ;;  %v6799_v26 = vld [vmem:[%s12286_s3 + $0x18] sm:$0xf0] }
 0x372   :  { %v2988_v57 = vmul.f32 %v2966_v6, %v10589_v8  ;;  %v2976_v13 = vmul.f32 %v11013_v17, %v2975_v18  ;;  %v3208_v30 = vpop.f32.mrf.mxu0  ;;  %v3221_v15 = vpop.f32.mrf.mxu1  ;;  %v6866_v8 = vor.u32 %v7821_v59, %v6863_v55  ;;  %v6846_v21 = vor.u32 %v7819_v52, %v6845_v60  ;;  %v6815_v6 = vld [vmem:[%s12286_s3 + $0x38] sm:$0xf0]  ;;  %v7807_v52 = vld [vmem:[%s12286_s3 + $0x14] sm:$0xf0]  ;;  %v7805_v25 = vld [vmem:[%s12286_s3 + $0xc] sm:$0xf] }
 0x373   :  { %v3251_v20 = vadd.f32 %v3208_v30, %v3001_v44  ;;  %v3252_v22 = vadd.f32 %v3221_v15, %v3002_v63  ;;  %v6829_v44 = vld [vmem:[%s12286_s3 + $0x48] sm:$0xf]  ;;  %v7815_v63 = vld [vmem:[%s12286_s3 + $0x54] sm:$0xf0]  ;;  %v6810_v59 = vor.u32 %v7808_v54, %v6807_v56  ;;  %v6818_v60 = vor.u32 %v7809_v0, %v6815_v6 }
 0x374   :  { %v11106_v5 = vadd.f32 %v2989_v35, %v2988_v57  ;;  %v2977_v14 = vadd.f32 %v11013_v17, %v2976_v13  ;;  %3893 = vmatpush.bf16.msrb.mxu3 %v6866_v8  ;;  %3881 = vmatpush.bf16.msrb.mxu2 %v6846_v21  ;;  %v6789_v35 = vld [vmem:[%s12286_s3] sm:$0xf]  ;;  %v7804_v57 = vld [vmem:[%s12286_s3 + $0x4] sm:$0xf]  ;;  %v6791_v13 = vld [vmem:[%s12286_s3 + $0x10] sm:$0xf0]  ;;  %v6802_v29 = vor.u32 %v7805_v25, %v6799_v26 }
 0x375   :  { %v6647_v32 = vmul.f32 -1.442695, %v3251_v20  ;;  %v6648_v33 = vmul.f32 -1.442695, %v3252_v22  ;;  %v6797_v20 = vld [vmem:[%s12286_s3 + $0x8] sm:$0xf]  ;;  %3857 = vmatpush.bf16.msrb.mxu0 %v6806_v4  ;;  %3870 = vmatpush.bf16.msrb.mxu1 %v6810_v59  ;;  %v6790_v22 = vor.u32 %v7806_v12, %v6789_v35  ;;  %v6794_v8 = vor.u32 %v7804_v57, %v6791_v13 }
 0x376   :  { %8107 = vtanh.f32 %v11106_v5  ;;  %v2981_v39 = vsel %vm11129_vm10, %v11013_v17, %v2977_v14  ;;  %v6830_v17 = vor.u32 %v7815_v63, %v6829_v44  ;;  %v6798_v46 = vor.u32 %v7807_v52, %v6797_v20  ;;  %v7037_v57 = vld [vmem:[%s12285_s2 + $0xf0] sm:$0xf0]  ;;  %v7043_v13 = vld [vmem:[%s12285_s2 + $0xe8] sm:$0xf]  ;;  %v7019_v20 = vld [vmem:[%s12285_s2 + $0xc0] sm:$0xf] }
 0x377   :  { %8109 = vpow2.f32 %v6647_v32  ;;  %v2986_v3 = vsel %vm2983_vm11, %v2985_v38, %v2981_v39  ;;  %v7021_v25 = vld [vmem:[%s12285_s2 + $0xd0] sm:$0xf0]  ;;  %v7027_v26 = vld [vmem:[%s12285_s2 + $0xc8] sm:$0xf] }
 0x378   :  { %8111 = vpow2.f32 %v6648_v33  ;;  %3894 = vmatpush.bf16.msrb.mxu3 %v6850_v37  ;;  %3882 = vmatpush.bf16.msrb.mxu2 %v6830_v17 }
 0x379   :  { %v11148_v51 = vpop.f32.mrf.mxu2  ;;  %v3247_v53 = vpop.f32.mrf.mxu3  ;;  %3858 = vmatpush.bf16.msrb.mxu0 %v6790_v22  ;;  %3871 = vmatpush.bf16.msrb.mxu1 %v6794_v8  ;;  %v7862_v22 = vld [vmem:[%s12285_s2 + $0xcc] sm:$0xf0]  ;;  %v7860_v8 = vld [vmem:[%s12285_s2 + $0xc4] sm:$0xf] }
 0x37a   :  { %v3254_v31 = vadd.f32 %v3247_v53, %v3004_v34  ;;  %v3210_v58 = vpop.f32.mrf.mxu0  ;;  %v3223_v24 = vpop.f32.mrf.mxu1  ;;  %v3253_v14 = vadd.f32 %v11148_v51, %v3003_v9  ;;  %v7020_v52 = vor.u32 %v7862_v22, %v7019_v20  ;;  %v7844_v20 = vld [vmem:[%s12285_s2 + $0x44] sm:$0xf]  ;;  %v6957_v22 = vld [vmem:[%s12285_s2 + $0x50] sm:$0xf0] }
 0x37c   :  { %v8108_v1 = vpop.eup %8107  ;;  %v6649_v18 = vmul.f32 -1.442695, %v3254_v31  ;;  %3895 = vmatpush.bf16.msrb.mxu3 %v6834_v61  ;;  %3883 = vmatpush.bf16.msrb.mxu2 %v6814_v19  ;;  %v7045_v19 = vld [vmem:[%s12285_s2 + $0xf8] sm:$0xf0] }
 0x37d   :  { %v8110_v55 = vpop.eup %8109  ;;  %v2992_v7 = vmul.f32 %v8108_v1, %v2986_v3 }
 0x37e   :  { %v8112_v30 = vpop.eup %8111  ;;  %v11186_v15 = vadd.f32 1.0, %v8110_v55  ;;  %8113 = vpow2.f32 %v6649_v18  ;;  %v7866_v55 = vld [vmem:[%s12285_s2 + $0xec] sm:$0xf0] }
 0x37f   :  { %v11188_v11 = vadd.f32 1.0, %v8112_v30  ;;  %v2995_v16 = vpack.c.bf16 %v2992_v7, %v2992_v7  ;;  %v7864_v7 = vld [vmem:[%s12285_s2 + $0xe4] sm:$0xf]  ;;  %v7867_v30 = vld [vmem:[%s12285_s2 + $0xf4] sm:$0xf0] }
 0x380   :  { %8115 = vrcp.f32 %v11186_v15  ;;  %3896 = vmatpush.bf16.msrb.mxu3 %v6818_v60  ;;  %3884 = vmatpush.bf16.msrb.mxu2 %v6798_v46  ;;  %v3271_v21 = vand.u32 2147483648, %v11186_v15  ;;  %v3269_v63 = vand.u32 2147483647, %v11186_v15  ;;  %vm3265_vm14 = vweird.f32 %v11186_v15  ;;  %v7861_v46 = vld [vmem:[%s12285_s2 + $0xcc] sm:$0xf] }
 0x381   :  { %8117 = vrcp.f32 %v11188_v11  ;;  %v3236_v28 = vpop.f32.mrf.mxu2  ;;  %v3249_v27 = vpop.f32.mrf.mxu3  ;;  %6516 = vst [vmem:[%s12289_s4 + $0x10] sm:$0xf] %v2995_v16  ;;  %3533 = vmatmul.bf16.vlgmr.msra.gmra.mxu0 %v2995_v16  ;;  %3546 = vmatmul.bf16.vlgmr.msra.gmra.mxu1 %v2995_v16  ;;  %v3290_v37 = vand.u32 2147483648, %v11188_v11  ;;  %v3288_v45 = vand.u32 2147483647, %v11188_v11  ;;  %vm3284_vm15 = vweird.f32 %v11188_v11 }
 0x382   :  { %3559 = vmatmul.bf16.vlgmr.msra.gmra.mxu2 %v2995_v16  ;;  %3572 = vmatmul.bf16.vlgmr.msra.gmra.mxu3 %v2995_v16  ;;  %v3272_v50 = vor.u32 1.1754944e-38, %v3271_v21  ;;  %vm3270_vm2 = vcmp.eq.f32.partialorder %v3269_v63, 8.507059e+37  ;;  %v7865_v16 = vld [vmem:[%s12285_s2 + $0xec] sm:$0xf]  ;;  %v7863_v28 = vld [vmem:[%s12285_s2 + $0xd4] sm:$0xf0]  ;;  %v7024_v27 = vor.u32 %v7860_v8, %v7021_v25 }
 0x383   :  { %v3291_v39 = vor.u32 1.1754944e-38, %v3290_v37  ;;  %vm3289_vm3 = vcmp.eq.f32.partialorder %v3288_v45, 8.507059e+37  ;;  %v7048_v60 = vor.u32 %v7865_v16, %v7045_v19  ;;  %v7028_v9 = vor.u32 %v7863_v28, %v7027_v26  ;;  %v7013_v63 = vld [vmem:[%s12285_s2 + $0xb8] sm:$0xf0]  ;;  %v6987_v45 = vld [vmem:[%s12285_s2 + $0x80] sm:$0xf] }
 0x384   :  { %v8114_v32 = vpop.eup %8113  ;;  %3897 = vmatpush.bf16.msrb.mxu3 %v6802_v29  ;;  %v7029_v29 = vld [vmem:[%s12285_s2 + $0xd8] sm:$0xf0]  ;;  %v6955_v16 = vld [vmem:[%s12285_s2 + $0x40] sm:$0xf]  ;;  %v7846_v19 = vld [vmem:[%s12285_s2 + $0x4c] sm:$0xf0]  ;;  %v6960_v26 = vor.u32 %v7844_v20, %v6957_v22 }
 0x385   :  { %v3298_v33 = vadd.f32 1.0, %v8114_v32  ;;  %v7032_v32 = vor.u32 %v7861_v46, %v7029_v29  ;;  %v6963_v8 = vld [vmem:[%s12285_s2 + $0x48] sm:$0xf]  ;;  %v7847_v28 = vld [vmem:[%s12285_s2 + $0x54] sm:$0xf0] }
 0x386   :  { %v8116_v34 = vpop.eup %8115  ;;  %v7179_v20 = vld [vmem:[%s12286_s3 + $0xf8] sm:$0xf0] }
 0x387   :  { %v8118_v36 = vpop.eup %8117  ;;  %v3261_v40 = vmul.f32 %v8116_v34, %v11186_v15  ;;  %8119 = vrcp.f32 %v3298_v33  ;;  %vm3266_vm12 = vweird.f32 %v8116_v34  ;;  %v3310_v0 = vand.u32 2147483648, %v3298_v33 }
 0x388   :  { %v3280_v2 = vmul.f32 %v8118_v36, %v11188_v11  ;;  %8121 = vtanh.f32 %v3253_v14  ;;  %vm3285_vm13 = vweird.f32 %v8118_v36  ;;  %vm3267_vm0 = vmor %vm3265_vm14, %vm3266_vm12  ;;  %vm3304_vm5 = vweird.f32 %v3298_v33  ;;  %4216 = vmatpush.bf16.msra.mxu3 %v7048_v60  ;;  %v7856_v14 = vld [vmem:[%s12285_s2 + $0xa4] sm:$0xf] }
 0x389   :  { %v3262_v41 = vsub.f32 1.0, %v3261_v40  ;;  %vm3286_vm1 = vmor %vm3284_vm15, %vm3285_vm13  ;;  %v3308_v1 = vand.u32 2147483647, %v3298_v33  ;;  %v3311_v3 = vor.u32 1.1754944e-38, %v3310_v0  ;;  %v7040_v15 = vor.u32 %v7864_v7, %v7037_v57  ;;  %v7005_v40 = vld [vmem:[%s12285_s2 + $0xb0] sm:$0xf0] }
 0x38a   :  { %v3281_v42 = vsub.f32 1.0, %v3280_v2  ;;  %v7044_v11 = vor.u32 %v7867_v30, %v7043_v13  ;;  %v7011_v2 = vld [vmem:[%s12285_s2 + $0xa8] sm:$0xf]  ;;  %v7008_v21 = vor.u32 %v7856_v14, %v7005_v40  ;;  %v6971_v0 = vld [vmem:[%s12285_s2 + $0x60] sm:$0xf]  ;;  %v6956_v60 = vor.u32 %v7846_v19, %v6955_v16 }
 0x38b   :  { %v3263_v44 = vmul.f32 %v8116_v34, %v3262_v41  ;;  %vm3309_vm7 = vcmp.eq.f32.partialorder %v3308_v1, 8.507059e+37  ;;  %4190 = vmatpush.bf16.msra.mxu1 %v7040_v15  ;;  %v7859_v41 = vld [vmem:[%s12285_s2 + $0xb4] sm:$0xf0]  ;;  %v7850_v1 = vld [vmem:[%s12285_s2 + $0x6c] sm:$0xf0] }
 0x38c   :  { %v3282_v10 = vmul.f32 %v8118_v36, %v3281_v42  ;;  %4203 = vmatpush.bf16.msra.mxu2 %v7044_v11  ;;  %4217 = vmatpush.bf16.msra.mxu3 %v7032_v32  ;;  %v6651_v42 = vld [vmem:[%s12287_s0 + $0x50] sm:$0xff]  ;;  %v7012_v37 = vor.u32 %v7859_v41, %v7011_v2  ;;  %v6981_v57 = vld [vmem:[%s12285_s2 + $0x78] sm:$0xf0]  ;;  %v6939_v14 = vld [vmem:[%s12285_s2 + $0x20] sm:$0xf] }
 0x38d   :  { %v8120_v47 = vpop.eup %8119  ;;  %v3264_v49 = vadd.f32 %v8116_v34, %v3263_v44  ;;  %v7857_v44 = vld [vmem:[%s12285_s2 + $0xac] sm:$0xf]  ;;  %v7840_v40 = vld [vmem:[%s12285_s2 + $0x24] sm:$0xf]  ;;  %v7899_v19 = vld [vmem:[%s12286_s3 + $0xf4] sm:$0xf0] }
 0x38e   :  { %v3283_v51 = vadd.f32 %v8118_v36, %v3282_v10  ;;  %v3300_v53 = vmul.f32 %v8120_v47, %v3298_v33  ;;  %v8122_v54 = vpop.eup %8121  ;;  %vm3305_vm4 = vweird.f32 %v8120_v47  ;;  %v7003_v33 = vld [vmem:[%s12285_s2 + $0xa0] sm:$0xf]  ;;  %v7016_v10 = vor.u32 %v7857_v44, %v7013_v63 }
 0x38f   :  { %v3268_v48 = vsel %vm3267_vm0, %v8116_v34, %v3264_v49  ;;  %vm3306_vm6 = vmor %vm3304_vm5, %vm3305_vm4  ;;  %4191 = vmatpush.bf16.msra.mxu1 %v7024_v27  ;;  %v7858_v34 = vld [vmem:[%s12285_s2 + $0xac] sm:$0xf0]  ;;  %v7852_v49 = vld [vmem:[%s12285_s2 + $0x84] sm:$0xf] }
 0x390   :  { %v3273_v56 = vsel %vm3270_vm2, %v3272_v50, %v3268_v48  ;;  %v3287_v38 = vsel %vm3286_vm1, %v8118_v36, %v3283_v51  ;;  %v3301_v31 = vsub.f32 1.0, %v3300_v53  ;;  %4204 = vmatpush.bf16.msra.mxu2 %v7028_v9  ;;  %v7004_v36 = vor.u32 %v7858_v34, %v7003_v33  ;;  %4218 = vmatpush.bf16.msra.mxu3 %v7016_v10  ;;  %v6995_v48 = vld [vmem:[%s12285_s2 + $0x88] sm:$0xf]  ;;  %v7845_v27 = vld [vmem:[%s12285_s2 + $0x4c] sm:$0xf] }
 0x391   :  { %v3292_v58 = vsel %vm3289_vm3, %v3291_v39, %v3287_v38  ;;  %v3315_v24 = vmul.f32 %v8122_v54, %v3273_v56  ;;  %v3327_v50 = vunpack.c.l.bf16 %v6651_v42  ;;  %v3328_v51 = vunpack.c.h.bf16 %v6651_v42  ;;  %v6989_v39 = vld [vmem:[%s12285_s2 + $0x90] sm:$0xf0]  ;;  %v7855_v54 = vld [vmem:[%s12285_s2 + $0x94] sm:$0xf0]  ;;  %v6965_v9 = vld [vmem:[%s12285_s2 + $0x58] sm:$0xf0] }
 0x392   :  { %v3314_v17 = vmul.f32 %v3292_v58, %v10701_v43  ;;  %v3302_v61 = vmul.f32 %v8120_v47, %v3301_v31  ;;  %v7035_v43 = vld [vmem:[%s12285_s2 + $0xe0] sm:$0xf]  ;;  %v6992_v56 = vor.u32 %v7852_v49, %v6989_v39  ;;  %v6996_v38 = vor.u32 %v7855_v54, %v6995_v48  ;;  %v7853_v31 = vld [vmem:[%s12285_s2 + $0x8c] sm:$0xf]  ;;  %v6997_v58 = vld [vmem:[%s12285_s2 + $0x98] sm:$0xf0] }
 0x393   :  { %v7036_v12 = vor.u32 %v7866_v55, %v7035_v43  ;;  %4192 = vmatpush.bf16.msra.mxu1 %v7008_v21  ;;  %v7851_v43 = vld [vmem:[%s12285_s2 + $0x74] sm:$0xf0]  ;;  %v6964_v33 = vor.u32 %v7847_v28, %v6963_v8  ;;  %v6968_v34 = vor.u32 %v7845_v27, %v6965_v9  ;;  %v6941_v42 = vld [vmem:[%s12285_s2 + $0x30] sm:$0xf0]  ;;  %v6947_v21 = vld [vmem:[%s12285_s2 + $0x28] sm:$0xf] }
 0x394   :  { %v11218_v23 = vadd.f32 %v3315_v24, %v3314_v17  ;;  %v3303_v62 = vadd.f32 %v8120_v47, %v3302_v61  ;;  %4205 = vmatpush.bf16.msra.mxu2 %v7012_v37  ;;  %v11326_v24 = vld [vmem:[%s12287_s0 + $0x58] sm:$0xff]  ;;  %v7000_v17 = vor.u32 %v7853_v31, %v6997_v58  ;;  %v6944_v63 = vor.u32 %v7840_v40, %v6941_v42  ;;  %v6923_v48 = vld [vmem:[%s12285_s2] sm:$0xf]  ;;  %v7838_v54 = vld [vmem:[%s12285_s2 + $0xc] sm:$0xf0] }
 0x395   :  { %4177 = vmatpush.bf16.msra.mxu0 %v7036_v12  ;;  %v7849_v12 = vld [vmem:[%s12285_s2 + $0x6c] sm:$0xf]  ;;  %v3330_v11 = vunpack.c.h.bf16 %v11326_v24  ;;  %v3329_v44 = vunpack.c.l.bf16 %v11326_v24  ;;  %v7843_v10 = vld [vmem:[%s12285_s2 + $0x34] sm:$0xf0]  ;;  %v6925_v58 = vld [vmem:[%s12285_s2 + $0x10] sm:$0xf0] }
 0x396   :  { %8123 = vtanh.f32 %v11218_v23  ;;  %v3307_v18 = vsel %vm3306_vm6, %v8120_v47, %v3303_v62  ;;  %v7854_v47 = vld [vmem:[%s12285_s2 + $0x8c] sm:$0xf0]  ;;  %4219 = vmatpush.bf16.msra.mxu3 %v7000_v17  ;;  %v6984_v15 = vor.u32 %v7849_v12, %v6981_v57 }
 0x397   :  { %v3312_v59 = vsel %vm3309_vm7, %v3311_v3, %v3307_v18  ;;  %v6988_v53 = vor.u32 %v7854_v47, %v6987_v45  ;;  %4193 = vmatpush.bf16.msra.mxu1 %v6992_v56  ;;  %v7848_v18 = vld [vmem:[%s12285_s2 + $0x64] sm:$0xf]  ;;  %v7841_v45 = vld [vmem:[%s12285_s2 + $0x2c] sm:$0xf]  ;;  %v6949_v47 = vld [vmem:[%s12285_s2 + $0x38] sm:$0xf0] }
 0x398   :  { %4206 = vmatpush.bf16.msra.mxu2 %v6996_v38  ;;  %v7836_v56 = vld [vmem:[%s12285_s2 + $0x4] sm:$0xf] }
 0x399   :  { %4178 = vmatpush.bf16.msra.mxu0 %v7020_v52 }
 0x39a   :  { %4220 = vmatpush.bf16.msra.mxu3 %v6984_v15  ;;  %v7177_v15 = vld [vmem:[%s12286_s3 + $0xe8] sm:$0xf] }
 0x39c   :  { %v8124_v4 = vpop.eup %8123 }
 0x39d   :  { %v3318_v6 = vmul.f32 %v8124_v4, %v3312_v59  ;;  %4179 = vmatpush.bf16.msra.mxu0 %v7004_v36  ;;  %v6972_v59 = vor.u32 %v7850_v1, %v6971_v0  ;;  %v7842_v36 = vld [vmem:[%s12285_s2 + $0x2c] sm:$0xf0]  ;;  %v6931_v0 = vld [vmem:[%s12285_s2 + $0x8] sm:$0xf]  ;;  %v7839_v1 = vld [vmem:[%s12285_s2 + $0x14] sm:$0xf0] }
 0x39e   :  { %4221 = vmatpush.bf16.msra.mxu3 %v6968_v34  ;;  %v6940_v41 = vor.u32 %v7842_v36, %v6939_v14  ;;  %v7161_v14 = vld [vmem:[%s12286_s3 + $0xc8] sm:$0xf]  ;;  %v7895_v36 = vld [vmem:[%s12286_s3 + $0xd4] sm:$0xf0] }
 0x39f   :  { %v3321_v35 = vpack.c.bf16 %v3318_v6, %v3318_v6  ;;  %v6973_v6 = vld [vmem:[%s12285_s2 + $0x70] sm:$0xf0] }
 0x3a0   :  { %v6976_v55 = vor.u32 %v7848_v18, %v6973_v6 }
 0x3a1   :  { %6650 = vst [vmem:[%s12290_s5 + $0xc] sm:$0xf] %v3321_v35  ;;  %3859 = vmatmul.bf16.vlgmr.msrb.gmra.mxu0 %v3321_v35  ;;  %3872 = vmatmul.bf16.vlgmr.msrb.gmra.mxu1 %v3321_v35 }
 0x3a2   :  { %3885 = vmatmul.bf16.vlgmr.msrb.gmra.mxu2 %v3321_v35  ;;  %3898 = vmatmul.bf16.vlgmr.msrb.gmra.mxu3 %v3321_v35  ;;  %v6979_v35 = vld [vmem:[%s12285_s2 + $0x68] sm:$0xf] }
 0x3a3   :  { %4180 = vmatpush.bf16.msra.mxu0 %v6988_v53  ;;  %v6980_v7 = vor.u32 %v7851_v43, %v6979_v35  ;;  %4194 = vmatpush.bf16.msra.mxu1 %v6976_v55  ;;  %v6952_v53 = vor.u32 %v7841_v45, %v6949_v47  ;;  %v7169_v43 = vld [vmem:[%s12286_s3 + $0xe0] sm:$0xf]  ;;  %v7898_v55 = vld [vmem:[%s12286_s3 + $0xec] sm:$0xf0]  ;;  %v7163_v45 = vld [vmem:[%s12286_s3 + $0xd8] sm:$0xf0] }
 0x3a4   :  { %v7137_v47 = vld [vmem:[%s12286_s3 + $0xa0] sm:$0xf] }
 0x3a5   :  { %4207 = vmatpush.bf16.msra.mxu2 %v6980_v7  ;;  %4222 = vmatpush.bf16.msra.mxu3 %v6952_v53  ;;  %v7896_v7 = vld [vmem:[%s12286_s3 + $0xe4] sm:$0xf] }
 0x3a7   :  { %4181 = vmatpush.bf16.msra.mxu0 %v6972_v59  ;;  %4195 = vmatpush.bf16.msra.mxu1 %v6960_v26  ;;  %v6933_v59 = vld [vmem:[%s12285_s2 + $0x18] sm:$0xf0]  ;;  %v7892_v26 = vld [vmem:[%s12286_s3 + $0xc4] sm:$0xf] }
 0x3a9   :  { %4208 = vmatpush.bf16.msra.mxu2 %v6964_v33 }
 0x3ab   :  { %4182 = vmatpush.bf16.msra.mxu0 %v6956_v60  ;;  %4196 = vmatpush.bf16.msra.mxu1 %v6944_v63  ;;  %v7897_v60 = vld [vmem:[%s12286_s3 + $0xec] sm:$0xf] }
 0x3ac   :  { %v7182_v33 = vor.u32 %v7897_v60, %v7179_v20  ;;  %v7887_v20 = vld [vmem:[%s12286_s3 + $0x94] sm:$0xf0] }
 0x3af   :  { %4183 = vmatpush.bf16.msra.mxu0 %v6940_v41  ;;  %v7881_v41 = vld [vmem:[%s12286_s3 + $0x6c] sm:$0xf] }
 0x3fe   :  { %v3534_v61 = vpop.f32.mrf.mxu0  ;;  %v3547_v62 = vpop.f32.mrf.mxu1 }
 0x3ff   :  { %v3577_v3 = vadd.f32 %v3534_v61, %v3327_v50  ;;  %v3578_v4 = vadd.f32 %v3547_v62, %v3328_v51  ;;  %v6948_v51 = vor.u32 %v7843_v10, %v6947_v21  ;;  %v6924_v61 = vor.u32 %v7838_v54, %v6923_v48  ;;  %v11504_v21 = vld [vmem:[%s12288_s1 + $0x20] sm:$0xff] }
 0x400   :  { %v6928_v62 = vor.u32 %v7836_v56, %v6925_v58  ;;  %v7162_v10 = vor.u32 %v7895_v36, %v7161_v14  ;;  %v7888_v54 = vld [vmem:[%s12286_s3 + $0xa4] sm:$0xf]  ;;  %v7139_v56 = vld [vmem:[%s12286_s3 + $0xb0] sm:$0xf0]  ;;  %v7113_v14 = vld [vmem:[%s12286_s3 + $0x68] sm:$0xf] }
 0x401   :  { %v6781_v13 = vmul.f32 -1.442695, %v3577_v3  ;;  %v6782_v30 = vmul.f32 -1.442695, %v3578_v4  ;;  %4209 = vmatpush.bf16.msra.mxu2 %v6948_v51  ;;  %v6932_v3 = vor.u32 %v7839_v1, %v6931_v0  ;;  %v7837_v4 = vld [vmem:[%s12285_s2 + $0xc] sm:$0xf]  ;;  %4184 = vmatpush.bf16.msra.mxu0 %v6924_v61  ;;  %v7142_v61 = vor.u32 %v7888_v54, %v7139_v56 }
 0x402   :  { %4197 = vmatpush.bf16.msra.mxu1 %v6928_v62  ;;  %v6936_v35 = vor.u32 %v7837_v4, %v6933_v59  ;;  %v7891_v62 = vld [vmem:[%s12286_s3 + $0xb4] sm:$0xf0]  ;;  %v7889_v0 = vld [vmem:[%s12286_s3 + $0xac] sm:$0xf]  ;;  %v7147_v1 = vld [vmem:[%s12286_s3 + $0xb8] sm:$0xf0] }
 0x403   :  { %8125 = vpow2.f32 %v6781_v13  ;;  %v7170_v13 = vor.u32 %v7898_v55, %v7169_v43  ;;  %v7121_v59 = vld [vmem:[%s12286_s3 + $0x80] sm:$0xf] }
 0x404   :  { %8127 = vpow2.f32 %v6782_v30  ;;  %v7171_v30 = vld [vmem:[%s12286_s3 + $0xf0] sm:$0xf0]  ;;  %4223 = vmatpush.bf16.msra.mxu3 %v6936_v35  ;;  %v7884_v35 = vld [vmem:[%s12286_s3 + $0x84] sm:$0xf] }
 0x405   :  { %v3560_v52 = vpop.f32.mrf.mxu2  ;;  %v3573_v25 = vpop.f32.mrf.mxu3  ;;  %4210 = vmatpush.bf16.msra.mxu2 %v6932_v3  ;;  %v7174_v16 = vor.u32 %v7896_v7, %v7171_v30  ;;  %4503 = vmatpush.bf16.msrb.mxu0 %v7170_v13  ;;  %v7150_v7 = vor.u32 %v7889_v0, %v7147_v1  ;;  %v7123_v13 = vld [vmem:[%s12286_s3 + $0x90] sm:$0xf0]  ;;  %v7129_v30 = vld [vmem:[%s12286_s3 + $0x88] sm:$0xf]  ;;  %v7099_v0 = vld [vmem:[%s12286_s3 + $0x58] sm:$0xf0] }
 0x406   :  { %v3580_v46 = vadd.f32 %v3573_v25, %v3330_v11  ;;  %v3536_v29 = vpop.f32.mrf.mxu0  ;;  %v3549_v32 = vpop.f32.mrf.mxu1  ;;  %v3579_v24 = vadd.f32 %v3560_v52, %v3329_v44  ;;  %v7153_v52 = vld [vmem:[%s12286_s3 + $0xc0] sm:$0xf]  ;;  %v7894_v25 = vld [vmem:[%s12286_s3 + $0xcc] sm:$0xf0]  ;;  %v7893_v44 = vld [vmem:[%s12286_s3 + $0xcc] sm:$0xf]  ;;  %v7126_v60 = vor.u32 %v7884_v35, %v7123_v13 }
 0x407   :  { %4516 = vmatpush.bf16.msrb.mxu1 %v7174_v16  ;;  %v7178_v32 = vor.u32 %v7899_v19, %v7177_v15  ;;  %v7154_v34 = vor.u32 %v7894_v25, %v7153_v52  ;;  %v7166_v53 = vor.u32 %v7893_v44, %v7163_v45  ;;  %v11584_v19 = vld [vmem:[%s12288_s1 + $0x28] sm:$0xff]  ;;  %v7131_v25 = vld [vmem:[%s12286_s3 + $0x98] sm:$0xf0]  ;;  %v7876_v45 = vld [vmem:[%s12286_s3 + $0x44] sm:$0xf] }
 0x408   :  { %v6783_v2 = vmul.f32 -1.442695, %v3580_v46  ;;  %v7155_v46 = vld [vmem:[%s12286_s3 + $0xd0] sm:$0xf0]  ;;  %4542 = vmatpush.bf16.msrb.mxu3 %v7182_v33  ;;  %v7880_v33 = vld [vmem:[%s12286_s3 + $0x64] sm:$0xf] }
 0x409   :  { %v8126_v37 = vpop.eup %8125  ;;  %4529 = vmatpush.bf16.msrb.mxu2 %v7178_v32  ;;  %4504 = vmatpush.bf16.msrb.mxu0 %v7154_v34  ;;  %v7130_v32 = vor.u32 %v7887_v20, %v7129_v30  ;;  %v7107_v34 = vld [vmem:[%s12286_s3 + $0x70] sm:$0xf0]  ;;  %v7073_v1 = vld [vmem:[%s12286_s3 + $0x20] sm:$0xf]  ;;  %v7081_v13 = vld [vmem:[%s12286_s3 + $0x28] sm:$0xf] }
 0x40a   :  { %v8128_v49 = vpop.eup %8127  ;;  %v11402_v50 = vadd.f32 1.0, %v8126_v37  ;;  %8129 = vpow2.f32 %v6783_v2  ;;  %v7158_v37 = vor.u32 %v7892_v26, %v7155_v46  ;;  %v7105_v26 = vld [vmem:[%s12286_s3 + $0x60] sm:$0xf]  ;;  %v7110_v44 = vor.u32 %v7880_v33, %v7107_v34  ;;  %v7075_v35 = vld [vmem:[%s12286_s3 + $0x30] sm:$0xf0] }
 0x40b   :  { %v11404_v39 = vadd.f32 1.0, %v8128_v49  ;;  %v7890_v49 = vld [vmem:[%s12286_s3 + $0xac] sm:$0xf0]  ;;  %v7875_v30 = vld [vmem:[%s12286_s3 + $0x34] sm:$0xf0] }
 0x40c   :  { %8131 = vrcp.f32 %v11402_v50  ;;  %v3595_v17 = vand.u32 2147483647, %v11402_v50  ;;  %v3597_v18 = vand.u32 2147483648, %v11402_v50  ;;  %vm3591_vm9 = vweird.f32 %v11402_v50  ;;  %4517 = vmatpush.bf16.msrb.mxu1 %v7158_v37  ;;  %4543 = vmatpush.bf16.msrb.mxu3 %v7166_v53  ;;  %v7091_v53 = vld [vmem:[%s12286_s3 + $0x50] sm:$0xf0] }
 0x40d   :  { %8133 = vrcp.f32 %v11404_v39  ;;  %v3562_v38 = vpop.f32.mrf.mxu2  ;;  %v3575_v31 = vpop.f32.mrf.mxu3  ;;  %v3616_v12 = vand.u32 2147483648, %v11404_v39  ;;  %v3614_v9 = vand.u32 2147483647, %v11404_v39  ;;  %v7138_v48 = vor.u32 %v7890_v49, %v7137_v47  ;;  %4530 = vmatpush.bf16.msrb.mxu2 %v7162_v10  ;;  %v7878_v10 = vld [vmem:[%s12286_s3 + $0x4c] sm:$0xf0] }
 0x40e   :  { %8135 = vtanh.f32 %v3579_v24  ;;  %vm11481_vm10 = vcmp.eq.f32.partialorder %v3595_v17, 8.507059e+37  ;;  %v3598_v42 = vor.u32 1.1754944e-38, %v3597_v18  ;;  %v7145_v38 = vld [vmem:[%s12286_s3 + $0xa8] sm:$0xf]  ;;  %v3653_v24 = vunpack.c.l.bf16 %v11504_v21 }
 0x40f   :  { %v3617_v2 = vor.u32 1.1754944e-38, %v3616_v12  ;;  %v3654_v17 = vunpack.c.h.bf16 %v11504_v21  ;;  %vm3610_vm13 = vweird.f32 %v11404_v39  ;;  %v7146_v4 = vor.u32 %v7891_v62, %v7145_v38  ;;  %4505 = vmatpush.bf16.msrb.mxu0 %v7138_v48  ;;  %v7877_v62 = vld [vmem:[%s12286_s3 + $0x4c] sm:$0xf] }
 0x410   :  { %v8130_v6 = vpop.eup %8129  ;;  %vm11566_vm15 = vcmp.eq.f32.partialorder %v3614_v9, 8.507059e+37  ;;  %4518 = vmatpush.bf16.msrb.mxu1 %v7142_v61  ;;  %4544 = vmatpush.bf16.msrb.mxu3 %v7150_v7  ;;  %v7094_v61 = vor.u32 %v7876_v45, %v7091_v53  ;;  %v7082_v34 = vor.u32 %v7875_v30, %v7081_v13 }
 0x411   :  { %v11444_v57 = vadd.f32 1.0, %v8130_v6  ;;  %v7886_v6 = vld [vmem:[%s12286_s3 + $0x8c] sm:$0xf0]  ;;  %4531 = vmatpush.bf16.msrb.mxu2 %v7146_v4 }
 0x412   :  { %v11452_v11 = vpop.eup %8131  ;;  %v7122_v12 = vor.u32 %v7886_v6, %v7121_v59  ;;  %v7874_v59 = vld [vmem:[%s12286_s3 + $0x2c] sm:$0xf0]  ;;  %v7872_v6 = vld [vmem:[%s12286_s3 + $0x24] sm:$0xf] }
 0x413   :  { %v11463_v22 = vpop.eup %8133  ;;  %v3587_v8 = vmul.f32 %v11452_v11, %v11402_v50  ;;  %vm3592_vm8 = vweird.f32 %v11452_v11  ;;  %8137 = vrcp.f32 %v11444_v57  ;;  %vm3630_vm1 = vweird.f32 %v11444_v57 }
 0x414   :  { %v3606_v28 = vmul.f32 %v11463_v22, %v11404_v39  ;;  %vm11497_vm11 = vmor %vm3591_vm9, %vm3592_vm8  ;;  %v8136_v50 = vpop.eup %8135  ;;  %vm3611_vm12 = vweird.f32 %v11463_v22  ;;  %4506 = vmatpush.bf16.msrb.mxu0 %v7122_v12  ;;  %4519 = vmatpush.bf16.msrb.mxu1 %v7126_v60  ;;  %v3634_v48 = vand.u32 2147483647, %v11444_v57  ;;  %v3636_v54 = vand.u32 2147483648, %v11444_v57 }
 0x415   :  { %v3588_v29 = vsub.f32 1.0, %v3587_v8  ;;  %vm11559_vm14 = vmor %vm3610_vm13, %vm3611_vm12  ;;  %v7885_v8 = vld [vmem:[%s12286_s3 + $0x8c] sm:$0xf]  ;;  %4532 = vmatpush.bf16.msrb.mxu2 %v7130_v32  ;;  %v7102_v12 = vor.u32 %v7877_v62, %v7099_v0  ;;  %v7074_v20 = vor.u32 %v7874_v59, %v7073_v1 }
 0x416   :  { %v3607_v40 = vsub.f32 1.0, %v3606_v28  ;;  %v7882_v28 = vld [vmem:[%s12286_s3 + $0x6c] sm:$0xf0]  ;;  %v3637_v39 = vor.u32 1.1754944e-38, %v3636_v54  ;;  %vm3635_vm3 = vcmp.eq.f32.partialorder %v3634_v48, 8.507059e+37 }
 0x417   :  { %v3589_v63 = vmul.f32 %v11452_v11, %v3588_v29  ;;  %v7106_v37 = vor.u32 %v7882_v28, %v7105_v26  ;;  %v7870_v28 = vld [vmem:[%s12286_s3 + $0xc] sm:$0xf0] }
 0x418   :  { %v3608_v51 = vmul.f32 %v11463_v22, %v3607_v40  ;;  %4520 = vmatpush.bf16.msrb.mxu1 %v7110_v44 }
 0x419   :  { %v11530_v31 = vpop.eup %8137  ;;  %v3590_v58 = vadd.f32 %v11452_v11, %v3589_v63  ;;  %v7089_v63 = vld [vmem:[%s12286_s3 + $0x40] sm:$0xf]  ;;  %4507 = vmatpush.bf16.msrb.mxu0 %v7106_v37 }
 0x41a   :  { %v3609_v18 = vadd.f32 %v11463_v22, %v3608_v51  ;;  %v3626_v3 = vmul.f32 %v11530_v31, %v11444_v57  ;;  %vm3631_vm0 = vweird.f32 %v11530_v31  ;;  %v7090_v57 = vor.u32 %v7878_v10, %v7089_v63 }
 0x41b   :  { %v3594_v43 = vsel %vm11497_vm11, %v11452_v11, %v3590_v58  ;;  %vm11646_vm2 = vmor %vm3630_vm1, %vm3631_vm0  ;;  %v3655_v63 = vunpack.c.l.bf16 %v11584_v19 }
 0x41c   :  { %v3599_v15 = vsel %vm11481_vm10, %v3598_v42, %v3594_v43  ;;  %v3613_v11 = vsel %vm11559_vm14, %v11463_v22, %v3609_v18  ;;  %v3627_v16 = vsub.f32 1.0, %v3626_v3  ;;  %v7115_v42 = vld [vmem:[%s12286_s3 + $0x78] sm:$0xf0]  ;;  %4521 = vmatpush.bf16.msrb.mxu1 %v7094_v61 }
 0x41d   :  { %v3618_v22 = vsel %vm11566_vm15, %v3617_v2, %v3613_v11  ;;  %v3641_v52 = vmul.f32 %v8136_v50, %v3599_v15  ;;  %v7883_v2 = vld [vmem:[%s12286_s3 + $0x74] sm:$0xf0]  ;;  %v3656_v50 = vunpack.c.h.bf16 %v11584_v19  ;;  %v7118_v58 = vor.u32 %v7881_v41, %v7115_v42  ;;  %v7873_v15 = vld [vmem:[%s12286_s3 + $0x2c] sm:$0xf]  ;;  %4508 = vmatpush.bf16.msrb.mxu0 %v7090_v57  ;;  %v7067_v42 = vld [vmem:[%s12286_s3 + $0x18] sm:$0xf0] }
 0x41e   :  { %v3640_v27 = vmul.f32 %v3618_v22, %v11106_v5  ;;  %v3628_v9 = vmul.f32 %v11530_v31, %v3627_v16  ;;  %v3860_v46 = vpop.f32.mrf.mxu0  ;;  %v3873_v29 = vpop.f32.mrf.mxu1  ;;  %v7134_v5 = vor.u32 %v7885_v8, %v7131_v25  ;;  %v7114_v38 = vor.u32 %v7883_v2, %v7113_v14  ;;  %v7083_v22 = vld [vmem:[%s12286_s3 + $0x38] sm:$0xf0]  ;;  %v7871_v2 = vld [vmem:[%s12286_s3 + $0x14] sm:$0xf0]  ;;  %v7869_v41 = vld [vmem:[%s12286_s3 + $0xc] sm:$0xf] }
 0x41f   :  { %v3903_v36 = vadd.f32 %v3860_v46, %v3653_v24  ;;  %v3904_v40 = vadd.f32 %v3873_v29, %v3654_v17  ;;  %v7097_v24 = vld [vmem:[%s12286_s3 + $0x48] sm:$0xf]  ;;  %v7879_v17 = vld [vmem:[%s12286_s3 + $0x54] sm:$0xf0]  ;;  %v7078_v8 = vor.u32 %v7872_v6, %v7075_v35  ;;  %v7086_v14 = vor.u32 %v7873_v15, %v7083_v22 }
 0x420   :  { %v11623_v21 = vadd.f32 %v3641_v52, %v3640_v27  ;;  %v3629_v51 = vadd.f32 %v11530_v31, %v3628_v9  ;;  %4545 = vmatpush.bf16.msrb.mxu3 %v7134_v5  ;;  %4533 = vmatpush.bf16.msrb.mxu2 %v7114_v38  ;;  %v7057_v52 = vld [vmem:[%s12286_s3] sm:$0xf]  ;;  %v7868_v27 = vld [vmem:[%s12286_s3 + $0x4] sm:$0xf]  ;;  %v7059_v9 = vld [vmem:[%s12286_s3 + $0x10] sm:$0xf0]  ;;  %v7070_v45 = vor.u32 %v7869_v41, %v7067_v42 }
 0x421   :  { %v6915_v47 = vmul.f32 -1.442695, %v3903_v36  ;;  %v6916_v49 = vmul.f32 -1.442695, %v3904_v40  ;;  %v7065_v36 = vld [vmem:[%s12286_s3 + $0x8] sm:$0xf]  ;;  %4509 = vmatpush.bf16.msrb.mxu0 %v7074_v20  ;;  %4522 = vmatpush.bf16.msrb.mxu1 %v7078_v8  ;;  %v7058_v40 = vor.u32 %v7870_v28, %v7057_v52  ;;  %v7062_v5 = vor.u32 %v7868_v27, %v7059_v9 }
 0x422   :  { %8139 = vtanh.f32 %v11623_v21  ;;  %v3633_v4 = vsel %vm11646_vm2, %v11530_v31, %v3629_v51  ;;  %v7098_v31 = vor.u32 %v7879_v17, %v7097_v24  ;;  %v7066_v10 = vor.u32 %v7871_v2, %v7065_v36  ;;  %v7305_v27 = vld [vmem:[%s12285_s2 + $0xf0] sm:$0xf0]  ;;  %v7311_v9 = vld [vmem:[%s12285_s2 + $0xe8] sm:$0xf]  ;;  %v7287_v36 = vld [vmem:[%s12285_s2 + $0xc0] sm:$0xf] }
 0x423   :  { %8141 = vpow2.f32 %v6915_v47  ;;  %v3638_v60 = vsel %vm3635_vm3, %v3637_v39, %v3633_v4  ;;  %v7289_v41 = vld [vmem:[%s12285_s2 + $0xd0] sm:$0xf0]  ;;  %v7295_v42 = vld [vmem:[%s12285_s2 + $0xc8] sm:$0xf] }
 0x424   :  { %8143 = vpow2.f32 %v6916_v49  ;;  %4546 = vmatpush.bf16.msrb.mxu3 %v7118_v58  ;;  %4534 = vmatpush.bf16.msrb.mxu2 %v7098_v31 }
 0x425   :  { %v11665_v18 = vpop.f32.mrf.mxu2  ;;  %v3899_v3 = vpop.f32.mrf.mxu3  ;;  %4510 = vmatpush.bf16.msrb.mxu0 %v7058_v40  ;;  %4523 = vmatpush.bf16.msrb.mxu1 %v7062_v5  ;;  %v7926_v40 = vld [vmem:[%s12285_s2 + $0xcc] sm:$0xf0]  ;;  %v7924_v5 = vld [vmem:[%s12285_s2 + $0xc4] sm:$0xf] }
 0x426   :  { %v3906_v43 = vadd.f32 %v3899_v3, %v3656_v50  ;;  %v3862_v55 = vpop.f32.mrf.mxu0  ;;  %v3875_v7 = vpop.f32.mrf.mxu1  ;;  %v3905_v51 = vadd.f32 %v11665_v18, %v3655_v63  ;;  %v7288_v2 = vor.u32 %v7926_v40, %v7287_v36  ;;  %v7908_v36 = vld [vmem:[%s12285_s2 + $0x44] sm:$0xf]  ;;  %v7225_v40 = vld [vmem:[%s12285_s2 + $0x50] sm:$0xf0] }
 0x428   :  { %v8140_v11 = vpop.eup %8139  ;;  %v6917_v16 = vmul.f32 -1.442695, %v3906_v43  ;;  %4547 = vmatpush.bf16.msrb.mxu3 %v7102_v12  ;;  %4535 = vmatpush.bf16.msrb.mxu2 %v7082_v34  ;;  %v7313_v34 = vld [vmem:[%s12285_s2 + $0xf8] sm:$0xf0] }
 0x429   :  { %v8142_v25 = vpop.eup %8141  ;;  %v3644_v26 = vmul.f32 %v8140_v11, %v3638_v60 }
 0x42a   :  { %v8144_v46 = vpop.eup %8143  ;;  %v11703_v29 = vadd.f32 1.0, %v8142_v25  ;;  %8145 = vpow2.f32 %v6917_v16  ;;  %v7930_v25 = vld [vmem:[%s12285_s2 + $0xec] sm:$0xf0] }
 0x42b   :  { %v11705_v32 = vadd.f32 1.0, %v8144_v46  ;;  %v3647_v33 = vpack.c.bf16 %v3644_v26, %v3644_v26  ;;  %v7928_v26 = vld [vmem:[%s12285_s2 + $0xe4] sm:$0xf]  ;;  %v7931_v46 = vld [vmem:[%s12285_s2 + $0xf4] sm:$0xf0] }
 0x42c   :  { %8147 = vrcp.f32 %v11703_v29  ;;  %4548 = vmatpush.bf16.msrb.mxu3 %v7086_v14  ;;  %4536 = vmatpush.bf16.msrb.mxu2 %v7066_v10  ;;  %v3923_v38 = vand.u32 2147483648, %v11703_v29  ;;  %v3921_v17 = vand.u32 2147483647, %v11703_v29  ;;  %vm3917_vm6 = vweird.f32 %v11703_v29  ;;  %v7925_v10 = vld [vmem:[%s12285_s2 + $0xcc] sm:$0xf] }
 0x42d   :  { %8149 = vrcp.f32 %v11705_v32  ;;  %v3888_v37 = vpop.f32.mrf.mxu2  ;;  %v3901_v44 = vpop.f32.mrf.mxu3  ;;  %6784 = vst [vmem:[%s12289_s4 + $0x14] sm:$0xf] %v3647_v33  ;;  %4185 = vmatmul.bf16.vlgmr.msra.gmra.mxu0 %v3647_v33  ;;  %4198 = vmatmul.bf16.vlgmr.msra.gmra.mxu1 %v3647_v33  ;;  %v3942_v58 = vand.u32 2147483648, %v11705_v32  ;;  %v3940_v61 = vand.u32 2147483647, %v11705_v32  ;;  %vm3936_vm7 = vweird.f32 %v11705_v32 }
 0x42e   :  { %4211 = vmatmul.bf16.vlgmr.msra.gmra.mxu2 %v3647_v33  ;;  %4224 = vmatmul.bf16.vlgmr.msra.gmra.mxu3 %v3647_v33  ;;  %v3924_v1 = vor.u32 1.1754944e-38, %v3923_v38  ;;  %vm3922_vm10 = vcmp.eq.f32.partialorder %v3921_v17, 8.507059e+37  ;;  %v7929_v33 = vld [vmem:[%s12285_s2 + $0xec] sm:$0xf]  ;;  %v7927_v37 = vld [vmem:[%s12285_s2 + $0xd4] sm:$0xf0]  ;;  %v7292_v44 = vor.u32 %v7924_v5, %v7289_v41 }
 0x42f   :  { %v3943_v4 = vor.u32 1.1754944e-38, %v3942_v58  ;;  %vm3941_vm11 = vcmp.eq.f32.partialorder %v3940_v61, 8.507059e+37  ;;  %v7316_v14 = vor.u32 %v7929_v33, %v7313_v34  ;;  %v7296_v63 = vor.u32 %v7927_v37, %v7295_v42  ;;  %v7281_v17 = vld [vmem:[%s12285_s2 + $0xb8] sm:$0xf0]  ;;  %v7255_v61 = vld [vmem:[%s12285_s2 + $0x80] sm:$0xf] }
 0x430   :  { %v8146_v47 = vpop.eup %8145  ;;  %4549 = vmatpush.bf16.msrb.mxu3 %v7070_v45  ;;  %v7297_v45 = vld [vmem:[%s12285_s2 + $0xd8] sm:$0xf0]  ;;  %v7223_v33 = vld [vmem:[%s12285_s2 + $0x40] sm:$0xf]  ;;  %v7910_v34 = vld [vmem:[%s12285_s2 + $0x4c] sm:$0xf0]  ;;  %v7228_v42 = vor.u32 %v7908_v36, %v7225_v40 }
 0x431   :  { %v3950_v49 = vadd.f32 1.0, %v8146_v47  ;;  %v7300_v47 = vor.u32 %v7925_v10, %v7297_v45  ;;  %v7231_v5 = vld [vmem:[%s12285_s2 + $0x48] sm:$0xf]  ;;  %v7911_v37 = vld [vmem:[%s12285_s2 + $0x54] sm:$0xf0] }
 0x432   :  { %v8148_v50 = vpop.eup %8147  ;;  %v7445_v36 = vld [vmem:[%s12286_s3 + $0xf8] sm:$0xf0] }
 0x433   :  { %v8150_v53 = vpop.eup %8149  ;;  %v3913_v48 = vmul.f32 %v8148_v50, %v11703_v29  ;;  %8151 = vrcp.f32 %v3950_v49  ;;  %vm3918_vm4 = vweird.f32 %v8148_v50  ;;  %v3962_v15 = vand.u32 2147483648, %v3950_v49 }
 0x434   :  { %v3932_v19 = vmul.f32 %v8150_v53, %v11705_v32  ;;  %8153 = vtanh.f32 %v3905_v51  ;;  %vm3937_vm5 = vweird.f32 %v8150_v53  ;;  %vm3919_vm8 = vmor %vm3917_vm6, %vm3918_vm4  ;;  %vm3956_vm13 = vweird.f32 %v3950_v49  ;;  %4868 = vmatpush.bf16.msra.mxu3 %v7316_v14  ;;  %v7920_v51 = vld [vmem:[%s12285_s2 + $0xa4] sm:$0xf] }
 0x435   :  { %v3914_v54 = vsub.f32 1.0, %v3913_v48  ;;  %vm3938_vm9 = vmor %vm3936_vm7, %vm3937_vm5  ;;  %v3960_v11 = vand.u32 2147483647, %v3950_v49  ;;  %v3963_v60 = vor.u32 1.1754944e-38, %v3962_v15  ;;  %v7308_v29 = vor.u32 %v7928_v26, %v7305_v27  ;;  %v7273_v48 = vld [vmem:[%s12285_s2 + $0xb0] sm:$0xf0] }
 0x436   :  { %v3933_v56 = vsub.f32 1.0, %v3932_v19  ;;  %v7312_v32 = vor.u32 %v7931_v46, %v7311_v9  ;;  %v7279_v19 = vld [vmem:[%s12285_s2 + $0xa8] sm:$0xf]  ;;  %v7276_v38 = vor.u32 %v7920_v51, %v7273_v48  ;;  %v7239_v15 = vld [vmem:[%s12285_s2 + $0x60] sm:$0xf]  ;;  %v7224_v14 = vor.u32 %v7910_v34, %v7223_v33 }
 0x437   :  { %v3915_v24 = vmul.f32 %v8148_v50, %v3914_v54  ;;  %vm3961_vm15 = vcmp.eq.f32.partialorder %v3960_v11, 8.507059e+37  ;;  %4842 = vmatpush.bf16.msra.mxu1 %v7308_v29  ;;  %v7923_v54 = vld [vmem:[%s12285_s2 + $0xb4] sm:$0xf0]  ;;  %v7914_v11 = vld [vmem:[%s12285_s2 + $0x6c] sm:$0xf0] }
 0x438   :  { %v3934_v57 = vmul.f32 %v8150_v53, %v3933_v56  ;;  %4855 = vmatpush.bf16.msra.mxu2 %v7312_v32  ;;  %4869 = vmatpush.bf16.msra.mxu3 %v7300_v47  ;;  %v6919_v56 = vld [vmem:[%s12287_s0 + $0x60] sm:$0xff]  ;;  %v7280_v58 = vor.u32 %v7923_v54, %v7279_v19  ;;  %v7249_v27 = vld [vmem:[%s12285_s2 + $0x78] sm:$0xf0]  ;;  %v7963_v34 = vld [vmem:[%s12286_s3 + $0xf4] sm:$0xf0] }
 0x439   :  { %v8152_v62 = vpop.eup %8151  ;;  %v3916_v0 = vadd.f32 %v8148_v50, %v3915_v24  ;;  %v7921_v24 = vld [vmem:[%s12285_s2 + $0xac] sm:$0xf]  ;;  %v7207_v51 = vld [vmem:[%s12285_s2 + $0x20] sm:$0xf]  ;;  %v7904_v48 = vld [vmem:[%s12285_s2 + $0x24] sm:$0xf] }
 0x43a   :  { %v3935_v18 = vadd.f32 %v8150_v53, %v3934_v57  ;;  %v3952_v3 = vmul.f32 %v8152_v62, %v3950_v49  ;;  %v8154_v6 = vpop.eup %8153  ;;  %vm3957_vm12 = vweird.f32 %v8152_v62  ;;  %v7271_v49 = vld [vmem:[%s12285_s2 + $0xa0] sm:$0xf]  ;;  %v7284_v57 = vor.u32 %v7921_v24, %v7281_v17 }
 0x43b   :  { %v3920_v59 = vsel %vm3919_vm8, %v8148_v50, %v3916_v0  ;;  %vm3958_vm14 = vmor %vm3956_vm13, %vm3957_vm12  ;;  %4843 = vmatpush.bf16.msra.mxu1 %v7292_v44  ;;  %v7922_v50 = vld [vmem:[%s12285_s2 + $0xac] sm:$0xf0]  ;;  %v7916_v0 = vld [vmem:[%s12285_s2 + $0x84] sm:$0xf] }
 0x43c   :  { %v3925_v35 = vsel %vm3922_vm10, %v3924_v1, %v3920_v59  ;;  %v3939_v39 = vsel %vm3938_vm9, %v8150_v53, %v3935_v18  ;;  %v3953_v43 = vsub.f32 1.0, %v3952_v3  ;;  %4856 = vmatpush.bf16.msra.mxu2 %v7296_v63  ;;  %v7272_v53 = vor.u32 %v7922_v50, %v7271_v49  ;;  %4870 = vmatpush.bf16.msra.mxu3 %v7284_v57  ;;  %v7263_v59 = vld [vmem:[%s12285_s2 + $0x88] sm:$0xf]  ;;  %v7909_v44 = vld [vmem:[%s12285_s2 + $0x4c] sm:$0xf] }
 0x43d   :  { %v3944_v55 = vsel %vm3941_vm11, %v3943_v4, %v3939_v39  ;;  %v3967_v7 = vmul.f32 %v8154_v6, %v3925_v35  ;;  %v3979_v1 = vunpack.c.l.bf16 %v6919_v56  ;;  %v3980_v18 = vunpack.c.h.bf16 %v6919_v56  ;;  %v7257_v4 = vld [vmem:[%s12285_s2 + $0x90] sm:$0xf0]  ;;  %v7919_v6 = vld [vmem:[%s12285_s2 + $0x94] sm:$0xf0]  ;;  %v7233_v63 = vld [vmem:[%s12285_s2 + $0x58] sm:$0xf0] }
 0x43e   :  { %v3966_v31 = vmul.f32 %v3944_v55, %v11218_v23  ;;  %v3954_v12 = vmul.f32 %v8152_v62, %v3953_v43  ;;  %v7303_v23 = vld [vmem:[%s12285_s2 + $0xe0] sm:$0xf]  ;;  %v7260_v35 = vor.u32 %v7916_v0, %v7257_v4  ;;  %v7264_v39 = vor.u32 %v7919_v6, %v7263_v59  ;;  %v7917_v43 = vld [vmem:[%s12285_s2 + $0x8c] sm:$0xf]  ;;  %v7265_v55 = vld [vmem:[%s12285_s2 + $0x98] sm:$0xf0] }
 0x43f   :  { %v7304_v28 = vor.u32 %v7930_v25, %v7303_v23  ;;  %4844 = vmatpush.bf16.msra.mxu1 %v7276_v38  ;;  %v7915_v23 = vld [vmem:[%s12285_s2 + $0x74] sm:$0xf0]  ;;  %v7232_v49 = vor.u32 %v7911_v37, %v7231_v5  ;;  %v7236_v50 = vor.u32 %v7909_v44, %v7233_v63  ;;  %v7209_v56 = vld [vmem:[%s12285_s2 + $0x30] sm:$0xf0]  ;;  %v7215_v38 = vld [vmem:[%s12285_s2 + $0x28] sm:$0xf] }
 0x440   :  { %v11735_v13 = vadd.f32 %v3967_v7, %v3966_v31  ;;  %v3955_v30 = vadd.f32 %v8152_v62, %v3954_v12  ;;  %4857 = vmatpush.bf16.msra.mxu2 %v7280_v58  ;;  %v11843_v7 = vld [vmem:[%s12287_s0 + $0x68] sm:$0xff]  ;;  %v7268_v31 = vor.u32 %v7917_v43, %v7265_v55  ;;  %v7212_v17 = vor.u32 %v7904_v48, %v7209_v56  ;;  %v7907_v57 = vld [vmem:[%s12285_s2 + $0x34] sm:$0xf0]  ;;  %v7191_v59 = vld [vmem:[%s12285_s2] sm:$0xf] }
 0x441   :  { %4829 = vmatpush.bf16.msra.mxu0 %v7304_v28  ;;  %v7913_v28 = vld [vmem:[%s12285_s2 + $0x6c] sm:$0xf]  ;;  %v3982_v32 = vunpack.c.h.bf16 %v11843_v7  ;;  %v3981_v24 = vunpack.c.l.bf16 %v11843_v7  ;;  %v7902_v6 = vld [vmem:[%s12285_s2 + $0xc] sm:$0xf0]  ;;  %v7193_v55 = vld [vmem:[%s12285_s2 + $0x10] sm:$0xf0] }
 0x442   :  { %8155 = vtanh.f32 %v11735_v13  ;;  %v3959_v16 = vsel %vm3958_vm14, %v8152_v62, %v3955_v30  ;;  %v7918_v62 = vld [vmem:[%s12285_s2 + $0x8c] sm:$0xf0]  ;;  %4871 = vmatpush.bf16.msra.mxu3 %v7268_v31  ;;  %v7252_v29 = vor.u32 %v7913_v28, %v7249_v27 }
 0x443   :  { %v3964_v8 = vsel %vm3961_vm15, %v3963_v60, %v3959_v16  ;;  %v7256_v3 = vor.u32 %v7918_v62, %v7255_v61  ;;  %4845 = vmatpush.bf16.msra.mxu1 %v7260_v35  ;;  %v7912_v16 = vld [vmem:[%s12285_s2 + $0x64] sm:$0xf]  ;;  %v7905_v61 = vld [vmem:[%s12285_s2 + $0x2c] sm:$0xf]  ;;  %v7217_v62 = vld [vmem:[%s12285_s2 + $0x38] sm:$0xf0] }
 0x444   :  { %4858 = vmatpush.bf16.msra.mxu2 %v7264_v39  ;;  %v7900_v35 = vld [vmem:[%s12285_s2 + $0x4] sm:$0xf] }
 0x445   :  { %4830 = vmatpush.bf16.msra.mxu0 %v7288_v2 }
 0x446   :  { %4872 = vmatpush.bf16.msra.mxu3 %v7252_v29  ;;  %v7443_v29 = vld [vmem:[%s12286_s3 + $0xe8] sm:$0xf] }
 0x448   :  { %v8156_v20 = vpop.eup %8155 }
 0x449   :  { %v3970_v22 = vmul.f32 %v8156_v20, %v3964_v8  ;;  %4831 = vmatpush.bf16.msra.mxu0 %v7272_v53  ;;  %v7240_v8 = vor.u32 %v7914_v11, %v7239_v15  ;;  %v7906_v53 = vld [vmem:[%s12285_s2 + $0x2c] sm:$0xf0]  ;;  %v7199_v15 = vld [vmem:[%s12285_s2 + $0x8] sm:$0xf]  ;;  %v7903_v11 = vld [vmem:[%s12285_s2 + $0x14] sm:$0xf0] }
 0x44a   :  { %4873 = vmatpush.bf16.msra.mxu3 %v7236_v50  ;;  %v7208_v54 = vor.u32 %v7906_v53, %v7207_v51  ;;  %v7427_v51 = vld [vmem:[%s12286_s3 + $0xc8] sm:$0xf]  ;;  %v7959_v53 = vld [vmem:[%s12286_s3 + $0xd4] sm:$0xf0] }
 0x44b   :  { %v3973_v52 = vpack.c.bf16 %v3970_v22, %v3970_v22  ;;  %v7241_v22 = vld [vmem:[%s12285_s2 + $0x70] sm:$0xf0] }
 0x44c   :  { %v7244_v25 = vor.u32 %v7912_v16, %v7241_v22 }
 0x44d   :  { %6918 = vst [vmem:[%s12290_s5 + $0x8] sm:$0xf] %v3973_v52  ;;  %4511 = vmatmul.bf16.vlgmr.msrb.gmra.mxu0 %v3973_v52  ;;  %4524 = vmatmul.bf16.vlgmr.msrb.gmra.mxu1 %v3973_v52 }
 0x44e   :  { %4537 = vmatmul.bf16.vlgmr.msrb.gmra.mxu2 %v3973_v52  ;;  %4550 = vmatmul.bf16.vlgmr.msrb.gmra.mxu3 %v3973_v52  ;;  %v7247_v52 = vld [vmem:[%s12285_s2 + $0x68] sm:$0xf] }
 0x44f   :  { %4832 = vmatpush.bf16.msra.mxu0 %v7256_v3  ;;  %v7248_v26 = vor.u32 %v7915_v23, %v7247_v52  ;;  %4846 = vmatpush.bf16.msra.mxu1 %v7244_v25  ;;  %v7220_v3 = vor.u32 %v7905_v61, %v7217_v62  ;;  %v7435_v23 = vld [vmem:[%s12286_s3 + $0xe0] sm:$0xf]  ;;  %v7962_v25 = vld [vmem:[%s12286_s3 + $0xec] sm:$0xf0]  ;;  %v7429_v61 = vld [vmem:[%s12286_s3 + $0xd8] sm:$0xf0] }
 0x450   :  { %v7403_v62 = vld [vmem:[%s12286_s3 + $0xa0] sm:$0xf] }
 0x451   :  { %4859 = vmatpush.bf16.msra.mxu2 %v7248_v26  ;;  %4874 = vmatpush.bf16.msra.mxu3 %v7220_v3  ;;  %v7960_v26 = vld [vmem:[%s12286_s3 + $0xe4] sm:$0xf] }
 0x453   :  { %4833 = vmatpush.bf16.msra.mxu0 %v7240_v8  ;;  %4847 = vmatpush.bf16.msra.mxu1 %v7228_v42  ;;  %v7201_v8 = vld [vmem:[%s12285_s2 + $0x18] sm:$0xf0]  ;;  %v7956_v42 = vld [vmem:[%s12286_s3 + $0xc4] sm:$0xf] }
 0x455   :  { %4860 = vmatpush.bf16.msra.mxu2 %v7232_v49 }
 0x457   :  { %4834 = vmatpush.bf16.msra.mxu0 %v7224_v14  ;;  %4848 = vmatpush.bf16.msra.mxu1 %v7212_v17  ;;  %v7961_v14 = vld [vmem:[%s12286_s3 + $0xec] sm:$0xf] }
 0x458   :  { %v7448_v49 = vor.u32 %v7961_v14, %v7445_v36  ;;  %v7951_v36 = vld [vmem:[%s12286_s3 + $0x94] sm:$0xf0] }
 0x45b   :  { %4835 = vmatpush.bf16.msra.mxu0 %v7208_v54  ;;  %v7945_v54 = vld [vmem:[%s12286_s3 + $0x6c] sm:$0xf] }
 0x4aa   :  { %v4186_v12 = vpop.f32.mrf.mxu0  ;;  %v4199_v30 = vpop.f32.mrf.mxu1 }
 0x4ab   :  { %v4229_v60 = vadd.f32 %v4186_v12, %v3979_v1  ;;  %v4230_v20 = vadd.f32 %v4199_v30, %v3980_v18  ;;  %v7216_v18 = vor.u32 %v7907_v57, %v7215_v38  ;;  %v7192_v12 = vor.u32 %v7902_v6, %v7191_v59  ;;  %v12021_v38 = vld [vmem:[%s12288_s1 + $0x10] sm:$0xff]  ;;  %v7952_v6 = vld [vmem:[%s12286_s3 + $0xa4] sm:$0xf] }
 0x4ac   :  { %v7196_v30 = vor.u32 %v7900_v35, %v7193_v55  ;;  %v7428_v57 = vor.u32 %v7959_v53, %v7427_v51  ;;  %v7405_v35 = vld [vmem:[%s12286_s3 + $0xb0] sm:$0xf0]  ;;  %v7379_v51 = vld [vmem:[%s12286_s3 + $0x68] sm:$0xf] }
 0x4ad   :  { %v7049_v9 = vmul.f32 -1.442695, %v4229_v60  ;;  %v7050_v46 = vmul.f32 -1.442695, %v4230_v20  ;;  %4861 = vmatpush.bf16.msra.mxu2 %v7216_v18  ;;  %v7200_v60 = vor.u32 %v7903_v11, %v7199_v15  ;;  %v7901_v20 = vld [vmem:[%s12285_s2 + $0xc] sm:$0xf]  ;;  %4836 = vmatpush.bf16.msra.mxu0 %v7192_v12  ;;  %v7408_v12 = vor.u32 %v7952_v6, %v7405_v35 }
 0x4ae   :  { %4849 = vmatpush.bf16.msra.mxu1 %v7196_v30  ;;  %v7204_v52 = vor.u32 %v7901_v20, %v7201_v8  ;;  %v7955_v30 = vld [vmem:[%s12286_s3 + $0xb4] sm:$0xf0]  ;;  %v7953_v15 = vld [vmem:[%s12286_s3 + $0xac] sm:$0xf]  ;;  %v7413_v11 = vld [vmem:[%s12286_s3 + $0xb8] sm:$0xf0] }
 0x4af   :  { %8157 = vpow2.f32 %v7049_v9  ;;  %v7436_v9 = vor.u32 %v7962_v25, %v7435_v23  ;;  %v7387_v8 = vld [vmem:[%s12286_s3 + $0x80] sm:$0xf] }
 0x4b0   :  { %8159 = vpow2.f32 %v7050_v46  ;;  %v7437_v46 = vld [vmem:[%s12286_s3 + $0xf0] sm:$0xf0]  ;;  %4875 = vmatpush.bf16.msra.mxu3 %v7204_v52  ;;  %v7948_v52 = vld [vmem:[%s12286_s3 + $0x84] sm:$0xf] }
 0x4b1   :  { %v4212_v2 = vpop.f32.mrf.mxu2  ;;  %v4225_v41 = vpop.f32.mrf.mxu3  ;;  %4862 = vmatpush.bf16.msra.mxu2 %v7200_v60  ;;  %v7440_v33 = vor.u32 %v7960_v26, %v7437_v46  ;;  %5154 = vmatpush.bf16.msrb.mxu0 %v7436_v9  ;;  %v7416_v26 = vor.u32 %v7953_v15, %v7413_v11  ;;  %v7389_v9 = vld [vmem:[%s12286_s3 + $0x90] sm:$0xf0]  ;;  %v7395_v46 = vld [vmem:[%s12286_s3 + $0x88] sm:$0xf]  ;;  %v7365_v15 = vld [vmem:[%s12286_s3 + $0x58] sm:$0xf0] }
 0x4b2   :  { %v4232_v10 = vadd.f32 %v4225_v41, %v3982_v32  ;;  %v4188_v45 = vpop.f32.mrf.mxu0  ;;  %v4201_v47 = vpop.f32.mrf.mxu1  ;;  %v4231_v7 = vadd.f32 %v4212_v2, %v3981_v24  ;;  %v7419_v2 = vld [vmem:[%s12286_s3 + $0xc0] sm:$0xf]  ;;  %v7958_v41 = vld [vmem:[%s12286_s3 + $0xcc] sm:$0xf0]  ;;  %v7957_v24 = vld [vmem:[%s12286_s3 + $0xcc] sm:$0xf]  ;;  %v7392_v14 = vor.u32 %v7948_v52, %v7389_v9 }
 0x4b3   :  { %5167 = vmatpush.bf16.msrb.mxu1 %v7440_v33  ;;  %v7444_v47 = vor.u32 %v7963_v34, %v7443_v29  ;;  %v7420_v50 = vor.u32 %v7958_v41, %v7419_v2  ;;  %v7432_v3 = vor.u32 %v7957_v24, %v7429_v61  ;;  %v12101_v34 = vld [vmem:[%s12288_s1 + $0x18] sm:$0xff]  ;;  %v7940_v61 = vld [vmem:[%s12286_s3 + $0x44] sm:$0xf]  ;;  %v7339_v11 = vld [vmem:[%s12286_s3 + $0x20] sm:$0xf] }
 0x4b4   :  { %v7051_v19 = vmul.f32 -1.442695, %v4232_v10  ;;  %v7421_v10 = vld [vmem:[%s12286_s3 + $0xd0] sm:$0xf0]  ;;  %5193 = vmatpush.bf16.msrb.mxu3 %v7448_v49  ;;  %v7397_v41 = vld [vmem:[%s12286_s3 + $0x98] sm:$0xf0] }
 0x4b5   :  { %v8158_v58 = vpop.eup %8157  ;;  %5180 = vmatpush.bf16.msrb.mxu2 %v7444_v47  ;;  %5155 = vmatpush.bf16.msrb.mxu0 %v7420_v50  ;;  %v7396_v47 = vor.u32 %v7951_v36, %v7395_v46  ;;  %v7944_v49 = vld [vmem:[%s12286_s3 + $0x64] sm:$0xf]  ;;  %v7373_v50 = vld [vmem:[%s12286_s3 + $0x70] sm:$0xf0]  ;;  %v7347_v9 = vld [vmem:[%s12286_s3 + $0x28] sm:$0xf] }
 0x4b6   :  { %v8160_v0 = vpop.eup %8159  ;;  %v11919_v1 = vadd.f32 1.0, %v8158_v58  ;;  %8161 = vpow2.f32 %v7051_v19  ;;  %v7424_v58 = vor.u32 %v7956_v42, %v7421_v10  ;;  %v7371_v42 = vld [vmem:[%s12286_s3 + $0x60] sm:$0xf]  ;;  %v7376_v24 = vor.u32 %v7944_v49, %v7373_v50  ;;  %v7341_v52 = vld [vmem:[%s12286_s3 + $0x30] sm:$0xf0] }
 0x4b7   :  { %v11921_v4 = vadd.f32 1.0, %v8160_v0  ;;  %v7954_v0 = vld [vmem:[%s12286_s3 + $0xac] sm:$0xf0]  ;;  %v7939_v46 = vld [vmem:[%s12286_s3 + $0x34] sm:$0xf0] }
 0x4b8   :  { %8163 = vrcp.f32 %v11919_v1  ;;  %v4247_v31 = vand.u32 2147483647, %v11919_v1  ;;  %v4249_v16 = vand.u32 2147483648, %v11919_v1  ;;  %vm4243_vm1 = vweird.f32 %v11919_v1  ;;  %5168 = vmatpush.bf16.msrb.mxu1 %v7424_v58  ;;  %5194 = vmatpush.bf16.msrb.mxu3 %v7432_v3  ;;  %v7357_v3 = vld [vmem:[%s12286_s3 + $0x50] sm:$0xf0] }
 0x4b9   :  { %8165 = vrcp.f32 %v11921_v4  ;;  %v4214_v39 = vpop.f32.mrf.mxu2  ;;  %v4227_v43 = vpop.f32.mrf.mxu3  ;;  %v4268_v28 = vand.u32 2147483648, %v11921_v4  ;;  %v4266_v63 = vand.u32 2147483647, %v11921_v4  ;;  %v7404_v59 = vor.u32 %v7954_v0, %v7403_v62  ;;  %5181 = vmatpush.bf16.msrb.mxu2 %v7428_v57  ;;  %v7942_v57 = vld [vmem:[%s12286_s3 + $0x4c] sm:$0xf0] }
 0x4ba   :  { %8167 = vtanh.f32 %v4231_v7  ;;  %vm11998_vm2 = vcmp.eq.f32.partialorder %v4247_v31, 8.507059e+37  ;;  %v4250_v56 = vor.u32 1.1754944e-38, %v4249_v16  ;;  %v7411_v39 = vld [vmem:[%s12286_s3 + $0xa8] sm:$0xf]  ;;  %v4305_v7 = vunpack.c.l.bf16 %v12021_v38 }
 0x4bb   :  { %v4269_v19 = vor.u32 1.1754944e-38, %v4268_v28  ;;  %v4306_v31 = vunpack.c.h.bf16 %v12021_v38  ;;  %vm4262_vm5 = vweird.f32 %v11921_v4  ;;  %v7412_v20 = vor.u32 %v7955_v30, %v7411_v39  ;;  %5156 = vmatpush.bf16.msrb.mxu0 %v7404_v59  ;;  %v7941_v30 = vld [vmem:[%s12286_s3 + $0x4c] sm:$0xf] }
 0x4bc   :  { %v8162_v22 = vpop.eup %8161  ;;  %vm12083_vm7 = vcmp.eq.f32.partialorder %v4266_v63, 8.507059e+37  ;;  %5169 = vmatpush.bf16.msrb.mxu1 %v7408_v12  ;;  %5195 = vmatpush.bf16.msrb.mxu3 %v7416_v26  ;;  %v7360_v12 = vor.u32 %v7940_v61, %v7357_v3  ;;  %v7348_v50 = vor.u32 %v7939_v46, %v7347_v9 }
 0x4bd   :  { %v11961_v27 = vadd.f32 1.0, %v8162_v22  ;;  %v7950_v22 = vld [vmem:[%s12286_s3 + $0x8c] sm:$0xf0]  ;;  %5182 = vmatpush.bf16.msrb.mxu2 %v7412_v20 }
 0x4be   :  { %v11969_v32 = vpop.eup %8163  ;;  %v7388_v28 = vor.u32 %v7950_v22, %v7387_v8  ;;  %v7938_v8 = vld [vmem:[%s12286_s3 + $0x2c] sm:$0xf0]  ;;  %v7936_v22 = vld [vmem:[%s12286_s3 + $0x24] sm:$0xf] }
 0x4bf   :  { %v11980_v40 = vpop.eup %8165  ;;  %v4239_v5 = vmul.f32 %v11969_v32, %v11919_v1  ;;  %vm4244_vm0 = vweird.f32 %v11969_v32  ;;  %8169 = vrcp.f32 %v11961_v27  ;;  %vm4282_vm9 = vweird.f32 %v11961_v27 }
 0x4c0   :  { %v4258_v37 = vmul.f32 %v11980_v40, %v11921_v4  ;;  %vm12014_vm3 = vmor %vm4243_vm1, %vm4244_vm0  ;;  %v8168_v1 = vpop.eup %8167  ;;  %vm4263_vm4 = vweird.f32 %v11980_v40  ;;  %5157 = vmatpush.bf16.msrb.mxu0 %v7388_v28  ;;  %5170 = vmatpush.bf16.msrb.mxu1 %v7392_v14  ;;  %v4286_v59 = vand.u32 2147483647, %v11961_v27  ;;  %v4288_v6 = vand.u32 2147483648, %v11961_v27 }
 0x4c1   :  { %v4240_v45 = vsub.f32 1.0, %v4239_v5  ;;  %vm12076_vm6 = vmor %vm4262_vm5, %vm4263_vm4  ;;  %v7949_v5 = vld [vmem:[%s12286_s3 + $0x8c] sm:$0xf]  ;;  %5183 = vmatpush.bf16.msrb.mxu2 %v7396_v47  ;;  %v7368_v28 = vor.u32 %v7941_v30, %v7365_v15  ;;  %v7340_v36 = vor.u32 %v7938_v8, %v7339_v11 }
 0x4c2   :  { %v4259_v48 = vsub.f32 1.0, %v4258_v37  ;;  %v7946_v37 = vld [vmem:[%s12286_s3 + $0x6c] sm:$0xf0]  ;;  %v4289_v4 = vor.u32 1.1754944e-38, %v4288_v6  ;;  %vm4287_vm11 = vcmp.eq.f32.partialorder %v4286_v59, 8.507059e+37 }
 0x4c3   :  { %v4241_v17 = vmul.f32 %v11969_v32, %v4240_v45  ;;  %v7372_v58 = vor.u32 %v7946_v37, %v7371_v42  ;;  %v7934_v37 = vld [vmem:[%s12286_s3 + $0xc] sm:$0xf0] }
 0x4c4   :  { %v4260_v18 = vmul.f32 %v11980_v40, %v4259_v48  ;;  %5171 = vmatpush.bf16.msrb.mxu1 %v7376_v24 }
 0x4c5   :  { %v12047_v43 = vpop.eup %8169  ;;  %v4242_v55 = vadd.f32 %v11969_v32, %v4241_v17  ;;  %v7355_v17 = vld [vmem:[%s12286_s3 + $0x40] sm:$0xf]  ;;  %5158 = vmatpush.bf16.msrb.mxu0 %v7372_v58 }
 0x4c6   :  { %v4261_v16 = vadd.f32 %v11980_v40, %v4260_v18  ;;  %v4278_v60 = vmul.f32 %v12047_v43, %v11961_v27  ;;  %vm4283_vm8 = vweird.f32 %v12047_v43  ;;  %v7356_v27 = vor.u32 %v7942_v57, %v7355_v17 }
 0x4c7   :  { %v4246_v23 = vsel %vm12014_vm3, %v11969_v32, %v4242_v55  ;;  %vm12163_vm10 = vmor %vm4282_vm9, %vm4283_vm8  ;;  %v4307_v17 = vunpack.c.l.bf16 %v12101_v34 }
 0x4c8   :  { %v4251_v29 = vsel %vm11998_vm2, %v4250_v56, %v4246_v23  ;;  %v4265_v32 = vsel %vm12076_vm6, %v11980_v40, %v4261_v16  ;;  %v4279_v33 = vsub.f32 1.0, %v4278_v60  ;;  %v7381_v56 = vld [vmem:[%s12286_s3 + $0x78] sm:$0xf0]  ;;  %5172 = vmatpush.bf16.msrb.mxu1 %v7360_v12 }
 0x4c9   :  { %v4270_v40 = vsel %vm12083_vm7, %v4269_v19, %v4265_v32  ;;  %v4293_v2 = vmul.f32 %v8168_v1, %v4251_v29  ;;  %v7947_v19 = vld [vmem:[%s12286_s3 + $0x74] sm:$0xf0]  ;;  %v4308_v1 = vunpack.c.h.bf16 %v12101_v34  ;;  %v7384_v55 = vor.u32 %v7945_v54, %v7381_v56  ;;  %v7937_v29 = vld [vmem:[%s12286_s3 + $0x2c] sm:$0xf]  ;;  %5159 = vmatpush.bf16.msrb.mxu0 %v7356_v27  ;;  %v7333_v56 = vld [vmem:[%s12286_s3 + $0x18] sm:$0xf0] }
 0x4ca   :  { %v4292_v44 = vmul.f32 %v4270_v40, %v11623_v21  ;;  %v4280_v63 = vmul.f32 %v12047_v43, %v4279_v33  ;;  %v4512_v10 = vpop.f32.mrf.mxu0  ;;  %v4525_v45 = vpop.f32.mrf.mxu1  ;;  %v7400_v21 = vor.u32 %v7949_v5, %v7397_v41  ;;  %v7380_v39 = vor.u32 %v7947_v19, %v7379_v51  ;;  %v7349_v40 = vld [vmem:[%s12286_s3 + $0x38] sm:$0xf0]  ;;  %v7935_v19 = vld [vmem:[%s12286_s3 + $0x14] sm:$0xf0]  ;;  %v7933_v54 = vld [vmem:[%s12286_s3 + $0xc] sm:$0xf] }
 0x4cb   :  { %v4555_v53 = vadd.f32 %v4512_v10, %v4305_v7  ;;  %v4556_v48 = vadd.f32 %v4525_v45, %v4306_v31  ;;  %v7363_v7 = vld [vmem:[%s12286_s3 + $0x48] sm:$0xf]  ;;  %v7943_v31 = vld [vmem:[%s12286_s3 + $0x54] sm:$0xf0]  ;;  %v7344_v5 = vor.u32 %v7936_v22, %v7341_v52  ;;  %v7352_v51 = vor.u32 %v7937_v29, %v7349_v40 }
 0x4cc   :  { %v12140_v38 = vadd.f32 %v4293_v2, %v4292_v44  ;;  %v4281_v18 = vadd.f32 %v12047_v43, %v4280_v63  ;;  %5196 = vmatpush.bf16.msrb.mxu3 %v7400_v21  ;;  %5184 = vmatpush.bf16.msrb.mxu2 %v7380_v39  ;;  %v7323_v2 = vld [vmem:[%s12286_s3] sm:$0xf]  ;;  %v7932_v44 = vld [vmem:[%s12286_s3 + $0x4] sm:$0xf]  ;;  %v7325_v63 = vld [vmem:[%s12286_s3 + $0x10] sm:$0xf0]  ;;  %v7336_v61 = vor.u32 %v7933_v54, %v7333_v56 }
 0x4cd   :  { %v7183_v62 = vmul.f32 -1.442695, %v4555_v53  ;;  %v7184_v0 = vmul.f32 -1.442695, %v4556_v48  ;;  %v7331_v53 = vld [vmem:[%s12286_s3 + $0x8] sm:$0xf]  ;;  %5160 = vmatpush.bf16.msrb.mxu0 %v7340_v36  ;;  %5173 = vmatpush.bf16.msrb.mxu1 %v7344_v5  ;;  %v7324_v48 = vor.u32 %v7934_v37, %v7323_v2  ;;  %v7328_v21 = vor.u32 %v7932_v44, %v7325_v63 }
 0x4ce   :  { %8171 = vtanh.f32 %v12140_v38  ;;  %v4285_v20 = vsel %vm12163_vm10, %v12047_v43, %v4281_v18  ;;  %v7364_v43 = vor.u32 %v7943_v31, %v7363_v7  ;;  %v7332_v57 = vor.u32 %v7935_v19, %v7331_v53 }
 0x4cf   :  { %8173 = vpow2.f32 %v7183_v62  ;;  %v4290_v14 = vsel %vm4287_vm11, %v4289_v4, %v4285_v20 }
 0x4d0   :  { %8175 = vpow2.f32 %v7184_v0  ;;  %5197 = vmatpush.bf16.msrb.mxu3 %v7384_v55  ;;  %5185 = vmatpush.bf16.msrb.mxu2 %v7364_v43 }
 0x4d1   :  { %v12182_v16 = vpop.f32.mrf.mxu2  ;;  %v4551_v60 = vpop.f32.mrf.mxu3  ;;  %5161 = vmatpush.bf16.msrb.mxu0 %v7324_v48  ;;  %5174 = vmatpush.bf16.msrb.mxu1 %v7328_v21 }
 0x4d2   :  { %v4558_v23 = vadd.f32 %v4551_v60, %v4308_v1  ;;  %v4514_v25 = vpop.f32.mrf.mxu0  ;;  %v4527_v26 = vpop.f32.mrf.mxu1  ;;  %v4557_v18 = vadd.f32 %v12182_v16, %v4307_v17 }
 0x4d4   :  { %v8172_v32 = vpop.eup %8171  ;;  %v7185_v33 = vmul.f32 -1.442695, %v4558_v23  ;;  %5198 = vmatpush.bf16.msrb.mxu3 %v7368_v28  ;;  %5186 = vmatpush.bf16.msrb.mxu2 %v7348_v50 }
 0x4d5   :  { %v8174_v41 = vpop.eup %8173  ;;  %v4296_v42 = vmul.f32 %v8172_v32, %v4290_v14 }
 0x4d6   :  { %v8176_v10 = vpop.eup %8175  ;;  %v12220_v45 = vadd.f32 1.0, %v8174_v41  ;;  %8177 = vpow2.f32 %v7185_v33 }
 0x4d7   :  { %v12222_v47 = vadd.f32 1.0, %v8176_v10  ;;  %v4299_v49 = vpack.c.bf16 %v4296_v42, %v4296_v42 }
 0x4d8   :  { %8179 = vrcp.f32 %v12220_v45  ;;  %5199 = vmatpush.bf16.msrb.mxu3 %v7352_v51  ;;  %5187 = vmatpush.bf16.msrb.mxu2 %v7332_v57  ;;  %v4575_v39 = vand.u32 2147483648, %v12220_v45  ;;  %v4573_v31 = vand.u32 2147483647, %v12220_v45  ;;  %vm4569_vm14 = vweird.f32 %v12220_v45 }
 0x4d9   :  { %8181 = vrcp.f32 %v12222_v47  ;;  %v4540_v58 = vpop.f32.mrf.mxu2  ;;  %v4553_v24 = vpop.f32.mrf.mxu3  ;;  %7052 = vst [vmem:[%s12289_s4 + $0x18] sm:$0xf] %v4299_v49  ;;  %4837 = vmatmul.bf16.vlgmr.msra.gmra.mxu0 %v4299_v49  ;;  %4850 = vmatmul.bf16.vlgmr.msra.gmra.mxu1 %v4299_v49  ;;  %v4594_v55 = vand.u32 2147483648, %v12222_v47  ;;  %v4592_v12 = vand.u32 2147483647, %v12222_v47  ;;  %vm4588_vm15 = vweird.f32 %v12222_v47 }
 0x4da   :  { %4863 = vmatmul.bf16.vlgmr.msra.gmra.mxu2 %v4299_v49  ;;  %4876 = vmatmul.bf16.vlgmr.msra.gmra.mxu3 %v4299_v49  ;;  %v4576_v11 = vor.u32 1.1754944e-38, %v4575_v39  ;;  %vm4574_vm2 = vcmp.eq.f32.partialorder %v4573_v31, 8.507059e+37 }
 0x4db   :  { %v4595_v20 = vor.u32 1.1754944e-38, %v4594_v55  ;;  %vm4593_vm3 = vcmp.eq.f32.partialorder %v4592_v12, 8.507059e+37 }
 0x4dc   :  { %v8178_v62 = vpop.eup %8177  ;;  %5200 = vmatpush.bf16.msrb.mxu3 %v7336_v61 }
 0x4dd   :  { %v4602_v0 = vadd.f32 1.0, %v8178_v62 }
 0x4de   :  { %v8180_v1 = vpop.eup %8179 }
 0x4df   :  { %v8182_v3 = vpop.eup %8181  ;;  %v4565_v59 = vmul.f32 %v8180_v1, %v12220_v45  ;;  %8183 = vrcp.f32 %v4602_v0  ;;  %vm4570_vm12 = vweird.f32 %v8180_v1  ;;  %v4614_v29 = vand.u32 2147483648, %v4602_v0  ;;  %v7188_v45 = vld [vmem:[%s12287_s0 + $0x78] sm:$0xff] }
 0x4e0   :  { %v4584_v34 = vmul.f32 %v8182_v3, %v12222_v47  ;;  %8185 = vtanh.f32 %v4557_v18  ;;  %vm4589_vm13 = vweird.f32 %v8182_v3  ;;  %vm4571_vm0 = vmor %vm4569_vm14, %vm4570_vm12  ;;  %vm4608_vm5 = vweird.f32 %v4602_v0 }
 0x4e1   :  { %v4566_v6 = vsub.f32 1.0, %v4565_v59  ;;  %vm4590_vm1 = vmor %vm4588_vm15, %vm4589_vm13  ;;  %v4612_v32 = vand.u32 2147483647, %v4602_v0  ;;  %v4615_v14 = vor.u32 1.1754944e-38, %v4614_v29  ;;  %v4634_v50 = vunpack.c.h.bf16 %v7188_v45 }
 0x4e2   :  { %v4585_v35 = vsub.f32 1.0, %v4584_v34  ;;  %v4633_v62 = vunpack.c.l.bf16 %v7188_v45 }
 0x4e3   :  { %v4567_v7 = vmul.f32 %v8180_v1, %v4566_v6  ;;  %vm4613_vm7 = vcmp.eq.f32.partialorder %v4612_v32, 8.507059e+37 }
 0x4e4   :  { %v4586_v27 = vmul.f32 %v8182_v3, %v4585_v35 }
 0x4e5   :  { %v8184_v30 = vpop.eup %8183  ;;  %v4568_v15 = vadd.f32 %v8180_v1, %v4567_v7  ;;  %v4954_v7 = vld [vmem:[%s12288_s1] sm:$0xff] }
 0x4e6   :  { %v4587_v16 = vadd.f32 %v8182_v3, %v4586_v27  ;;  %v4604_v60 = vmul.f32 %v8184_v30, %v4602_v0  ;;  %v8186_v22 = vpop.eup %8185  ;;  %vm4609_vm4 = vweird.f32 %v8184_v30 }
 0x4e7   :  { %v4572_v8 = vsel %vm4571_vm0, %v8180_v1, %v4568_v15  ;;  %vm4610_vm6 = vmor %vm4608_vm5, %vm4609_vm4 }
 0x4e8   :  { %v4577_v52 = vsel %vm4574_vm2, %v4576_v11, %v4572_v8  ;;  %v4591_v4 = vsel %vm4590_vm1, %v8182_v3, %v4587_v16  ;;  %v4605_v23 = vsub.f32 1.0, %v4604_v60  ;;  %v4956_v60 = vunpack.c.l.bf16 %v4954_v7 }
 0x4e9   :  { %v4596_v25 = vsel %vm4593_vm3, %v4595_v20, %v4591_v4  ;;  %v4619_v26 = vmul.f32 %v8186_v22, %v4577_v52 }
 0x4ea   :  { %v4618_v43 = vmul.f32 %v4596_v25, %v11735_v13  ;;  %v4606_v28 = vmul.f32 %v8184_v30, %v4605_v23  ;;  %v7187_v13 = vld [vmem:[%s12287_s0 + $0x70] sm:$0xff]  ;;  %v4957_v23 = vunpack.c.h.bf16 %v4954_v7 }
 0x4eb   :  { %v4631_v41 = vunpack.c.l.bf16 %v7187_v13  ;;  %v4632_v42 = vunpack.c.h.bf16 %v7187_v13 }
 0x4ec   :  { %v12252_v9 = vadd.f32 %v4619_v26, %v4618_v43  ;;  %v4607_v46 = vadd.f32 %v8184_v30, %v4606_v28 }
 0x4ee   :  { %8187 = vtanh.f32 %v12252_v9  ;;  %v4611_v33 = vsel %vm4610_vm6, %v8184_v30, %v4607_v46 }
 0x4ef   :  { %v4616_v5 = vsel %vm4613_vm7, %v4615_v14, %v4611_v33 }
 0x4f4   :  { %v8188_v36 = vpop.eup %8187 }
 0x4f5   :  { %v4622_v40 = vmul.f32 %v8188_v36, %v4616_v5 }
 0x4f7   :  { %v4625_v2 = vpack.c.bf16 %v4622_v40, %v4622_v40 }
 0x4f9   :  { %7186 = vst [vmem:[%s12290_s5 + $0x4] sm:$0xf] %v4625_v2  ;;  %5162 = vmatmul.bf16.vlgmr.msrb.gmra.mxu0 %v4625_v2  ;;  %5175 = vmatmul.bf16.vlgmr.msrb.gmra.mxu1 %v4625_v2 }
 0x4fa   :  { %5188 = vmatmul.bf16.vlgmr.msrb.gmra.mxu2 %v4625_v2  ;;  %5201 = vmatmul.bf16.vlgmr.msrb.gmra.mxu3 %v4625_v2  ;;  %v4955_v2 = vld [vmem:[%s12288_s1 + $0x8] sm:$0xff] }
 0x556   :  { %v4838_v37 = vpop.f32.mrf.mxu0  ;;  %v4851_v44 = vpop.f32.mrf.mxu1 }
 0x557   :  { %v4881_v63 = vadd.f32 %v4838_v37, %v4631_v41  ;;  %v4882_v10 = vadd.f32 %v4851_v44, %v4632_v42 }
 0x559   :  { %v7317_v47 = vmul.f32 -1.442695, %v4881_v63  ;;  %v7318_v49 = vmul.f32 -1.442695, %v4882_v10  ;;  %v4959_v63 = vunpack.c.h.bf16 %v4955_v2 }
 0x55b   :  { %8189 = vpow2.f32 %v7317_v47 }
 0x55c   :  { %8191 = vpow2.f32 %v7318_v49 }
 0x55d   :  { %v4864_v51 = vpop.f32.mrf.mxu2  ;;  %v4877_v53 = vpop.f32.mrf.mxu3 }
 0x55e   :  { %v4884_v48 = vadd.f32 %v4877_v53, %v4634_v50  ;;  %v4840_v21 = vpop.f32.mrf.mxu0  ;;  %v4853_v19 = vpop.f32.mrf.mxu1  ;;  %v4883_v3 = vadd.f32 %v4864_v51, %v4633_v62 }
 0x560   :  { %v7319_v54 = vmul.f32 -1.442695, %v4884_v48 }
 0x561   :  { %v8190_v56 = vpop.eup %8189 }
 0x562   :  { %v8192_v58 = vpop.eup %8191  ;;  %v4889_v24 = vadd.f32 1.0, %v8190_v56  ;;  %8193 = vpow2.f32 %v7319_v54 }
 0x563   :  { %v4908_v17 = vadd.f32 1.0, %v8192_v58 }
 0x564   :  { %8195 = vrcp.f32 %v4889_v24  ;;  %v4901_v55 = vand.u32 2147483648, %v4889_v24  ;;  %v4899_v12 = vand.u32 2147483647, %v4889_v24  ;;  %vm4895_vm10 = vweird.f32 %v4889_v24 }
 0x565   :  { %8197 = vrcp.f32 %v4908_v17  ;;  %v4866_v57 = vpop.f32.mrf.mxu2  ;;  %v4879_v61 = vpop.f32.mrf.mxu3  ;;  %v4920_v31 = vand.u32 2147483648, %v4908_v17  ;;  %v4918_v15 = vand.u32 2147483647, %v4908_v17  ;;  %vm4914_vm11 = vweird.f32 %v4908_v17 }
 0x566   :  { %v4902_v20 = vor.u32 1.1754944e-38, %v4901_v55  ;;  %vm4900_vm14 = vcmp.eq.f32.partialorder %v4899_v12, 8.507059e+37 }
 0x567   :  { %v4921_v52 = vor.u32 1.1754944e-38, %v4920_v31  ;;  %vm4919_vm15 = vcmp.eq.f32.partialorder %v4918_v15, 8.507059e+37 }
 0x568   :  { %v8194_v0 = vpop.eup %8193 }
 0x569   :  { %v12264_v1 = vadd.f32 1.0, %v8194_v0  ;;  %v4958_v0 = vunpack.c.l.bf16 %v4955_v2 }
 0x56a   :  { %v8196_v18 = vpop.eup %8195 }
 0x56b   :  { %v8198_v59 = vpop.eup %8197  ;;  %v4891_v34 = vmul.f32 %v8196_v18, %v4889_v24  ;;  %8199 = vrcp.f32 %v12264_v1  ;;  %vm4896_vm8 = vweird.f32 %v8196_v18  ;;  %v4940_v44 = vand.u32 2147483648, %v12264_v1 }
 0x56c   :  { %v4910_v6 = vmul.f32 %v8198_v59, %v4908_v17  ;;  %8201 = vtanh.f32 %v4883_v3  ;;  %vm4915_vm9 = vweird.f32 %v8198_v59  ;;  %vm4897_vm12 = vmor %vm4895_vm10, %vm4896_vm8  ;;  %vm4934_vm1 = vweird.f32 %v12264_v1 }
 0x56d   :  { %v4892_v35 = vsub.f32 1.0, %v4891_v34  ;;  %vm4916_vm13 = vmor %vm4914_vm11, %vm4915_vm9  ;;  %v4941_v49 = vor.u32 1.1754944e-38, %v4940_v44 }
 0x56e   :  { %v4911_v39 = vsub.f32 1.0, %v4910_v6 }
 0x56f   :  { %v4893_v27 = vmul.f32 %v8196_v18, %v4892_v35 }
 0x570   :  { %v4912_v30 = vmul.f32 %v8198_v59, %v4911_v39 }
 0x571   :  { %v8200_v11 = vpop.eup %8199  ;;  %v4894_v16 = vadd.f32 %v8196_v18, %v4893_v27 }
 0x572   :  { %v4913_v8 = vadd.f32 %v8198_v59, %v4912_v30  ;;  %v4930_v22 = vmul.f32 %v8200_v11, %v12264_v1  ;;  %v8202_v25 = vpop.eup %8201  ;;  %vm4935_vm0 = vweird.f32 %v8200_v11 }
 0x573   :  { %v4898_v4 = vsel %vm4897_vm12, %v8196_v18, %v4894_v16  ;;  %vm4936_vm2 = vmor %vm4934_vm1, %vm4935_vm0 }
 0x574   :  { %v4903_v26 = vsel %vm4900_vm14, %v4902_v20, %v4898_v4  ;;  %v4917_v43 = vsel %vm4916_vm13, %v8198_v59, %v4913_v8  ;;  %v4931_v28 = vsub.f32 1.0, %v4930_v22 }
 0x575   :  { %v4922_v46 = vsel %vm4919_vm15, %v4921_v52, %v4917_v43  ;;  %v4945_v29 = vmul.f32 %v8202_v25, %v4903_v26 }
 0x576   :  { %v4944_v32 = vmul.f32 %v4922_v46, %v12140_v38  ;;  %v4932_v33 = vmul.f32 %v8200_v11, %v4931_v28  ;;  %v5163_v14 = vpop.f32.mrf.mxu0  ;;  %v5176_v36 = vpop.f32.mrf.mxu1  ;;  %v4938_v38 = vand.u32 2147483647, %v12264_v1 }
 0x577   :  { %v5206_v5 = vadd.f32 %v5163_v14, %v4956_v60  ;;  %v5207_v40 = vadd.f32 %v5176_v36, %v4957_v23 }
 0x578   :  { %v4946_v13 = vadd.f32 %v4945_v29, %v4944_v32  ;;  %v4933_v41 = vadd.f32 %v8200_v11, %v4932_v33  ;;  %vm4939_vm3 = vcmp.eq.f32.partialorder %v4938_v38, 8.507059e+37 }
 0x579   :  { %v7449_v42 = vmul.f32 -1.442695, %v5206_v5  ;;  %v7450_v37 = vmul.f32 -1.442695, %v5207_v40 }
 0x57a   :  { %8203 = vtanh.f32 %v4946_v13  ;;  %v4937_v10 = vsel %vm4936_vm2, %v8200_v11, %v4933_v41 }
 0x57b   :  { %8205 = vpow2.f32 %v7449_v42  ;;  %v4942_v21 = vsel %vm4939_vm3, %v4941_v49, %v4937_v10 }
 0x57c   :  { %8207 = vpow2.f32 %v7450_v37 }
 0x57d   :  { %v5189_v45 = vpop.f32.mrf.mxu2  ;;  %v5202_v47 = vpop.f32.mrf.mxu3 }
 0x57e   :  { %v5209_v50 = vadd.f32 %v5202_v47, %v4959_v63  ;;  %v5165_v51 = vpop.f32.mrf.mxu0  ;;  %v5178_v53 = vpop.f32.mrf.mxu1  ;;  %v5208_v59 = vadd.f32 %v5189_v45, %v4958_v0 }
 0x580   :  { %v8204_v48 = vpop.eup %8203  ;;  %v7451_v19 = vmul.f32 -1.442695, %v5209_v50 }
 0x581   :  { %v8206_v54 = vpop.eup %8205  ;;  %v4948_v56 = vmul.f32 %v8204_v48, %v4942_v21 }
 0x582   :  { %v8208_v58 = vpop.eup %8207  ;;  %v5214_v24 = vadd.f32 1.0, %v8206_v54  ;;  %8209 = vpow2.f32 %v7451_v19 }
 0x583   :  { %v4951_v17 = vpack.c.bf16 %v4948_v56, %v4948_v56  ;;  %v5233_v57 = vadd.f32 1.0, %v8208_v58 }
 0x584   :  { %8211 = vrcp.f32 %v5214_v24  ;;  %v5226_v7 = vand.u32 2147483648, %v5214_v24  ;;  %v5224_v12 = vand.u32 2147483647, %v5214_v24  ;;  %vm5220_vm6 = vweird.f32 %v5214_v24 }
 0x585   :  { %7320 = vst [vmem:[%s12289_s4 + $0x1c] sm:$0xf] %v4951_v17  ;;  %8213 = vrcp.f32 %v5233_v57  ;;  %v5191_v61 = vpop.f32.mrf.mxu2  ;;  %v5204_v62 = vpop.f32.mrf.mxu3  ;;  %v5245_v31 = vand.u32 2147483648, %v5233_v57  ;;  %v5243_v15 = vand.u32 2147483647, %v5233_v57  ;;  %vm5239_vm7 = vweird.f32 %v5233_v57 }
 0x586   :  { %v5227_v60 = vor.u32 1.1754944e-38, %v5226_v7  ;;  %vm5225_vm10 = vcmp.eq.f32.partialorder %v5224_v12, 8.507059e+37 }
 0x587   :  { %v5246_v22 = vor.u32 1.1754944e-38, %v5245_v31  ;;  %vm5244_vm11 = vcmp.eq.f32.partialorder %v5243_v15, 8.507059e+37 }
 0x588   :  { %v8210_v1 = vpop.eup %8209 }
 0x589   :  { %v5253_v18 = vadd.f32 1.0, %v8210_v1 }
 0x58a   :  { %v8212_v3 = vpop.eup %8211 }
 0x58b   :  { %v8214_v34 = vpop.eup %8213  ;;  %v5216_v6 = vmul.f32 %v8212_v3, %v5214_v24  ;;  %8215 = vrcp.f32 %v5253_v18  ;;  %vm5221_vm4 = vweird.f32 %v8212_v3  ;;  %v5265_v14 = vand.u32 2147483648, %v5253_v18 }
 0x58c   :  { %v5235_v35 = vmul.f32 %v8214_v34, %v5233_v57  ;;  %8217 = vtanh.f32 %v5208_v59  ;;  %vm5240_vm5 = vweird.f32 %v8214_v34  ;;  %vm5222_vm8 = vmor %vm5220_vm6, %vm5221_vm4  ;;  %vm5259_vm13 = vweird.f32 %v5253_v18 }
 0x58d   :  { %v5217_v39 = vsub.f32 1.0, %v5216_v6  ;;  %vm5241_vm9 = vmor %vm5239_vm7, %vm5240_vm5  ;;  %v5263_v36 = vand.u32 2147483647, %v5253_v18  ;;  %v5266_v40 = vor.u32 1.1754944e-38, %v5265_v14 }
 0x58e   :  { %v5236_v55 = vsub.f32 1.0, %v5235_v35 }
 0x58f   :  { %v5218_v27 = vmul.f32 %v8212_v3, %v5217_v39  ;;  %vm5264_vm15 = vcmp.eq.f32.partialorder %v5263_v36, 8.507059e+37 }
 0x590   :  { %v5237_v30 = vmul.f32 %v8214_v34, %v5236_v55 }
 0x591   :  { %v8216_v11 = vpop.eup %8215  ;;  %v5219_v16 = vadd.f32 %v8212_v3, %v5218_v27 }
 0x592   :  { %v5238_v20 = vadd.f32 %v8214_v34, %v5237_v30  ;;  %v5255_v8 = vmul.f32 %v8216_v11, %v5253_v18  ;;  %v8218_v4 = vpop.eup %8217  ;;  %vm5260_vm12 = vweird.f32 %v8216_v11 }
 0x593   :  { %v5223_v52 = vsel %vm5222_vm8, %v8212_v3, %v5219_v16  ;;  %vm5261_vm14 = vmor %vm5259_vm13, %vm5260_vm12 }
 0x594   :  { %v5228_v23 = vsel %vm5225_vm10, %v5227_v60, %v5223_v52  ;;  %v5242_v25 = vsel %vm5241_vm9, %v8214_v34, %v5238_v20  ;;  %v5256_v26 = vsub.f32 1.0, %v5255_v8 }
 0x595   :  { %v5247_v43 = vsel %vm5244_vm11, %v5246_v22, %v5242_v25  ;;  %v5270_v28 = vmul.f32 %v8218_v4, %v5228_v23 }
 0x596   :  { %v5269_v46 = vmul.f32 %v5247_v43, %v12252_v9  ;;  %v5257_v29 = vmul.f32 %v8216_v11, %v5256_v26 }
 0x598   :  { %v5271_v32 = vadd.f32 %v5270_v28, %v5269_v46  ;;  %v5258_v33 = vadd.f32 %v8216_v11, %v5257_v29 }
 0x59a   :  { %8219 = vtanh.f32 %v5271_v32  ;;  %v5262_v5 = vsel %vm5261_vm14, %v8216_v11, %v5258_v33 }
 0x59b   :  { %v5267_v13 = vsel %vm5264_vm15, %v5266_v40, %v5262_v5 }
 0x5a0   :  { %v8220_v2 = vpop.eup %8219 }
 0x5a1   :  { %v5273_v41 = vmul.f32 %v8220_v2, %v5267_v13 }
 0x5a3   :  { %v5276_v42 = vpack.c.bf16 %v5273_v41, %v5273_v41 }
 0x5a5   :  { %5277 = vst [vmem:[%s12290_s5] sm:$0xf] %v5276_v42 }

</bundles_post_ra>
